<compile_context>
chip_gen: v7x
topology: tpu7x:2x2x1
jax: 0.10.0
libtpu: 0.0.40
codegen_flags: <defaults>
</compile_context>

<pallas_src>
import functools

import jax
import jax.numpy as jnp
from jax.experimental import pallas as pl
from jax.experimental.pallas import tpu as pltpu


# ----------------------------- Pallas kernels ------------------------------

def _gemm_bias_kernel(a_ref, b_ref, bias_ref, o_ref, *, act):
    acc = jnp.dot(a_ref[...], b_ref[...], preferred_element_type=jnp.float32)
    acc = acc + bias_ref[...]
    if act == "relu":
        acc = jnp.maximum(acc, 0.0)
    o_ref[...] = acc


def _gemm_kernel(a_ref, b_ref, o_ref, *, act):
    acc = jnp.dot(a_ref[...], b_ref[...], preferred_element_type=jnp.float32)
    if act == "relu":
        acc = jnp.maximum(acc, 0.0)
    o_ref[...] = acc


def matmul_act(a, b, bias=None, act="none"):
    """C = act(A @ B [+ bias]). bf16 operands, f32 accumulate, single VMEM block."""
    M, K = a.shape
    K2, N = b.shape
    assert K == K2
    if bias is not None:
        kernel = functools.partial(_gemm_bias_kernel, act=act)
        in_specs = [
            pl.BlockSpec((M, K), lambda i: (0, 0)),
            pl.BlockSpec((K, N), lambda i: (0, 0)),
            pl.BlockSpec(bias.shape, lambda i: (0, 0)),
        ]
        args = (a, b, bias)
    else:
        kernel = functools.partial(_gemm_kernel, act=act)
        in_specs = [
            pl.BlockSpec((M, K), lambda i: (0, 0)),
            pl.BlockSpec((K, N), lambda i: (0, 0)),
        ]
        args = (a, b)
    return pl.pallas_call(
        kernel,
        out_shape=jax.ShapeDtypeStruct((M, N), jnp.float32),
        grid=(1,),
        in_specs=in_specs,
        out_specs=pl.BlockSpec((M, N), lambda i: (0, 0)),
        compiler_params=pltpu.CompilerParams(dimension_semantics=("arbitrary",)),
    )(*args)


def _latent_kernel(flat_ref, wml_ref, bml_ref, eps_ref, wup_ref, bup_ref,
                   up_ref, kl_ref, *, latent_dim):
    # (B, 2L) = flat @ [Wmu^T | Wlogvar^T] + [bmu | blogvar]
    ml = jnp.dot(flat_ref[...], wml_ref[...],
                 preferred_element_type=jnp.float32) + bml_ref[...]
    mu = ml[:, :latent_dim]
    logvar = ml[:, latent_dim:]
    # KL term (summed; divided by batch in the final loss kernel).
    kl_ref[...] = -0.5 * jnp.sum(logvar + 1.0 - jnp.exp(logvar) - mu * mu,
                                 keepdims=True)
    # Reparameterization and upsample Linear, all from VMEM.
    z = mu + jnp.exp(0.5 * logvar) * eps_ref[...]
    up_ref[...] = jnp.dot(z.astype(jnp.bfloat16), wup_ref[...],
                          preferred_element_type=jnp.float32) + bup_ref[...]


def latent_chain(flat, wml, bml, eps, wup, bup):
    """Fused mu/logvar GEMM + KL + z-sample + upsample GEMM. Returns (up, kl)."""
    B, K = flat.shape
    L = eps.shape[1]
    P = wup.shape[1]
    kernel = functools.partial(_latent_kernel, latent_dim=L)
    up, kl = pl.pallas_call(
        kernel,
        out_shape=(jax.ShapeDtypeStruct((B, P), jnp.float32),
                   jax.ShapeDtypeStruct((1, 1), jnp.float32)),
        grid=(1,),
        in_specs=[
            pl.BlockSpec((B, K), lambda i: (0, 0)),
            pl.BlockSpec(wml.shape, lambda i: (0, 0)),
            pl.BlockSpec(bml.shape, lambda i: (0, 0)),
            pl.BlockSpec((B, L), lambda i: (0, 0)),
            pl.BlockSpec(wup.shape, lambda i: (0, 0)),
            pl.BlockSpec(bup.shape, lambda i: (0, 0)),
        ],
        out_specs=(pl.BlockSpec((B, P), lambda i: (0, 0)),
                   pl.BlockSpec((1, 1), lambda i: (0, 0))),
        compiler_params=pltpu.CompilerParams(dimension_semantics=("arbitrary",)),
    )(flat.astype(jnp.bfloat16), wml, bml, eps, wup, bup)
    return up, kl


def _dec3_loss_kernel(col_ref, w_ref, b_ref, x_ref, kl_ref, o_ref, *, inv_batch):
    # Final ConvTranspose2d (stride 1 -> plain conv via im2col) producing logits,
    # with sigmoid + BCE folded in via the stable logits form:
    #   -[x log sigma(a) + (1-x) log(1-sigma(a))] == softplus(a) - x*a
    logits = jnp.dot(col_ref[...], w_ref[...],
                     preferred_element_type=jnp.float32) + b_ref[...]
    x = x_ref[...]
    sp = jnp.maximum(logits, 0.0) + jnp.log(1.0 + jnp.exp(-jnp.abs(logits)))
    bce = jnp.sum(sp - x * logits)
    o_ref[...] = (bce + kl_ref[...]) * inv_batch


# -------------------- conv glue (pure indexing / padding) -------------------

def conv2d_cf(act, wm, bias_c1, k, stride, pad, relu):
    """Conv in channel-first-transposed layout.

    act: (Cin, B, H, W) f32, wm: (Cout, k*k*Cin) bf16, bias_c1: (Cout, 1) f32.
    Returns (Cout, B, Ho, Wo) f32 (lane-dense GEMM output, no transpose needed).
    """
    C, B, H, W = act.shape
    Cout = wm.shape[0]
    xp = jnp.pad(act, ((0, 0), (0, 0), (pad, pad), (pad, pad)))
    Hp, Wp = H + 2 * pad, W + 2 * pad
    Ho = (Hp - k) // stride + 1
    Wo = (Wp - k) // stride + 1
    taps = []
    for kh in range(k):
        for kw in range(k):
            taps.append(xp[:, :, kh:kh + stride * (Ho - 1) + 1:stride,
                               kw:kw + stride * (Wo - 1) + 1:stride])
    # rows ordered (kh, kw, cin) to match wm columns
    colT = jnp.concatenate(taps, axis=0).reshape(k * k * C, B * Ho * Wo)
    out = matmul_act(wm, colT.astype(jnp.bfloat16), bias_c1,
                     act="relu" if relu else "none")          # (Cout, B*Ho*Wo)
    return out.reshape(Cout, B, Ho, Wo)


def deconv_s2(x_nhwc, wm, bias, padding, output_padding, k=4):
    """Stride-2 ConvTranspose2d via GEMM-then-col2im (no dilation, no scatter).

    x_nhwc: (B, H, W, Cin) f32, wm: (Cin, k*k*Cout) bf16, bias: (Cout,) f32.
    """
    B, H, W, Cin = x_nhwc.shape
    Cout = wm.shape[1] // (k * k)
    a = x_nhwc.reshape(B * H * W, Cin).astype(jnp.bfloat16)
    y = matmul_act(a, wm, None, act="none")                    # (B*H*W, k*k*Cout)
    y = y.reshape(B, H, W, k, k, Cout)
    # col2im, stride 2: out_full[2i+kh, 2j+kw] += y[i, j, kh, kw]
    # height: parity interleave (even rows <- kh in {0,2}, odd rows <- kh in {1,3})
    zs = []
    for r in range(2):
        top = jnp.pad(y[:, :, :, r, :, :],     ((0, 0), (0, 1), (0, 0), (0, 0), (0, 0)))
        bot = jnp.pad(y[:, :, :, r + 2, :, :], ((0, 0), (1, 0), (0, 0), (0, 0), (0, 0)))
        zs.append(top + bot)
    z = jnp.stack(zs, axis=2).reshape(B, 2 * (H + 1), W, k, Cout)
    # width: same decomposition on kw
    ws = []
    for r in range(2):
        left  = jnp.pad(z[:, :, :, r, :],     ((0, 0), (0, 0), (0, 1), (0, 0)))
        right = jnp.pad(z[:, :, :, r + 2, :], ((0, 0), (0, 0), (1, 0), (0, 0)))
        ws.append(left + right)
    full = jnp.stack(ws, axis=3).reshape(B, 2 * (H + 1), 2 * (W + 1), Cout)
    he = 2 * (H + 1) - (padding - output_padding)
    we = 2 * (W + 1) - (padding - output_padding)
    out = full[:, padding:he, padding:we, :]
    return jnp.maximum(out + bias.reshape(1, 1, 1, Cout), 0.0)


def dec3_bce_kl_loss(d_nhwc, wm3, b3, x, kl, batch, k=4, pad=1):
    """Final deconv (stride 1) fused with sigmoid + BCE + KL -> scalar loss."""
    B, H, W, C = d_nhwc.shape
    Ho = H + 2 * pad - k + 1
    Wo = W + 2 * pad - k + 1
    xp = jnp.pad(d_nhwc, ((0, 0), (pad, pad), (pad, pad), (0, 0)))
    taps = [xp[:, kh:kh + Ho, kw:kw + Wo, :] for kh in range(k) for kw in range(k)]
    # columns ordered (kh, kw, cin) to match wm3 rows
    col = jnp.concatenate(taps, axis=-1).reshape(B * Ho * Wo, k * k * C)
    col = col.astype(jnp.bfloat16)
    xt = x.reshape(B * Ho * Wo, 1).astype(jnp.float32)   # (b, h, w) order, C == 1
    kernel = functools.partial(_dec3_loss_kernel, inv_batch=1.0 / float(batch))
    out = pl.pallas_call(
        kernel,
        out_shape=jax.ShapeDtypeStruct((1, 1), jnp.float32),
        grid=(1,),
        in_specs=[
            pl.BlockSpec(col.shape, lambda i: (0, 0)),
            pl.BlockSpec(wm3.shape, lambda i: (0, 0)),
            pl.BlockSpec(b3.shape, lambda i: (0, 0)),
            pl.BlockSpec(xt.shape, lambda i: (0, 0)),
            pl.BlockSpec(kl.shape, lambda i: (0, 0)),
        ],
        out_specs=pl.BlockSpec((1, 1), lambda i: (0, 0)),
        compiler_params=pltpu.CompilerParams(dimension_semantics=("arbitrary",)),
    )(col, wm3, b3, xt, kl)
    return out[0, 0]


# ------------------------------ VAE forward ---------------------------------

def vae_forward(fp, x, eps):
    B = x.shape[0]
    # encoder in (C, B, H, W) layout -> lane-dense GEMM outputs, no per-layer transpose
    h = x.transpose(1, 0, 2, 3)                                            # (1,B,28,28)
    h = conv2d_cf(h, fp["enc1_wm"], fp["enc1_b"], 4, 1, 2, relu=True)      # (32,B,29,29)
    h = conv2d_cf(h, fp["enc2_wm"], fp["enc2_b"], 4, 2, 1, relu=True)      # (32,B,14,14)
    h = conv2d_cf(h, fp["enc3_wm"], fp["enc3_b"], 4, 2, 1, relu=False)     # (64,B,7,7)
    # flatten in PyTorch .view(B, C*H*W) order
    flat = h.transpose(1, 0, 2, 3).reshape(B, -1)                          # (B,3136)
    # fused mu/logvar + KL + reparameterize + upsample
    up, kl = latent_chain(flat, fp["wml"], fp["bml"], eps, fp["wup"], fp["bup"])
    # decoder in NHWC layout
    d = up.reshape(B, 64, 7, 7).transpose(0, 2, 3, 1)                      # (B,7,7,64)
    d = deconv_s2(d, fp["dec1_wm"], fp["dec1_b"], padding=1, output_padding=0)  # (B,14,14,32)
    d = deconv_s2(d, fp["dec2_wm"], fp["dec2_b"], padding=1, output_padding=1)  # (B,29,29,32)
    # dec3 + sigmoid + BCE + KL fused -> scalar loss
    return dec3_bce_kl_loss(d, fp["dec3_wm"], fp["dec3_b"], x, kl, B)


# --------------------------- parameter handling ------------------------------

def init_params(key, latent_dim):
    """Parameters in PyTorch layouts (the spec's module)."""
    ks = jax.random.split(key, 18)
    def w(k, shape, scale):
        return jax.random.normal(k, shape, dtype=jnp.float32) * scale
    p = {}
    p["enc1_w"] = w(ks[0], (32, 1, 4, 4), 0.10);   p["enc1_b"] = w(ks[1], (32,), 0.01)
    p["enc2_w"] = w(ks[2], (32, 32, 4, 4), 0.05);  p["enc2_b"] = w(ks[3], (32,), 0.01)
    p["enc3_w"] = w(ks[4], (64, 32, 4, 4), 0.05);  p["enc3_b"] = w(ks[5], (64,), 0.01)
    p["mu_w"] = w(ks[6], (latent_dim, 64 * 7 * 7), 0.01)
    p["mu_b"] = w(ks[7], (latent_dim,), 0.01)
    p["logvar_w"] = w(ks[8], (latent_dim, 64 * 7 * 7), 0.01)
    p["logvar_b"] = w(ks[9], (latent_dim,), 0.01)
    p["up_w"] = w(ks[10], (64 * 7 * 7, latent_dim), 0.05)
    p["up_b"] = w(ks[11], (64 * 7 * 7,), 0.01)
    # ConvTranspose2d weight layout: (in_channels, out_channels, k, k)
    p["dec1_w"] = w(ks[12], (64, 32, 4, 4), 0.05); p["dec1_b"] = w(ks[13], (32,), 0.01)
    p["dec2_w"] = w(ks[14], (32, 32, 4, 4), 0.05); p["dec2_b"] = w(ks[15], (32,), 0.01)
    p["dec3_w"] = w(ks[16], (32, 1, 4, 4), 0.05);  p["dec3_b"] = w(ks[17], (1,), 0.01)
    return p


def prepare_params(p, k=4):
    """One-time (outside jit) reshape/cast of weights into GEMM-ready bf16 form."""
    f = {}
    # encoder: Wm (Cout, k*k*Cin) with column order (kh, kw, cin); bias (Cout, 1)
    for name in ("enc1", "enc2", "enc3"):
        w = p[name + "_w"]
        cout = w.shape[0]
        f[name + "_wm"] = w.transpose(0, 2, 3, 1).reshape(cout, -1).astype(jnp.bfloat16)
        f[name + "_b"] = p[name + "_b"].reshape(cout, 1).astype(jnp.float32)
    # latent chain: [Wmu^T | Wlogvar^T] (3136, 2L), biases (1, 2L); Wup^T (L, 3136)
    f["wml"] = jnp.concatenate([p["mu_w"].T, p["logvar_w"].T], axis=1).astype(jnp.bfloat16)
    f["bml"] = jnp.concatenate([p["mu_b"], p["logvar_b"]]).reshape(1, -1).astype(jnp.float32)
    f["wup"] = p["up_w"].T.astype(jnp.bfloat16)
    f["bup"] = p["up_b"].reshape(1, -1).astype(jnp.float32)
    # stride-2 deconvs: Wm (Cin, k*k*Cout) with column order (kh, kw, cout)
    for name in ("dec1", "dec2"):
        w = p[name + "_w"]
        cin = w.shape[0]
        f[name + "_wm"] = w.transpose(0, 2, 3, 1).reshape(cin, -1).astype(jnp.bfloat16)
        f[name + "_b"] = p[name + "_b"].astype(jnp.float32)
    # stride-1 deconv == conv with flipped kernel: Wm (k*k*Cin, 1), rows (kh, kw, cin)
    w3 = p["dec3_w"]
    f["dec3_wm"] = jnp.flip(w3, (2, 3)).transpose(2, 3, 0, 1).reshape(k * k * w3.shape[0], 1)
    f["dec3_wm"] = f["dec3_wm"].astype(jnp.bfloat16)
    f["dec3_b"] = p["dec3_b"].reshape(1, 1).astype(jnp.float32)
    return f


if __name__ == "__main__":
    key = jax.random.PRNGKey(0)
    k_param, k_x, k_eps = jax.random.split(key, 3)

    latent_dim = 16
    B = 2
    params = init_params(k_param, latent_dim)
    fp = prepare_params(params)   # weight reshape/cast done once, outside jit

    # Architecture hard-codes 64*7*7 -> input must be (B, 1, 28, 28); values in [0,1] for BCE.
    x = jax.random.uniform(k_x, (B, 1, 28, 28), dtype=jnp.float32)
    # torch.randn_like(mu) equivalent, drawn on host for determinism.
    eps = jax.random.normal(k_eps, (B, latent_dim), dtype=jnp.float32)

    loss = jax.jit(vae_forward)(fp, x, eps)
    loss = jax.block_until_ready(loss)
    assert loss.shape == () and jnp.isfinite(loss)
    print("KERNEL_OK")
</pallas_src>

<mosaic_0001>
module attributes {stable_mosaic.version = 11 : i64} {
  func.func @_gemm_bias_kernel(%arg0: i32, %arg1: memref<32x16xbf16, #tpu.memory_space<vmem>>, %arg2: memref<16x1682xbf16, #tpu.memory_space<vmem>>, %arg3: memref<32x1xf32, #tpu.memory_space<vmem>>, %arg4: memref<32x1682xf32, #tpu.memory_space<vmem>>) attributes {dimension_semantics = [#tpu.dimension_semantics<arbitrary>], iteration_bounds = array<i64: 1>, scalar_prefetch = 0 : i64, scratch_operands = 0 : i64, tpu.core_type = #tpu.core_type<tc>, window_params = [{pipeline_mode = #tpu.pipeline_mode<synchronous>, transform_indices = @transform_0, window_bounds = array<i64: 32, 16>}, {pipeline_mode = #tpu.pipeline_mode<synchronous>, transform_indices = @transform_1, window_bounds = array<i64: 16, 1682>}, {pipeline_mode = #tpu.pipeline_mode<synchronous>, transform_indices = @transform_2, window_bounds = array<i64: 32, 1>}, {pipeline_mode = #tpu.pipeline_mode<synchronous>, transform_indices = @transform_3, window_bounds = array<i64: 32, 1682>}]} {
    %c0 = arith.constant 0 : index
    %c0_0 = arith.constant 0 : index
    %0 = vector.load %arg1[%c0, %c0_0] : memref<32x16xbf16, #tpu.memory_space<vmem>>, vector<32x16xbf16>
    %c0_1 = arith.constant 0 : index
    %c0_2 = arith.constant 0 : index
    %1 = vector.load %arg2[%c0_1, %c0_2] : memref<16x1682xbf16, #tpu.memory_space<vmem>>, vector<16x1682xbf16>
    %cst = arith.constant dense<0.000000e+00> : vector<32x1682xf32>
    %2 = tpu.matmul %0, %1, %cst {dimension_numbers = #tpu.dot_dimension_numbers<[1], [0], [0], [1], [0, 0, 1, 1], [], []>} : vector<32x16xbf16>, vector<16x1682xbf16>, vector<32x1682xf32> -> vector<32x1682xf32>
    %c0_3 = arith.constant 0 : index
    %c0_4 = arith.constant 0 : index
    %3 = vector.load %arg3[%c0_3, %c0_4] : memref<32x1xf32, #tpu.memory_space<vmem>>, vector<32x1xf32>
    %4 = vector.broadcast %3 : vector<32x1xf32> to vector<32x1682xf32>
    %5 = arith.addf %2, %4 : vector<32x1682xf32>
    %cst_5 = arith.constant 0.000000e+00 : f32
    %6 = vector.broadcast %cst_5 : f32 to vector<32x1682xf32>
    %7 = arith.maximumf %5, %6 : vector<32x1682xf32>
    %c0_6 = arith.constant 0 : index
    %c0_7 = arith.constant 0 : index
    %8 = vector.load %arg4[%c0_6, %c0_7] : memref<32x1682xf32, #tpu.memory_space<vmem>>, vector<32x1682xf32>
    tpu.vector_store %arg4[%c0_6, %c0_7], %7 {strides = array<i32>} : memref<32x1682xf32, #tpu.memory_space<vmem>>, vector<32x1682xf32>,
    return
  }
  func.func @transform_0(%arg0: i32) -> (i32, i32) {
    %c0_i32 = arith.constant 0 : i32
    %c0_i32_0 = arith.constant 0 : i32
    %c0_i32_1 = arith.constant 0 : i32
    return %c0_i32, %c0_i32_0 : i32, i32
  }
  func.func @transform_1(%arg0: i32) -> (i32, i32) {
    %c0_i32 = arith.constant 0 : i32
    %c0_i32_0 = arith.constant 0 : i32
    %c0_i32_1 = arith.constant 0 : i32
    return %c0_i32, %c0_i32_0 : i32, i32
  }
  func.func @transform_2(%arg0: i32) -> (i32, i32) {
    %c0_i32 = arith.constant 0 : i32
    %c0_i32_0 = arith.constant 0 : i32
    %c0_i32_1 = arith.constant 0 : i32
    return %c0_i32, %c0_i32_0 : i32, i32
  }
  func.func @transform_3(%arg0: i32) -> (i32, i32) {
    %c0_i32 = arith.constant 0 : i32
    %c0_i32_0 = arith.constant 0 : i32
    %c0_i32_1 = arith.constant 0 : i32
    return %c0_i32, %c0_i32_0 : i32, i32
  }
}

module attributes {stable_mosaic.version = 11 : i64} {
  func.func @_gemm_bias_kernel(%arg0: i32, %arg1: memref<32x512xbf16, #tpu.memory_space<vmem>>, %arg2: memref<512x392xbf16, #tpu.memory_space<vmem>>, %arg3: memref<32x1xf32, #tpu.memory_space<vmem>>, %arg4: memref<32x392xf32, #tpu.memory_space<vmem>>) attributes {dimension_semantics = [#tpu.dimension_semantics<arbitrary>], iteration_bounds = array<i64: 1>, scalar_prefetch = 0 : i64, scratch_operands = 0 : i64, tpu.core_type = #tpu.core_type<tc>, window_params = [{pipeline_mode = #tpu.pipeline_mode<synchronous>, transform_indices = @transform_0, window_bounds = array<i64: 32, 512>}, {pipeline_mode = #tpu.pipeline_mode<synchronous>, transform_indices = @transform_1, window_bounds = array<i64: 512, 392>}, {pipeline_mode = #tpu.pipeline_mode<synchronous>, transform_indices = @transform_2, window_bounds = array<i64: 32, 1>}, {pipeline_mode = #tpu.pipeline_mode<synchronous>, transform_indices = @transform_3, window_bounds = array<i64: 32, 392>}]} {
    %c0 = arith.constant 0 : index
    %c0_0 = arith.constant 0 : index
    %0 = vector.load %arg1[%c0, %c0_0] : memref<32x512xbf16, #tpu.memory_space<vmem>>, vector<32x512xbf16>
    %c0_1 = arith.constant 0 : index
    %c0_2 = arith.constant 0 : index
    %1 = vector.load %arg2[%c0_1, %c0_2] : memref<512x392xbf16, #tpu.memory_space<vmem>>, vector<512x392xbf16>
    %cst = arith.constant dense<0.000000e+00> : vector<32x392xf32>
    %2 = tpu.matmul %0, %1, %cst {dimension_numbers = #tpu.dot_dimension_numbers<[1], [0], [0], [1], [0, 0, 1, 1], [], []>} : vector<32x512xbf16>, vector<512x392xbf16>, vector<32x392xf32> -> vector<32x392xf32>
    %c0_3 = arith.constant 0 : index
    %c0_4 = arith.constant 0 : index
    %3 = vector.load %arg3[%c0_3, %c0_4] : memref<32x1xf32, #tpu.memory_space<vmem>>, vector<32x1xf32>
    %4 = vector.broadcast %3 : vector<32x1xf32> to vector<32x392xf32>
    %5 = arith.addf %2, %4 : vector<32x392xf32>
    %cst_5 = arith.constant 0.000000e+00 : f32
    %6 = vector.broadcast %cst_5 : f32 to vector<32x392xf32>
    %7 = arith.maximumf %5, %6 : vector<32x392xf32>
    %c0_6 = arith.constant 0 : index
    %c0_7 = arith.constant 0 : index
    %8 = vector.load %arg4[%c0_6, %c0_7] : memref<32x392xf32, #tpu.memory_space<vmem>>, vector<32x392xf32>
    tpu.vector_store %arg4[%c0_6, %c0_7], %7 {strides = array<i32>} : memref<32x392xf32, #tpu.memory_space<vmem>>, vector<32x392xf32>,
    return
  }
  func.func @transform_0(%arg0: i32) -> (i32, i32) {
    %c0_i32 = arith.constant 0 : i32
    %c0_i32_0 = arith.constant 0 : i32
    %c0_i32_1 = arith.constant 0 : i32
    return %c0_i32, %c0_i32_0 : i32, i32
  }
  func.func @transform_1(%arg0: i32) -> (i32, i32) {
    %c0_i32 = arith.constant 0 : i32
    %c0_i32_0 = arith.constant 0 : i32
    %c0_i32_1 = arith.constant 0 : i32
    return %c0_i32, %c0_i32_0 : i32, i32
  }
  func.func @transform_2(%arg0: i32) -> (i32, i32) {
    %c0_i32 = arith.constant 0 : i32
    %c0_i32_0 = arith.constant 0 : i32
    %c0_i32_1 = arith.constant 0 : i32
    return %c0_i32, %c0_i32_0 : i32, i32
  }
  func.func @transform_3(%arg0: i32) -> (i32, i32) {
    %c0_i32 = arith.constant 0 : i32
    %c0_i32_0 = arith.constant 0 : i32
    %c0_i32_1 = arith.constant 0 : i32
    return %c0_i32, %c0_i32_0 : i32, i32
  }
}

module attributes {stable_mosaic.version = 11 : i64} {
  func.func @_gemm_bias_kernel(%arg0: i32, %arg1: memref<64x512xbf16, #tpu.memory_space<vmem>>, %arg2: memref<512x98xbf16, #tpu.memory_space<vmem>>, %arg3: memref<64x1xf32, #tpu.memory_space<vmem>>, %arg4: memref<64x98xf32, #tpu.memory_space<vmem>>) attributes {dimension_semantics = [#tpu.dimension_semantics<arbitrary>], iteration_bounds = array<i64: 1>, scalar_prefetch = 0 : i64, scratch_operands = 0 : i64, tpu.core_type = #tpu.core_type<tc>, window_params = [{pipeline_mode = #tpu.pipeline_mode<synchronous>, transform_indices = @transform_0, window_bounds = array<i64: 64, 512>}, {pipeline_mode = #tpu.pipeline_mode<synchronous>, transform_indices = @transform_1, window_bounds = array<i64: 512, 98>}, {pipeline_mode = #tpu.pipeline_mode<synchronous>, transform_indices = @transform_2, window_bounds = array<i64: 64, 1>}, {pipeline_mode = #tpu.pipeline_mode<synchronous>, transform_indices = @transform_3, window_bounds = array<i64: 64, 98>}]} {
    %c0 = arith.constant 0 : index
    %c0_0 = arith.constant 0 : index
    %0 = vector.load %arg1[%c0, %c0_0] : memref<64x512xbf16, #tpu.memory_space<vmem>>, vector<64x512xbf16>
    %c0_1 = arith.constant 0 : index
    %c0_2 = arith.constant 0 : index
    %1 = vector.load %arg2[%c0_1, %c0_2] : memref<512x98xbf16, #tpu.memory_space<vmem>>, vector<512x98xbf16>
    %cst = arith.constant dense<0.000000e+00> : vector<64x98xf32>
    %2 = tpu.matmul %0, %1, %cst {dimension_numbers = #tpu.dot_dimension_numbers<[1], [0], [0], [1], [0, 0, 1, 1], [], []>} : vector<64x512xbf16>, vector<512x98xbf16>, vector<64x98xf32> -> vector<64x98xf32>
    %c0_3 = arith.constant 0 : index
    %c0_4 = arith.constant 0 : index
    %3 = vector.load %arg3[%c0_3, %c0_4] : memref<64x1xf32, #tpu.memory_space<vmem>>, vector<64x1xf32>
    %4 = vector.broadcast %3 : vector<64x1xf32> to vector<64x98xf32>
    %5 = arith.addf %2, %4 : vector<64x98xf32>
    %c0_5 = arith.constant 0 : index
    %c0_6 = arith.constant 0 : index
    %6 = vector.load %arg4[%c0_5, %c0_6] : memref<64x98xf32, #tpu.memory_space<vmem>>, vector<64x98xf32>
    tpu.vector_store %arg4[%c0_5, %c0_6], %5 {strides = array<i32>} : memref<64x98xf32, #tpu.memory_space<vmem>>, vector<64x98xf32>,
    return
  }
  func.func @transform_0(%arg0: i32) -> (i32, i32) {
    %c0_i32 = arith.constant 0 : i32
    %c0_i32_0 = arith.constant 0 : i32
    %c0_i32_1 = arith.constant 0 : i32
    return %c0_i32, %c0_i32_0 : i32, i32
  }
  func.func @transform_1(%arg0: i32) -> (i32, i32) {
    %c0_i32 = arith.constant 0 : i32
    %c0_i32_0 = arith.constant 0 : i32
    %c0_i32_1 = arith.constant 0 : i32
    return %c0_i32, %c0_i32_0 : i32, i32
  }
  func.func @transform_2(%arg0: i32) -> (i32, i32) {
    %c0_i32 = arith.constant 0 : i32
    %c0_i32_0 = arith.constant 0 : i32
    %c0_i32_1 = arith.constant 0 : i32
    return %c0_i32, %c0_i32_0 : i32, i32
  }
  func.func @transform_3(%arg0: i32) -> (i32, i32) {
    %c0_i32 = arith.constant 0 : i32
    %c0_i32_0 = arith.constant 0 : i32
    %c0_i32_1 = arith.constant 0 : i32
    return %c0_i32, %c0_i32_0 : i32, i32
  }
}

module attributes {stable_mosaic.version = 11 : i64} {
  func.func @_latent_kernel(%arg0: i32, %arg1: memref<2x3136xbf16, #tpu.memory_space<vmem>>, %arg2: memref<3136x32xbf16, #tpu.memory_space<vmem>>, %arg3: memref<1x32xf32, #tpu.memory_space<vmem>>, %arg4: memref<2x16xf32, #tpu.memory_space<vmem>>, %arg5: memref<16x3136xbf16, #tpu.memory_space<vmem>>, %arg6: memref<1x3136xf32, #tpu.memory_space<vmem>>, %arg7: memref<2x3136xf32, #tpu.memory_space<vmem>>, %arg8: memref<1x1xf32, #tpu.memory_space<vmem>>) attributes {dimension_semantics = [#tpu.dimension_semantics<arbitrary>], iteration_bounds = array<i64: 1>, scalar_prefetch = 0 : i64, scratch_operands = 0 : i64, tpu.core_type = #tpu.core_type<tc>, window_params = [{pipeline_mode = #tpu.pipeline_mode<synchronous>, transform_indices = @transform_0, window_bounds = array<i64: 2, 3136>}, {pipeline_mode = #tpu.pipeline_mode<synchronous>, transform_indices = @transform_1, window_bounds = array<i64: 3136, 32>}, {pipeline_mode = #tpu.pipeline_mode<synchronous>, transform_indices = @transform_2, window_bounds = array<i64: 1, 32>}, {pipeline_mode = #tpu.pipeline_mode<synchronous>, transform_indices = @transform_3, window_bounds = array<i64: 2, 16>}, {pipeline_mode = #tpu.pipeline_mode<synchronous>, transform_indices = @transform_4, window_bounds = array<i64: 16, 3136>}, {pipeline_mode = #tpu.pipeline_mode<synchronous>, transform_indices = @transform_5, window_bounds = array<i64: 1, 3136>}, {pipeline_mode = #tpu.pipeline_mode<synchronous>, transform_indices = @transform_6, window_bounds = array<i64: 2, 3136>}, {pipeline_mode = #tpu.pipeline_mode<synchronous>, transform_indices = @transform_7, window_bounds = array<i64: 1, 1>}]} {
    %c0 = arith.constant 0 : index
    %c0_0 = arith.constant 0 : index
    %0 = vector.load %arg1[%c0, %c0_0] : memref<2x3136xbf16, #tpu.memory_space<vmem>>, vector<2x3136xbf16>
    %c0_1 = arith.constant 0 : index
    %c0_2 = arith.constant 0 : index
    %1 = vector.load %arg2[%c0_1, %c0_2] : memref<3136x32xbf16, #tpu.memory_space<vmem>>, vector<3136x32xbf16>
    %cst = arith.constant dense<0.000000e+00> : vector<2x32xf32>
    %2 = tpu.matmul %0, %1, %cst {dimension_numbers = #tpu.dot_dimension_numbers<[1], [0], [0], [1], [0, 0, 1, 1], [], []>} : vector<2x3136xbf16>, vector<3136x32xbf16>, vector<2x32xf32> -> vector<2x32xf32>
    %c0_3 = arith.constant 0 : index
    %c0_4 = arith.constant 0 : index
    %3 = vector.load %arg3[%c0_3, %c0_4] : memref<1x32xf32, #tpu.memory_space<vmem>>, vector<1x32xf32>
    %4 = vector.broadcast %3 : vector<1x32xf32> to vector<2x32xf32>
    %5 = arith.addf %2, %4 : vector<2x32xf32>
    %6 = vector.extract_strided_slice %5 {offsets = [0, 0], sizes = [2, 16], strides = [1, 1]} : vector<2x32xf32> to vector<2x16xf32>
    %7 = vector.extract_strided_slice %5 {offsets = [0, 16], sizes = [2, 16], strides = [1, 1]} : vector<2x32xf32> to vector<2x16xf32>
    %cst_5 = arith.constant 1.000000e+00 : f32
    %8 = vector.broadcast %cst_5 : f32 to vector<2x16xf32>
    %9 = arith.addf %7, %8 : vector<2x16xf32>
    %10 = math.exp %7 : vector<2x16xf32>
    %11 = arith.subf %9, %10 : vector<2x16xf32>
    %12 = arith.mulf %6, %6 : vector<2x16xf32>
    %13 = arith.subf %11, %12 : vector<2x16xf32>
    %14 = vector.shape_cast %13 : vector<2x16xf32> to vector<1x2x16xf32>
    %cst_6 = arith.constant dense<0.000000e+00> : vector<1xf32>
    %15 = vector.multi_reduction <add>, %14, %cst_6 [1, 2] : vector<1x2x16xf32> to vector<1xf32>
    %16 = vector.shape_cast %15 : vector<1xf32> to vector<1x1x1xf32>
    %17 = vector.extract %16[0, 0, 0] : f32 from vector<1x1x1xf32>
    %18 = vector.broadcast %17 : f32 to vector<1x1xf32>
    %cst_7 = arith.constant -5.000000e-01 : f32
    %19 = vector.broadcast %cst_7 : f32 to vector<1x1xf32>
    %20 = arith.mulf %19, %18 : vector<1x1xf32>
    %c0_8 = arith.constant 0 : index
    %c0_9 = arith.constant 0 : index
    %21 = vector.load %arg8[%c0_8, %c0_9] : memref<1x1xf32, #tpu.memory_space<vmem>>, vector<1x1xf32>
    tpu.vector_store %arg8[%c0_8, %c0_9], %20 {strides = array<i32>} : memref<1x1xf32, #tpu.memory_space<vmem>>, vector<1x1xf32>,
    %cst_10 = arith.constant 5.000000e-01 : f32
    %22 = vector.broadcast %cst_10 : f32 to vector<2x16xf32>
    %23 = arith.mulf %22, %7 : vector<2x16xf32>
    %24 = math.exp %23 : vector<2x16xf32>
    %c0_11 = arith.constant 0 : index
    %c0_12 = arith.constant 0 : index
    %25 = vector.load %arg4[%c0_11, %c0_12] : memref<2x16xf32, #tpu.memory_space<vmem>>, vector<2x16xf32>
    %26 = arith.mulf %24, %25 : vector<2x16xf32>
    %27 = arith.addf %6, %26 : vector<2x16xf32>
    %28 = arith.truncf %27 : vector<2x16xf32> to vector<2x16xbf16>
    %c0_13 = arith.constant 0 : index
    %c0_14 = arith.constant 0 : index
    %29 = vector.load %arg5[%c0_13, %c0_14] : memref<16x3136xbf16, #tpu.memory_space<vmem>>, vector<16x3136xbf16>
    %cst_15 = arith.constant dense<0.000000e+00> : vector<2x3136xf32>
    %30 = tpu.matmul %28, %29, %cst_15 {dimension_numbers = #tpu.dot_dimension_numbers<[1], [0], [0], [1], [0, 0, 1, 1], [], []>} : vector<2x16xbf16>, vector<16x3136xbf16>, vector<2x3136xf32> -> vector<2x3136xf32>
    %c0_16 = arith.constant 0 : index
    %c0_17 = arith.constant 0 : index
    %31 = vector.load %arg6[%c0_16, %c0_17] : memref<1x3136xf32, #tpu.memory_space<vmem>>, vector<1x3136xf32>
    %32 = vector.broadcast %31 : vector<1x3136xf32> to vector<2x3136xf32>
    %33 = arith.addf %30, %32 : vector<2x3136xf32>
    %c0_18 = arith.constant 0 : index
    %c0_19 = arith.constant 0 : index
    %34 = vector.load %arg7[%c0_18, %c0_19] : memref<2x3136xf32, #tpu.memory_space<vmem>>, vector<2x3136xf32>
    tpu.vector_store %arg7[%c0_18, %c0_19], %33 {strides = array<i32>} : memref<2x3136xf32, #tpu.memory_space<vmem>>, vector<2x3136xf32>,
    return
  }
  func.func @transform_0(%arg0: i32) -> (i32, i32) {
    %c0_i32 = arith.constant 0 : i32
    %c0_i32_0 = arith.constant 0 : i32
    %c0_i32_1 = arith.constant 0 : i32
    return %c0_i32, %c0_i32_0 : i32, i32
  }
  func.func @transform_1(%arg0: i32) -> (i32, i32) {
    %c0_i32 = arith.constant 0 : i32
    %c0_i32_0 = arith.constant 0 : i32
    %c0_i32_1 = arith.constant 0 : i32
    return %c0_i32, %c0_i32_0 : i32, i32
  }
  func.func @transform_2(%arg0: i32) -> (i32, i32) {
    %c0_i32 = arith.constant 0 : i32
    %c0_i32_0 = arith.constant 0 : i32
    %c0_i32_1 = arith.constant 0 : i32
    return %c0_i32, %c0_i32_0 : i32, i32
  }
  func.func @transform_3(%arg0: i32) -> (i32, i32) {
    %c0_i32 = arith.constant 0 : i32
    %c0_i32_0 = arith.constant 0 : i32
    %c0_i32_1 = arith.constant 0 : i32
    return %c0_i32, %c0_i32_0 : i32, i32
  }
  func.func @transform_4(%arg0: i32) -> (i32, i32) {
    %c0_i32 = arith.constant 0 : i32
    %c0_i32_0 = arith.constant 0 : i32
    %c0_i32_1 = arith.constant 0 : i32
    return %c0_i32, %c0_i32_0 : i32, i32
  }
  func.func @transform_5(%arg0: i32) -> (i32, i32) {
    %c0_i32 = arith.constant 0 : i32
    %c0_i32_0 = arith.constant 0 : i32
    %c0_i32_1 = arith.constant 0 : i32
    return %c0_i32, %c0_i32_0 : i32, i32
  }
  func.func @transform_6(%arg0: i32) -> (i32, i32) {
    %c0_i32 = arith.constant 0 : i32
    %c0_i32_0 = arith.constant 0 : i32
    %c0_i32_1 = arith.constant 0 : i32
    return %c0_i32, %c0_i32_0 : i32, i32
  }
  func.func @transform_7(%arg0: i32) -> (i32, i32) {
    %c0_i32 = arith.constant 0 : i32
    %c0_i32_0 = arith.constant 0 : i32
    %c0_i32_1 = arith.constant 0 : i32
    return %c0_i32, %c0_i32_0 : i32, i32
  }
}

module attributes {stable_mosaic.version = 11 : i64} {
  func.func @_gemm_kernel(%arg0: i32, %arg1: memref<98x64xbf16, #tpu.memory_space<vmem>>, %arg2: memref<64x512xbf16, #tpu.memory_space<vmem>>, %arg3: memref<98x512xf32, #tpu.memory_space<vmem>>) attributes {dimension_semantics = [#tpu.dimension_semantics<arbitrary>], iteration_bounds = array<i64: 1>, scalar_prefetch = 0 : i64, scratch_operands = 0 : i64, tpu.core_type = #tpu.core_type<tc>, window_params = [{pipeline_mode = #tpu.pipeline_mode<synchronous>, transform_indices = @transform_0, window_bounds = array<i64: 98, 64>}, {pipeline_mode = #tpu.pipeline_mode<synchronous>, transform_indices = @transform_1, window_bounds = array<i64: 64, 512>}, {pipeline_mode = #tpu.pipeline_mode<synchronous>, transform_indices = @transform_2, window_bounds = array<i64: 98, 512>}]} {
    %c0 = arith.constant 0 : index
    %c0_0 = arith.constant 0 : index
    %0 = vector.load %arg1[%c0, %c0_0] : memref<98x64xbf16, #tpu.memory_space<vmem>>, vector<98x64xbf16>
    %c0_1 = arith.constant 0 : index
    %c0_2 = arith.constant 0 : index
    %1 = vector.load %arg2[%c0_1, %c0_2] : memref<64x512xbf16, #tpu.memory_space<vmem>>, vector<64x512xbf16>
    %cst = arith.constant dense<0.000000e+00> : vector<98x512xf32>
    %2 = tpu.matmul %0, %1, %cst {dimension_numbers = #tpu.dot_dimension_numbers<[1], [0], [0], [1], [0, 0, 1, 1], [], []>} : vector<98x64xbf16>, vector<64x512xbf16>, vector<98x512xf32> -> vector<98x512xf32>
    %c0_3 = arith.constant 0 : index
    %c0_4 = arith.constant 0 : index
    %3 = vector.load %arg3[%c0_3, %c0_4] : memref<98x512xf32, #tpu.memory_space<vmem>>, vector<98x512xf32>
    tpu.vector_store %arg3[%c0_3, %c0_4], %2 {strides = array<i32>} : memref<98x512xf32, #tpu.memory_space<vmem>>, vector<98x512xf32>,
    return
  }
  func.func @transform_0(%arg0: i32) -> (i32, i32) {
    %c0_i32 = arith.constant 0 : i32
    %c0_i32_0 = arith.constant 0 : i32
    %c0_i32_1 = arith.constant 0 : i32
    return %c0_i32, %c0_i32_0 : i32, i32
  }
  func.func @transform_1(%arg0: i32) -> (i32, i32) {
    %c0_i32 = arith.constant 0 : i32
    %c0_i32_0 = arith.constant 0 : i32
    %c0_i32_1 = arith.constant 0 : i32
    return %c0_i32, %c0_i32_0 : i32, i32
  }
  func.func @transform_2(%arg0: i32) -> (i32, i32) {
    %c0_i32 = arith.constant 0 : i32
    %c0_i32_0 = arith.constant 0 : i32
    %c0_i32_1 = arith.constant 0 : i32
    return %c0_i32, %c0_i32_0 : i32, i32
  }
}

module attributes {stable_mosaic.version = 11 : i64} {
  func.func @_gemm_kernel(%arg0: i32, %arg1: memref<392x32xbf16, #tpu.memory_space<vmem>>, %arg2: memref<32x512xbf16, #tpu.memory_space<vmem>>, %arg3: memref<392x512xf32, #tpu.memory_space<vmem>>) attributes {dimension_semantics = [#tpu.dimension_semantics<arbitrary>], iteration_bounds = array<i64: 1>, scalar_prefetch = 0 : i64, scratch_operands = 0 : i64, tpu.core_type = #tpu.core_type<tc>, window_params = [{pipeline_mode = #tpu.pipeline_mode<synchronous>, transform_indices = @transform_0, window_bounds = array<i64: 392, 32>}, {pipeline_mode = #tpu.pipeline_mode<synchronous>, transform_indices = @transform_1, window_bounds = array<i64: 32, 512>}, {pipeline_mode = #tpu.pipeline_mode<synchronous>, transform_indices = @transform_2, window_bounds = array<i64: 392, 512>}]} {
    %c0 = arith.constant 0 : index
    %c0_0 = arith.constant 0 : index
    %0 = vector.load %arg1[%c0, %c0_0] : memref<392x32xbf16, #tpu.memory_space<vmem>>, vector<392x32xbf16>
    %c0_1 = arith.constant 0 : index
    %c0_2 = arith.constant 0 : index
    %1 = vector.load %arg2[%c0_1, %c0_2] : memref<32x512xbf16, #tpu.memory_space<vmem>>, vector<32x512xbf16>
    %cst = arith.constant dense<0.000000e+00> : vector<392x512xf32>
    %2 = tpu.matmul %0, %1, %cst {dimension_numbers = #tpu.dot_dimension_numbers<[1], [0], [0], [1], [0, 0, 1, 1], [], []>} : vector<392x32xbf16>, vector<32x512xbf16>, vector<392x512xf32> -> vector<392x512xf32>
    %c0_3 = arith.constant 0 : index
    %c0_4 = arith.constant 0 : index
    %3 = vector.load %arg3[%c0_3, %c0_4] : memref<392x512xf32, #tpu.memory_space<vmem>>, vector<392x512xf32>
    tpu.vector_store %arg3[%c0_3, %c0_4], %2 {strides = array<i32>} : memref<392x512xf32, #tpu.memory_space<vmem>>, vector<392x512xf32>,
    return
  }
  func.func @transform_0(%arg0: i32) -> (i32, i32) {
    %c0_i32 = arith.constant 0 : i32
    %c0_i32_0 = arith.constant 0 : i32
    %c0_i32_1 = arith.constant 0 : i32
    return %c0_i32, %c0_i32_0 : i32, i32
  }
  func.func @transform_1(%arg0: i32) -> (i32, i32) {
    %c0_i32 = arith.constant 0 : i32
    %c0_i32_0 = arith.constant 0 : i32
    %c0_i32_1 = arith.constant 0 : i32
    return %c0_i32, %c0_i32_0 : i32, i32
  }
  func.func @transform_2(%arg0: i32) -> (i32, i32) {
    %c0_i32 = arith.constant 0 : i32
    %c0_i32_0 = arith.constant 0 : i32
    %c0_i32_1 = arith.constant 0 : i32
    return %c0_i32, %c0_i32_0 : i32, i32
  }
}

module attributes {stable_mosaic.version = 11 : i64} {
  func.func @_dec3_loss_kernel(%arg0: i32, %arg1: memref<1568x512xbf16, #tpu.memory_space<vmem>>, %arg2: memref<512x1xbf16, #tpu.memory_space<vmem>>, %arg3: memref<1x1xf32, #tpu.memory_space<vmem>>, %arg4: memref<1568x1xf32, #tpu.memory_space<vmem>>, %arg5: memref<1x1xf32, #tpu.memory_space<vmem>>, %arg6: memref<1x1xf32, #tpu.memory_space<vmem>>) attributes {dimension_semantics = [#tpu.dimension_semantics<arbitrary>], iteration_bounds = array<i64: 1>, scalar_prefetch = 0 : i64, scratch_operands = 0 : i64, tpu.core_type = #tpu.core_type<tc>, window_params = [{pipeline_mode = #tpu.pipeline_mode<synchronous>, transform_indices = @transform_0, window_bounds = array<i64: 1568, 512>}, {pipeline_mode = #tpu.pipeline_mode<synchronous>, transform_indices = @transform_1, window_bounds = array<i64: 512, 1>}, {pipeline_mode = #tpu.pipeline_mode<synchronous>, transform_indices = @transform_2, window_bounds = array<i64: 1, 1>}, {pipeline_mode = #tpu.pipeline_mode<synchronous>, transform_indices = @transform_3, window_bounds = array<i64: 1568, 1>}, {pipeline_mode = #tpu.pipeline_mode<synchronous>, transform_indices = @transform_4, window_bounds = array<i64: 1, 1>}, {pipeline_mode = #tpu.pipeline_mode<synchronous>, transform_indices = @transform_5, window_bounds = array<i64: 1, 1>}]} {
    %c0 = arith.constant 0 : index
    %c0_0 = arith.constant 0 : index
    %0 = vector.load %arg1[%c0, %c0_0] : memref<1568x512xbf16, #tpu.memory_space<vmem>>, vector<1568x512xbf16>
    %c0_1 = arith.constant 0 : index
    %c0_2 = arith.constant 0 : index
    %1 = vector.load %arg2[%c0_1, %c0_2] : memref<512x1xbf16, #tpu.memory_space<vmem>>, vector<512x1xbf16>
    %cst = arith.constant dense<0.000000e+00> : vector<1568x1xf32>
    %2 = tpu.matmul %0, %1, %cst {dimension_numbers = #tpu.dot_dimension_numbers<[1], [0], [0], [1], [0, 0, 1, 1], [], []>} : vector<1568x512xbf16>, vector<512x1xbf16>, vector<1568x1xf32> -> vector<1568x1xf32>
    %c0_3 = arith.constant 0 : index
    %c0_4 = arith.constant 0 : index
    %3 = vector.load %arg3[%c0_3, %c0_4] : memref<1x1xf32, #tpu.memory_space<vmem>>, vector<1x1xf32>
    %4 = vector.broadcast %3 : vector<1x1xf32> to vector<1568x1xf32>
    %5 = arith.addf %2, %4 : vector<1568x1xf32>
    %c0_5 = arith.constant 0 : index
    %c0_6 = arith.constant 0 : index
    %6 = vector.load %arg4[%c0_5, %c0_6] : memref<1568x1xf32, #tpu.memory_space<vmem>>, vector<1568x1xf32>
    %cst_7 = arith.constant 0.000000e+00 : f32
    %7 = vector.broadcast %cst_7 : f32 to vector<1568x1xf32>
    %8 = arith.maximumf %5, %7 : vector<1568x1xf32>
    %9 = math.absf %5 : vector<1568x1xf32>
    %cst_8 = arith.constant 0.000000e+00 : f32
    %10 = vector.broadcast %cst_8 : f32 to vector<1568x1xf32>
    %11 = arith.subf %10, %9 : vector<1568x1xf32>
    %12 = math.exp %11 : vector<1568x1xf32>
    %cst_9 = arith.constant 1.000000e+00 : f32
    %13 = vector.broadcast %cst_9 : f32 to vector<1568x1xf32>
    %14 = arith.addf %13, %12 : vector<1568x1xf32>
    %15 = math.log %14 : vector<1568x1xf32>
    %16 = arith.addf %8, %15 : vector<1568x1xf32>
    %17 = arith.mulf %6, %5 : vector<1568x1xf32>
    %18 = arith.subf %16, %17 : vector<1568x1xf32>
    %19 = vector.shape_cast %18 : vector<1568x1xf32> to vector<1x1568x1xf32>
    %cst_10 = arith.constant dense<0.000000e+00> : vector<1xf32>
    %20 = vector.multi_reduction <add>, %19, %cst_10 [1, 2] : vector<1x1568x1xf32> to vector<1xf32>
    %21 = vector.shape_cast %20 : vector<1xf32> to vector<1x1x1xf32>
    %22 = vector.extract %21[0, 0, 0] : f32 from vector<1x1x1xf32>
    %c0_11 = arith.constant 0 : index
    %c0_12 = arith.constant 0 : index
    %23 = vector.load %arg5[%c0_11, %c0_12] : memref<1x1xf32, #tpu.memory_space<vmem>>, vector<1x1xf32>
    %24 = vector.broadcast %22 : f32 to vector<1x1xf32>
    %25 = arith.addf %24, %23 : vector<1x1xf32>
    %cst_13 = arith.constant 5.000000e-01 : f32
    %26 = vector.broadcast %cst_13 : f32 to vector<1x1xf32>
    %27 = arith.mulf %25, %26 : vector<1x1xf32>
    %c0_14 = arith.constant 0 : index
    %c0_15 = arith.constant 0 : index
    %28 = vector.load %arg6[%c0_14, %c0_15] : memref<1x1xf32, #tpu.memory_space<vmem>>, vector<1x1xf32>
    tpu.vector_store %arg6[%c0_14, %c0_15], %27 {strides = array<i32>} : memref<1x1xf32, #tpu.memory_space<vmem>>, vector<1x1xf32>,
    return
  }
  func.func @transform_0(%arg0: i32) -> (i32, i32) {
    %c0_i32 = arith.constant 0 : i32
    %c0_i32_0 = arith.constant 0 : i32
    %c0_i32_1 = arith.constant 0 : i32
    return %c0_i32, %c0_i32_0 : i32, i32
  }
  func.func @transform_1(%arg0: i32) -> (i32, i32) {
    %c0_i32 = arith.constant 0 : i32
    %c0_i32_0 = arith.constant 0 : i32
    %c0_i32_1 = arith.constant 0 : i32
    return %c0_i32, %c0_i32_0 : i32, i32
  }
  func.func @transform_2(%arg0: i32) -> (i32, i32) {
    %c0_i32 = arith.constant 0 : i32
    %c0_i32_0 = arith.constant 0 : i32
    %c0_i32_1 = arith.constant 0 : i32
    return %c0_i32, %c0_i32_0 : i32, i32
  }
  func.func @transform_3(%arg0: i32) -> (i32, i32) {
    %c0_i32 = arith.constant 0 : i32
    %c0_i32_0 = arith.constant 0 : i32
    %c0_i32_1 = arith.constant 0 : i32
    return %c0_i32, %c0_i32_0 : i32, i32
  }
  func.func @transform_4(%arg0: i32) -> (i32, i32) {
    %c0_i32 = arith.constant 0 : i32
    %c0_i32_0 = arith.constant 0 : i32
    %c0_i32_1 = arith.constant 0 : i32
    return %c0_i32, %c0_i32_0 : i32, i32
  }
  func.func @transform_5(%arg0: i32) -> (i32, i32) {
    %c0_i32 = arith.constant 0 : i32
    %c0_i32_0 = arith.constant 0 : i32
    %c0_i32_1 = arith.constant 0 : i32
    return %c0_i32, %c0_i32_0 : i32, i32
  }
}

</mosaic_0001>

<bundles_post_ra>
// kernel: vae_forward.7
= control target key start
LH: loop header
LB: loop body
LE: loop exit
PB: predicated region body
PF: predicated region fallthrough
CT: control target
= control target key end

     0   :  { %v690_v1 = vmov 0   ;;  %vm137_vm0 = vcmask 130048   ;;  %vm584_vm1 = vcmask 146432   ;;  %s1037_s1 = inlined_call_operand.vmem [shape: bf16[16,1682], index: 1, kind: input, shape index: {}]   ;;  %s1038_s0 = inlined_call_operand.vmem [shape: bf16[32,16], index: 0, kind: input, shape index: {}]   ;;  %s1039_s2 = inlined_call_operand.vmem [shape: f32[32,1], index: 2, kind: input, shape index: {}]   ;;  %s1040_s3 = inlined_call_operand.vmem [shape: f32[32,1682], index: 3, kind: output, shape index: {}]  }
   0x1   :  { %v667_v0 = vld [vmem:[%s1037_s1 + $0x4] ss:$56 sps:$4 sm:$0xff]   ;;  %176 = vmatprep.mubr.bf16.mxu0 %v690_v1  ;;  %186 = vmatprep.mubr.bf16.mxu1 %v690_v1  ;;  %v669_v2 = vld [vmem:[%s1037_s1] ss:$56 sps:$4 sm:$0xff]   ;;  %v671_v4 = vld [vmem:[%s1038_s0 + $0x8] sm:$0xff]  }
   0x2   :  { %666 = vset.pattern.permute.xlu1 %v690_v1  ;;  %665 = vset.pattern.permute.xlu0 %v690_v1  ;;  %v670_v3 = vld [vmem:[%s1038_s0] sm:$0xff]   ;;  %v675_v7 = vld [vmem:[%s1037_s1 + $0x10] ss:$56 sps:$4 sm:$0xff]   ;;  %v677_v8 = vld [vmem:[%s1037_s1 + $0x14] ss:$56 sps:$4 sm:$0xff]  }
   0x3   :  { %144 = vmatprep.subr.bf16.mxu0 %v667_v0  ;;  %662 = vmatprep.subr.bf16.mxu1 %v667_v0  ;;  %v672_v5 = vld [vmem:[%s1037_s1 + $0x8] ss:$56 sps:$4 sm:$0xff]   ;;  %v674_v6 = vld [vmem:[%s1037_s1 + $0xc] ss:$56 sps:$4 sm:$0xff]   ;;  %v680_v9 = vld [vmem:[%s1037_s1 + $0x1c] ss:$56 sps:$4 sm:$0xff]  }
   0x4   :  { %145 = vmatpush1.bf16.msra.mxu0 %v669_v2  ;;  %663 = vmatpush1.bf16.msra.mxu1 %v669_v2  ;;  %v683_v10 = vld [vmem:[%s1037_s1 + $0x24] ss:$56 sps:$4 sm:$0xff]   ;;  %v678_v11 = vld [vmem:[%s1037_s1 + $0x18] ss:$56 sps:$4 sm:$0xff]   ;;  %v689_v16 = vld [vmem:[%s1037_s1 + $0x34] ss:$56 sps:$4 sm:$0xff]  }
   0x5   :  { %197 = vmatprep.subr.bf16.mxu1 %v674_v6  ;;  %250 = vmatprep.subr.bf16.mxu0 %v677_v8  ;;  %v681_v12 = vld [vmem:[%s1037_s1 + $0x20] ss:$56 sps:$4 sm:$0xff]   ;;  %v35_v13 = vld [vmem:[%s1039_s2 + $0x10] sm:$0xff]  ;;  %v686_v15 = vld [vmem:[%s1037_s1 + $0x2c] ss:$56 sps:$4 sm:$0xff]  }
   0x6   :  { %v33_v14 = vld [vmem:[%s1039_s2] sm:$0xff]  ;;  %49 = vperm.xlu1 %666, %v35_v13   ;;  %v36_v17 = vld [vmem:[%s1039_s2 + $0x18] sm:$0xff]  ;;  %v34_v18 = vld [vmem:[%s1039_s2 + $0x8] sm:$0xff] }
   0x7   :  { %648 = vmatmul.mubr.msk.bf16.vlgmr.msra.gmra.mrb[0].mxu0 %vm137_vm0, %v670_v3  ;;  %649 = vmatmul.mubr.msk.bf16.vlgmr.msra.gmra.mrb[0].mxu1 %vm137_vm0, %v671_v4  ;;  %v684_v19 = vld [vmem:[%s1037_s1 + $0x28] ss:$56 sps:$4 sm:$0xff]  }
   0x8   :  { %198 = vmatpush1.bf16.msra.mxu1 %v672_v5  ;;  %251 = vmatpush1.bf16.msra.mxu0 %v675_v7  ;;  %v687_v20 = vld [vmem:[%s1037_s1 + $0x30] ss:$56 sps:$4 sm:$0xff]  }
   0x9   :  { %229 = vmatprep.mubr.bf16.mxu1 %v690_v1  ;;  %282 = vmatprep.mubr.bf16.mxu0 %v690_v1 }
   0xa   :  { %303 = vmatprep.subr.bf16.mxu1 %v680_v9  ;;  %356 = vmatprep.subr.bf16.mxu0 %v683_v10 }
   0xb   :  { %39 = vperm.xlu0 %665, %v33_v14   ;;  %54 = vperm.xlu1 %666, %v36_v17  }
   0xf   :  { %650 = vmatmul.mubr.msk.bf16.vlgmr.msra.gmra.mrb[4].mxu1 %vm137_vm0, %v670_v3  ;;  %652 = vmatmul.mubr.msk.bf16.vlgmr.msra.gmra.mrb[4].mxu0 %vm137_vm0, %v670_v3 }
  0x10   :  { %304 = vmatpush1.bf16.msra.mxu1 %v678_v11  ;;  %357 = vmatpush1.bf16.msra.mxu0 %v681_v12 }
  0x11   :  { %239 = vmatprep.mubr.bf16.mxu1 %v690_v1  ;;  %292 = vmatprep.mubr.bf16.mxu0 %v690_v1 }
  0x12   :  { %409 = vmatprep.subr.bf16.mxu1 %v686_v15  ;;  %462 = vmatprep.subr.bf16.mxu0 %v689_v16 }
  0x13   :  { %44 = vperm.xlu0 %665, %v34_v18  }
  0x17   :  { %651 = vmatmul.mubr.msk.bf16.gmra.mrb[8].mxu1 %vm137_vm0, %v671_v4  ;;  %653 = vmatmul.mubr.msk.bf16.gmra.mrb[8].mxu0 %vm137_vm0, %v671_v4 }
  0x18   :  { %335 = vmatprep.mubr.bf16.mxu1 %v690_v1  ;;  %388 = vmatprep.mubr.bf16.mxu0 %v690_v1 }
  0x1f   :  { %654 = vmatmul.mubr.msk.bf16.vlgmr.msra.gmra.mrb[12].mxu1 %vm137_vm0, %v670_v3  ;;  %656 = vmatmul.mubr.msk.bf16.vlgmr.msra.gmra.mrb[12].mxu0 %vm137_vm0, %v670_v3 }
  0x20   :  { %410 = vmatpush1.bf16.msra.mxu1 %v684_v19  ;;  %463 = vmatpush1.bf16.msra.mxu0 %v687_v20 }
  0x21   :  { %345 = vmatprep.mubr.bf16.mxu1 %v690_v1  ;;  %398 = vmatprep.mubr.bf16.mxu0 %v690_v1 }
  0x27   :  { %655 = vmatmul.mubr.msk.bf16.gmra.mrb[16].mxu1 %vm137_vm0, %v671_v4  ;;  %657 = vmatmul.mubr.msk.bf16.gmra.mrb[16].mxu0 %vm137_vm0, %v671_v4 }
  0x28   :  { %441 = vmatprep.mubr.bf16.mxu1 %v690_v1  ;;  %494 = vmatprep.mubr.bf16.mxu0 %v690_v1 }
  0x2f   :  { %658 = vmatmul.mubr.msk.bf16.vlgmr.msra.gmra.mrb[20].mxu1 %vm137_vm0, %v670_v3  ;;  %660 = vmatmul.mubr.msk.bf16.vlgmr.msra.gmra.mrb[20].mxu0 %vm137_vm0, %v670_v3 }
  0x30   :  { %451 = vmatprep.mubr.bf16.mxu1 %v690_v1  ;;  %504 = vmatprep.mubr.bf16.mxu0 %v690_v1 }
  0x37   :  { %659 = vmatmul.mubr.msk.bf16.gmra.mrb[24].mxu1 %vm137_vm0, %v671_v4  ;;  %661 = vmatmul.mubr.msk.bf16.gmra.mrb[24].mxu0 %vm137_vm0, %v671_v4 }
  0x85   :  { %v801_v21 = vpop.permute.xlu1 %49 }
  0x8a   :  { %v803_v22 = vpop.permute.xlu0 %39  ;;  %v805_v23 = vpop.permute.xlu1 %54 }
  0x92   :  { %v807_v24 = vpop.permute.xlu0 %44 }
  0xda   :  { %v178_v25 = vpop.f32.mrb[0].mxu0  ;;  %v188_v26 = vpop.f32.mrb[0].mxu1 }
  0xdb   :  { %v179_v27 = vadd.f32 %v178_v25, %v803_v22  ;;  %v189_v28 = vadd.f32 %v188_v26, %v801_v21  ;;  %v180_v29 = vpop.f32.mrb[1].mxu0  ;;  %v190_v30 = vpop.f32.mrb[1].mxu1 }
  0xdc   :  { %v181_v31 = vadd.f32 %v180_v29, %v803_v22  ;;  %v191_v32 = vadd.f32 %v190_v30, %v801_v21  ;;  %v182_v33 = vpop.f32.mrb[2].mxu0  ;;  %v192_v34 = vpop.f32.mrb[2].mxu1 }
  0xdd   :  { %v515_v35 = vmax.f32 %v179_v27, 0.0  ;;  %v543_v36 = vmax.f32 %v189_v28, 0.0  ;;  %v183_v37 = vadd.f32 %v182_v33, %v807_v24  ;;  %v193_v38 = vadd.f32 %v192_v34, %v805_v23  ;;  %v184_v39 = vpop.f32.mrb[3].mxu0  ;;  %v194_v40 = vpop.f32.mrb[3].mxu1 }
  0xde   :  { %v516_v41 = vmax.f32 %v181_v31, 0.0  ;;  %v544_v42 = vmax.f32 %v191_v32, 0.0  ;;  %v185_v43 = vadd.f32 %v184_v39, %v807_v24  ;;  %v195_v44 = vadd.f32 %v194_v40, %v805_v23 }
  0xdf   :  { %571 = vst [vmem:[%s1040_s3] sm:$0xff] %v515_v35  ;;  %600 = vst [vmem:[%s1040_s3 + $0xe0] sm:$0xff] %v543_v36  ;;  %v529_v45 = vmax.f32 %v183_v37, 0.0  ;;  %v557_v46 = vmax.f32 %v193_v38, 0.0 }
  0xe0   :  { %572 = vst [vmem:[%s1040_s3 + $0x8] sm:$0xff] %v516_v41  ;;  %601 = vst [vmem:[%s1040_s3 + $0xe8] sm:$0xff] %v544_v42  ;;  %v530_v47 = vmax.f32 %v185_v43, 0.0  ;;  %v558_v48 = vmax.f32 %v195_v44, 0.0 }
  0xe1   :  { %586 = vst [vmem:[%s1040_s3 + $0x70] sm:$0xff] %v529_v45  ;;  %614 = vst [vmem:[%s1040_s3 + $0x150] sm:$0xff] %v557_v46 }
  0xe2   :  { %587 = vst [vmem:[%s1040_s3 + $0x78] sm:$0xff] %v530_v47  ;;  %615 = vst [vmem:[%s1040_s3 + $0x158] sm:$0xff] %v558_v48  ;;  %v231_v49 = vpop.f32.mrb[4].mxu1  ;;  %v284_v50 = vpop.f32.mrb[4].mxu0 }
  0xe3   :  { %v232_v51 = vadd.f32 %v231_v49, %v803_v22  ;;  %v285_v52 = vadd.f32 %v284_v50, %v803_v22  ;;  %v233_v53 = vpop.f32.mrb[5].mxu1  ;;  %v286_v54 = vpop.f32.mrb[5].mxu0 }
  0xe4   :  { %v234_v55 = vadd.f32 %v233_v53, %v803_v22  ;;  %v287_v56 = vadd.f32 %v286_v54, %v803_v22  ;;  %v235_v57 = vpop.f32.mrb[6].mxu1  ;;  %v288_v58 = vpop.f32.mrb[6].mxu0 }
  0xe5   :  { %v517_v59 = vmax.f32 %v232_v51, 0.0  ;;  %v519_v60 = vmax.f32 %v285_v52, 0.0  ;;  %v236_v61 = vadd.f32 %v235_v57, %v807_v24  ;;  %v289_v62 = vadd.f32 %v288_v58, %v807_v24  ;;  %v237_v63 = vpop.f32.mrb[7].mxu1  ;;  %v290_v0 = vpop.f32.mrb[7].mxu0 }
  0xe6   :  { %v518_v1 = vmax.f32 %v234_v55, 0.0  ;;  %v520_v2 = vmax.f32 %v287_v56, 0.0  ;;  %v238_v3 = vadd.f32 %v237_v63, %v807_v24  ;;  %v291_v4 = vadd.f32 %v290_v0, %v807_v24 }
  0xe7   :  { %573 = vst [vmem:[%s1040_s3 + $0x10] sm:$0xff] %v517_v59  ;;  %575 = vst [vmem:[%s1040_s3 + $0x20] sm:$0xff] %v519_v60  ;;  %v531_v5 = vmax.f32 %v236_v61, 0.0  ;;  %v533_v6 = vmax.f32 %v289_v62, 0.0 }
  0xe8   :  { %574 = vst [vmem:[%s1040_s3 + $0x18] sm:$0xff] %v518_v1  ;;  %576 = vst [vmem:[%s1040_s3 + $0x28] sm:$0xff] %v520_v2  ;;  %v532_v7 = vmax.f32 %v238_v3, 0.0  ;;  %v534_v8 = vmax.f32 %v291_v4, 0.0 }
  0xe9   :  { %588 = vst [vmem:[%s1040_s3 + $0x80] sm:$0xff] %v531_v5  ;;  %590 = vst [vmem:[%s1040_s3 + $0x90] sm:$0xff] %v533_v6 }
  0xea   :  { %589 = vst [vmem:[%s1040_s3 + $0x88] sm:$0xff] %v532_v7  ;;  %591 = vst [vmem:[%s1040_s3 + $0x98] sm:$0xff] %v534_v8  ;;  %v241_v9 = vpop.f32.mrb[8].mxu1  ;;  %v294_v10 = vpop.f32.mrb[8].mxu0 }
  0xeb   :  { %v242_v11 = vadd.f32 %v241_v9, %v801_v21  ;;  %v295_v12 = vadd.f32 %v294_v10, %v801_v21  ;;  %v243_v13 = vpop.f32.mrb[9].mxu1  ;;  %v296_v14 = vpop.f32.mrb[9].mxu0 }
  0xec   :  { %v244_v15 = vadd.f32 %v243_v13, %v801_v21  ;;  %v297_v16 = vadd.f32 %v296_v14, %v801_v21  ;;  %v245_v17 = vpop.f32.mrb[10].mxu1  ;;  %v298_v18 = vpop.f32.mrb[10].mxu0 }
  0xed   :  { %v545_v19 = vmax.f32 %v242_v11, 0.0  ;;  %v547_v20 = vmax.f32 %v295_v12, 0.0  ;;  %v246_v25 = vadd.f32 %v245_v17, %v805_v23  ;;  %v299_v26 = vadd.f32 %v298_v18, %v805_v23  ;;  %v247_v27 = vpop.f32.mrb[11].mxu1  ;;  %v300_v28 = vpop.f32.mrb[11].mxu0 }
  0xee   :  { %v546_v29 = vmax.f32 %v244_v15, 0.0  ;;  %v548_v30 = vmax.f32 %v297_v16, 0.0  ;;  %v248_v31 = vadd.f32 %v247_v27, %v805_v23  ;;  %v301_v32 = vadd.f32 %v300_v28, %v805_v23 }
  0xef   :  { %602 = vst [vmem:[%s1040_s3 + $0xf0] sm:$0xff] %v545_v19  ;;  %604 = vst [vmem:[%s1040_s3 + $0x100] sm:$0xff] %v547_v20  ;;  %v559_v33 = vmax.f32 %v246_v25, 0.0  ;;  %v561_v34 = vmax.f32 %v299_v26, 0.0 }
  0xf0   :  { %603 = vst [vmem:[%s1040_s3 + $0xf8] sm:$0xff] %v546_v29  ;;  %605 = vst [vmem:[%s1040_s3 + $0x108] sm:$0xff] %v548_v30  ;;  %v560_v35 = vmax.f32 %v248_v31, 0.0  ;;  %v562_v36 = vmax.f32 %v301_v32, 0.0 }
  0xf1   :  { %616 = vst [vmem:[%s1040_s3 + $0x160] sm:$0xff] %v559_v33  ;;  %618 = vst [vmem:[%s1040_s3 + $0x170] sm:$0xff] %v561_v34 }
  0xf2   :  { %617 = vst [vmem:[%s1040_s3 + $0x168] sm:$0xff] %v560_v35  ;;  %619 = vst [vmem:[%s1040_s3 + $0x178] sm:$0xff] %v562_v36  ;;  %v337_v37 = vpop.f32.mrb[12].mxu1  ;;  %v390_v38 = vpop.f32.mrb[12].mxu0 }
  0xf3   :  { %v338_v39 = vadd.f32 %v337_v37, %v803_v22  ;;  %v391_v40 = vadd.f32 %v390_v38, %v803_v22  ;;  %v339_v41 = vpop.f32.mrb[13].mxu1  ;;  %v392_v42 = vpop.f32.mrb[13].mxu0 }
  0xf4   :  { %v340_v43 = vadd.f32 %v339_v41, %v803_v22  ;;  %v393_v44 = vadd.f32 %v392_v42, %v803_v22  ;;  %v341_v45 = vpop.f32.mrb[14].mxu1  ;;  %v394_v46 = vpop.f32.mrb[14].mxu0 }
  0xf5   :  { %v521_v47 = vmax.f32 %v338_v39, 0.0  ;;  %v523_v48 = vmax.f32 %v391_v40, 0.0  ;;  %v342_v49 = vadd.f32 %v341_v45, %v807_v24  ;;  %v395_v50 = vadd.f32 %v394_v46, %v807_v24  ;;  %v343_v51 = vpop.f32.mrb[15].mxu1  ;;  %v396_v52 = vpop.f32.mrb[15].mxu0 }
  0xf6   :  { %v522_v53 = vmax.f32 %v340_v43, 0.0  ;;  %v524_v54 = vmax.f32 %v393_v44, 0.0  ;;  %v344_v55 = vadd.f32 %v343_v51, %v807_v24  ;;  %v397_v56 = vadd.f32 %v396_v52, %v807_v24 }
  0xf7   :  { %577 = vst [vmem:[%s1040_s3 + $0x30] sm:$0xff] %v521_v47  ;;  %579 = vst [vmem:[%s1040_s3 + $0x40] sm:$0xff] %v523_v48  ;;  %v535_v57 = vmax.f32 %v342_v49, 0.0  ;;  %v537_v58 = vmax.f32 %v395_v50, 0.0 }
  0xf8   :  { %578 = vst [vmem:[%s1040_s3 + $0x38] sm:$0xff] %v522_v53  ;;  %580 = vst [vmem:[%s1040_s3 + $0x48] sm:$0xff] %v524_v54  ;;  %v536_v59 = vmax.f32 %v344_v55, 0.0  ;;  %v538_v60 = vmax.f32 %v397_v56, 0.0 }
  0xf9   :  { %592 = vst [vmem:[%s1040_s3 + $0xa0] sm:$0xff] %v535_v57  ;;  %594 = vst [vmem:[%s1040_s3 + $0xb0] sm:$0xff] %v537_v58 }
  0xfa   :  { %593 = vst [vmem:[%s1040_s3 + $0xa8] sm:$0xff] %v536_v59  ;;  %595 = vst [vmem:[%s1040_s3 + $0xb8] sm:$0xff] %v538_v60  ;;  %v347_v61 = vpop.f32.mrb[16].mxu1  ;;  %v400_v62 = vpop.f32.mrb[16].mxu0 }
  0xfb   :  { %v348_v63 = vadd.f32 %v347_v61, %v801_v21  ;;  %v401_v0 = vadd.f32 %v400_v62, %v801_v21  ;;  %v349_v1 = vpop.f32.mrb[17].mxu1  ;;  %v402_v2 = vpop.f32.mrb[17].mxu0 }
  0xfc   :  { %v350_v3 = vadd.f32 %v349_v1, %v801_v21  ;;  %v403_v4 = vadd.f32 %v402_v2, %v801_v21  ;;  %v351_v5 = vpop.f32.mrb[18].mxu1  ;;  %v404_v6 = vpop.f32.mrb[18].mxu0 }
  0xfd   :  { %v549_v7 = vmax.f32 %v348_v63, 0.0  ;;  %v551_v8 = vmax.f32 %v401_v0, 0.0  ;;  %v352_v9 = vadd.f32 %v351_v5, %v805_v23  ;;  %v405_v10 = vadd.f32 %v404_v6, %v805_v23  ;;  %v353_v11 = vpop.f32.mrb[19].mxu1  ;;  %v406_v12 = vpop.f32.mrb[19].mxu0 }
  0xfe   :  { %v550_v13 = vmax.f32 %v350_v3, 0.0  ;;  %v552_v14 = vmax.f32 %v403_v4, 0.0  ;;  %v354_v15 = vadd.f32 %v353_v11, %v805_v23  ;;  %v407_v16 = vadd.f32 %v406_v12, %v805_v23 }
  0xff   :  { %606 = vst [vmem:[%s1040_s3 + $0x110] sm:$0xff] %v549_v7  ;;  %608 = vst [vmem:[%s1040_s3 + $0x120] sm:$0xff] %v551_v8  ;;  %v563_v17 = vmax.f32 %v352_v9, 0.0  ;;  %v565_v18 = vmax.f32 %v405_v10, 0.0 }
 0x100   :  { %607 = vst [vmem:[%s1040_s3 + $0x118] sm:$0xff] %v550_v13  ;;  %609 = vst [vmem:[%s1040_s3 + $0x128] sm:$0xff] %v552_v14  ;;  %v564_v19 = vmax.f32 %v354_v15, 0.0  ;;  %v566_v20 = vmax.f32 %v407_v16, 0.0 }
 0x101   :  { %620 = vst [vmem:[%s1040_s3 + $0x180] sm:$0xff] %v563_v17  ;;  %622 = vst [vmem:[%s1040_s3 + $0x190] sm:$0xff] %v565_v18 }
 0x102   :  { %621 = vst [vmem:[%s1040_s3 + $0x188] sm:$0xff] %v564_v19  ;;  %623 = vst [vmem:[%s1040_s3 + $0x198] sm:$0xff] %v566_v20  ;;  %v443_v25 = vpop.f32.mrb[20].mxu1  ;;  %v496_v26 = vpop.f32.mrb[20].mxu0 }
 0x103   :  { %v444_v27 = vadd.f32 %v443_v25, %v803_v22  ;;  %v497_v28 = vadd.f32 %v496_v26, %v803_v22  ;;  %v445_v29 = vpop.f32.mrb[21].mxu1  ;;  %v498_v30 = vpop.f32.mrb[21].mxu0 }
 0x104   :  { %v446_v31 = vadd.f32 %v445_v29, %v803_v22  ;;  %v499_v32 = vadd.f32 %v498_v30, %v803_v22  ;;  %v447_v33 = vpop.f32.mrb[22].mxu1  ;;  %v500_v34 = vpop.f32.mrb[22].mxu0 }
 0x105   :  { %v525_v35 = vmax.f32 %v444_v27, 0.0  ;;  %v527_v36 = vmax.f32 %v497_v28, 0.0  ;;  %v448_v37 = vadd.f32 %v447_v33, %v807_v24  ;;  %v501_v38 = vadd.f32 %v500_v34, %v807_v24  ;;  %v449_v39 = vpop.f32.mrb[23].mxu1  ;;  %v502_v40 = vpop.f32.mrb[23].mxu0 }
 0x106   :  { %v526_v41 = vmax.f32 %v446_v31, 0.0  ;;  %v528_v42 = vmax.f32 %v499_v32, 0.0  ;;  %v450_v43 = vadd.f32 %v449_v39, %v807_v24  ;;  %v503_v44 = vadd.f32 %v502_v40, %v807_v24 }
 0x107   :  { %581 = vst [vmem:[%s1040_s3 + $0x50] sm:$0xff] %v525_v35  ;;  %583 = vst [vmem:[%s1040_s3 + $0x60] sm:$0xff] %v527_v36  ;;  %v539_v22 = vmax.f32 %v448_v37, 0.0  ;;  %v541_v45 = vmax.f32 %v501_v38, 0.0 }
 0x108   :  { %582 = vst [vmem:[%s1040_s3 + $0x58] sm:$0xff] %v526_v41  ;;  %585 = vst.msk [vmem:[%s1040_s3 + $0x68] sm:$0xff] %vm584_vm1, %v528_v42  ;;  %v540_v24 = vmax.f32 %v450_v43, 0.0  ;;  %v542_v46 = vmax.f32 %v503_v44, 0.0 }
 0x109   :  { %596 = vst [vmem:[%s1040_s3 + $0xc0] sm:$0xff] %v539_v22  ;;  %598 = vst [vmem:[%s1040_s3 + $0xd0] sm:$0xff] %v541_v45 }
 0x10a   :  { %597 = vst [vmem:[%s1040_s3 + $0xc8] sm:$0xff] %v540_v24  ;;  %599 = vst.msk [vmem:[%s1040_s3 + $0xd8] sm:$0xff] %vm584_vm1, %v542_v46  ;;  %v453_v47 = vpop.f32.mrb[24].mxu1  ;;  %v506_v48 = vpop.f32.mrb[24].mxu0 }
 0x10b   :  { %v454_v49 = vadd.f32 %v453_v47, %v801_v21  ;;  %v507_v50 = vadd.f32 %v506_v48, %v801_v21  ;;  %v455_v51 = vpop.f32.mrb[25].mxu1  ;;  %v508_v52 = vpop.f32.mrb[25].mxu0 }
 0x10c   :  { %v456_v53 = vadd.f32 %v455_v51, %v801_v21  ;;  %v509_v54 = vadd.f32 %v508_v52, %v801_v21  ;;  %v457_v55 = vpop.f32.mrb[26].mxu1  ;;  %v510_v56 = vpop.f32.mrb[26].mxu0 }
 0x10d   :  { %v553_v57 = vmax.f32 %v454_v49, 0.0  ;;  %v555_v58 = vmax.f32 %v507_v50, 0.0  ;;  %v458_v59 = vadd.f32 %v457_v55, %v805_v23  ;;  %v511_v60 = vadd.f32 %v510_v56, %v805_v23  ;;  %v459_v61 = vpop.f32.mrb[27].mxu1  ;;  %v512_v62 = vpop.f32.mrb[27].mxu0 }
 0x10e   :  { %v554_v63 = vmax.f32 %v456_v53, 0.0  ;;  %v556_v0 = vmax.f32 %v509_v54, 0.0  ;;  %v460_v1 = vadd.f32 %v459_v61, %v805_v23  ;;  %v513_v2 = vadd.f32 %v512_v62, %v805_v23 }
 0x10f   :  { %610 = vst [vmem:[%s1040_s3 + $0x130] sm:$0xff] %v553_v57  ;;  %612 = vst [vmem:[%s1040_s3 + $0x140] sm:$0xff] %v555_v58  ;;  %v567_v21 = vmax.f32 %v458_v59, 0.0  ;;  %v569_v3 = vmax.f32 %v511_v60, 0.0 }
 0x110   :  { %611 = vst [vmem:[%s1040_s3 + $0x138] sm:$0xff] %v554_v63  ;;  %613 = vst.msk [vmem:[%s1040_s3 + $0x148] sm:$0xff] %vm584_vm1, %v556_v0  ;;  %v568_v23 = vmax.f32 %v460_v1, 0.0  ;;  %v570_v4 = vmax.f32 %v513_v2, 0.0 }
 0x111   :  { %624 = vst [vmem:[%s1040_s3 + $0x1a0] sm:$0xff] %v567_v21  ;;  %626 = vst [vmem:[%s1040_s3 + $0x1b0] sm:$0xff] %v569_v3 }
 0x112   :  { %625 = vst [vmem:[%s1040_s3 + $0x1a8] sm:$0xff] %v568_v23  ;;  %627 = vst.msk [vmem:[%s1040_s3 + $0x1b8] sm:$0xff] %vm584_vm1, %v570_v4 }

// kernel: vae_forward.8
= control target key start
LH: loop header
LB: loop body
LE: loop exit
PB: predicated region body
PF: predicated region fallthrough
CT: control target
= control target key end

     0   :  { %v1478_v18 = vmov 0   ;;  %vm1085_vm0 = vcmask 64512   ;;  %s1971_s1 = inlined_call_operand.vmem [shape: bf16[512,392], index: 1, kind: input, shape index: {}]   ;;  %s1972_s0 = inlined_call_operand.vmem [shape: bf16[32,512], index: 0, kind: input, shape index: {}]   ;;  %s1973_s2 = inlined_call_operand.vmem [shape: f32[32,1], index: 2, kind: input, shape index: {}]   ;;  %s1974_s3 = inlined_call_operand.vmem [shape: f32[32,392], index: 3, kind: output, shape index: {}]  }
   0x1   :  { %v1274_v0 = vld [vmem:[%s1971_s1 + $0x4] ss:$16 sps:$4 sm:$0xff]   ;;  %v1276_v1 = vld [vmem:[%s1971_s1 + $0xc] ss:$16 sps:$4 sm:$0xff]   ;;  %v1278_v2 = vld [vmem:[%s1971_s1] ss:$16 sps:$4 sm:$0xff]   ;;  %1272 = vset.pattern.permute.xlu0 %v1478_v18  ;;  %1273 = vset.pattern.permute.xlu1 %v1478_v18 }
   0x2   :  { %854 = vmatprep.subr.bf16.mxu0 %v1274_v0  ;;  %v1279_v3 = vld [vmem:[%s1971_s1 + $0x8] ss:$16 sps:$4 sm:$0xff]   ;;  %960 = vmatprep.subr.bf16.mxu1 %v1276_v1  ;;  %v1280_v4 = vld [vmem:[%s1971_s1 + $0x24] ss:$16 sps:$4 sm:$0xff]   ;;  %v1282_v5 = vld [vmem:[%s1971_s1 + $0x2c] ss:$16 sps:$4 sm:$0xff]  }
   0x3   :  { %855 = vmatpush1.bf16.msra.mxu0 %v1278_v2  ;;  %961 = vmatpush1.bf16.msra.mxu1 %v1279_v3  ;;  %v1284_v6 = vld [vmem:[%s1971_s1 + $0x20] ss:$16 sps:$4 sm:$0xff]   ;;  %v1285_v7 = vld [vmem:[%s1971_s1 + $0x28] ss:$16 sps:$4 sm:$0xff]   ;;  %v1286_v8 = vld [vmem:[%s1971_s1 + $0x44] ss:$16 sps:$4 sm:$0xff]  }
   0x4   :  { %856 = vmatprep.subr.bf16.mxu0 %v1280_v4  ;;  %962 = vmatprep.subr.bf16.mxu1 %v1282_v5  ;;  %v1288_v9 = vld [vmem:[%s1971_s1 + $0x4c] ss:$16 sps:$4 sm:$0xff]   ;;  %v1290_v10 = vld [vmem:[%s1971_s1 + $0x40] ss:$16 sps:$4 sm:$0xff]   ;;  %v1291_v11 = vld [vmem:[%s1971_s1 + $0x48] ss:$16 sps:$4 sm:$0xff]  }
   0x5   :  { %v1292_v12 = vld [vmem:[%s1971_s1 + $0x64] ss:$16 sps:$4 sm:$0xff]   ;;  %v1294_v13 = vld [vmem:[%s1971_s1 + $0x6c] ss:$16 sps:$4 sm:$0xff]   ;;  %v1296_v14 = vld [vmem:[%s1971_s1 + $0x60] ss:$16 sps:$4 sm:$0xff]  }
   0x6   :  { %v1297_v15 = vld [vmem:[%s1971_s1 + $0x68] ss:$16 sps:$4 sm:$0xff]   ;;  %v1298_v16 = vld [vmem:[%s1971_s1 + $0x84] ss:$16 sps:$4 sm:$0xff]   ;;  %v1300_v17 = vld [vmem:[%s1971_s1 + $0x8c] ss:$16 sps:$4 sm:$0xff]  }
   0x7   :  { %857 = vmatpush1.bf16.msra.mxu0 %v1284_v6  ;;  %963 = vmatpush1.bf16.msra.mxu1 %v1285_v7  ;;  %v1302_v19 = vld [vmem:[%s1971_s1 + $0x80] ss:$16 sps:$4 sm:$0xff]   ;;  %v1303_v20 = vld [vmem:[%s1971_s1 + $0x88] ss:$16 sps:$4 sm:$0xff]   ;;  %v1304_v21 = vld [vmem:[%s1971_s1 + $0xa4] ss:$16 sps:$4 sm:$0xff]  }
   0x8   :  { %858 = vmatprep.subr.bf16.mxu0 %v1286_v8  ;;  %964 = vmatprep.subr.bf16.mxu1 %v1288_v9  ;;  %v1306_v22 = vld [vmem:[%s1971_s1 + $0xac] ss:$16 sps:$4 sm:$0xff]   ;;  %v1308_v23 = vld [vmem:[%s1971_s1 + $0xa0] ss:$16 sps:$4 sm:$0xff]   ;;  %v1309_v24 = vld [vmem:[%s1971_s1 + $0xa8] ss:$16 sps:$4 sm:$0xff]  }
   0x9   :  { %v1310_v25 = vld [vmem:[%s1971_s1 + $0xc4] ss:$16 sps:$4 sm:$0xff]   ;;  %v1312_v26 = vld [vmem:[%s1971_s1 + $0xcc] ss:$16 sps:$4 sm:$0xff]   ;;  %v1314_v27 = vld [vmem:[%s1971_s1 + $0xc0] ss:$16 sps:$4 sm:$0xff]  }
   0xa   :  { %v1315_v28 = vld [vmem:[%s1971_s1 + $0xc8] ss:$16 sps:$4 sm:$0xff]   ;;  %v1316_v29 = vld [vmem:[%s1971_s1 + $0xe4] ss:$16 sps:$4 sm:$0xff]   ;;  %v1318_v30 = vld [vmem:[%s1971_s1 + $0xec] ss:$16 sps:$4 sm:$0xff]  }
   0xb   :  { %859 = vmatpush1.bf16.msra.mxu0 %v1290_v10  ;;  %965 = vmatpush1.bf16.msra.mxu1 %v1291_v11  ;;  %v1320_v31 = vld [vmem:[%s1971_s1 + $0xe0] ss:$16 sps:$4 sm:$0xff]   ;;  %v1321_v32 = vld [vmem:[%s1971_s1 + $0xe8] ss:$16 sps:$4 sm:$0xff]   ;;  %v1322_v33 = vld [vmem:[%s1971_s1 + $0x104] ss:$16 sps:$4 sm:$0xff]  }
   0xc   :  { %860 = vmatprep.subr.bf16.mxu0 %v1292_v12  ;;  %966 = vmatprep.subr.bf16.mxu1 %v1294_v13  ;;  %v1324_v34 = vld [vmem:[%s1971_s1 + $0x10c] ss:$16 sps:$4 sm:$0xff]   ;;  %v1326_v35 = vld [vmem:[%s1971_s1 + $0x100] ss:$16 sps:$4 sm:$0xff]   ;;  %v1327_v36 = vld [vmem:[%s1971_s1 + $0x108] ss:$16 sps:$4 sm:$0xff]  }
   0xd   :  { %v1328_v37 = vld [vmem:[%s1971_s1 + $0x124] ss:$16 sps:$4 sm:$0xff]   ;;  %v1330_v38 = vld [vmem:[%s1971_s1 + $0x12c] ss:$16 sps:$4 sm:$0xff]   ;;  %v1332_v39 = vld [vmem:[%s1971_s1 + $0x120] ss:$16 sps:$4 sm:$0xff]  }
   0xe   :  { %v1333_v40 = vld [vmem:[%s1971_s1 + $0x128] ss:$16 sps:$4 sm:$0xff]   ;;  %v1334_v41 = vld [vmem:[%s1971_s1 + $0x144] ss:$16 sps:$4 sm:$0xff]   ;;  %v1336_v42 = vld [vmem:[%s1971_s1 + $0x14c] ss:$16 sps:$4 sm:$0xff]  }
   0xf   :  { %861 = vmatpush1.bf16.msra.mxu0 %v1296_v14  ;;  %967 = vmatpush1.bf16.msra.mxu1 %v1297_v15  ;;  %v1338_v43 = vld [vmem:[%s1971_s1 + $0x140] ss:$16 sps:$4 sm:$0xff]   ;;  %v1339_v44 = vld [vmem:[%s1971_s1 + $0x148] ss:$16 sps:$4 sm:$0xff]   ;;  %v1340_v45 = vld [vmem:[%s1971_s1 + $0x164] ss:$16 sps:$4 sm:$0xff]  }
  0x10   :  { %862 = vmatprep.subr.bf16.mxu0 %v1298_v16  ;;  %968 = vmatprep.subr.bf16.mxu1 %v1300_v17  ;;  %v1342_v46 = vld [vmem:[%s1971_s1 + $0x16c] ss:$16 sps:$4 sm:$0xff]   ;;  %v1344_v47 = vld [vmem:[%s1971_s1 + $0x160] ss:$16 sps:$4 sm:$0xff]   ;;  %v1345_v48 = vld [vmem:[%s1971_s1 + $0x168] ss:$16 sps:$4 sm:$0xff]  }
  0x11   :  { %v1372_v49 = vld [vmem:[%s1972_s0 + $0x4] ss:$16 sps:$4 sm:$0xff]   ;;  %v1348_v51 = vld [vmem:[%s1971_s1 + $0x18c] ss:$16 sps:$4 sm:$0xff]   ;;  %v1350_v52 = vld [vmem:[%s1971_s1 + $0x180] ss:$16 sps:$4 sm:$0xff]  }
  0x12   :  { %v1346_v50 = vld [vmem:[%s1971_s1 + $0x184] ss:$16 sps:$4 sm:$0xff]   ;;  %886 = vmatprep.mubr.bf16.mxu0 %v1372_v49  ;;  %992 = vmatprep.mubr.bf16.mxu1 %v1372_v49  ;;  %v1351_v53 = vld [vmem:[%s1971_s1 + $0x188] ss:$16 sps:$4 sm:$0xff]   ;;  %v1354_v55 = vld [vmem:[%s1971_s1 + $0x1ac] ss:$16 sps:$4 sm:$0xff]  }
  0x13   :  { %863 = vmatpush1.bf16.msra.mxu0 %v1302_v19  ;;  %969 = vmatpush1.bf16.msra.mxu1 %v1303_v20  ;;  %v1352_v54 = vld [vmem:[%s1971_s1 + $0x1a4] ss:$16 sps:$4 sm:$0xff]   ;;  %v1356_v56 = vld [vmem:[%s1971_s1 + $0x1a0] ss:$16 sps:$4 sm:$0xff]   ;;  %v1357_v57 = vld [vmem:[%s1971_s1 + $0x1a8] ss:$16 sps:$4 sm:$0xff]  }
  0x14   :  { %864 = vmatprep.subr.bf16.mxu0 %v1304_v21  ;;  %970 = vmatprep.subr.bf16.mxu1 %v1306_v22  ;;  %v1358_v58 = vld [vmem:[%s1971_s1 + $0x1c4] ss:$16 sps:$4 sm:$0xff]   ;;  %v1360_v59 = vld [vmem:[%s1971_s1 + $0x1cc] ss:$16 sps:$4 sm:$0xff]   ;;  %v1362_v60 = vld [vmem:[%s1971_s1 + $0x1c0] ss:$16 sps:$4 sm:$0xff]  }
  0x15   :  { %v1363_v61 = vld [vmem:[%s1971_s1 + $0x1c8] ss:$16 sps:$4 sm:$0xff]   ;;  %v1364_v62 = vld [vmem:[%s1971_s1 + $0x1e4] ss:$16 sps:$4 sm:$0xff]   ;;  %v1366_v63 = vld [vmem:[%s1971_s1 + $0x1ec] ss:$16 sps:$4 sm:$0xff]  }
  0x16   :  { %v1368_v0 = vld [vmem:[%s1971_s1 + $0x1e0] ss:$16 sps:$4 sm:$0xff]   ;;  %v1369_v1 = vld [vmem:[%s1971_s1 + $0x1e8] ss:$16 sps:$4 sm:$0xff]   ;;  %v1375_v2 = vld [vmem:[%s1971_s1 + $0x204] ss:$16 sps:$4 sm:$0xff]  }
  0x17   :  { %865 = vmatpush1.bf16.msra.mxu0 %v1308_v23  ;;  %971 = vmatpush1.bf16.msra.mxu1 %v1309_v24  ;;  %v1378_v3 = vld [vmem:[%s1971_s1 + $0x20c] ss:$16 sps:$4 sm:$0xff]   ;;  %v1370_v4 = vld [vmem:[%s1972_s0] ss:$16 sps:$4 sm:$0xff]   ;;  %v1376_v6 = vld [vmem:[%s1971_s1 + $0x208] ss:$16 sps:$4 sm:$0xff]  }
  0x18   :  { %866 = vmatprep.subr.bf16.mxu0 %v1310_v25  ;;  %972 = vmatprep.subr.bf16.mxu1 %v1312_v26  ;;  %v1373_v5 = vld [vmem:[%s1971_s1 + $0x200] ss:$16 sps:$4 sm:$0xff]   ;;  %v1381_v7 = vld [vmem:[%s1971_s1 + $0x224] ss:$16 sps:$4 sm:$0xff]   ;;  %v1384_v8 = vld [vmem:[%s1971_s1 + $0x22c] ss:$16 sps:$4 sm:$0xff]  }
  0x19   :  { %v1379_v9 = vld [vmem:[%s1971_s1 + $0x220] ss:$16 sps:$4 sm:$0xff]   ;;  %v1382_v10 = vld [vmem:[%s1971_s1 + $0x228] ss:$16 sps:$4 sm:$0xff]   ;;  %v1387_v11 = vld [vmem:[%s1971_s1 + $0x244] ss:$16 sps:$4 sm:$0xff]  }
  0x1a   :  { %v1390_v12 = vld [vmem:[%s1971_s1 + $0x24c] ss:$16 sps:$4 sm:$0xff]   ;;  %v1385_v13 = vld [vmem:[%s1971_s1 + $0x240] ss:$16 sps:$4 sm:$0xff]   ;;  %v1388_v14 = vld [vmem:[%s1971_s1 + $0x248] ss:$16 sps:$4 sm:$0xff]  }
  0x1b   :  { %867 = vmatpush1.bf16.msra.mxu0 %v1314_v27  ;;  %973 = vmatpush1.bf16.msra.mxu1 %v1315_v28  ;;  %v1393_v15 = vld [vmem:[%s1971_s1 + $0x264] ss:$16 sps:$4 sm:$0xff]   ;;  %v1396_v16 = vld [vmem:[%s1971_s1 + $0x26c] ss:$16 sps:$4 sm:$0xff]   ;;  %v1391_v17 = vld [vmem:[%s1971_s1 + $0x260] ss:$16 sps:$4 sm:$0xff]  }
  0x1c   :  { %868 = vmatprep.subr.bf16.mxu0 %v1316_v29  ;;  %974 = vmatprep.subr.bf16.mxu1 %v1318_v30  ;;  %v1394_v18 = vld [vmem:[%s1971_s1 + $0x268] ss:$16 sps:$4 sm:$0xff]   ;;  %v1399_v19 = vld [vmem:[%s1971_s1 + $0x284] ss:$16 sps:$4 sm:$0xff]   ;;  %v1402_v20 = vld [vmem:[%s1971_s1 + $0x28c] ss:$16 sps:$4 sm:$0xff]  }
  0x1d   :  { %v1397_v21 = vld [vmem:[%s1971_s1 + $0x280] ss:$16 sps:$4 sm:$0xff]   ;;  %v1400_v22 = vld [vmem:[%s1971_s1 + $0x288] ss:$16 sps:$4 sm:$0xff]   ;;  %v1405_v23 = vld [vmem:[%s1971_s1 + $0x2a4] ss:$16 sps:$4 sm:$0xff]  }
  0x1e   :  { %v1408_v24 = vld [vmem:[%s1971_s1 + $0x2ac] ss:$16 sps:$4 sm:$0xff]   ;;  %v1403_v25 = vld [vmem:[%s1971_s1 + $0x2a0] ss:$16 sps:$4 sm:$0xff]   ;;  %v1457_v26 = vld [vmem:[%s1972_s0 + $0x24] ss:$16 sps:$4 sm:$0xff]  }
  0x1f   :  { %869 = vmatpush1.bf16.msra.mxu0 %v1320_v31  ;;  %975 = vmatpush1.bf16.msra.mxu1 %v1321_v32  ;;  %v1406_v27 = vld [vmem:[%s1971_s1 + $0x2a8] ss:$16 sps:$4 sm:$0xff]   ;;  %v1459_v28 = vld [vmem:[%s1972_s0 + $0x20] ss:$16 sps:$4 sm:$0xff]   ;;  %v1411_v29 = vld [vmem:[%s1971_s1 + $0x2c4] ss:$16 sps:$4 sm:$0xff]  }
  0x20   :  { %870 = vmatprep.subr.bf16.mxu0 %v1322_v33  ;;  %976 = vmatprep.subr.bf16.mxu1 %v1324_v34  ;;  %v1414_v30 = vld [vmem:[%s1971_s1 + $0x2cc] ss:$16 sps:$4 sm:$0xff]   ;;  %v1409_v31 = vld [vmem:[%s1971_s1 + $0x2c0] ss:$16 sps:$4 sm:$0xff]   ;;  %v1412_v32 = vld [vmem:[%s1971_s1 + $0x2c8] ss:$16 sps:$4 sm:$0xff]  }
  0x21   :  { %v1417_v33 = vld [vmem:[%s1971_s1 + $0x2e4] ss:$16 sps:$4 sm:$0xff]   ;;  %v1420_v34 = vld [vmem:[%s1971_s1 + $0x2ec] ss:$16 sps:$4 sm:$0xff]   ;;  %v1430_v49 = vld [vmem:[%s1971_s1 + $0x328] ss:$16 sps:$4 sm:$0xff]  }
  0x23   :  { %871 = vmatpush1.bf16.msra.mxu0 %v1326_v35  ;;  %977 = vmatpush1.bf16.msra.mxu1 %v1327_v36  ;;  %v1474_v35 = vld [vmem:[%s1972_s0 + $0xc] ss:$16 sps:$4 sm:$0xff]   ;;  %v150_v36 = vld [vmem:[%s1973_s2] sm:$0xff] }
  0x24   :  { %872 = vmatprep.subr.bf16.mxu0 %v1328_v37  ;;  %978 = vmatprep.subr.bf16.mxu1 %v1330_v38  ;;  %v152_v37 = vld [vmem:[%s1973_s2 + $0x10] sm:$0xff] }
  0x25   :  { %v1415_v38 = vld [vmem:[%s1971_s1 + $0x2e0] ss:$16 sps:$4 sm:$0xff]   ;;  %156 = vperm.xlu0 %1272, %v150_v36   ;;  %166 = vperm.xlu1 %1273, %v152_v37  }
  0x27   :  { %873 = vmatpush1.bf16.msra.mxu0 %v1332_v39  ;;  %979 = vmatpush1.bf16.msra.mxu1 %v1333_v40  ;;  %v1418_v39 = vld [vmem:[%s1971_s1 + $0x2e8] ss:$16 sps:$4 sm:$0xff]   ;;  %v1423_v40 = vld [vmem:[%s1971_s1 + $0x304] ss:$16 sps:$4 sm:$0xff]  }
  0x28   :  { %874 = vmatprep.subr.bf16.mxu0 %v1334_v41  ;;  %980 = vmatprep.subr.bf16.mxu1 %v1336_v42  ;;  %v1426_v41 = vld [vmem:[%s1971_s1 + $0x30c] ss:$16 sps:$4 sm:$0xff]  }
  0x29   :  { %v151_v42 = vld [vmem:[%s1973_s2 + $0x8] sm:$0xff] }
  0x2a   :  { %161 = vperm.xlu0 %1272, %v151_v42  }
  0x2b   :  { %875 = vmatpush1.bf16.msra.mxu0 %v1338_v43  ;;  %981 = vmatpush1.bf16.msra.mxu1 %v1339_v44  ;;  %v153_v43 = vld [vmem:[%s1973_s2 + $0x18] sm:$0xff]  ;;  %v1421_v44 = vld [vmem:[%s1971_s1 + $0x300] ss:$16 sps:$4 sm:$0xff]  }
  0x2c   :  { %876 = vmatprep.subr.bf16.mxu0 %v1340_v45  ;;  %982 = vmatprep.subr.bf16.mxu1 %v1342_v46  ;;  %v1424_v45 = vld [vmem:[%s1971_s1 + $0x308] ss:$16 sps:$4 sm:$0xff]   ;;  %v1429_v46 = vld [vmem:[%s1971_s1 + $0x324] ss:$16 sps:$4 sm:$0xff]  }
  0x2d   :  { %171 = vperm.xlu1 %1273, %v153_v43  }
  0x2f   :  { %877 = vmatpush1.bf16.msra.mxu0 %v1344_v47  ;;  %983 = vmatpush1.bf16.msra.mxu1 %v1345_v48  ;;  %v1432_v47 = vld [vmem:[%s1971_s1 + $0x32c] ss:$16 sps:$4 sm:$0xff]   ;;  %v1427_v48 = vld [vmem:[%s1971_s1 + $0x320] ss:$16 sps:$4 sm:$0xff]  }
  0x30   :  { %878 = vmatprep.subr.bf16.mxu0 %v1346_v50  ;;  %984 = vmatprep.subr.bf16.mxu1 %v1348_v51  ;;  %v1435_v50 = vld [vmem:[%s1971_s1 + $0x344] ss:$16 sps:$4 sm:$0xff]   ;;  %v1438_v51 = vld [vmem:[%s1971_s1 + $0x34c] ss:$16 sps:$4 sm:$0xff]  }
  0x33   :  { %879 = vmatpush1.bf16.msra.mxu0 %v1350_v52  ;;  %985 = vmatpush1.bf16.msra.mxu1 %v1351_v53  ;;  %v1433_v52 = vld [vmem:[%s1971_s1 + $0x340] ss:$16 sps:$4 sm:$0xff]   ;;  %v1436_v53 = vld [vmem:[%s1971_s1 + $0x348] ss:$16 sps:$4 sm:$0xff]  }
  0x34   :  { %880 = vmatprep.subr.bf16.mxu0 %v1352_v54  ;;  %986 = vmatprep.subr.bf16.mxu1 %v1354_v55  ;;  %v1441_v54 = vld [vmem:[%s1971_s1 + $0x364] ss:$16 sps:$4 sm:$0xff]   ;;  %v1444_v55 = vld [vmem:[%s1971_s1 + $0x36c] ss:$16 sps:$4 sm:$0xff]  }
  0x37   :  { %881 = vmatpush1.bf16.msra.mxu0 %v1356_v56  ;;  %987 = vmatpush1.bf16.msra.mxu1 %v1357_v57  ;;  %v1439_v56 = vld [vmem:[%s1971_s1 + $0x360] ss:$16 sps:$4 sm:$0xff]   ;;  %v1442_v57 = vld [vmem:[%s1971_s1 + $0x368] ss:$16 sps:$4 sm:$0xff]  }
  0x38   :  { %882 = vmatprep.subr.bf16.mxu0 %v1358_v58  ;;  %988 = vmatprep.subr.bf16.mxu1 %v1360_v59  ;;  %v1447_v58 = vld [vmem:[%s1971_s1 + $0x384] ss:$16 sps:$4 sm:$0xff]   ;;  %v1450_v59 = vld [vmem:[%s1971_s1 + $0x38c] ss:$16 sps:$4 sm:$0xff]  }
  0x3b   :  { %883 = vmatpush1.bf16.msra.mxu0 %v1362_v60  ;;  %989 = vmatpush1.bf16.msra.mxu1 %v1363_v61  ;;  %v1445_v60 = vld [vmem:[%s1971_s1 + $0x380] ss:$16 sps:$4 sm:$0xff]   ;;  %v1448_v61 = vld [vmem:[%s1971_s1 + $0x388] ss:$16 sps:$4 sm:$0xff]  }
  0x3c   :  { %884 = vmatprep.subr.bf16.mxu0 %v1364_v62  ;;  %990 = vmatprep.subr.bf16.mxu1 %v1366_v63  ;;  %v1453_v62 = vld [vmem:[%s1971_s1 + $0x3a4] ss:$16 sps:$4 sm:$0xff]   ;;  %v1456_v63 = vld [vmem:[%s1971_s1 + $0x3ac] ss:$16 sps:$4 sm:$0xff]  }
  0x3f   :  { %885 = vmatpush1.bf16.msra.mxu0 %v1368_v0  ;;  %991 = vmatpush1.bf16.msra.mxu1 %v1369_v1  ;;  %v1451_v0 = vld [vmem:[%s1971_s1 + $0x3a0] ss:$16 sps:$4 sm:$0xff]   ;;  %v1454_v1 = vld [vmem:[%s1971_s1 + $0x3a8] ss:$16 sps:$4 sm:$0xff]  }
  0x40   :  { %907 = vmatprep.subr.bf16.mxu0 %v1375_v2  ;;  %1013 = vmatprep.subr.bf16.mxu1 %v1378_v3  ;;  %v1462_v2 = vld [vmem:[%s1971_s1 + $0x3c4] ss:$16 sps:$4 sm:$0xff]   ;;  %v1465_v3 = vld [vmem:[%s1971_s1 + $0x3cc] ss:$16 sps:$4 sm:$0xff]  }
  0x42   :  { %887 = vmatmul.mubr.bf16.vlgmr.msra.gmra.mrb[0].mxu0 %v1370_v4  ;;  %993 = vmatmul.mubr.bf16.vlgmr.msra.gmra.mrb[0].mxu1 %v1370_v4  ;;  %v1460_v4 = vld [vmem:[%s1971_s1 + $0x3c0] ss:$16 sps:$4 sm:$0xff]  }
  0x43   :  { %908 = vmatpush1.bf16.msra.mxu0 %v1373_v5  ;;  %1014 = vmatpush1.bf16.msra.mxu1 %v1376_v6  ;;  %v1463_v5 = vld [vmem:[%s1971_s1 + $0x3c8] ss:$16 sps:$4 sm:$0xff]   ;;  %v1468_v6 = vld [vmem:[%s1971_s1 + $0x3e4] ss:$16 sps:$4 sm:$0xff]  }
  0x44   :  { %909 = vmatprep.subr.bf16.mxu0 %v1381_v7  ;;  %1015 = vmatprep.subr.bf16.mxu1 %v1384_v8  ;;  %v1471_v7 = vld [vmem:[%s1971_s1 + $0x3ec] ss:$16 sps:$4 sm:$0xff]   ;;  %v1466_v8 = vld [vmem:[%s1971_s1 + $0x3e0] ss:$16 sps:$4 sm:$0xff]  }
  0x45   :  { %896 = vmatprep.mubr.bf16.mxu0 %v1457_v26  ;;  %1002 = vmatprep.mubr.bf16.mxu1 %v1457_v26 }
  0x47   :  { %910 = vmatpush1.bf16.msra.mxu0 %v1379_v9  ;;  %1016 = vmatpush1.bf16.msra.mxu1 %v1382_v10  ;;  %v1469_v9 = vld [vmem:[%s1971_s1 + $0x3e8] ss:$16 sps:$4 sm:$0xff]  }
  0x48   :  { %911 = vmatprep.subr.bf16.mxu0 %v1387_v11  ;;  %1017 = vmatprep.subr.bf16.mxu1 %v1390_v12  ;;  %v1472_v10 = vld [vmem:[%s1972_s0 + $0x8] ss:$16 sps:$4 sm:$0xff]   ;;  %v1475_v11 = vld [vmem:[%s1972_s0 + $0x2c] ss:$16 sps:$4 sm:$0xff]  }
  0x49   :  { %v1477_v12 = vld [vmem:[%s1972_s0 + $0x28] ss:$16 sps:$4 sm:$0xff]  }
  0x4a   :  { %897 = vmatmul.mubr.bf16.gmra.mrb[4].mxu0 %v1459_v28  ;;  %1003 = vmatmul.mubr.bf16.gmra.mrb[4].mxu1 %v1459_v28 }
  0x4b   :  { %912 = vmatpush1.bf16.msra.mxu0 %v1385_v13  ;;  %1018 = vmatpush1.bf16.msra.mxu1 %v1388_v14 }
  0x4c   :  { %913 = vmatprep.subr.bf16.mxu0 %v1393_v15  ;;  %1019 = vmatprep.subr.bf16.mxu1 %v1396_v16 }
  0x4d   :  { %939 = vmatprep.mubr.bf16.mxu0 %v1474_v35  ;;  %1045 = vmatprep.mubr.bf16.mxu1 %v1474_v35 }
  0x4f   :  { %914 = vmatpush1.bf16.msra.mxu0 %v1391_v17  ;;  %1020 = vmatpush1.bf16.msra.mxu1 %v1394_v18 }
  0x50   :  { %915 = vmatprep.subr.bf16.mxu0 %v1399_v19  ;;  %1021 = vmatprep.subr.bf16.mxu1 %v1402_v20 }
  0x53   :  { %916 = vmatpush1.bf16.msra.mxu0 %v1397_v21  ;;  %1022 = vmatpush1.bf16.msra.mxu1 %v1400_v22 }
  0x54   :  { %917 = vmatprep.subr.bf16.mxu0 %v1405_v23  ;;  %1023 = vmatprep.subr.bf16.mxu1 %v1408_v24 }
  0x57   :  { %918 = vmatpush1.bf16.msra.mxu0 %v1403_v25  ;;  %1024 = vmatpush1.bf16.msra.mxu1 %v1406_v27 }
  0x58   :  { %919 = vmatprep.subr.bf16.mxu0 %v1411_v29  ;;  %1025 = vmatprep.subr.bf16.mxu1 %v1414_v30 }
  0x5b   :  { %920 = vmatpush1.bf16.msra.mxu0 %v1409_v31  ;;  %1026 = vmatpush1.bf16.msra.mxu1 %v1412_v32 }
  0x5c   :  { %921 = vmatprep.subr.bf16.mxu0 %v1417_v33  ;;  %1027 = vmatprep.subr.bf16.mxu1 %v1420_v34 }
  0x5f   :  { %922 = vmatpush1.bf16.msra.mxu0 %v1415_v38  ;;  %1028 = vmatpush1.bf16.msra.mxu1 %v1418_v39 }
  0x60   :  { %923 = vmatprep.subr.bf16.mxu0 %v1423_v40  ;;  %1029 = vmatprep.subr.bf16.mxu1 %v1426_v41 }
  0x63   :  { %924 = vmatpush1.bf16.msra.mxu0 %v1421_v44  ;;  %1030 = vmatpush1.bf16.msra.mxu1 %v1424_v45 }
  0x64   :  { %925 = vmatprep.subr.bf16.mxu0 %v1429_v46  ;;  %1031 = vmatprep.subr.bf16.mxu1 %v1432_v47 }
  0x67   :  { %926 = vmatpush1.bf16.msra.mxu0 %v1427_v48  ;;  %1032 = vmatpush1.bf16.msra.mxu1 %v1430_v49 }
  0x68   :  { %927 = vmatprep.subr.bf16.mxu0 %v1435_v50  ;;  %1033 = vmatprep.subr.bf16.mxu1 %v1438_v51 }
  0x6b   :  { %928 = vmatpush1.bf16.msra.mxu0 %v1433_v52  ;;  %1034 = vmatpush1.bf16.msra.mxu1 %v1436_v53 }
  0x6c   :  { %929 = vmatprep.subr.bf16.mxu0 %v1441_v54  ;;  %1035 = vmatprep.subr.bf16.mxu1 %v1444_v55 }
  0x6f   :  { %930 = vmatpush1.bf16.msra.mxu0 %v1439_v56  ;;  %1036 = vmatpush1.bf16.msra.mxu1 %v1442_v57 }
  0x70   :  { %931 = vmatprep.subr.bf16.mxu0 %v1447_v58  ;;  %1037 = vmatprep.subr.bf16.mxu1 %v1450_v59 }
  0x73   :  { %932 = vmatpush1.bf16.msra.mxu0 %v1445_v60  ;;  %1038 = vmatpush1.bf16.msra.mxu1 %v1448_v61 }
  0x74   :  { %933 = vmatprep.subr.bf16.mxu0 %v1453_v62  ;;  %1039 = vmatprep.subr.bf16.mxu1 %v1456_v63 }
  0x77   :  { %934 = vmatpush1.bf16.msra.mxu0 %v1451_v0  ;;  %1040 = vmatpush1.bf16.msra.mxu1 %v1454_v1 }
  0x78   :  { %935 = vmatprep.subr.bf16.mxu0 %v1462_v2  ;;  %1041 = vmatprep.subr.bf16.mxu1 %v1465_v3 }
  0x7b   :  { %936 = vmatpush1.bf16.msra.mxu0 %v1460_v4  ;;  %1042 = vmatpush1.bf16.msra.mxu1 %v1463_v5 }
  0x7c   :  { %937 = vmatprep.subr.bf16.mxu0 %v1468_v6  ;;  %1043 = vmatprep.subr.bf16.mxu1 %v1471_v7 }
  0x7f   :  { %938 = vmatpush1.bf16.msra.mxu0 %v1466_v8  ;;  %1044 = vmatpush1.bf16.msra.mxu1 %v1469_v9 }
  0x82   :  { %940 = vmatmul.mubr.bf16.vlgmr.msra.gmra.mrb[0].mxu0 %v1472_v10  ;;  %1046 = vmatmul.mubr.bf16.vlgmr.msra.gmra.mrb[0].mxu1 %v1472_v10 }
  0x83   :  { %949 = vmatprep.mubr.bf16.mxu0 %v1475_v11  ;;  %1055 = vmatprep.mubr.bf16.mxu1 %v1475_v11 }
  0x8a   :  { %950 = vmatmul.mubr.bf16.gmra.mrb[4].mxu0 %v1477_v12  ;;  %1056 = vmatmul.mubr.bf16.gmra.mrb[4].mxu1 %v1477_v12 }
  0xa4   :  { %v157_v13 = vpop.permute.xlu0 %156  ;;  %v167_v15 = vpop.permute.xlu1 %166 }
  0xa9   :  { %v162_v14 = vpop.permute.xlu0 %161 }
  0xac   :  { %v172_v40 = vpop.permute.xlu1 %171 }
 0x155   :  { %v941_v16 = vpop.f32.mrb[0].mxu0  ;;  %v1047_v17 = vpop.f32.mrb[0].mxu1 }
 0x156   :  { %v1239_v18 = vadd.f32 %v941_v16, %v157_v13  ;;  %v1247_v19 = vadd.f32 %v1047_v17, %v157_v13  ;;  %v943_v20 = vpop.f32.mrb[1].mxu0  ;;  %v1049_v21 = vpop.f32.mrb[1].mxu1 }
 0x157   :  { %v1240_v22 = vadd.f32 %v943_v20, %v157_v13  ;;  %v1248_v23 = vadd.f32 %v1049_v21, %v157_v13  ;;  %v945_v24 = vpop.f32.mrb[2].mxu0  ;;  %v1051_v25 = vpop.f32.mrb[2].mxu1 }
 0x158   :  { %v1066_v26 = vmax.f32 %v1239_v18, 0.0  ;;  %v1068_v27 = vmax.f32 %v1247_v19, 0.0  ;;  %v1241_v28 = vadd.f32 %v945_v24, %v162_v14  ;;  %v1249_v29 = vadd.f32 %v1051_v25, %v162_v14  ;;  %v947_v30 = vpop.f32.mrb[3].mxu0  ;;  %v1053_v31 = vpop.f32.mrb[3].mxu1 }
 0x159   :  { %v1067_v32 = vmax.f32 %v1240_v22, 0.0  ;;  %v1069_v33 = vmax.f32 %v1248_v23, 0.0  ;;  %v1242_v34 = vadd.f32 %v947_v30, %v162_v14  ;;  %v1250_v35 = vadd.f32 %v1053_v31, %v162_v14 }
 0x15a   :  { %1082 = vst [vmem:[%s1974_s3] sm:$0xff] %v1066_v26  ;;  %1084 = vst [vmem:[%s1974_s3 + $0x10] sm:$0xff] %v1068_v27  ;;  %v1070_v36 = vmax.f32 %v1241_v28, 0.0  ;;  %v1072_v37 = vmax.f32 %v1249_v29, 0.0 }
 0x15b   :  { %1083 = vst [vmem:[%s1974_s3 + $0x8] sm:$0xff] %v1067_v32  ;;  %1086 = vst.msk [vmem:[%s1974_s3 + $0x18] sm:$0xff] %vm1085_vm0, %v1069_v33  ;;  %v1071_v38 = vmax.f32 %v1242_v34, 0.0  ;;  %v1073_v39 = vmax.f32 %v1250_v35, 0.0 }
 0x15c   :  { %1087 = vst [vmem:[%s1974_s3 + $0x20] sm:$0xff] %v1070_v36  ;;  %1089 = vst [vmem:[%s1974_s3 + $0x30] sm:$0xff] %v1072_v37 }
 0x15d   :  { %1088 = vst [vmem:[%s1974_s3 + $0x28] sm:$0xff] %v1071_v38  ;;  %1090 = vst.msk [vmem:[%s1974_s3 + $0x38] sm:$0xff] %vm1085_vm0, %v1073_v39  ;;  %v951_v41 = vpop.f32.mrb[4].mxu0  ;;  %v1057_v42 = vpop.f32.mrb[4].mxu1 }
 0x15e   :  { %v1243_v43 = vadd.f32 %v951_v41, %v167_v15  ;;  %v1251_v44 = vadd.f32 %v1057_v42, %v167_v15  ;;  %v953_v45 = vpop.f32.mrb[5].mxu0  ;;  %v1059_v46 = vpop.f32.mrb[5].mxu1 }
 0x15f   :  { %v1244_v47 = vadd.f32 %v953_v45, %v167_v15  ;;  %v1252_v48 = vadd.f32 %v1059_v46, %v167_v15  ;;  %v955_v49 = vpop.f32.mrb[6].mxu0  ;;  %v1061_v50 = vpop.f32.mrb[6].mxu1 }
 0x160   :  { %v1074_v51 = vmax.f32 %v1243_v43, 0.0  ;;  %v1076_v52 = vmax.f32 %v1251_v44, 0.0  ;;  %v1245_v53 = vadd.f32 %v955_v49, %v172_v40  ;;  %v1253_v54 = vadd.f32 %v1061_v50, %v172_v40  ;;  %v957_v55 = vpop.f32.mrb[7].mxu0  ;;  %v1063_v56 = vpop.f32.mrb[7].mxu1 }
 0x161   :  { %v1075_v57 = vmax.f32 %v1244_v47, 0.0  ;;  %v1077_v58 = vmax.f32 %v1252_v48, 0.0  ;;  %v1246_v59 = vadd.f32 %v957_v55, %v172_v40  ;;  %v1254_v60 = vadd.f32 %v1063_v56, %v172_v40 }
 0x162   :  { %1091 = vst [vmem:[%s1974_s3 + $0x40] sm:$0xff] %v1074_v51  ;;  %1093 = vst [vmem:[%s1974_s3 + $0x50] sm:$0xff] %v1076_v52  ;;  %v1078_v61 = vmax.f32 %v1245_v53, 0.0  ;;  %v1080_v62 = vmax.f32 %v1253_v54, 0.0 }
 0x163   :  { %1092 = vst [vmem:[%s1974_s3 + $0x48] sm:$0xff] %v1075_v57  ;;  %1094 = vst.msk [vmem:[%s1974_s3 + $0x58] sm:$0xff] %vm1085_vm0, %v1077_v58  ;;  %v1079_v63 = vmax.f32 %v1246_v59, 0.0  ;;  %v1081_v0 = vmax.f32 %v1254_v60, 0.0 }
 0x164   :  { %1095 = vst [vmem:[%s1974_s3 + $0x60] sm:$0xff] %v1078_v61  ;;  %1097 = vst [vmem:[%s1974_s3 + $0x70] sm:$0xff] %v1080_v62 }
 0x165   :  { %1096 = vst [vmem:[%s1974_s3 + $0x68] sm:$0xff] %v1079_v63  ;;  %1098 = vst.msk [vmem:[%s1974_s3 + $0x78] sm:$0xff] %vm1085_vm0, %v1081_v0 }

// kernel: vae_forward.9
= control target key start
LH: loop header
LB: loop body
LE: loop exit
PB: predicated region body
PF: predicated region fallthrough
CT: control target
= control target key end

     0   :  { %v745_v1 = vmov 0   ;;  %vm545_vm0 = vcmask 801792   ;;  %s966_s1 = inlined_call_operand.vmem [shape: bf16[512,98], index: 1, kind: input, shape index: {}]   ;;  %s967_s0 = inlined_call_operand.vmem [shape: bf16[64,512], index: 0, kind: input, shape index: {}]   ;;  %s968_s2 = inlined_call_operand.vmem [shape: f32[64,1], index: 2, kind: input, shape index: {}]   ;;  %s969_s3 = inlined_call_operand.vmem [shape: f32[64,98], index: 3, kind: output, shape index: {}]  }
   0x1   :  { %v689_v0 = vld [vmem:[%s966_s1 + $0x40] sm:$0xff]   ;;  %687 = vset.pattern.permute.xlu0 %v745_v1  ;;  %688 = vset.pattern.permute.xlu1 %v745_v1  ;;  %v693_v5 = vld [vmem:[%s966_s1 + $0x48] sm:$0xff]   ;;  %v697_v9 = vld [vmem:[%s966_s1 + $0x50] sm:$0xff]  }
   0x2   :  { %v690_v2 = vld [vmem:[%s966_s1 + $0xc0] sm:$0xff]   ;;  %606 = vmatprep.subr.bf16.mxu0 %v689_v0  ;;  %v694_v6 = vld [vmem:[%s966_s1 + $0xc8] sm:$0xff]   ;;  %v698_v10 = vld [vmem:[%s966_s1 + $0xd0] sm:$0xff]  }
   0x3   :  { %v691_v3 = vld [vmem:[%s966_s1] sm:$0xff]   ;;  %646 = vmatprep.subr.bf16.mxu1 %v690_v2  ;;  %v695_v7 = vld [vmem:[%s966_s1 + $0x8] sm:$0xff]   ;;  %v699_v11 = vld [vmem:[%s966_s1 + $0x10] sm:$0xff]  }
   0x4   :  { %v692_v4 = vld [vmem:[%s966_s1 + $0x80] sm:$0xff]   ;;  %607 = vmatpush3.bf16.msra.mxu0 %v691_v3  ;;  %v696_v8 = vld [vmem:[%s966_s1 + $0x88] sm:$0xff]   ;;  %v700_v12 = vld [vmem:[%s966_s1 + $0x90] sm:$0xff]  }
   0x5   :  { %647 = vmatpush3.bf16.msra.mxu1 %v692_v4  ;;  %608 = vmatprep.subr.bf16.mxu0 %v693_v5  ;;  %v701_v13 = vld [vmem:[%s966_s1 + $0x58] sm:$0xff]   ;;  %v705_v17 = vld [vmem:[%s966_s1 + $0x60] sm:$0xff]   ;;  %v709_v21 = vld [vmem:[%s966_s1 + $0x68] sm:$0xff]  }
   0x6   :  { %648 = vmatprep.subr.bf16.mxu1 %v694_v6  ;;  %v702_v14 = vld [vmem:[%s966_s1 + $0xd8] sm:$0xff]   ;;  %v706_v18 = vld [vmem:[%s966_s1 + $0xe0] sm:$0xff]   ;;  %v710_v22 = vld [vmem:[%s966_s1 + $0xe8] sm:$0xff]  }
   0x7   :  { %v703_v15 = vld [vmem:[%s966_s1 + $0x18] sm:$0xff]   ;;  %v707_v19 = vld [vmem:[%s966_s1 + $0x20] sm:$0xff]   ;;  %v711_v23 = vld [vmem:[%s966_s1 + $0x28] sm:$0xff]  }
   0x8   :  { %609 = vmatpush3.bf16.msra.mxu0 %v695_v7  ;;  %v704_v16 = vld [vmem:[%s966_s1 + $0x98] sm:$0xff]   ;;  %v708_v20 = vld [vmem:[%s966_s1 + $0xa0] sm:$0xff]   ;;  %v712_v24 = vld [vmem:[%s966_s1 + $0xa8] sm:$0xff]  }
   0x9   :  { %649 = vmatpush3.bf16.msra.mxu1 %v696_v8  ;;  %610 = vmatprep.subr.bf16.mxu0 %v697_v9  ;;  %v713_v25 = vld [vmem:[%s966_s1 + $0x70] sm:$0xff]   ;;  %v717_v29 = vld [vmem:[%s966_s1 + $0x78] sm:$0xff]   ;;  %v95_v43 = vld [vmem:[%s968_s2] sm:$0xff] }
   0xa   :  { %650 = vmatprep.subr.bf16.mxu1 %v698_v10  ;;  %v714_v26 = vld [vmem:[%s966_s1 + $0xf0] sm:$0xff]   ;;  %v718_v30 = vld [vmem:[%s966_s1 + $0xf8] sm:$0xff]   ;;  %105 = vperm.xlu0 %687, %v95_v43   ;;  %v96_v45 = vld [vmem:[%s968_s2 + $0x8] sm:$0xff] }
   0xb   :  { %v715_v27 = vld [vmem:[%s966_s1 + $0x30] sm:$0xff]   ;;  %v719_v31 = vld [vmem:[%s966_s1 + $0x38] sm:$0xff]   ;;  %v99_v48 = vld [vmem:[%s968_s2 + $0x20] sm:$0xff] }
   0xc   :  { %611 = vmatpush3.bf16.msra.mxu0 %v699_v11  ;;  %v716_v28 = vld [vmem:[%s966_s1 + $0xb0] sm:$0xff]   ;;  %v720_v32 = vld [vmem:[%s966_s1 + $0xb8] sm:$0xff]   ;;  %v100_v51 = vld [vmem:[%s968_s2 + $0x28] sm:$0xff] }
   0xd   :  { %651 = vmatpush3.bf16.msra.mxu1 %v700_v12  ;;  %612 = vmatprep.subr.bf16.mxu0 %v701_v13  ;;  %v721_v33 = vld [vmem:[%s967_s0] ss:$16 sps:$4 sm:$0xff]   ;;  %v723_v34 = vld [vmem:[%s967_s0 + $0x4] ss:$16 sps:$4 sm:$0xff]   ;;  %v724_v35 = vld [vmem:[%s967_s0 + $0x8] ss:$16 sps:$4 sm:$0xff]  }
   0xe   :  { %652 = vmatprep.subr.bf16.mxu1 %v702_v14  ;;  %v726_v36 = vld [vmem:[%s967_s0 + $0xc] ss:$16 sps:$4 sm:$0xff]   ;;  %447 = vmatprep.mubr.bf16.mxu0 %v723_v34  ;;  %v727_v37 = vld [vmem:[%s967_s0 + $0x24] ss:$16 sps:$4 sm:$0xff]   ;;  %v731_v39 = vld [vmem:[%s967_s0 + $0x20] ss:$16 sps:$4 sm:$0xff]  }
   0xf   :  { %512 = vmatprep.mubr.bf16.mxu1 %v726_v36  ;;  %v729_v38 = vld [vmem:[%s967_s0 + $0x2c] ss:$16 sps:$4 sm:$0xff]   ;;  %v732_v40 = vld [vmem:[%s967_s0 + $0x28] ss:$16 sps:$4 sm:$0xff]   ;;  %v733_v41 = vld [vmem:[%s967_s0 + $0x44] ss:$16 sps:$4 sm:$0xff]   ;;  %110 = vperm.xlu0 %687, %v96_v45  }
  0x10   :  { %613 = vmatpush3.bf16.msra.mxu0 %v703_v15  ;;  %v735_v42 = vld [vmem:[%s967_s0 + $0x4c] ss:$16 sps:$4 sm:$0xff]   ;;  %v97_v44 = vld [vmem:[%s968_s2 + $0x10] sm:$0xff]  ;;  %v738_v49 = vld [vmem:[%s967_s0 + $0x48] ss:$16 sps:$4 sm:$0xff]  }
  0x11   :  { %653 = vmatpush3.bf16.msra.mxu1 %v704_v16  ;;  %614 = vmatprep.subr.bf16.mxu0 %v705_v17  ;;  %v98_v46 = vld [vmem:[%s968_s2 + $0x18] sm:$0xff]  ;;  %v737_v47 = vld [vmem:[%s967_s0 + $0x40] ss:$16 sps:$4 sm:$0xff]   ;;  %v739_v50 = vld [vmem:[%s967_s0 + $0x64] ss:$16 sps:$4 sm:$0xff]  }
  0x12   :  { %654 = vmatprep.subr.bf16.mxu1 %v706_v18  ;;  %115 = vperm.xlu1 %688, %v97_v44   ;;  %v741_v52 = vld [vmem:[%s967_s0 + $0x6c] ss:$16 sps:$4 sm:$0xff]   ;;  %v101_v53 = vld [vmem:[%s968_s2 + $0x30] sm:$0xff]  ;;  %v744_v56 = vld [vmem:[%s967_s0 + $0x68] ss:$16 sps:$4 sm:$0xff]  }
  0x13   :  { %125 = vperm.xlu0 %687, %v99_v48   ;;  %v102_v54 = vld [vmem:[%s968_s2 + $0x38] sm:$0xff]  ;;  %v743_v55 = vld [vmem:[%s967_s0 + $0x60] ss:$16 sps:$4 sm:$0xff]  }
  0x14   :  { %615 = vmatpush3.bf16.msra.mxu0 %v707_v19 }
  0x15   :  { %655 = vmatpush3.bf16.msra.mxu1 %v708_v20  ;;  %616 = vmatprep.subr.bf16.mxu0 %v709_v21 }
  0x16   :  { %656 = vmatprep.subr.bf16.mxu1 %v710_v22  ;;  %120 = vperm.xlu1 %688, %v98_v46  }
  0x17   :  { %135 = vperm.xlu0 %687, %v101_v53  }
  0x18   :  { %617 = vmatpush3.bf16.msra.mxu0 %v711_v23 }
  0x19   :  { %657 = vmatpush3.bf16.msra.mxu1 %v712_v24  ;;  %618 = vmatprep.subr.bf16.mxu0 %v713_v25 }
  0x1a   :  { %658 = vmatprep.subr.bf16.mxu1 %v714_v26  ;;  %130 = vperm.xlu1 %688, %v100_v51  }
  0x1c   :  { %619 = vmatpush3.bf16.msra.mxu0 %v715_v27 }
  0x1d   :  { %659 = vmatpush3.bf16.msra.mxu1 %v716_v28  ;;  %620 = vmatprep.subr.bf16.mxu0 %v717_v29 }
  0x1e   :  { %660 = vmatprep.subr.bf16.mxu1 %v718_v30  ;;  %140 = vperm.xlu1 %688, %v102_v54  }
  0x20   :  { %621 = vmatpush3.bf16.msra.mxu0 %v719_v31 }
  0x21   :  { %661 = vmatpush3.bf16.msra.mxu1 %v720_v32 }
  0x23   :  { %448 = vmatmul.mubr.bf16.vlgmr.msra.gmra.mrb[0].mxu0 %v721_v33 }
  0x24   :  { %513 = vmatmul.mubr.bf16.vlgmr.msra.gmra.mrb[0].mxu1 %v724_v35  ;;  %455 = vmatprep.mubr.bf16.mxu0 %v727_v37 }
  0x25   :  { %520 = vmatprep.mubr.bf16.mxu1 %v729_v38 }
  0x2b   :  { %456 = vmatmul.mubr.bf16.gmra.mrb[4].mxu0 %v731_v39 }
  0x2c   :  { %521 = vmatmul.mubr.bf16.gmra.mrb[4].mxu1 %v732_v40  ;;  %463 = vmatprep.mubr.bf16.mxu0 %v733_v41 }
  0x2d   :  { %528 = vmatprep.mubr.bf16.mxu1 %v735_v42 }
  0x33   :  { %464 = vmatmul.mubr.bf16.gmra.mrb[8].mxu0 %v737_v47 }
  0x34   :  { %529 = vmatmul.mubr.bf16.gmra.mrb[8].mxu1 %v738_v49  ;;  %471 = vmatprep.mubr.bf16.mxu0 %v739_v50 }
  0x35   :  { %536 = vmatprep.mubr.bf16.mxu1 %v741_v52 }
  0x3b   :  { %472 = vmatmul.mubr.bf16.gmra.mrb[12].mxu0 %v743_v55 }
  0x3c   :  { %537 = vmatmul.mubr.bf16.gmra.mrb[12].mxu1 %v744_v56 }
  0x89   :  { %v106_v57 = vpop.permute.xlu0 %105 }
  0x8e   :  { %v111_v59 = vpop.permute.xlu0 %110 }
  0x91   :  { %v116_v10 = vpop.permute.xlu1 %115 }
  0x92   :  { %v126_v29 = vpop.permute.xlu0 %125 }
  0x95   :  { %v121_v24 = vpop.permute.xlu1 %120 }
  0x96   :  { %v136_v46 = vpop.permute.xlu0 %135 }
  0x99   :  { %v131_v42 = vpop.permute.xlu1 %130 }
  0xf6   :  { %v622_v58 = vpop.f32.mrb[0].mxu0 }
  0xf7   :  { %v662_v60 = vpop.f32.mrb[0].mxu1  ;;  %v623_v61 = vpop.f32.mrb[1].mxu0 }
  0xf8   :  { %v624_v62 = vadd.f32 %v623_v61, %v622_v58  ;;  %v663_v63 = vpop.f32.mrb[1].mxu1  ;;  %v625_v0 = vpop.f32.mrb[2].mxu0 }
  0xf9   :  { %v664_v1 = vadd.f32 %v663_v63, %v662_v60  ;;  %v665_v2 = vpop.f32.mrb[2].mxu1  ;;  %v626_v3 = vpop.f32.mrb[3].mxu0 }
  0xfa   :  { %v450_v4 = vadd.f32 %v624_v62, %v106_v57  ;;  %v627_v5 = vadd.f32 %v626_v3, %v625_v0  ;;  %v666_v6 = vpop.f32.mrb[3].mxu1  ;;  %v141_v60 = vpop.permute.xlu1 %140 }
  0xfb   :  { %v667_v7 = vadd.f32 %v666_v6, %v665_v2 }
  0xfc   :  { %v515_v8 = vadd.f32 %v664_v1, %v450_v4  ;;  %v453_v9 = vadd.f32 %v627_v5, %v111_v59 }
  0xfe   :  { %546 = vst.msk [vmem:[%s969_s3] sm:$0xff] %vm545_vm0, %v515_v8  ;;  %v518_v11 = vadd.f32 %v667_v7, %v453_v9  ;;  %v628_v12 = vpop.f32.mrb[4].mxu0 }
  0xff   :  { %v668_v13 = vpop.f32.mrb[4].mxu1  ;;  %v629_v14 = vpop.f32.mrb[5].mxu0 }
 0x100   :  { %547 = vst.msk [vmem:[%s969_s3 + $0x8] sm:$0xff] %vm545_vm0, %v518_v11  ;;  %v630_v15 = vadd.f32 %v629_v14, %v628_v12  ;;  %v669_v16 = vpop.f32.mrb[5].mxu1  ;;  %v631_v17 = vpop.f32.mrb[6].mxu0 }
 0x101   :  { %v670_v18 = vadd.f32 %v669_v16, %v668_v13  ;;  %v671_v19 = vpop.f32.mrb[6].mxu1  ;;  %v632_v20 = vpop.f32.mrb[7].mxu0 }
 0x102   :  { %v458_v21 = vadd.f32 %v630_v15, %v116_v10  ;;  %v633_v22 = vadd.f32 %v632_v20, %v631_v17  ;;  %v672_v23 = vpop.f32.mrb[7].mxu1 }
 0x103   :  { %v673_v25 = vadd.f32 %v672_v23, %v671_v19 }
 0x104   :  { %v523_v26 = vadd.f32 %v670_v18, %v458_v21  ;;  %v461_v27 = vadd.f32 %v633_v22, %v121_v24 }
 0x106   :  { %548 = vst.msk [vmem:[%s969_s3 + $0x10] sm:$0xff] %vm545_vm0, %v523_v26  ;;  %v526_v28 = vadd.f32 %v673_v25, %v461_v27  ;;  %v634_v30 = vpop.f32.mrb[8].mxu0 }
 0x107   :  { %v674_v31 = vpop.f32.mrb[8].mxu1  ;;  %v635_v32 = vpop.f32.mrb[9].mxu0 }
 0x108   :  { %549 = vst.msk [vmem:[%s969_s3 + $0x18] sm:$0xff] %vm545_vm0, %v526_v28  ;;  %v636_v33 = vadd.f32 %v635_v32, %v634_v30  ;;  %v675_v34 = vpop.f32.mrb[9].mxu1  ;;  %v637_v35 = vpop.f32.mrb[10].mxu0 }
 0x109   :  { %v676_v36 = vadd.f32 %v675_v34, %v674_v31  ;;  %v677_v37 = vpop.f32.mrb[10].mxu1  ;;  %v638_v38 = vpop.f32.mrb[11].mxu0 }
 0x10a   :  { %v466_v39 = vadd.f32 %v636_v33, %v126_v29  ;;  %v639_v40 = vadd.f32 %v638_v38, %v637_v35  ;;  %v678_v41 = vpop.f32.mrb[11].mxu1 }
 0x10b   :  { %v679_v43 = vadd.f32 %v678_v41, %v677_v37 }
 0x10c   :  { %v531_v44 = vadd.f32 %v676_v36, %v466_v39  ;;  %v469_v45 = vadd.f32 %v639_v40, %v131_v42 }
 0x10e   :  { %550 = vst.msk [vmem:[%s969_s3 + $0x20] sm:$0xff] %vm545_vm0, %v531_v44  ;;  %v534_v47 = vadd.f32 %v679_v43, %v469_v45  ;;  %v640_v48 = vpop.f32.mrb[12].mxu0 }
 0x10f   :  { %v680_v49 = vpop.f32.mrb[12].mxu1  ;;  %v641_v50 = vpop.f32.mrb[13].mxu0 }
 0x110   :  { %551 = vst.msk [vmem:[%s969_s3 + $0x28] sm:$0xff] %vm545_vm0, %v534_v47  ;;  %v642_v51 = vadd.f32 %v641_v50, %v640_v48  ;;  %v681_v52 = vpop.f32.mrb[13].mxu1  ;;  %v643_v53 = vpop.f32.mrb[14].mxu0 }
 0x111   :  { %v682_v54 = vadd.f32 %v681_v52, %v680_v49  ;;  %v683_v55 = vpop.f32.mrb[14].mxu1  ;;  %v644_v56 = vpop.f32.mrb[15].mxu0 }
 0x112   :  { %v474_v57 = vadd.f32 %v642_v51, %v136_v46  ;;  %v645_v58 = vadd.f32 %v644_v56, %v643_v53  ;;  %v684_v59 = vpop.f32.mrb[15].mxu1 }
 0x113   :  { %v685_v61 = vadd.f32 %v684_v59, %v683_v55 }
 0x114   :  { %v539_v62 = vadd.f32 %v682_v54, %v474_v57  ;;  %v477_v63 = vadd.f32 %v645_v58, %v141_v60 }
 0x116   :  { %552 = vst.msk [vmem:[%s969_s3 + $0x30] sm:$0xff] %vm545_vm0, %v539_v62  ;;  %v542_v0 = vadd.f32 %v685_v61, %v477_v63 }
 0x118   :  { %553 = vst.msk [vmem:[%s969_s3 + $0x38] sm:$0xff] %vm545_vm0, %v542_v0 }

// kernel: vae_forward.10
= control target key start
LH: loop header
LB: loop body
LE: loop exit
PB: predicated region body
PF: predicated region fallthrough
CT: control target
= control target key end

     0   :  { %v438_v27 = vlaneseq  ;;  %v4152_v35 = vmov 1966171168   ;;  %s4153_s25 = smov 16   ;;  %vm4155_vm0 = vmmov 0   ;;  %s5107_s0 = inlined_call_operand.vmem [shape: bf16[2,3136], index: 0, kind: input, shape index: {}]   ;;  %s5108_s1 = inlined_call_operand.vmem [shape: bf16[3136,32], index: 1, kind: input, shape index: {}]   ;;  %s5109_s2 = inlined_call_operand.vmem [shape: f32[1,32], index: 2, kind: input, shape index: {}]   ;;  %s5110_s3 = inlined_call_operand.vmem [shape: f32[2,16], index: 3, kind: input, shape index: {}]   ;;  %s5111_s4 = inlined_call_operand.vmem [shape: bf16[16,3136], index: 4, kind: input, shape index: {}]   ;;  %s5112_s5 = inlined_call_operand.vmem [shape: f32[1,3136], index: 5, kind: input, shape index: {}]   ;;  %s5113_s6 = inlined_call_operand.vmem [shape: f32[2,3136], index: 6, kind: output, shape index: {0}]   ;;  %s5114_s7 = inlined_call_operand.hbm [shape: f32[1,1], index: 7, kind: output, shape index: {1}]  }
   0x1   :  { %v3888_v0 = vld [vmem:[%s5108_s1 + $0x40] sm:$0xff]   ;;  %v3892_v4 = vld [vmem:[%s5108_s1 + $0x48] sm:$0xff]   ;;  %v3896_v8 = vld [vmem:[%s5108_s1 + $0x50] sm:$0xff]   ;;  %v436_v36 = vunpack.c.l.s4 %v4152_v35 }
   0x2   :  { %v3889_v1 = vld [vmem:[%s5108_s1] sm:$0xff]   ;;  %3589 = vmatprep.subr.bf16.mxu0 %v3888_v0  ;;  %v3893_v5 = vld [vmem:[%s5108_s1 + $0x8] sm:$0xff]   ;;  %v3897_v9 = vld [vmem:[%s5108_s1 + $0x10] sm:$0xff]   ;;  %v4293_v32 = vshrl.u32 %v438_v27, 7 }
   0x3   :  { %v3890_v2 = vld [vmem:[%s5108_s1 + $0xc0] sm:$0xff]   ;;  %3590 = vmatpush3.bf16.msra.mxu0 %v3889_v1  ;;  %v3894_v6 = vld [vmem:[%s5108_s1 + $0xc8] sm:$0xff]   ;;  %v3898_v10 = vld [vmem:[%s5108_s1 + $0xd0] sm:$0xff]   ;;  %v437_v39 = vunpack.c.0.s8 %v436_v36 }
   0x4   :  { %v3891_v3 = vld [vmem:[%s5108_s1 + $0x80] sm:$0xff]   ;;  %3611 = vmatprep.subr.bf16.mxu1 %v3890_v2  ;;  %3591 = vmatprep.subr.bf16.mxu0 %v3892_v4  ;;  %v3895_v7 = vld [vmem:[%s5108_s1 + $0x88] sm:$0xff]   ;;  %v3899_v11 = vld [vmem:[%s5108_s1 + $0x90] sm:$0xff]  }
   0x5   :  { %3612 = vmatpush3.bf16.msra.mxu1 %v3891_v3  ;;  %v3900_v12 = vld [vmem:[%s5108_s1 + $0x58] sm:$0xff]   ;;  %v3904_v16 = vld [vmem:[%s5108_s1 + $0x60] sm:$0xff]   ;;  %v3908_v20 = vld [vmem:[%s5108_s1 + $0x68] sm:$0xff]   ;;  %v4308_v41 = vsub.s32 %v437_v39, %v4293_v32 }
   0x6   :  { %3613 = vmatprep.subr.bf16.mxu1 %v3894_v6  ;;  %v3901_v13 = vld [vmem:[%s5108_s1 + $0x18] sm:$0xff]   ;;  %v3905_v17 = vld [vmem:[%s5108_s1 + $0x20] sm:$0xff]   ;;  %v3909_v21 = vld [vmem:[%s5108_s1 + $0x28] sm:$0xff]  }
   0x7   :  { %3592 = vmatpush3.bf16.msra.mxu0 %v3893_v5  ;;  %v3902_v14 = vld [vmem:[%s5108_s1 + $0xd8] sm:$0xff]   ;;  %v3906_v18 = vld [vmem:[%s5108_s1 + $0xe0] sm:$0xff]   ;;  %v3910_v22 = vld [vmem:[%s5108_s1 + $0xe8] sm:$0xff]  }
   0x8   :  { %3593 = vmatprep.subr.bf16.mxu0 %v3896_v8  ;;  %v3903_v15 = vld [vmem:[%s5108_s1 + $0x98] sm:$0xff]   ;;  %v3907_v19 = vld [vmem:[%s5108_s1 + $0xa0] sm:$0xff]   ;;  %v3911_v23 = vld [vmem:[%s5108_s1 + $0xa8] sm:$0xff]  }
   0x9   :  { %3614 = vmatpush3.bf16.msra.mxu1 %v3895_v7  ;;  %v3912_v24 = vld [vmem:[%s5108_s1 + $0x70] sm:$0xff]   ;;  %v3916_v29 = vld [vmem:[%s5108_s1 + $0x78] sm:$0xff]   ;;  %v27_v33 = vld [vmem:[%s5107_s0] sm:$0xff] }
   0xa   :  { %3615 = vmatprep.subr.bf16.mxu1 %v3898_v10  ;;  %v3913_v25 = vld [vmem:[%s5108_s1 + $0x30] sm:$0xff]   ;;  %v3917_v30 = vld [vmem:[%s5108_s1 + $0x38] sm:$0xff]   ;;  %v3921_v37 = vld [vmem:[%s5108_s1 + $0x140] sm:$0xff]   ;;  %v434_v38 = vcombine.high %v27_v33, %v27_v33  ;;  %v441_v42 = vrot.slane %v27_v33, %v4308_v41 }
   0xb   :  { %3594 = vmatpush3.bf16.msra.mxu0 %v3897_v9  ;;  %v3914_v26 = vld [vmem:[%s5108_s1 + $0xf0] sm:$0xff]   ;;  %v3918_v31 = vld [vmem:[%s5108_s1 + $0xf8] sm:$0xff]   ;;  %v3923_v40 = vld [vmem:[%s5108_s1 + $0x1c0] sm:$0xff]  }
   0xc   :  { %3595 = vmatprep.subr.bf16.mxu0 %v3900_v12  ;;  %v3915_v28 = vld [vmem:[%s5108_s1 + $0xb0] sm:$0xff]   ;;  %v3920_v34 = vld [vmem:[%s5108_s1 + $0xb8] sm:$0xff]   ;;  %v4312_v43 = vrot.slane %v434_v38, %v4308_v41  ;;  %v449_v44 = vcombine.high %v441_v42, %v441_v42  ;;  %v457_v45 = vrot.slane %v441_v42, %v4308_v41  ;;  %v3922_v48 = vld [vmem:[%s5108_s1 + $0x100] sm:$0xff]  }
   0xd   :  { %3616 = vmatpush3.bf16.msra.mxu1 %v3899_v11  ;;  %v3925_v51 = vld [vmem:[%s5108_s1 + $0x148] sm:$0xff]   ;;  %v3924_v53 = vld [vmem:[%s5108_s1 + $0x180] sm:$0xff]   ;;  %v3929_v57 = vld [vmem:[%s5108_s1 + $0x150] sm:$0xff]  }
   0xe   :  { %3617 = vmatprep.subr.bf16.mxu1 %v3902_v14  ;;  %v450_v46 = vcombine.high %v4312_v43, %v4312_v43  ;;  %v471_v47 = vrot.slane %v449_v44, %v4308_v41  ;;  %v479_v50 = vcombine.high %v457_v45, %v457_v45  ;;  %v3927_v54 = vld [vmem:[%s5108_s1 + $0x1c8] sm:$0xff]   ;;  %v3931_v59 = vld [vmem:[%s5108_s1 + $0x1d0] sm:$0xff]   ;;  %v3933_v61 = vld [vmem:[%s5108_s1 + $0x158] sm:$0xff]  }
   0xf   :  { %3596 = vmatpush3.bf16.msra.mxu0 %v3901_v13  ;;  %v3926_v56 = vld [vmem:[%s5108_s1 + $0x108] sm:$0xff]   ;;  %v3930_v60 = vld [vmem:[%s5108_s1 + $0x110] sm:$0xff]   ;;  %v3935_v63 = vld [vmem:[%s5108_s1 + $0x1d8] sm:$0xff]  }
  0x10   :  { %3597 = vmatprep.subr.bf16.mxu0 %v3904_v16  ;;  %v478_v49 = vrot.slane %v450_v46, %v4308_v41  ;;  %1831 = vmatprep.mubr.bf16.mxu0 %v471_v47  ;;  %v481_v52 = vcombine.high %v471_v47, %v471_v47  ;;  %v3928_v58 = vld [vmem:[%s5108_s1 + $0x188] sm:$0xff]   ;;  %v3932_v62 = vld [vmem:[%s5108_s1 + $0x190] sm:$0xff]   ;;  %v3934_v0 = vld [vmem:[%s5108_s1 + $0x118] sm:$0xff]  }
  0x11   :  { %3618 = vmatpush3.bf16.msra.mxu1 %v3903_v15  ;;  %v3937_v1 = vld [vmem:[%s5108_s1 + $0x160] sm:$0xff]   ;;  %v3936_v2 = vld [vmem:[%s5108_s1 + $0x198] sm:$0xff]   ;;  %v3941_v5 = vld [vmem:[%s5108_s1 + $0x168] sm:$0xff]  }
  0x12   :  { %3619 = vmatprep.subr.bf16.mxu1 %v3906_v18  ;;  %v482_v55 = vcombine.high %v478_v49, %v478_v49  ;;  %1871 = vmatprep.mubr.bf16.mxu1 %v481_v52  ;;  %v3939_v3 = vld [vmem:[%s5108_s1 + $0x1e0] sm:$0xff]   ;;  %v3943_v7 = vld [vmem:[%s5108_s1 + $0x1e8] sm:$0xff]   ;;  %v3945_v9 = vld [vmem:[%s5108_s1 + $0x170] sm:$0xff]  }
  0x13   :  { %3598 = vmatpush3.bf16.msra.mxu0 %v3905_v17  ;;  %v3938_v4 = vld [vmem:[%s5108_s1 + $0x120] sm:$0xff]   ;;  %v3942_v8 = vld [vmem:[%s5108_s1 + $0x128] sm:$0xff]   ;;  %v3947_v11 = vld [vmem:[%s5108_s1 + $0x1f0] sm:$0xff]   ;;  %v464_v17 = vrot.slane %v4312_v43, %v4308_v41 }
  0x14   :  { %3599 = vmatprep.subr.bf16.mxu0 %v3908_v20  ;;  %v3940_v6 = vld [vmem:[%s5108_s1 + $0x1a0] sm:$0xff]   ;;  %v3944_v10 = vld [vmem:[%s5108_s1 + $0x1a8] sm:$0xff]   ;;  %v3946_v12 = vld [vmem:[%s5108_s1 + $0x130] sm:$0xff]  }
  0x15   :  { %3620 = vmatpush3.bf16.msra.mxu1 %v3907_v19  ;;  %v3949_v13 = vld [vmem:[%s5108_s1 + $0x178] sm:$0xff]   ;;  %v3948_v14 = vld [vmem:[%s5108_s1 + $0x1b0] sm:$0xff]   ;;  %v3953_v18 = vld [vmem:[%s5108_s1 + $0x240] sm:$0xff]  }
  0x16   :  { %3621 = vmatprep.subr.bf16.mxu1 %v3910_v22  ;;  %v3951_v15 = vld [vmem:[%s5108_s1 + $0x1f8] sm:$0xff]   ;;  %v3955_v20 = vld [vmem:[%s5108_s1 + $0x2c0] sm:$0xff]   ;;  %v480_v22 = vcombine.high %v464_v17, %v464_v17  ;;  %v3961_v27 = vld [vmem:[%s5108_s1 + $0x250] sm:$0xff]  }
  0x17   :  { %3600 = vmatpush3.bf16.msra.mxu0 %v3909_v21  ;;  %v3950_v16 = vld [vmem:[%s5108_s1 + $0x138] sm:$0xff]   ;;  %v3954_v21 = vld [vmem:[%s5108_s1 + $0x200] sm:$0xff]   ;;  %v3964_v33 = vld [vmem:[%s5108_s1 + $0x290] sm:$0xff]  }
  0x18   :  { %3601 = vmatprep.subr.bf16.mxu0 %v3912_v24  ;;  %v3952_v19 = vld [vmem:[%s5108_s1 + $0x1b8] sm:$0xff]   ;;  %v3956_v24 = vld [vmem:[%s5108_s1 + $0x280] sm:$0xff]   ;;  %v3975_v43 = vld [vmem:[%s5108_s1 + $0x2e8] sm:$0xff]  }
  0x19   :  { %3622 = vmatpush3.bf16.msra.mxu1 %v3911_v23  ;;  %v3957_v23 = vld [vmem:[%s5108_s1 + $0x248] sm:$0xff]   ;;  %v3966_v35 = vld [vmem:[%s5108_s1 + $0x218] sm:$0xff]   ;;  %v3969_v36 = vld [vmem:[%s5108_s1 + $0x260] sm:$0xff]  }
  0x1a   :  { %3623 = vmatprep.subr.bf16.mxu1 %v3914_v26  ;;  %v3958_v26 = vld [vmem:[%s5108_s1 + $0x208] sm:$0xff]   ;;  %v3971_v38 = vld [vmem:[%s5108_s1 + $0x2e0] sm:$0xff]  }
  0x1b   :  { %3602 = vmatpush3.bf16.msra.mxu0 %v3913_v25  ;;  %v3959_v25 = vld [vmem:[%s5108_s1 + $0x2c8] sm:$0xff]   ;;  %v3970_v39 = vld [vmem:[%s5108_s1 + $0x220] sm:$0xff]  }
  0x1c   :  { %3603 = vmatprep.subr.bf16.mxu0 %v3916_v29  ;;  %v3963_v29 = vld [vmem:[%s5108_s1 + $0x2d0] sm:$0xff]   ;;  %v3972_v42 = vld [vmem:[%s5108_s1 + $0x2a0] sm:$0xff]   ;;  %v3974_v44 = vld [vmem:[%s5108_s1 + $0x228] sm:$0xff]  }
  0x1d   :  { %3624 = vmatpush3.bf16.msra.mxu1 %v3915_v28  ;;  %v3960_v28 = vld [vmem:[%s5108_s1 + $0x288] sm:$0xff]  }
  0x1e   :  { %3625 = vmatprep.subr.bf16.mxu1 %v3918_v31  ;;  %v3965_v31 = vld [vmem:[%s5108_s1 + $0x258] sm:$0xff]   ;;  %v28_v46 = vld [vmem:[%s5107_s0 + $0x8] sm:$0xff] }
  0x1f   :  { %3604 = vmatpush3.bf16.msra.mxu0 %v3917_v30  ;;  %v3962_v30 = vld [vmem:[%s5108_s1 + $0x210] sm:$0xff]   ;;  %v3976_v47 = vld [vmem:[%s5108_s1 + $0x2a8] sm:$0xff]  }
  0x20   :  { %3633 = vmatprep.subr.bf16.mxu0 %v3921_v37  ;;  %v3968_v37 = vld [vmem:[%s5108_s1 + $0x298] sm:$0xff]  }
  0x21   :  { %3626 = vmatpush3.bf16.msra.mxu1 %v3920_v34  ;;  %v3967_v34 = vld [vmem:[%s5108_s1 + $0x2d8] sm:$0xff]  }
  0x22   :  { %3655 = vmatprep.subr.bf16.mxu1 %v3923_v40  ;;  %1832 = vmatmul.mubr.bf16.vlgmr.msra.gmra.mrb[0].mxu0 %v457_v45  ;;  %v3973_v40 = vld [vmem:[%s5108_s1 + $0x268] sm:$0xff]   ;;  %v3977_v45 = vld [vmem:[%s5108_s1 + $0x270] sm:$0xff]  }
  0x23   :  { %3634 = vmatpush3.bf16.msra.mxu0 %v3922_v48  ;;  %1911 = vmatprep.mubr.bf16.mxu0 %v478_v49  ;;  %v490_v48 = vrot.slane %v28_v46, %v4308_v41  ;;  %v483_v49 = vcombine.high %v28_v46, %v28_v46  ;;  %v4025_v46 = vld [vmem:[%s5108_s1 + $0x488] sm:$0xff]  }
  0x24   :  { %1872 = vmatmul.mubr.bf16.vlgmr.msra.gmra.mrb[0].mxu1 %v479_v50  ;;  %3635 = vmatprep.subr.bf16.mxu0 %v3925_v51  ;;  %v3979_v50 = vld [vmem:[%s5108_s1 + $0x2f0] sm:$0xff]  }
  0x25   :  { %3656 = vmatpush3.bf16.msra.mxu1 %v3924_v53  ;;  %1951 = vmatprep.mubr.bf16.mxu1 %v482_v55  ;;  %v3978_v51 = vld [vmem:[%s5108_s1 + $0x230] sm:$0xff]   ;;  %v498_v52 = vcombine.high %v490_v48, %v490_v48  ;;  %v4497_v53 = vrot.slane %v483_v49, %v4308_v41  ;;  %v4030_v49 = vld [vmem:[%s5108_s1 + $0x458] sm:$0xff]  }
  0x26   :  { %3657 = vmatprep.subr.bf16.mxu1 %v3927_v54  ;;  %v3981_v54 = vld [vmem:[%s5108_s1 + $0x278] sm:$0xff]   ;;  %v3980_v55 = vld [vmem:[%s5108_s1 + $0x2b0] sm:$0xff]  }
  0x27   :  { %3636 = vmatpush3.bf16.msra.mxu0 %v3926_v56  ;;  %v520_v56 = vrot.slane %v498_v52, %v4308_v41  ;;  %v4031_v52 = vld [vmem:[%s5108_s1 + $0x418] sm:$0xff]  }
  0x28   :  { %3637 = vmatprep.subr.bf16.mxu0 %v3929_v57  ;;  %v499_v57 = vcombine.high %v4497_v53, %v4497_v53 }
  0x29   :  { %3658 = vmatpush3.bf16.msra.mxu1 %v3928_v58  ;;  %v3983_v58 = vld [vmem:[%s5108_s1 + $0x2f8] sm:$0xff]  }
  0x2a   :  { %3659 = vmatprep.subr.bf16.mxu1 %v3931_v59  ;;  %v3982_v59 = vld [vmem:[%s5108_s1 + $0x238] sm:$0xff]  }
  0x2b   :  { %3638 = vmatpush3.bf16.msra.mxu0 %v3930_v60  ;;  %v530_v60 = vcombine.high %v520_v56, %v520_v56 }
  0x2c   :  { %3639 = vmatprep.subr.bf16.mxu0 %v3933_v61  ;;  %v506_v61 = vrot.slane %v490_v48, %v4308_v41  ;;  %v4027_v48 = vld [vmem:[%s5108_s1 + $0x410] sm:$0xff]  }
  0x2d   :  { %3660 = vmatpush3.bf16.msra.mxu1 %v3932_v62  ;;  %v3985_v62 = vld [vmem:[%s5108_s1 + $0x340] sm:$0xff]  }
  0x2e   :  { %3661 = vmatprep.subr.bf16.mxu1 %v3935_v63  ;;  %v3984_v63 = vld [vmem:[%s5108_s1 + $0x2b8] sm:$0xff]  }
  0x2f   :  { %3640 = vmatpush3.bf16.msra.mxu0 %v3934_v0  ;;  %v527_v0 = vrot.slane %v499_v57, %v4308_v41  ;;  %v4038_v57 = vld [vmem:[%s5108_s1 + $0x468] sm:$0xff]  }
  0x30   :  { %3641 = vmatprep.subr.bf16.mxu0 %v3937_v1  ;;  %v3987_v1 = vld [vmem:[%s5108_s1 + $0x3c0] sm:$0xff]  }
  0x31   :  { %3662 = vmatpush3.bf16.msra.mxu1 %v3936_v2  ;;  %v3986_v2 = vld [vmem:[%s5108_s1 + $0x300] sm:$0xff]  }
  0x32   :  { %3663 = vmatprep.subr.bf16.mxu1 %v3939_v3  ;;  %v528_v3 = vcombine.high %v506_v61, %v506_v61 }
  0x33   :  { %3642 = vmatpush3.bf16.msra.mxu0 %v3938_v4  ;;  %v3989_v4 = vld [vmem:[%s5108_s1 + $0x348] sm:$0xff]  }
  0x34   :  { %3643 = vmatprep.subr.bf16.mxu0 %v3941_v5  ;;  %v3988_v5 = vld [vmem:[%s5108_s1 + $0x380] sm:$0xff]  }
  0x35   :  { %3664 = vmatpush3.bf16.msra.mxu1 %v3940_v6  ;;  %v531_v6 = vcombine.high %v527_v0, %v527_v0 }
  0x36   :  { %3665 = vmatprep.subr.bf16.mxu1 %v3943_v7  ;;  %v3991_v7 = vld [vmem:[%s5108_s1 + $0x3c8] sm:$0xff]  }
  0x37   :  { %3644 = vmatpush3.bf16.msra.mxu0 %v3942_v8  ;;  %v3990_v8 = vld [vmem:[%s5108_s1 + $0x308] sm:$0xff]  }
  0x38   :  { %3645 = vmatprep.subr.bf16.mxu0 %v3945_v9  ;;  %v3993_v9 = vld [vmem:[%s5108_s1 + $0x350] sm:$0xff]  }
  0x39   :  { %3666 = vmatpush3.bf16.msra.mxu1 %v3944_v10  ;;  %v3992_v10 = vld [vmem:[%s5108_s1 + $0x388] sm:$0xff]  }
  0x3a   :  { %3667 = vmatprep.subr.bf16.mxu1 %v3947_v11  ;;  %v3995_v11 = vld [vmem:[%s5108_s1 + $0x3d0] sm:$0xff]  }
  0x3b   :  { %3646 = vmatpush3.bf16.msra.mxu0 %v3946_v12  ;;  %v3994_v12 = vld [vmem:[%s5108_s1 + $0x310] sm:$0xff]  }
  0x3c   :  { %3647 = vmatprep.subr.bf16.mxu0 %v3949_v13  ;;  %v3997_v13 = vld [vmem:[%s5108_s1 + $0x358] sm:$0xff]  }
  0x3d   :  { %3668 = vmatpush3.bf16.msra.mxu1 %v3948_v14  ;;  %v3996_v14 = vld [vmem:[%s5108_s1 + $0x390] sm:$0xff]  }
  0x3e   :  { %3669 = vmatprep.subr.bf16.mxu1 %v3951_v15  ;;  %v3999_v15 = vld [vmem:[%s5108_s1 + $0x3d8] sm:$0xff]  }
  0x3f   :  { %3648 = vmatpush3.bf16.msra.mxu0 %v3950_v16  ;;  %v3998_v16 = vld [vmem:[%s5108_s1 + $0x318] sm:$0xff]  }
  0x40   :  { %3677 = vmatprep.subr.bf16.mxu0 %v3953_v18  ;;  %v4000_v18 = vld [vmem:[%s5108_s1 + $0x398] sm:$0xff]  }
  0x41   :  { %3670 = vmatpush3.bf16.msra.mxu1 %v3952_v19  ;;  %v4003_v19 = vld [vmem:[%s5108_s1 + $0x3e0] sm:$0xff]  }
  0x42   :  { %1912 = vmatmul.mubr.bf16.vlgmr.msra.gmra.mrb[4].mxu0 %v464_v17  ;;  %3699 = vmatprep.subr.bf16.mxu1 %v3955_v20  ;;  %v4001_v17 = vld [vmem:[%s5108_s1 + $0x360] sm:$0xff]  }
  0x43   :  { %3678 = vmatpush3.bf16.msra.mxu0 %v3954_v21  ;;  %1991 = vmatprep.mubr.bf16.mxu0 %v520_v56  ;;  %v4002_v20 = vld [vmem:[%s5108_s1 + $0x320] sm:$0xff]   ;;  %v4005_v21 = vld [vmem:[%s5108_s1 + $0x368] sm:$0xff]  }
  0x44   :  { %1952 = vmatmul.mubr.bf16.vlgmr.msra.gmra.mrb[4].mxu1 %v480_v22  ;;  %3679 = vmatprep.subr.bf16.mxu0 %v3957_v23  ;;  %v4004_v22 = vld [vmem:[%s5108_s1 + $0x3a0] sm:$0xff]   ;;  %v4007_v23 = vld [vmem:[%s5108_s1 + $0x3e8] sm:$0xff]  }
  0x45   :  { %3700 = vmatpush3.bf16.msra.mxu1 %v3956_v24  ;;  %2031 = vmatprep.mubr.bf16.mxu1 %v530_v60  ;;  %v4006_v24 = vld [vmem:[%s5108_s1 + $0x328] sm:$0xff]   ;;  %v4035_v56 = vld [vmem:[%s5108_s1 + $0x420] sm:$0xff]  }
  0x46   :  { %3701 = vmatprep.subr.bf16.mxu1 %v3959_v25  ;;  %v4009_v25 = vld [vmem:[%s5108_s1 + $0x370] sm:$0xff]   ;;  %v4039_v60 = vld [vmem:[%s5108_s1 + $0x428] sm:$0xff]  }
  0x47   :  { %3680 = vmatpush3.bf16.msra.mxu0 %v3958_v26  ;;  %v4008_v26 = vld [vmem:[%s5108_s1 + $0x3a8] sm:$0xff]  }
  0x48   :  { %3681 = vmatprep.subr.bf16.mxu0 %v3961_v27  ;;  %v4011_v27 = vld [vmem:[%s5108_s1 + $0x3f0] sm:$0xff]  }
  0x49   :  { %3702 = vmatpush3.bf16.msra.mxu1 %v3960_v28  ;;  %v4010_v28 = vld [vmem:[%s5108_s1 + $0x330] sm:$0xff]  }
  0x4a   :  { %3703 = vmatprep.subr.bf16.mxu1 %v3963_v29  ;;  %v4013_v29 = vld [vmem:[%s5108_s1 + $0x378] sm:$0xff]  }
  0x4b   :  { %3682 = vmatpush3.bf16.msra.mxu0 %v3962_v30  ;;  %v4012_v30 = vld [vmem:[%s5108_s1 + $0x3b0] sm:$0xff]  }
  0x4c   :  { %3683 = vmatprep.subr.bf16.mxu0 %v3965_v31  ;;  %v4015_v31 = vld [vmem:[%s5108_s1 + $0x3f8] sm:$0xff]  }
  0x4d   :  { %3704 = vmatpush3.bf16.msra.mxu1 %v3964_v33  ;;  %v4014_v33 = vld [vmem:[%s5108_s1 + $0x338] sm:$0xff]  }
  0x4e   :  { %3705 = vmatprep.subr.bf16.mxu1 %v3967_v34  ;;  %v513_v34 = vrot.slane %v4497_v53, %v4308_v41  ;;  %v4034_v53 = vld [vmem:[%s5108_s1 + $0x460] sm:$0xff]  }
  0x4f   :  { %3684 = vmatpush3.bf16.msra.mxu0 %v3966_v35  ;;  %v4018_v35 = vld [vmem:[%s5108_s1 + $0x440] sm:$0xff]  }
  0x50   :  { %3685 = vmatprep.subr.bf16.mxu0 %v3969_v36  ;;  %v4017_v36 = vld [vmem:[%s5108_s1 + $0x3b8] sm:$0xff]  }
  0x51   :  { %3706 = vmatpush3.bf16.msra.mxu1 %v3968_v37  ;;  %v4020_v37 = vld [vmem:[%s5108_s1 + $0x4c0] sm:$0xff]  }
  0x52   :  { %3707 = vmatprep.subr.bf16.mxu1 %v3971_v38  ;;  %v4019_v38 = vld [vmem:[%s5108_s1 + $0x400] sm:$0xff]  }
  0x53   :  { %3686 = vmatpush3.bf16.msra.mxu0 %v3970_v39  ;;  %v529_v39 = vcombine.high %v513_v34, %v513_v34 }
  0x54   :  { %3687 = vmatprep.subr.bf16.mxu0 %v3973_v40  ;;  %v4022_v40 = vld [vmem:[%s5108_s1 + $0x448] sm:$0xff]  }
  0x55   :  { %3708 = vmatpush3.bf16.msra.mxu1 %v3972_v42  ;;  %v4021_v42 = vld [vmem:[%s5108_s1 + $0x480] sm:$0xff]  }
  0x56   :  { %3709 = vmatprep.subr.bf16.mxu1 %v3975_v43  ;;  %v4024_v43 = vld [vmem:[%s5108_s1 + $0x4c8] sm:$0xff]  }
  0x57   :  { %3688 = vmatpush3.bf16.msra.mxu0 %v3974_v44  ;;  %v4023_v44 = vld [vmem:[%s5108_s1 + $0x408] sm:$0xff]  }
  0x58   :  { %3689 = vmatprep.subr.bf16.mxu0 %v3977_v45  ;;  %v4026_v45 = vld [vmem:[%s5108_s1 + $0x450] sm:$0xff]  }
  0x59   :  { %3710 = vmatpush3.bf16.msra.mxu1 %v3976_v47  ;;  %v4028_v47 = vld [vmem:[%s5108_s1 + $0x4d0] sm:$0xff]  }
  0x5a   :  { %3711 = vmatprep.subr.bf16.mxu1 %v3979_v50  ;;  %v4029_v50 = vld [vmem:[%s5108_s1 + $0x490] sm:$0xff]  }
  0x5b   :  { %3690 = vmatpush3.bf16.msra.mxu0 %v3978_v51  ;;  %v4032_v51 = vld [vmem:[%s5108_s1 + $0x4d8] sm:$0xff]  }
  0x5c   :  { %3691 = vmatprep.subr.bf16.mxu0 %v3981_v54  ;;  %v4033_v54 = vld [vmem:[%s5108_s1 + $0x498] sm:$0xff]  }
  0x5d   :  { %3712 = vmatpush3.bf16.msra.mxu1 %v3980_v55  ;;  %v4036_v55 = vld [vmem:[%s5108_s1 + $0x4e0] sm:$0xff]  }
  0x5e   :  { %3713 = vmatprep.subr.bf16.mxu1 %v3983_v58  ;;  %v4037_v58 = vld [vmem:[%s5108_s1 + $0x4a0] sm:$0xff]  }
  0x5f   :  { %3692 = vmatpush3.bf16.msra.mxu0 %v3982_v59  ;;  %v4040_v59 = vld [vmem:[%s5108_s1 + $0x4e8] sm:$0xff]  }
  0x60   :  { %3721 = vmatprep.subr.bf16.mxu0 %v3985_v62  ;;  %v29_v62 = vld [vmem:[%s5107_s0 + $0x10] sm:$0xff] }
  0x61   :  { %3714 = vmatpush3.bf16.msra.mxu1 %v3984_v63  ;;  %v4041_v63 = vld [vmem:[%s5108_s1 + $0x4a8] sm:$0xff]  }
  0x62   :  { %1992 = vmatmul.mubr.bf16.vlgmr.msra.gmra.mrb[8].mxu0 %v506_v61  ;;  %3743 = vmatprep.subr.bf16.mxu1 %v3987_v1  ;;  %v4042_v61 = vld [vmem:[%s5108_s1 + $0x470] sm:$0xff]   ;;  %v532_v1 = vcombine.high %v29_v62, %v29_v62 }
  0x63   :  { %3722 = vmatpush3.bf16.msra.mxu0 %v3986_v2  ;;  %2071 = vmatprep.mubr.bf16.mxu0 %v527_v0  ;;  %v539_v0 = vrot.slane %v29_v62, %v4308_v41  ;;  %v4044_v2 = vld [vmem:[%s5108_s1 + $0x4f0] sm:$0xff]  }
  0x64   :  { %2032 = vmatmul.mubr.bf16.vlgmr.msra.gmra.mrb[8].mxu1 %v528_v3  ;;  %3723 = vmatprep.subr.bf16.mxu0 %v3989_v4  ;;  %v4043_v3 = vld [vmem:[%s5108_s1 + $0x430] sm:$0xff]  }
  0x65   :  { %3744 = vmatpush3.bf16.msra.mxu1 %v3988_v5  ;;  %2111 = vmatprep.mubr.bf16.mxu1 %v531_v6  ;;  %v547_v4 = vcombine.high %v539_v0, %v539_v0  ;;  %v4703_v5 = vrot.slane %v532_v1, %v4308_v41  ;;  %v4046_v6 = vld [vmem:[%s5108_s1 + $0x478] sm:$0xff]  }
  0x66   :  { %3745 = vmatprep.subr.bf16.mxu1 %v3991_v7  ;;  %v4045_v7 = vld [vmem:[%s5108_s1 + $0x4b0] sm:$0xff]  }
  0x67   :  { %3724 = vmatpush3.bf16.msra.mxu0 %v3990_v8  ;;  %v569_v8 = vrot.slane %v547_v4, %v4308_v41 }
  0x68   :  { %3725 = vmatprep.subr.bf16.mxu0 %v3993_v9  ;;  %v548_v9 = vcombine.high %v4703_v5, %v4703_v5 }
  0x69   :  { %3746 = vmatpush3.bf16.msra.mxu1 %v3992_v10  ;;  %v4048_v10 = vld [vmem:[%s5108_s1 + $0x4f8] sm:$0xff]  }
  0x6a   :  { %3747 = vmatprep.subr.bf16.mxu1 %v3995_v11  ;;  %v4047_v11 = vld [vmem:[%s5108_s1 + $0x438] sm:$0xff]  }
  0x6b   :  { %3726 = vmatpush3.bf16.msra.mxu0 %v3994_v12  ;;  %v579_v12 = vcombine.high %v569_v8, %v569_v8 }
  0x6c   :  { %3727 = vmatprep.subr.bf16.mxu0 %v3997_v13  ;;  %v555_v13 = vrot.slane %v539_v0, %v4308_v41 }
  0x6d   :  { %3748 = vmatpush3.bf16.msra.mxu1 %v3996_v14  ;;  %v4050_v14 = vld [vmem:[%s5108_s1 + $0x540] sm:$0xff]  }
  0x6e   :  { %3749 = vmatprep.subr.bf16.mxu1 %v3999_v15  ;;  %v4049_v15 = vld [vmem:[%s5108_s1 + $0x4b8] sm:$0xff]  }
  0x6f   :  { %3728 = vmatpush3.bf16.msra.mxu0 %v3998_v16  ;;  %v576_v16 = vrot.slane %v548_v9, %v4308_v41 }
  0x70   :  { %3729 = vmatprep.subr.bf16.mxu0 %v4001_v17  ;;  %v4052_v17 = vld [vmem:[%s5108_s1 + $0x5c0] sm:$0xff]  }
  0x71   :  { %3750 = vmatpush3.bf16.msra.mxu1 %v4000_v18  ;;  %v4051_v18 = vld [vmem:[%s5108_s1 + $0x500] sm:$0xff]  }
  0x72   :  { %3751 = vmatprep.subr.bf16.mxu1 %v4003_v19  ;;  %v577_v19 = vcombine.high %v555_v13, %v555_v13 }
  0x73   :  { %3730 = vmatpush3.bf16.msra.mxu0 %v4002_v20  ;;  %v4054_v20 = vld [vmem:[%s5108_s1 + $0x548] sm:$0xff]  }
  0x74   :  { %3731 = vmatprep.subr.bf16.mxu0 %v4005_v21  ;;  %v4053_v21 = vld [vmem:[%s5108_s1 + $0x580] sm:$0xff]  }
  0x75   :  { %3752 = vmatpush3.bf16.msra.mxu1 %v4004_v22  ;;  %v580_v22 = vcombine.high %v576_v16, %v576_v16 }
  0x76   :  { %3753 = vmatprep.subr.bf16.mxu1 %v4007_v23  ;;  %v4056_v23 = vld [vmem:[%s5108_s1 + $0x5c8] sm:$0xff]  }
  0x77   :  { %3732 = vmatpush3.bf16.msra.mxu0 %v4006_v24  ;;  %v4055_v24 = vld [vmem:[%s5108_s1 + $0x508] sm:$0xff]  }
  0x78   :  { %3733 = vmatprep.subr.bf16.mxu0 %v4009_v25  ;;  %v4058_v25 = vld [vmem:[%s5108_s1 + $0x550] sm:$0xff]  }
  0x79   :  { %3754 = vmatpush3.bf16.msra.mxu1 %v4008_v26  ;;  %v4057_v26 = vld [vmem:[%s5108_s1 + $0x588] sm:$0xff]  }
  0x7a   :  { %3755 = vmatprep.subr.bf16.mxu1 %v4011_v27  ;;  %v4060_v27 = vld [vmem:[%s5108_s1 + $0x5d0] sm:$0xff]  }
  0x7b   :  { %3734 = vmatpush3.bf16.msra.mxu0 %v4010_v28  ;;  %v4059_v28 = vld [vmem:[%s5108_s1 + $0x510] sm:$0xff]  }
  0x7c   :  { %3735 = vmatprep.subr.bf16.mxu0 %v4013_v29  ;;  %v4062_v29 = vld [vmem:[%s5108_s1 + $0x558] sm:$0xff]  }
  0x7d   :  { %3756 = vmatpush3.bf16.msra.mxu1 %v4012_v30  ;;  %v4061_v30 = vld [vmem:[%s5108_s1 + $0x590] sm:$0xff]  }
  0x7e   :  { %3757 = vmatprep.subr.bf16.mxu1 %v4015_v31  ;;  %v4064_v31 = vld [vmem:[%s5108_s1 + $0x5d8] sm:$0xff]  }
  0x7f   :  { %3736 = vmatpush3.bf16.msra.mxu0 %v4014_v33  ;;  %v4063_v33 = vld [vmem:[%s5108_s1 + $0x518] sm:$0xff]  }
  0x80   :  { %3765 = vmatprep.subr.bf16.mxu0 %v4018_v35  ;;  %v4065_v35 = vld [vmem:[%s5108_s1 + $0x598] sm:$0xff]  }
  0x81   :  { %3758 = vmatpush3.bf16.msra.mxu1 %v4017_v36  ;;  %v4068_v36 = vld [vmem:[%s5108_s1 + $0x5e0] sm:$0xff]  }
  0x82   :  { %2072 = vmatmul.mubr.bf16.vlgmr.msra.gmra.mrb[12].mxu0 %v513_v34  ;;  %3787 = vmatprep.subr.bf16.mxu1 %v4020_v37  ;;  %v4066_v34 = vld [vmem:[%s5108_s1 + $0x560] sm:$0xff]  }
  0x83   :  { %3766 = vmatpush3.bf16.msra.mxu0 %v4019_v38  ;;  %2151 = vmatprep.mubr.bf16.mxu0 %v569_v8  ;;  %v4067_v37 = vld [vmem:[%s5108_s1 + $0x520] sm:$0xff]   ;;  %v4070_v38 = vld [vmem:[%s5108_s1 + $0x568] sm:$0xff]  }
  0x84   :  { %2112 = vmatmul.mubr.bf16.vlgmr.msra.gmra.mrb[12].mxu1 %v529_v39  ;;  %3767 = vmatprep.subr.bf16.mxu0 %v4022_v40  ;;  %v4069_v39 = vld [vmem:[%s5108_s1 + $0x5a0] sm:$0xff]   ;;  %v4072_v40 = vld [vmem:[%s5108_s1 + $0x5e8] sm:$0xff]  }
  0x85   :  { %3788 = vmatpush3.bf16.msra.mxu1 %v4021_v42  ;;  %2191 = vmatprep.mubr.bf16.mxu1 %v579_v12  ;;  %v4071_v42 = vld [vmem:[%s5108_s1 + $0x528] sm:$0xff]  }
  0x86   :  { %3789 = vmatprep.subr.bf16.mxu1 %v4024_v43  ;;  %v4074_v43 = vld [vmem:[%s5108_s1 + $0x570] sm:$0xff]  }
  0x87   :  { %3768 = vmatpush3.bf16.msra.mxu0 %v4023_v44  ;;  %v4073_v44 = vld [vmem:[%s5108_s1 + $0x5a8] sm:$0xff]  }
  0x88   :  { %3769 = vmatprep.subr.bf16.mxu0 %v4026_v45  ;;  %v4076_v45 = vld [vmem:[%s5108_s1 + $0x5f0] sm:$0xff]  }
  0x89   :  { %3790 = vmatpush3.bf16.msra.mxu1 %v4025_v46  ;;  %v4075_v46 = vld [vmem:[%s5108_s1 + $0x530] sm:$0xff]  }
  0x8a   :  { %3791 = vmatprep.subr.bf16.mxu1 %v4028_v47  ;;  %v4078_v47 = vld [vmem:[%s5108_s1 + $0x578] sm:$0xff]  }
  0x8b   :  { %3770 = vmatpush3.bf16.msra.mxu0 %v4027_v48  ;;  %v4077_v48 = vld [vmem:[%s5108_s1 + $0x5b0] sm:$0xff]  }
  0x8c   :  { %3771 = vmatprep.subr.bf16.mxu0 %v4030_v49  ;;  %v4079_v49 = vld [vmem:[%s5108_s1 + $0x538] sm:$0xff]  }
  0x8d   :  { %3792 = vmatpush3.bf16.msra.mxu1 %v4029_v50  ;;  %v4080_v50 = vld [vmem:[%s5108_s1 + $0x5f8] sm:$0xff]  }
  0x8e   :  { %3793 = vmatprep.subr.bf16.mxu1 %v4032_v51  ;;  %v4082_v51 = vld [vmem:[%s5108_s1 + $0x5b8] sm:$0xff]  }
  0x8f   :  { %3772 = vmatpush3.bf16.msra.mxu0 %v4031_v52  ;;  %v2351_v52 = vld [vmem:[%s5110_s3] sm:$0x3] }
  0x90   :  { %3773 = vmatprep.subr.bf16.mxu0 %v4034_v53  ;;  %v562_v53 = vrot.slane %v4703_v5, %v4308_v41  ;;  %2353 = vrot.lane.b32.xlu0 %v2351_v52, %s4153_s25 }
  0x91   :  { %3794 = vmatpush3.bf16.msra.mxu1 %v4033_v54  ;;  %v4083_v54 = vld [vmem:[%s5108_s1 + $0x600] sm:$0xff]  }
  0x92   :  { %3795 = vmatprep.subr.bf16.mxu1 %v4036_v55  ;;  %v4154_v55 = vmov 0.0  }
  0x93   :  { %3774 = vmatpush3.bf16.msra.mxu0 %v4035_v56  ;;  %v578_v56 = vcombine.high %v562_v53, %v562_v53 }
  0x94   :  { %3775 = vmatprep.subr.bf16.mxu0 %v4038_v57  ;;  %v4084_v57 = vld [vmem:[%s5108_s1 + $0x608] sm:$0xff]  }
  0x95   :  { %3796 = vmatpush3.bf16.msra.mxu1 %v4037_v58 }
  0x96   :  { %3797 = vmatprep.subr.bf16.mxu1 %v4040_v59 }
  0x97   :  { %3776 = vmatpush3.bf16.msra.mxu0 %v4039_v60 }
  0x98   :  { %3777 = vmatprep.subr.bf16.mxu0 %v4042_v61 }
  0x99   :  { %3798 = vmatpush3.bf16.msra.mxu1 %v4041_v63 }
  0x9a   :  { %3799 = vmatprep.subr.bf16.mxu1 %v4044_v2 }
  0x9b   :  { %3778 = vmatpush3.bf16.msra.mxu0 %v4043_v3 }
  0x9c   :  { %3779 = vmatprep.subr.bf16.mxu0 %v4046_v6 }
  0x9d   :  { %3800 = vmatpush3.bf16.msra.mxu1 %v4045_v7 }
  0x9e   :  { %3801 = vmatprep.subr.bf16.mxu1 %v4048_v10 }
  0x9f   :  { %3780 = vmatpush3.bf16.msra.mxu0 %v4047_v11 }
  0xa0   :  { %3809 = vmatprep.subr.bf16.mxu0 %v4050_v14 }
  0xa1   :  { %3802 = vmatpush3.bf16.msra.mxu1 %v4049_v15 }
  0xa2   :  { %2152 = vmatmul.mubr.bf16.vlgmr.msra.gmra.mrb[16].mxu0 %v555_v13  ;;  %3831 = vmatprep.subr.bf16.mxu1 %v4052_v17 }
  0xa3   :  { %3810 = vmatpush3.bf16.msra.mxu0 %v4051_v18  ;;  %2231 = vmatprep.mubr.bf16.mxu0 %v576_v16 }
  0xa4   :  { %2192 = vmatmul.mubr.bf16.vlgmr.msra.gmra.mrb[16].mxu1 %v577_v19  ;;  %3811 = vmatprep.subr.bf16.mxu0 %v4054_v20 }
  0xa5   :  { %3832 = vmatpush3.bf16.msra.mxu1 %v4053_v21  ;;  %2271 = vmatprep.mubr.bf16.mxu1 %v580_v22 }
  0xa6   :  { %3833 = vmatprep.subr.bf16.mxu1 %v4056_v23 }
  0xa7   :  { %3812 = vmatpush3.bf16.msra.mxu0 %v4055_v24 }
  0xa8   :  { %3813 = vmatprep.subr.bf16.mxu0 %v4058_v25 }
  0xa9   :  { %3834 = vmatpush3.bf16.msra.mxu1 %v4057_v26 }
  0xaa   :  { %3835 = vmatprep.subr.bf16.mxu1 %v4060_v27 }
  0xab   :  { %3814 = vmatpush3.bf16.msra.mxu0 %v4059_v28 }
  0xac   :  { %3815 = vmatprep.subr.bf16.mxu0 %v4062_v29 }
  0xad   :  { %3836 = vmatpush3.bf16.msra.mxu1 %v4061_v30 }
  0xae   :  { %3837 = vmatprep.subr.bf16.mxu1 %v4064_v31 }
  0xaf   :  { %3816 = vmatpush3.bf16.msra.mxu0 %v4063_v33 }
  0xb0   :  { %3817 = vmatprep.subr.bf16.mxu0 %v4066_v34 }
  0xb1   :  { %3838 = vmatpush3.bf16.msra.mxu1 %v4065_v35 }
  0xb2   :  { %3839 = vmatprep.subr.bf16.mxu1 %v4068_v36 }
  0xb3   :  { %3818 = vmatpush3.bf16.msra.mxu0 %v4067_v37 }
  0xb4   :  { %3819 = vmatprep.subr.bf16.mxu0 %v4070_v38 }
  0xb5   :  { %3840 = vmatpush3.bf16.msra.mxu1 %v4069_v39 }
  0xb6   :  { %3841 = vmatprep.subr.bf16.mxu1 %v4072_v40 }
  0xb7   :  { %3820 = vmatpush3.bf16.msra.mxu0 %v4071_v42 }
  0xb8   :  { %3821 = vmatprep.subr.bf16.mxu0 %v4074_v43 }
  0xb9   :  { %3842 = vmatpush3.bf16.msra.mxu1 %v4073_v44 }
  0xba   :  { %3843 = vmatprep.subr.bf16.mxu1 %v4076_v45 }
  0xbb   :  { %3822 = vmatpush3.bf16.msra.mxu0 %v4075_v46 }
  0xbc   :  { %3823 = vmatprep.subr.bf16.mxu0 %v4078_v47 }
  0xbd   :  { %3844 = vmatpush3.bf16.msra.mxu1 %v4077_v48 }
  0xbe   :  { %3845 = vmatprep.subr.bf16.mxu1 %v4080_v50 }
  0xbf   :  { %3824 = vmatpush3.bf16.msra.mxu0 %v4079_v49 }
  0xc0   :  { %3860 = vmatprep.subr.bf16.mxu0 %v4154_v55 }
  0xc1   :  { %3846 = vmatpush3.bf16.msra.mxu1 %v4082_v51 }
  0xc2   :  { %2232 = vmatmul.mubr.bf16.vlgmr.msra.gmra.mrb[20].mxu0 %v562_v53 }
  0xc3   :  { %3861 = vmatpush3.bf16.msra.mxu0 %v4083_v54  ;;  %3868 = vmatprep.mubr.msk.bf16.mxu0 %vm4155_vm0, %v4154_v55 }
  0xc4   :  { %2272 = vmatmul.mubr.bf16.vlgmr.msra.gmra.mrb[20].mxu1 %v578_v56  ;;  %3862 = vmatprep.subr.bf16.mxu0 %v4154_v55 }
  0xc5   :  { %13 = vsyncpa [#allocation3], 0  ;;  %v4085_v58 = vld [vmem:[%s5108_s1 + $0x610] sm:$0xff]   ;;  %v4086_v59 = vld [vmem:[%s5108_s1 + $0x618] sm:$0xff]   ;;  %vm1795_vm1 = vcmask 523264   ;;  %s4157_s23 = smov 112  }
  0xc6   :  { %v3352_v60 = vld.sshfl [vmem:[%s5107_s0 + $0x18] sm:$0x1 pattern:$0x75316420]  ;;  %v3351_v63 = vld [vmem:[%s5109_s2] ss:$0 sm:$0xff] }
  0xc7   :  { %3863 = vmatpush3.bf16.msra.mxu0 %v4084_v57  ;;  %v594_v61 = vrot.slane %v3352_v60, %v4308_v41  ;;  %vm2648_vm2 = vcmask 130048   ;;  %vm2333_vm3 = vcmask 123904   ;;  %vm3331_vm4 = vcmask 517120   ;;  %s4159_s3 = smov [#allocation2]  }
  0xc8   :  { %3864 = vmatprep.subr.bf16.mxu0 %v4154_v55  ;;  %s3341_s28 = sshll.u32 %s4159_s3, 4  ;;  %vm2346_vm5 = vcmask 0   ;;  %s3342_s28 = int_to_ptr.vmem [resolvable:$true] %s3341_s28 }
  0xc9   :  { %s4128_s30 = scalar_lea.vmem %s3342_s28, 16  ;;  %s4132_s8 = scalar_lea.vmem %s3342_s28, 32 }
  0xca   :  { %p4129_p0 = scmp.ne.s32.totalorder %s3342_s28, %s4128_s30  ;;  %p4133_p1 = scmp.lt.s32.totalorder %s3342_s28, %s3342_s28 }
  0xcb   :  { %3865 = vmatpush3.bf16.msra.mxu0 %v4085_v58  ;;  %p4134_p2 = scmp.lt.s32.totalorder %s4132_s8, %s4128_s30 }
  0xcc   :  { %3866 = vmatprep.subr.bf16.mxu0 %v4154_v55 }
  0xcd   :  { %p4135_p3 = por %p4134_p2, %p4133_p1 }
  0xcf   :  { %3867 = vmatpush3.bf16.msra.mxu0 %v4086_v59  ;;  %p4136_p4 = pnand %p4135_p3, %p4129_p0 }
  0xd2   :  { %3869 = vmatmul.mubr.msk.bf16.vlgmr.msra.gmra.mrb[24].mxu0 %vm1795_vm1, %v594_v61 }
  0xf5   :  { %v3605_v62 = vpop.f32.mrb[0].mxu0 }
  0xf6   :  { %v3606_v0 = vpop.f32.mrb[1].mxu0 }
  0xf7   :  { %v3607_v1 = vadd.f32 %v3606_v0, %v3605_v62  ;;  %v3608_v2 = vpop.f32.mrb[2].mxu0  ;;  %v3627_v3 = vpop.f32.mrb[0].mxu1 }
  0xf8   :  { %v3609_v4 = vpop.f32.mrb[3].mxu0  ;;  %v3628_v5 = vpop.f32.mrb[1].mxu1 }
  0xf9   :  { %v1834_v6 = vadd.f32 %v3607_v1, %v3351_v63  ;;  %v3629_v7 = vadd.f32 %v3628_v5, %v3627_v3  ;;  %v3630_v8 = vpop.f32.mrb[2].mxu1 }
  0xfa   :  { %v3631_v9 = vpop.f32.mrb[3].mxu1 }
  0xfb   :  { %v1874_v10 = vadd.f32 %v3629_v7, %v1834_v6 }
 0x115   :  { %v3649_v41 = vpop.f32.mrb[4].mxu0 }
 0x116   :  { %v3650_v11 = vpop.f32.mrb[5].mxu0 }
 0x117   :  { %v3651_v12 = vadd.f32 %v3650_v11, %v3649_v41  ;;  %v3652_v13 = vpop.f32.mrb[6].mxu0  ;;  %v3671_v14 = vpop.f32.mrb[4].mxu1 }
 0x118   :  { %v3653_v15 = vpop.f32.mrb[7].mxu0  ;;  %v3672_v16 = vpop.f32.mrb[5].mxu1 }
 0x119   :  { %v1914_v17 = vadd.f32 %v3651_v12, %v1874_v10  ;;  %v3673_v18 = vadd.f32 %v3672_v16, %v3671_v14  ;;  %v3674_v19 = vpop.f32.mrb[6].mxu1  ;;  %v4089_v16 = vld [vmem:[%s5111_s4 + $0x4] ss:$100 sps:$4 sm:$0xff]  }
 0x11a   :  { %v3675_v20 = vpop.f32.mrb[7].mxu1  ;;  %v4090_v19 = vld [vmem:[%s5111_s4 + $0x10] ss:$100 sps:$4 sm:$0xff]   ;;  %2652 = vmatprep.subr.bf16.mxu1 %v4089_v16  ;;  %v4992_v16 = vsub.s32 3, %v4293_v32 }
 0x11b   :  { %v1954_v21 = vadd.f32 %v3673_v18, %v1914_v17  ;;  %v4092_v17 = vld [vmem:[%s5111_s4 + $0x14] ss:$100 sps:$4 sm:$0xff]   ;;  %v4087_v18 = vld [vmem:[%s5111_s4] ss:$100 sps:$4 sm:$0xff]   ;;  %v4156_v20 = vmov 0  }
 0x11c   :  { %2734 = vmatprep.subr.bf16.mxu0 %v4092_v17  ;;  %2653 = vmatpush1.bf16.msra.mxu1 %v4087_v18 }
 0x11d   :  { %2735 = vmatpush1.bf16.msra.mxu0 %v4090_v19  ;;  %2684 = vmatprep.mubr.bf16.mxu1 %v4156_v20 }
 0x11e   :  { %2766 = vmatprep.mubr.bf16.mxu0 %v4156_v20 }
 0x135   :  { %v3693_v22 = vpop.f32.mrb[8].mxu0 }
 0x136   :  { %v3694_v23 = vpop.f32.mrb[9].mxu0 }
 0x137   :  { %v3695_v24 = vadd.f32 %v3694_v23, %v3693_v22  ;;  %v3696_v25 = vpop.f32.mrb[10].mxu0  ;;  %v3715_v26 = vpop.f32.mrb[8].mxu1  ;;  %v4098_v22 = vld [vmem:[%s5111_s4 + $0x24] ss:$100 sps:$4 sm:$0xff]  }
 0x138   :  { %v3697_v27 = vpop.f32.mrb[11].mxu0  ;;  %v3716_v28 = vpop.f32.mrb[9].mxu1  ;;  %2816 = vmatprep.subr.bf16.mxu0 %v4098_v22 }
 0x139   :  { %v1994_v29 = vadd.f32 %v3695_v24, %v1954_v21  ;;  %v3717_v30 = vadd.f32 %v3716_v28, %v3715_v26  ;;  %v3718_v31 = vpop.f32.mrb[10].mxu1  ;;  %v4095_v21 = vld [vmem:[%s5111_s4 + $0xc] ss:$100 sps:$4 sm:$0xff]   ;;  %v2354_v23 = vpop.permute.xlu0 %2353 }
 0x13a   :  { %v3719_v33 = vpop.f32.mrb[11].mxu1  ;;  %2693 = vmatprep.subr.bf16.mxu1 %v4095_v21 }
 0x13b   :  { %v2034_v34 = vadd.f32 %v3717_v30, %v1994_v29 }
 0x155   :  { %v3737_v35 = vpop.f32.mrb[12].mxu0 }
 0x156   :  { %v3738_v36 = vpop.f32.mrb[13].mxu0 }
 0x157   :  { %v3739_v37 = vadd.f32 %v3738_v36, %v3737_v35  ;;  %v3740_v38 = vpop.f32.mrb[14].mxu0  ;;  %v3759_v39 = vpop.f32.mrb[12].mxu1  ;;  %v4093_v35 = vld [vmem:[%s5111_s4 + $0x8] ss:$100 sps:$4 sm:$0xff]   ;;  %v4096_v36 = vld [vmem:[%s5111_s4 + $0x20] ss:$100 sps:$4 sm:$0xff]  }
 0x158   :  { %v3741_v40 = vpop.f32.mrb[15].mxu0  ;;  %v3760_v42 = vpop.f32.mrb[13].mxu1  ;;  %v4101_v38 = vld [vmem:[%s5111_s4 + $0x1c] ss:$100 sps:$4 sm:$0xff]  }
 0x159   :  { %v2074_v43 = vadd.f32 %v3739_v37, %v2034_v34  ;;  %v3761_v44 = vadd.f32 %v3760_v42, %v3759_v39  ;;  %v3762_v45 = vpop.f32.mrb[14].mxu1  ;;  %v4104_v39 = vld [vmem:[%s5111_s4 + $0x34] ss:$100 sps:$4 sm:$0xff]  }
 0x15a   :  { %v3763_v46 = vpop.f32.mrb[15].mxu1  ;;  %v4099_v40 = vld [vmem:[%s5111_s4 + $0x18] ss:$100 sps:$4 sm:$0xff]   ;;  %v4102_v42 = vld [vmem:[%s5111_s4 + $0x30] ss:$100 sps:$4 sm:$0xff]  }
 0x15b   :  { %v2114_v47 = vadd.f32 %v3761_v44, %v2074_v43  ;;  %v4107_v43 = vld [vmem:[%s5111_s4 + $0x2c] ss:$100 sps:$4 sm:$0xff]   ;;  %v4110_v44 = vld [vmem:[%s5111_s4 + $0x44] ss:$100 sps:$4 sm:$0xff]  }
 0x15c   :  { %v4105_v45 = vld [vmem:[%s5111_s4 + $0x28] ss:$100 sps:$4 sm:$0xff]   ;;  %v4108_v46 = vld [vmem:[%s5111_s4 + $0x40] ss:$100 sps:$4 sm:$0xff]  }
 0x175   :  { %v3781_v48 = vpop.f32.mrb[16].mxu0 }
 0x176   :  { %v3782_v49 = vpop.f32.mrb[17].mxu0 }
 0x177   :  { %v3783_v50 = vadd.f32 %v3782_v49, %v3781_v48  ;;  %v3784_v51 = vpop.f32.mrb[18].mxu0  ;;  %v3803_v52 = vpop.f32.mrb[16].mxu1  ;;  %v4116_v48 = vld [vmem:[%s5111_s4 + $0x54] ss:$100 sps:$4 sm:$0xff]  }
 0x178   :  { %v3785_v53 = vpop.f32.mrb[19].mxu0  ;;  %v3804_v54 = vpop.f32.mrb[17].mxu1  ;;  %v4111_v49 = vld [vmem:[%s5111_s4 + $0x38] ss:$100 sps:$4 sm:$0xff]   ;;  %v4119_v51 = vld [vmem:[%s5111_s4 + $0x4c] ss:$100 sps:$4 sm:$0xff]  }
 0x179   :  { %v2154_v56 = vadd.f32 %v3783_v50, %v2114_v47  ;;  %v3805_v57 = vadd.f32 %v3804_v54, %v3803_v52  ;;  %v3806_v58 = vpop.f32.mrb[18].mxu1  ;;  %v4113_v47 = vld [vmem:[%s5111_s4 + $0x3c] ss:$100 sps:$4 sm:$0xff]   ;;  %v4114_v50 = vld [vmem:[%s5111_s4 + $0x50] ss:$100 sps:$4 sm:$0xff]  }
 0x17a   :  { %v3807_v59 = vpop.f32.mrb[19].mxu1  ;;  %v4117_v52 = vld [vmem:[%s5111_s4 + $0x48] ss:$100 sps:$4 sm:$0xff]   ;;  %v4120_v53 = vld [vmem:[%s5111_s4 + $0x60] ss:$100 sps:$4 sm:$0xff]  }
 0x17b   :  { %v2194_v60 = vadd.f32 %v3805_v57, %v2154_v56  ;;  %v4123_v54 = vld [vmem:[%s5111_s4 + $0x5c] ss:$100 sps:$4 sm:$0xff]   ;;  %v4960_v59 = vsub.s32 4, %v4293_v32 }
 0x17c   :  { %v4121_v56 = vld [vmem:[%s5111_s4 + $0x58] ss:$100 sps:$4 sm:$0xff]  }
 0x195   :  { %v3825_v61 = vpop.f32.mrb[20].mxu0 }
 0x196   :  { %v3826_v62 = vpop.f32.mrb[21].mxu0 }
 0x197   :  { %v3827_v63 = vadd.f32 %v3826_v62, %v3825_v61  ;;  %v3828_v0 = vpop.f32.mrb[22].mxu0  ;;  %v3847_v1 = vpop.f32.mrb[20].mxu1  ;;  %v4968_v61 = vsub.s32 1, %v4293_v32  ;;  %v4971_v62 = vsub.s32 5, %v4293_v32 }
 0x198   :  { %v3829_v2 = vpop.f32.mrb[23].mxu0  ;;  %v3848_v3 = vpop.f32.mrb[21].mxu1 }
 0x199   :  { %v2234_v4 = vadd.f32 %v3827_v63, %v2194_v60  ;;  %v3849_v5 = vadd.f32 %v3848_v3, %v3847_v1  ;;  %v3850_v6 = vpop.f32.mrb[22].mxu1  ;;  %v4965_v60 = vld [vmem:[%s5112_s5] sm:$0xff] }
 0x19a   :  { %v3851_v7 = vpop.f32.mrb[23].mxu1  ;;  %v2416_v0 = vrot.slane %v4965_v60, %v4960_v59  ;;  %v2404_v1 = vrot.slane %v4965_v60, %v4968_v61  ;;  %v2420_v2 = vrot.slane %v4965_v60, %v4971_v62 }
 0x19b   :  { %v2274_v8 = vadd.f32 %v3849_v5, %v2234_v4 }
 0x1a5   :  { %v2313_v9 = vpop.f32.mrb[24].mxu0 }
 0x1a6   :  { %v2314_v10 = vadd.f32 %v2313_v9, %v2274_v8  ;;  %v3870_v41 = vpop.f32.mrb[25].mxu0  ;;  %v4984_v9 = vsub.s32 2, %v4293_v32 }
 0x1a7   :  { %v2316_v11 = vpop.f32.mrb[26].mxu0  ;;  %v4158_v41 = vmov 1983009808  }
 0x1a8   :  { %v3871_v12 = vpop.f32.mrb[27].mxu0  ;;  %v2323_v13 = vmul.f32 %v2314_v10, %v2314_v10  ;;  %v2348_v14 = vmul.f32 0.5, %v2314_v10  ;;  %v2320_v26 = vmul.f32 1.442695, %v2314_v10  ;;  %v2319_v28 = vadd.f32 1.0, %v2314_v10 }
 0x1a9   :  { %v3212_v11 = vunpack.c.l.s4 %v4158_v41  ;;  %v2408_v21 = vrot.slane %v4965_v60, %v4984_v9 }
 0x1aa   :  { %2325 = vrot.lane.b32.xlu1 %v2323_v13, %s4153_s25  ;;  %v2349_v15 = vmul.f32 1.442695, %v2348_v14 }
 0x1ac   :  { %4124 = vpow2.f32 %v2349_v15  ;;  %v4989_v15 = vld [vmem:[%s5112_s5 + $0x8] sm:$0xff] }
 0x1ad   :  { %4126 = vpow2.f32 %v2320_v26  ;;  %v2444_v41 = vrot.slane %v4989_v15, %v4992_v16 }
 0x1b6   :  { %v4125_v24 = vpop.eup %4124 }
 0x1b7   :  { %v2356_v25 = vmul.f32 %v4125_v24, %v2354_v23  ;;  %v4127_v27 = vpop.eup %4126  ;;  %v3213_v23 = vunpack.c.0.s8 %v3212_v11  ;;  %v2412_v24 = vrot.slane %v4965_v60, %v4992_v16 }
 0x1b8   :  { %v2322_v29 = vsub.f32 %v2319_v28, %v4127_v27 }
 0x1b9   :  { %2358 = vrot.lane.b32.xlu0 %v2356_v25, %s4157_s23  ;;  %v2436_v25 = vrot.slane %v4989_v15, %v4968_v61 }
 0x21c   :  { %v2326_v30 = vpop.permute.xlu1 %2325 }
 0x21d   :  { %v2328_v31 = vsub.f32 %v2322_v29, %v2326_v30 }
 0x21f   :  { %2330 = vrot.lane.b32.xlu1 %v2328_v31, %s4157_s23 }
 0x22b   :  { %v2359_v33 = vpop.permute.xlu0 %2358 }
 0x22c   :  { %v2361_v34 = vadd.f32 %v2359_v33, %v2314_v10  ;;  %v5006_v33 = vsub.s32 6, %v4293_v32 }
 0x22e   :  { %v2362_v37 = vpack.c.bf16 %v2361_v34, %v2361_v34  ;;  %v5009_v34 = vsub.s32 %v3213_v23, %v4293_v32 }
 0x230   :  { %3576 = vmatmul.mubr.msk.bf16.vlgmr.msra.gmra.mrb[24].mxu1 %vm2648_vm2, %v2362_v37  ;;  %3578 = vmatmul.mubr.msk.bf16.vlgmr.msra.gmra.mrb[28].mxu0 %vm2648_vm2, %v2362_v37 }
 0x231   :  { %2694 = vmatpush1.bf16.msra.mxu1 %v4093_v35  ;;  %2817 = vmatpush1.bf16.msra.mxu0 %v4096_v36 }
 0x232   :  { %2725 = vmatprep.mubr.bf16.mxu1 %v4156_v20  ;;  %2848 = vmatprep.mubr.bf16.mxu0 %v4156_v20 }
 0x233   :  { %2775 = vmatprep.subr.bf16.mxu1 %v4101_v38  ;;  %2898 = vmatprep.subr.bf16.mxu0 %v4104_v39  ;;  %v5012_v39 = vsub.s32 7, %v4293_v32 }
 0x238   :  { %3577 = vmatmul.mubr.msk.bf16.vlgmr.msra.gmra.mrb[28].mxu1 %vm2648_vm2, %v2362_v37  ;;  %3580 = vmatmul.mubr.msk.bf16.vlgmr.msra.gmra.mrb[32].mxu0 %vm2648_vm2, %v2362_v37 }
 0x239   :  { %2776 = vmatpush1.bf16.msra.mxu1 %v4099_v40  ;;  %2899 = vmatpush1.bf16.msra.mxu0 %v4102_v42 }
 0x23a   :  { %2807 = vmatprep.mubr.bf16.mxu1 %v4156_v20  ;;  %2930 = vmatprep.mubr.bf16.mxu0 %v4156_v20 }
 0x23b   :  { %2857 = vmatprep.subr.bf16.mxu1 %v4107_v43  ;;  %2980 = vmatprep.subr.bf16.mxu0 %v4110_v44 }
 0x240   :  { %3579 = vmatmul.mubr.msk.bf16.vlgmr.msra.gmra.mrb[32].mxu1 %vm2648_vm2, %v2362_v37  ;;  %3582 = vmatmul.mubr.msk.bf16.vlgmr.msra.gmra.mrb[36].mxu0 %vm2648_vm2, %v2362_v37 }
 0x241   :  { %2858 = vmatpush1.bf16.msra.mxu1 %v4105_v45  ;;  %2981 = vmatpush1.bf16.msra.mxu0 %v4108_v46  ;;  %v2424_v45 = vrot.slane %v4965_v60, %v5006_v33  ;;  %v2448_v46 = vrot.slane %v4989_v15, %v4960_v59 }
 0x242   :  { %2889 = vmatprep.mubr.bf16.mxu1 %v4156_v20  ;;  %3012 = vmatprep.mubr.bf16.mxu0 %v4156_v20 }
 0x243   :  { %2939 = vmatprep.subr.bf16.mxu1 %v4113_v47  ;;  %3062 = vmatprep.subr.bf16.mxu0 %v4116_v48 }
 0x248   :  { %3581 = vmatmul.mubr.msk.bf16.vlgmr.msra.gmra.mrb[36].mxu1 %vm2648_vm2, %v2362_v37  ;;  %3584 = vmatmul.mubr.msk.bf16.vlgmr.msra.gmra.mrb[40].mxu0 %vm2648_vm2, %v2362_v37 }
 0x249   :  { %2940 = vmatpush1.bf16.msra.mxu1 %v4111_v49  ;;  %3063 = vmatpush1.bf16.msra.mxu0 %v4114_v50  ;;  %v2428_v49 = vrot.slane %v4965_v60, %v5012_v39 }
 0x24a   :  { %2971 = vmatprep.mubr.bf16.mxu1 %v4156_v20  ;;  %3094 = vmatprep.mubr.bf16.mxu0 %v4156_v20 }
 0x24b   :  { %3021 = vmatprep.subr.bf16.mxu1 %v4119_v51  ;;  %3872 = vmatprep.subr.bf16.mxu0 %v4154_v55 }
 0x250   :  { %3583 = vmatmul.mubr.msk.bf16.vlgmr.msra.gmra.mrb[40].mxu1 %vm2648_vm2, %v2362_v37  ;;  %3586 = vmatmul.mubr.msk.bf16.vlgmr.msra.gmra.mrb[44].mxu0 %vm2648_vm2, %v2362_v37 }
 0x251   :  { %3022 = vmatpush1.bf16.msra.mxu1 %v4117_v52  ;;  %3873 = vmatpush3.bf16.msra.mxu0 %v4120_v53 }
 0x252   :  { %3053 = vmatprep.mubr.bf16.mxu1 %v4156_v20  ;;  %3874 = vmatprep.mubr.msk.bf16.mxu0 %vm4155_vm0, %v4154_v55  ;;  %v4957_v55 = vsub.s32 0, %v4293_v32  ;;  %v2452_v32 = vrot.slane %v4989_v15, %v4971_v62 }
 0x253   :  { %3103 = vmatprep.subr.bf16.mxu1 %v4123_v54 }
 0x254   :  { %v2400_v63 = vrot.slane %v4965_v60, %v4957_v55  ;;  %v2432_v22 = vrot.slane %v4989_v15, %v4957_v55  ;;  %v5033_v60 = vld [vmem:[%s5112_s5 + $0x10] sm:$0xff] }
 0x255   :  { %v2468_v11 = vrot.slane %v5033_v60, %v4968_v61 }
 0x258   :  { %3585 = vmatmul.mubr.msk.bf16.vlgmr.msra.gmra.mrb[44].mxu1 %vm2648_vm2, %v2362_v37  ;;  %3875 = vmatmul.mubr.msk.bf16.vlgmr.msra.gmra.mrb[48].mxu0 %vm2648_vm2, %v2362_v37 }
 0x259   :  { %3104 = vmatpush1.bf16.msra.mxu1 %v4121_v56  ;;  %3135 = vmatprep.mubr.bf16.mxu1 %v4156_v20 }
 0x260   :  { %3587 = vmatmul.mubr.msk.bf16.vlgmr.msra.gmra.mrb[48].mxu1 %vm2648_vm2, %v2362_v37 }
 0x291   :  { %v2331_v57 = vpop.permute.xlu1 %2330 }
 0x292   :  { %v2334_v58 = vsel %vm2333_vm3, %v2331_v57, 0.0 }
 0x293   :  { %2335 = vadd.xlane.f32.xlu0 %v2334_v58 }
 0x303   :  { %v2686_v3 = vpop.f32.mrb[24].mxu1  ;;  %v2768_v4 = vpop.f32.mrb[28].mxu0 }
 0x304   :  { %v2687_v5 = vadd.f32 %v2686_v3, %v2400_v63  ;;  %v4981_v6 = vadd.f32 %v2768_v4, %v2416_v0  ;;  %v2688_v7 = vpop.f32.mrb[25].mxu1  ;;  %v2770_v8 = vpop.f32.mrb[29].mxu0 }
 0x305   :  { %v2689_v10 = vadd.f32 %v2688_v7, %v2404_v1  ;;  %v2771_v12 = vadd.f32 %v2770_v8, %v2420_v2  ;;  %v2690_v13 = vpop.f32.mrb[26].mxu1  ;;  %v2772_v14 = vpop.f32.mrb[30].mxu0  ;;  %v2464_v7 = vrot.slane %v5033_v60, %v4957_v55 }
 0x306   :  { %v2691_v17 = vpop.f32.mrb[27].mxu1  ;;  %v2773_v18 = vpop.f32.mrb[31].mxu0 }
 0x307   :  { %v3209_v19 = vcombine.low %v2687_v5, %v2689_v10  ;;  %v3226_v20 = vcombine.low %v4981_v6, %v2771_v12  ;;  %v2440_v6 = vrot.slane %v4989_v15, %v4984_v9 }
 0x309   :  { %v3217_v47 = vrot.slane %v3209_v19, %v5009_v34  ;;  %v3234_v8 = vrot.slane %v3226_v20, %v5009_v34 }
 0x30b   :  { %v2727_v26 = vpop.f32.mrb[28].mxu1  ;;  %v2850_v27 = vpop.f32.mrb[32].mxu0 }
 0x30c   :  { %v2728_v28 = vadd.f32 %v2727_v26, %v2408_v21  ;;  %v5003_v29 = vadd.f32 %v2850_v27, %v2432_v22  ;;  %v2729_v30 = vpop.f32.mrb[29].mxu1  ;;  %v2852_v31 = vpop.f32.mrb[33].mxu0 }
 0x30d   :  { %v2730_v35 = vadd.f32 %v2729_v30, %v2412_v24  ;;  %v2853_v36 = vadd.f32 %v2852_v31, %v2436_v25  ;;  %v2731_v37 = vpop.f32.mrb[30].mxu1  ;;  %v2854_v38 = vpop.f32.mrb[34].mxu0  ;;  %v2460_v30 = vrot.slane %v4989_v15, %v5012_v39 }
 0x30e   :  { %v2732_v40 = vpop.f32.mrb[31].mxu1  ;;  %v2855_v42 = vpop.f32.mrb[35].mxu0  ;;  %v2484_v37 = vrot.slane %v5033_v60, %v4971_v62 }
 0x30f   :  { %v3210_v43 = vcombine.low %v2728_v28, %v2730_v35  ;;  %v3243_v44 = vcombine.low %v5003_v29, %v2853_v36  ;;  %v2456_v28 = vrot.slane %v4989_v15, %v5006_v33  ;;  %v2480_v29 = vrot.slane %v5033_v60, %v4960_v59 }
 0x311   :  { %v3224_v48 = vrot.slane %v3210_v43, %v5009_v34  ;;  %v3251_v31 = vrot.slane %v3243_v44, %v5009_v34 }
 0x313   :  { %v3225_v50 = vcombine.low %v3217_v47, %v3224_v48  ;;  %v2809_v51 = vpop.f32.mrb[32].mxu1  ;;  %v2932_v52 = vpop.f32.mrb[36].mxu0 }
 0x314   :  { %v2810_v53 = vadd.f32 %v2809_v51, %v2424_v45  ;;  %v5025_v54 = vadd.f32 %v2932_v52, %v2448_v46  ;;  %v2811_v56 = vpop.f32.mrb[33].mxu1  ;;  %v2934_v57 = vpop.f32.mrb[37].mxu0 }
 0x315   :  { %3325 = vst [vmem:[%s5113_s6] sm:$0xff] %v3225_v50  ;;  %v2812_v58 = vadd.f32 %v2811_v56, %v2428_v49  ;;  %v2935_v63 = vadd.f32 %v2934_v57, %v2452_v32  ;;  %v2813_v0 = vpop.f32.mrb[34].mxu1  ;;  %v2936_v1 = vpop.f32.mrb[38].mxu0 }
 0x316   :  { %v2814_v2 = vpop.f32.mrb[35].mxu1  ;;  %v2937_v3 = vpop.f32.mrb[39].mxu0 }
 0x317   :  { %v3227_v4 = vcombine.low %v2810_v53, %v2812_v58  ;;  %v3260_v5 = vcombine.low %v5025_v54, %v2935_v63  ;;  %v2472_v54 = vrot.slane %v5033_v60, %v4984_v9  ;;  %v3550_v58 = vld [vmem:[%s5112_s5 + $0x18] ss:$0 sm:$0xff]  ;;  %v2476_v63 = vrot.slane %v5033_v60, %v4992_v16 }
 0x319   :  { %v3241_v10 = vrot.slane %v3227_v4, %v5009_v34  ;;  %v3268_v56 = vrot.slane %v3260_v5, %v5009_v34 }
 0x31b   :  { %v3242_v12 = vcombine.low %v3234_v8, %v3241_v10  ;;  %v2891_v13 = vpop.f32.mrb[36].mxu1  ;;  %v3014_v14 = vpop.f32.mrb[40].mxu0 }
 0x31c   :  { %v2892_v17 = vadd.f32 %v2891_v13, %v2440_v6  ;;  %v5046_v18 = vadd.f32 %v3014_v14, %v2464_v7  ;;  %v2893_v19 = vpop.f32.mrb[37].mxu1  ;;  %v3016_v21 = vpop.f32.mrb[41].mxu0  ;;  %v2488_v14 = vrot.slane %v5033_v60, %v5006_v33 }
 0x31d   :  { %3326 = vst [vmem:[%s5113_s6 + $0x8] sm:$0xff] %v3242_v12  ;;  %v2894_v55 = vadd.f32 %v2893_v19, %v2444_v41  ;;  %v3017_v20 = vadd.f32 %v3016_v21, %v2468_v11  ;;  %v2895_v22 = vpop.f32.mrb[38].mxu1  ;;  %v3018_v23 = vpop.f32.mrb[42].mxu0  ;;  %v2492_v19 = vrot.slane %v5033_v60, %v5012_v39 }
 0x31e   :  { %v2896_v24 = vpop.f32.mrb[39].mxu1  ;;  %v3019_v25 = vpop.f32.mrb[43].mxu0 }
 0x31f   :  { %v3244_v26 = vcombine.low %v2892_v17, %v2894_v55  ;;  %v3277_v61 = vcombine.low %v5046_v18, %v3017_v20 }
 0x320   :  { %v2336_v27 = vpop.xlane.xlu0 %2335 }
 0x321   :  { %v3258_v35 = vrot.slane %v3244_v26, %v5009_v34  ;;  %v2337_v36 = vrot.slane %v2336_v27, 4  ;;  %v3285_v17 = vrot.slane %v3277_v61, %v5009_v34 }
 0x323   :  { %v3259_v38 = vcombine.low %v3251_v31, %v3258_v35  ;;  %v2338_v40 = vadd.f32 %v2337_v36, %v2336_v27  ;;  %v2973_v42 = vpop.f32.mrb[40].mxu1  ;;  %v3096_v43 = vpop.f32.mrb[44].mxu0 }
 0x324   :  { %v2974_v45 = vadd.f32 %v2973_v42, %v2456_v28  ;;  %v3097_v46 = vadd.f32 %v3096_v43, %v2480_v29  ;;  %v2975_v47 = vpop.f32.mrb[41].mxu1  ;;  %v3098_v48 = vpop.f32.mrb[45].mxu0 }
 0x325   :  { %3327 = vst [vmem:[%s5113_s6 + $0x10] sm:$0xff] %v3259_v38  ;;  %v2339_v59 = vrot.slane %v2338_v40, 2  ;;  %v2976_v15 = vadd.f32 %v2975_v47, %v2460_v30  ;;  %v3099_v44 = vadd.f32 %v3098_v48, %v2484_v37  ;;  %v2977_v49 = vpop.f32.mrb[42].mxu1  ;;  %v3100_v32 = vpop.f32.mrb[46].mxu0 }
 0x326   :  { %v2978_v50 = vpop.f32.mrb[43].mxu1  ;;  %v3101_v51 = vpop.f32.mrb[47].mxu0 }
 0x327   :  { %v3261_v62 = vcombine.low %v2974_v45, %v2976_v15  ;;  %v3294_v52 = vcombine.low %v3097_v46, %v3099_v44  ;;  %v2340_v53 = vadd.f32 %v2339_v59, %v2338_v40 }
 0x329   :  { %v3275_v57 = vrot.slane %v3261_v62, %v5009_v34  ;;  %v2341_v0 = vrot.slane %v2340_v53, 1  ;;  %v3302_v33 = vrot.slane %v3294_v52, %v5009_v34 }
 0x32b   :  { %v3276_v1 = vcombine.low %v3268_v56, %v3275_v57  ;;  %v3055_v2 = vpop.f32.mrb[44].mxu1  ;;  %v3178_v3 = vpop.f32.mrb[48].mxu0  ;;  %v2342_v4 = vadd.f32 %v2341_v0, %v2340_v53 }
 0x32c   :  { %v3056_v6 = vadd.f32 %v3055_v2, %v2472_v54  ;;  %v3179_v7 = vadd.f32 %v3550_v58, %v3178_v3  ;;  %v3057_v8 = vpop.f32.mrb[45].mxu1  ;;  %v3876_v9 = vpop.f32.mrb[49].mxu0 }
 0x32d   :  { %3328 = vst [vmem:[%s5113_s6 + $0x18] sm:$0xff] %v3276_v1  ;;  %v3058_v5 = vadd.f32 %v3057_v8, %v2476_v63  ;;  %3878 = vpush %v2342_v4  ;;  %v3059_v10 = vpop.f32.mrb[46].mxu1  ;;  %v3181_v41 = vpop.f32.mrb[50].mxu0 }
 0x32e   :  { %v3317_v16 = vrot.slane %v3179_v7, %v5009_v34  ;;  %v3060_v11 = vpop.f32.mrb[47].mxu1  ;;  %v3877_v12 = vpop.f32.mrb[51].mxu0 }
 0x32f   :  { %v3278_v13 = vcombine.low %v3056_v6, %v3058_v5 }
 0x330   :  { %3332 = vst.msk [vmem:[%s5113_s6 + $0x30] sm:$0x3] %vm3331_vm4, %v3317_v16 }
 0x331   :  { %v3292_v18 = vrot.slane %v3278_v13, %v5009_v34 }
 0x333   :  { %v3293_v21 = vcombine.low %v3285_v17, %v3292_v18  ;;  %v3137_v55 = vpop.f32.mrb[48].mxu1 }
 0x334   :  { %v3138_v20 = vadd.f32 %v3137_v55, %v2488_v14  ;;  %v3139_v22 = vpop.f32.mrb[49].mxu1 }
 0x335   :  { %3329 = vst [vmem:[%s5113_s6 + $0x20] sm:$0xff] %v3293_v21  ;;  %v3140_v23 = vadd.f32 %v3139_v22, %v2492_v19  ;;  %v3141_v24 = vpop.f32.mrb[50].mxu1 }
 0x336   :  { %v3142_v25 = vpop.f32.mrb[51].mxu1 }
 0x337   :  { %v3295_v26 = vcombine.low %v3138_v20, %v3140_v23 }
 0x339   :  { %v3309_v61 = vrot.slane %v3295_v26, %v5009_v34 }
 0x33b   :  { %v3310_v27 = vcombine.low %v3302_v33, %v3309_v61 }
 0x33d   :  { %3330 = vst [vmem:[%s5113_s6 + $0x28] sm:$0xff] %v3310_v27 }
 0x35e   :  { %s3879_s29 = spop %3878 }
 0x35f   :  { %v2344_v39 = vstv %s3879_s29 }
 0x360   :  { %v2345_v60 = vmul.f32 -0.5, %v2344_v39 }
 0x362   :  { %2347 = vst.msk [vmem:[#allocation2] sm:$0x1] %vm2346_vm5, %v2345_v60 }
 0x363   :  { %4139 = shalt.err (!%p4136_p4)
}
 0x364   :  { %s4140_s6 = scalar_lea.hbm %s5114_s7, 16 }
 0x365   :  { %p4141_p5 = scmp.ne.s32.totalorder %s5114_s7, %s4140_s6  ;;  %p4144_p6 = scmp.lt.u32.totalorder %s4140_s6, %s5114_s7 }
 0x367   :  { %p4146_p7 = pnand %p4144_p6, %p4141_p5 }
 0x369   :  { %4149 = shalt.err (!%p4146_p7)
}
 0x36a   :  { %3344 = dma.vmem_to_hbm [thread:$0]  %s3342_s28, 16, %s5114_s7, [#allocation3]  }
 0x36b   :  { %4150 = dma.done.wait [#allocation3], 16  }
 0x36c   :  { %4151 = vsyncadd [#allocation3], 4294967280 }
 0x36d   :  { %3350 = vsyncpa [#allocation3], 1 }

// kernel: vae_forward.11
= control target key start
LH: loop header
LB: loop body
LE: loop exit
PB: predicated region body
PF: predicated region fallthrough
CT: control target
= control target key end

     0   :  { %v503_v1 = vmov 0   ;;  %vm154_vm0 = vcmask 523264   ;;  %s772_s1 = inlined_call_operand.vmem [shape: bf16[64,512], index: 1, kind: input, shape index: {}]   ;;  %s773_s0 = inlined_call_operand.vmem [shape: bf16[98,64], index: 0, kind: input, shape index: {}]   ;;  %s774_s2 = inlined_call_operand.vmem [shape: f32[98,512], index: 2, kind: output, shape index: {}]  }
   0x1   :  { %v472_v0 = vld [vmem:[%s772_s1 + $0x4] ss:$16 sps:$4 sm:$0xff]   ;;  %208 = vmatprep.mubr.bf16.mxu0 %v503_v1  ;;  %309 = vmatprep.mubr.bf16.mxu1 %v503_v1  ;;  %v474_v2 = vld [vmem:[%s772_s1 + $0xc] ss:$16 sps:$4 sm:$0xff]   ;;  %v476_v3 = vld [vmem:[%s772_s1] ss:$16 sps:$4 sm:$0xff]  }
   0x2   :  { %176 = vmatprep.subr.bf16.mxu0 %v472_v0  ;;  %v477_v4 = vld [vmem:[%s772_s1 + $0x8] ss:$16 sps:$4 sm:$0xff]   ;;  %277 = vmatprep.subr.bf16.mxu1 %v474_v2  ;;  %v478_v5 = vld [vmem:[%s772_s1 + $0x24] ss:$16 sps:$4 sm:$0xff]   ;;  %v480_v6 = vld [vmem:[%s772_s1 + $0x2c] ss:$16 sps:$4 sm:$0xff]  }
   0x3   :  { %177 = vmatpush1.bf16.msra.mxu0 %v476_v3  ;;  %278 = vmatpush1.bf16.msra.mxu1 %v477_v4  ;;  %v482_v7 = vld [vmem:[%s772_s1 + $0x20] ss:$16 sps:$4 sm:$0xff]   ;;  %v483_v8 = vld [vmem:[%s772_s1 + $0x28] ss:$16 sps:$4 sm:$0xff]   ;;  %v484_v9 = vld [vmem:[%s772_s1 + $0x44] ss:$16 sps:$4 sm:$0xff]  }
   0x4   :  { %178 = vmatprep.subr.bf16.mxu0 %v478_v5  ;;  %279 = vmatprep.subr.bf16.mxu1 %v480_v6  ;;  %v486_v10 = vld [vmem:[%s772_s1 + $0x4c] ss:$16 sps:$4 sm:$0xff]   ;;  %v488_v11 = vld [vmem:[%s772_s1 + $0x40] ss:$16 sps:$4 sm:$0xff]   ;;  %v489_v12 = vld [vmem:[%s772_s1 + $0x48] ss:$16 sps:$4 sm:$0xff]  }
   0x5   :  { %v490_v13 = vld [vmem:[%s772_s1 + $0x64] ss:$16 sps:$4 sm:$0xff]   ;;  %v492_v14 = vld [vmem:[%s772_s1 + $0x6c] ss:$16 sps:$4 sm:$0xff]   ;;  %v494_v15 = vld [vmem:[%s772_s1 + $0x60] ss:$16 sps:$4 sm:$0xff]  }
   0x6   :  { %v495_v16 = vld [vmem:[%s772_s1 + $0x68] ss:$16 sps:$4 sm:$0xff]   ;;  %v496_v17 = vld [vmem:[%s773_s0] sm:$0xff]   ;;  %v498_v19 = vld [vmem:[%s773_s0 + $0x10] sm:$0xff]  }
   0x7   :  { %179 = vmatpush1.bf16.msra.mxu0 %v482_v7  ;;  %280 = vmatpush1.bf16.msra.mxu1 %v483_v8  ;;  %v497_v18 = vld [vmem:[%s773_s0 + $0x8] sm:$0xff]   ;;  %v499_v20 = vld [vmem:[%s773_s0 + $0x18] sm:$0xff]   ;;  %v500_v21 = vld [vmem:[%s773_s0 + $0x20] sm:$0xff]  }
   0x8   :  { %180 = vmatprep.subr.bf16.mxu0 %v484_v9  ;;  %281 = vmatprep.subr.bf16.mxu1 %v486_v10  ;;  %v501_v22 = vld [vmem:[%s773_s0 + $0x28] sm:$0xff]   ;;  %v502_v23 = vld [vmem:[%s773_s0 + $0x30] ss:$0 sps:$4 sm:$0x11]  }
   0xb   :  { %181 = vmatpush1.bf16.msra.mxu0 %v488_v11  ;;  %282 = vmatpush1.bf16.msra.mxu1 %v489_v12 }
   0xc   :  { %182 = vmatprep.subr.bf16.mxu0 %v490_v13  ;;  %283 = vmatprep.subr.bf16.mxu1 %v492_v14 }
   0xf   :  { %183 = vmatpush1.bf16.msra.mxu0 %v494_v15  ;;  %284 = vmatpush1.bf16.msra.mxu1 %v495_v16 }
  0x12   :  { %457 = vmatmul.mubr.msk.bf16.vlgmr.msra.gmra.mrb[0].mxu0 %vm154_vm0, %v496_v17  ;;  %464 = vmatmul.mubr.msk.bf16.vlgmr.msra.gmra.mrb[0].mxu1 %vm154_vm0, %v496_v17 }
  0x13   :  { %218 = vmatprep.mubr.bf16.mxu0 %v503_v1  ;;  %319 = vmatprep.mubr.bf16.mxu1 %v503_v1 }
  0x1a   :  { %458 = vmatmul.mubr.msk.bf16.gmra.mrb[4].mxu0 %vm154_vm0, %v497_v18  ;;  %465 = vmatmul.mubr.msk.bf16.gmra.mrb[4].mxu1 %vm154_vm0, %v497_v18 }
  0x1b   :  { %228 = vmatprep.mubr.bf16.mxu0 %v503_v1  ;;  %329 = vmatprep.mubr.bf16.mxu1 %v503_v1 }
  0x22   :  { %459 = vmatmul.mubr.msk.bf16.gmra.mrb[8].mxu0 %vm154_vm0, %v498_v19  ;;  %466 = vmatmul.mubr.msk.bf16.gmra.mrb[8].mxu1 %vm154_vm0, %v498_v19 }
  0x23   :  { %238 = vmatprep.mubr.bf16.mxu0 %v503_v1  ;;  %339 = vmatprep.mubr.bf16.mxu1 %v503_v1 }
  0x2a   :  { %460 = vmatmul.mubr.msk.bf16.gmra.mrb[12].mxu0 %vm154_vm0, %v499_v20  ;;  %467 = vmatmul.mubr.msk.bf16.gmra.mrb[12].mxu1 %vm154_vm0, %v499_v20 }
  0x2b   :  { %248 = vmatprep.mubr.bf16.mxu0 %v503_v1  ;;  %349 = vmatprep.mubr.bf16.mxu1 %v503_v1 }
  0x32   :  { %461 = vmatmul.mubr.msk.bf16.gmra.mrb[16].mxu0 %vm154_vm0, %v500_v21  ;;  %468 = vmatmul.mubr.msk.bf16.gmra.mrb[16].mxu1 %vm154_vm0, %v500_v21 }
  0x33   :  { %258 = vmatprep.mubr.bf16.mxu0 %v503_v1  ;;  %359 = vmatprep.mubr.bf16.mxu1 %v503_v1 }
  0x3a   :  { %462 = vmatmul.mubr.msk.bf16.gmra.mrb[20].mxu0 %vm154_vm0, %v501_v22  ;;  %469 = vmatmul.mubr.msk.bf16.gmra.mrb[20].mxu1 %vm154_vm0, %v501_v22 }
  0x3b   :  { %268 = vmatprep.mubr.bf16.mxu0 %v503_v1  ;;  %369 = vmatprep.mubr.bf16.mxu1 %v503_v1 }
  0x42   :  { %463 = vmatmul.mubr.msk.bf16.gmra.mrb[24].mxu0 %vm154_vm0, %v502_v23  ;;  %470 = vmatmul.mubr.msk.bf16.gmra.mrb[24].mxu1 %vm154_vm0, %v502_v23 }
  0xe5   :  { %v210_v24 = vpop.f32.mrb[0].mxu0  ;;  %v311_v25 = vpop.f32.mrb[0].mxu1 }
  0xe6   :  { %378 = vst [vmem:[%s774_s2] sm:$0xff] %v210_v24  ;;  %380 = vst [vmem:[%s774_s2 + $0x10] sm:$0xff] %v311_v25  ;;  %v212_v26 = vpop.f32.mrb[1].mxu0  ;;  %v313_v27 = vpop.f32.mrb[1].mxu1 }
  0xe7   :  { %379 = vst [vmem:[%s774_s2 + $0x8] sm:$0xff] %v212_v26  ;;  %381 = vst [vmem:[%s774_s2 + $0x18] sm:$0xff] %v313_v27  ;;  %v214_v28 = vpop.f32.mrb[2].mxu0  ;;  %v315_v29 = vpop.f32.mrb[2].mxu1 }
  0xe8   :  { %382 = vst [vmem:[%s774_s2 + $0x20] sm:$0xff] %v214_v28  ;;  %384 = vst [vmem:[%s774_s2 + $0x30] sm:$0xff] %v315_v29  ;;  %v216_v30 = vpop.f32.mrb[3].mxu0  ;;  %v317_v31 = vpop.f32.mrb[3].mxu1 }
  0xe9   :  { %383 = vst [vmem:[%s774_s2 + $0x28] sm:$0xff] %v216_v30  ;;  %385 = vst [vmem:[%s774_s2 + $0x38] sm:$0xff] %v317_v31 }
  0xed   :  { %v220_v32 = vpop.f32.mrb[4].mxu0  ;;  %v321_v33 = vpop.f32.mrb[4].mxu1 }
  0xee   :  { %386 = vst [vmem:[%s774_s2 + $0x40] sm:$0xff] %v220_v32  ;;  %388 = vst [vmem:[%s774_s2 + $0x50] sm:$0xff] %v321_v33  ;;  %v222_v34 = vpop.f32.mrb[5].mxu0  ;;  %v323_v35 = vpop.f32.mrb[5].mxu1 }
  0xef   :  { %387 = vst [vmem:[%s774_s2 + $0x48] sm:$0xff] %v222_v34  ;;  %389 = vst [vmem:[%s774_s2 + $0x58] sm:$0xff] %v323_v35  ;;  %v224_v36 = vpop.f32.mrb[6].mxu0  ;;  %v325_v37 = vpop.f32.mrb[6].mxu1 }
  0xf0   :  { %390 = vst [vmem:[%s774_s2 + $0x60] sm:$0xff] %v224_v36  ;;  %392 = vst [vmem:[%s774_s2 + $0x70] sm:$0xff] %v325_v37  ;;  %v226_v38 = vpop.f32.mrb[7].mxu0  ;;  %v327_v39 = vpop.f32.mrb[7].mxu1 }
  0xf1   :  { %391 = vst [vmem:[%s774_s2 + $0x68] sm:$0xff] %v226_v38  ;;  %393 = vst [vmem:[%s774_s2 + $0x78] sm:$0xff] %v327_v39 }
  0xf5   :  { %v230_v40 = vpop.f32.mrb[8].mxu0  ;;  %v331_v41 = vpop.f32.mrb[8].mxu1 }
  0xf6   :  { %394 = vst [vmem:[%s774_s2 + $0x80] sm:$0xff] %v230_v40  ;;  %396 = vst [vmem:[%s774_s2 + $0x90] sm:$0xff] %v331_v41  ;;  %v232_v42 = vpop.f32.mrb[9].mxu0  ;;  %v333_v43 = vpop.f32.mrb[9].mxu1 }
  0xf7   :  { %395 = vst [vmem:[%s774_s2 + $0x88] sm:$0xff] %v232_v42  ;;  %397 = vst [vmem:[%s774_s2 + $0x98] sm:$0xff] %v333_v43  ;;  %v234_v44 = vpop.f32.mrb[10].mxu0  ;;  %v335_v45 = vpop.f32.mrb[10].mxu1 }
  0xf8   :  { %398 = vst [vmem:[%s774_s2 + $0xa0] sm:$0xff] %v234_v44  ;;  %400 = vst [vmem:[%s774_s2 + $0xb0] sm:$0xff] %v335_v45  ;;  %v236_v46 = vpop.f32.mrb[11].mxu0  ;;  %v337_v47 = vpop.f32.mrb[11].mxu1 }
  0xf9   :  { %399 = vst [vmem:[%s774_s2 + $0xa8] sm:$0xff] %v236_v46  ;;  %401 = vst [vmem:[%s774_s2 + $0xb8] sm:$0xff] %v337_v47 }
  0xfd   :  { %v240_v48 = vpop.f32.mrb[12].mxu0  ;;  %v341_v49 = vpop.f32.mrb[12].mxu1 }
  0xfe   :  { %402 = vst [vmem:[%s774_s2 + $0xc0] sm:$0xff] %v240_v48  ;;  %404 = vst [vmem:[%s774_s2 + $0xd0] sm:$0xff] %v341_v49  ;;  %v242_v50 = vpop.f32.mrb[13].mxu0  ;;  %v343_v51 = vpop.f32.mrb[13].mxu1 }
  0xff   :  { %403 = vst [vmem:[%s774_s2 + $0xc8] sm:$0xff] %v242_v50  ;;  %405 = vst [vmem:[%s774_s2 + $0xd8] sm:$0xff] %v343_v51  ;;  %v244_v52 = vpop.f32.mrb[14].mxu0  ;;  %v345_v53 = vpop.f32.mrb[14].mxu1 }
 0x100   :  { %406 = vst [vmem:[%s774_s2 + $0xe0] sm:$0xff] %v244_v52  ;;  %408 = vst [vmem:[%s774_s2 + $0xf0] sm:$0xff] %v345_v53  ;;  %v246_v54 = vpop.f32.mrb[15].mxu0  ;;  %v347_v55 = vpop.f32.mrb[15].mxu1 }
 0x101   :  { %407 = vst [vmem:[%s774_s2 + $0xe8] sm:$0xff] %v246_v54  ;;  %409 = vst [vmem:[%s774_s2 + $0xf8] sm:$0xff] %v347_v55 }
 0x105   :  { %v250_v56 = vpop.f32.mrb[16].mxu0  ;;  %v351_v57 = vpop.f32.mrb[16].mxu1 }
 0x106   :  { %410 = vst [vmem:[%s774_s2 + $0x100] sm:$0xff] %v250_v56  ;;  %412 = vst [vmem:[%s774_s2 + $0x110] sm:$0xff] %v351_v57  ;;  %v252_v58 = vpop.f32.mrb[17].mxu0  ;;  %v353_v59 = vpop.f32.mrb[17].mxu1 }
 0x107   :  { %411 = vst [vmem:[%s774_s2 + $0x108] sm:$0xff] %v252_v58  ;;  %413 = vst [vmem:[%s774_s2 + $0x118] sm:$0xff] %v353_v59  ;;  %v254_v60 = vpop.f32.mrb[18].mxu0  ;;  %v355_v61 = vpop.f32.mrb[18].mxu1 }
 0x108   :  { %414 = vst [vmem:[%s774_s2 + $0x120] sm:$0xff] %v254_v60  ;;  %416 = vst [vmem:[%s774_s2 + $0x130] sm:$0xff] %v355_v61  ;;  %v256_v62 = vpop.f32.mrb[19].mxu0  ;;  %v357_v63 = vpop.f32.mrb[19].mxu1 }
 0x109   :  { %415 = vst [vmem:[%s774_s2 + $0x128] sm:$0xff] %v256_v62  ;;  %417 = vst [vmem:[%s774_s2 + $0x138] sm:$0xff] %v357_v63 }
 0x10d   :  { %v260_v0 = vpop.f32.mrb[20].mxu0  ;;  %v361_v1 = vpop.f32.mrb[20].mxu1 }
 0x10e   :  { %418 = vst [vmem:[%s774_s2 + $0x140] sm:$0xff] %v260_v0  ;;  %420 = vst [vmem:[%s774_s2 + $0x150] sm:$0xff] %v361_v1  ;;  %v262_v2 = vpop.f32.mrb[21].mxu0  ;;  %v363_v3 = vpop.f32.mrb[21].mxu1 }
 0x10f   :  { %419 = vst [vmem:[%s774_s2 + $0x148] sm:$0xff] %v262_v2  ;;  %421 = vst [vmem:[%s774_s2 + $0x158] sm:$0xff] %v363_v3  ;;  %v264_v4 = vpop.f32.mrb[22].mxu0  ;;  %v365_v5 = vpop.f32.mrb[22].mxu1 }
 0x110   :  { %422 = vst [vmem:[%s774_s2 + $0x160] sm:$0xff] %v264_v4  ;;  %424 = vst [vmem:[%s774_s2 + $0x170] sm:$0xff] %v365_v5  ;;  %v266_v6 = vpop.f32.mrb[23].mxu0  ;;  %v367_v7 = vpop.f32.mrb[23].mxu1 }
 0x111   :  { %423 = vst [vmem:[%s774_s2 + $0x168] sm:$0xff] %v266_v6  ;;  %425 = vst [vmem:[%s774_s2 + $0x178] sm:$0xff] %v367_v7 }
 0x115   :  { %v270_v8 = vpop.f32.mrb[24].mxu0  ;;  %v371_v9 = vpop.f32.mrb[24].mxu1 }
 0x116   :  { %426 = vst [vmem:[%s774_s2 + $0x180] sm:$0x3] %v270_v8  ;;  %428 = vst [vmem:[%s774_s2 + $0x190] sm:$0x3] %v371_v9  ;;  %v272_v10 = vpop.f32.mrb[25].mxu0  ;;  %v373_v11 = vpop.f32.mrb[25].mxu1 }
 0x117   :  { %427 = vst [vmem:[%s774_s2 + $0x188] sm:$0x3] %v272_v10  ;;  %429 = vst [vmem:[%s774_s2 + $0x198] sm:$0x3] %v373_v11  ;;  %v274_v12 = vpop.f32.mrb[26].mxu0  ;;  %v375_v13 = vpop.f32.mrb[26].mxu1 }
 0x118   :  { %v275_v14 = vpop.f32.mrb[27].mxu0  ;;  %v376_v15 = vpop.f32.mrb[27].mxu1 }

// kernel: vae_forward.12
= control target key start
LH: loop header
LB: loop body
LE: loop exit
PB: predicated region body
PF: predicated region fallthrough
CT: control target
= control target key end

     0   :  { %v1191_v1 = vmov 0   ;;  %vm232_vm0 = vcmask 261120   ;;  %s1994_s1 = inlined_call_operand.vmem [shape: bf16[32,512], index: 1, kind: input, shape index: {}]   ;;  %s1995_s0 = inlined_call_operand.vmem [shape: bf16[392,32], index: 0, kind: input, shape index: {}]   ;;  %s1996_s2 = inlined_call_operand.vmem [shape: f32[392,512], index: 2, kind: output, shape index: {}]  }
   0x1   :  { %v1154_v0 = vld [vmem:[%s1994_s1 + $0x4] ss:$16 sps:$4 sm:$0xff]   ;;  %340 = vmatprep.mubr.bf16.mxu0 %v1191_v1  ;;  %621 = vmatprep.mubr.bf16.mxu1 %v1191_v1  ;;  %v1156_v2 = vld [vmem:[%s1994_s1 + $0xc] ss:$16 sps:$4 sm:$0xff]   ;;  %v1158_v3 = vld [vmem:[%s1994_s1] ss:$16 sps:$4 sm:$0xff]  }
   0x2   :  { %308 = vmatprep.subr.bf16.mxu0 %v1154_v0  ;;  %v1159_v4 = vld [vmem:[%s1994_s1 + $0x8] ss:$16 sps:$4 sm:$0xff]   ;;  %589 = vmatprep.subr.bf16.mxu1 %v1156_v2  ;;  %v1160_v5 = vld [vmem:[%s1994_s1 + $0x24] ss:$16 sps:$4 sm:$0xff]   ;;  %v1162_v6 = vld [vmem:[%s1994_s1 + $0x2c] ss:$16 sps:$4 sm:$0xff]  }
   0x3   :  { %309 = vmatpush1.bf16.msra.mxu0 %v1158_v3  ;;  %590 = vmatpush1.bf16.msra.mxu1 %v1159_v4  ;;  %v1164_v7 = vld [vmem:[%s1994_s1 + $0x20] ss:$16 sps:$4 sm:$0xff]   ;;  %v1165_v8 = vld [vmem:[%s1994_s1 + $0x28] ss:$16 sps:$4 sm:$0xff]  }
   0x4   :  { %310 = vmatprep.subr.bf16.mxu0 %v1160_v5  ;;  %591 = vmatprep.subr.bf16.mxu1 %v1162_v6  ;;  %v1166_v9 = vld [vmem:[%s1995_s0] sm:$0xff]   ;;  %v1167_v10 = vld [vmem:[%s1995_s0 + $0x8] sm:$0xff]   ;;  %v1168_v11 = vld [vmem:[%s1995_s0 + $0x10] sm:$0xff]  }
   0x5   :  { %v1169_v12 = vld [vmem:[%s1995_s0 + $0x18] sm:$0xff]   ;;  %v1170_v13 = vld [vmem:[%s1995_s0 + $0x20] sm:$0xff]   ;;  %v1171_v14 = vld [vmem:[%s1995_s0 + $0x28] sm:$0xff]  }
   0x6   :  { %v1172_v15 = vld [vmem:[%s1995_s0 + $0x30] sm:$0xff]   ;;  %v1173_v16 = vld [vmem:[%s1995_s0 + $0x38] sm:$0xff]   ;;  %v1174_v17 = vld [vmem:[%s1995_s0 + $0x40] sm:$0xff]  }
   0x7   :  { %311 = vmatpush1.bf16.msra.mxu0 %v1164_v7  ;;  %592 = vmatpush1.bf16.msra.mxu1 %v1165_v8  ;;  %v1175_v18 = vld [vmem:[%s1995_s0 + $0x48] sm:$0xff]   ;;  %v1176_v19 = vld [vmem:[%s1995_s0 + $0x50] sm:$0xff]   ;;  %v1177_v20 = vld [vmem:[%s1995_s0 + $0x58] sm:$0xff]  }
   0x8   :  { %v1178_v21 = vld [vmem:[%s1995_s0 + $0x60] sm:$0xff]   ;;  %v1179_v22 = vld [vmem:[%s1995_s0 + $0x68] sm:$0xff]   ;;  %v1180_v23 = vld [vmem:[%s1995_s0 + $0x70] sm:$0xff]  }
   0x9   :  { %v1181_v24 = vld [vmem:[%s1995_s0 + $0x78] sm:$0xff]   ;;  %v1182_v25 = vld [vmem:[%s1995_s0 + $0x80] sm:$0xff]   ;;  %v1183_v26 = vld [vmem:[%s1995_s0 + $0x88] sm:$0xff]  }
   0xa   :  { %1103 = vmatmul.mubr.msk.bf16.vlgmr.msra.gmra.mrb[0].mxu0 %vm232_vm0, %v1166_v9  ;;  %1128 = vmatmul.mubr.msk.bf16.vlgmr.msra.gmra.mrb[0].mxu1 %vm232_vm0, %v1166_v9  ;;  %v1184_v27 = vld [vmem:[%s1995_s0 + $0x90] sm:$0xff]   ;;  %v1185_v28 = vld [vmem:[%s1995_s0 + $0x98] sm:$0xff]   ;;  %v1186_v29 = vld [vmem:[%s1995_s0 + $0xa0] sm:$0xff]  }
   0xb   :  { %350 = vmatprep.mubr.bf16.mxu0 %v1191_v1  ;;  %631 = vmatprep.mubr.bf16.mxu1 %v1191_v1  ;;  %v1187_v30 = vld [vmem:[%s1995_s0 + $0xa8] sm:$0xff]   ;;  %v1188_v31 = vld [vmem:[%s1995_s0 + $0xb0] sm:$0xff]   ;;  %v1189_v32 = vld [vmem:[%s1995_s0 + $0xb8] sm:$0xff]  }
   0xc   :  { %v1190_v33 = vld [vmem:[%s1995_s0 + $0xc0] ss:$0 sps:$4 sm:$0xff]  }
  0x12   :  { %1104 = vmatmul.mubr.msk.bf16.gmra.mrb[4].mxu0 %vm232_vm0, %v1167_v10  ;;  %1129 = vmatmul.mubr.msk.bf16.gmra.mrb[4].mxu1 %vm232_vm0, %v1167_v10 }
  0x13   :  { %360 = vmatprep.mubr.bf16.mxu0 %v1191_v1  ;;  %641 = vmatprep.mubr.bf16.mxu1 %v1191_v1 }
  0x1a   :  { %1105 = vmatmul.mubr.msk.bf16.gmra.mrb[8].mxu0 %vm232_vm0, %v1168_v11  ;;  %1130 = vmatmul.mubr.msk.bf16.gmra.mrb[8].mxu1 %vm232_vm0, %v1168_v11 }
  0x1b   :  { %370 = vmatprep.mubr.bf16.mxu0 %v1191_v1  ;;  %651 = vmatprep.mubr.bf16.mxu1 %v1191_v1 }
  0x22   :  { %1106 = vmatmul.mubr.msk.bf16.gmra.mrb[12].mxu0 %vm232_vm0, %v1169_v12  ;;  %1131 = vmatmul.mubr.msk.bf16.gmra.mrb[12].mxu1 %vm232_vm0, %v1169_v12 }
  0x23   :  { %380 = vmatprep.mubr.bf16.mxu0 %v1191_v1  ;;  %661 = vmatprep.mubr.bf16.mxu1 %v1191_v1 }
  0x2a   :  { %1107 = vmatmul.mubr.msk.bf16.gmra.mrb[16].mxu0 %vm232_vm0, %v1170_v13  ;;  %1132 = vmatmul.mubr.msk.bf16.gmra.mrb[16].mxu1 %vm232_vm0, %v1170_v13 }
  0x2b   :  { %390 = vmatprep.mubr.bf16.mxu0 %v1191_v1  ;;  %671 = vmatprep.mubr.bf16.mxu1 %v1191_v1 }
  0x32   :  { %1108 = vmatmul.mubr.msk.bf16.gmra.mrb[20].mxu0 %vm232_vm0, %v1171_v14  ;;  %1133 = vmatmul.mubr.msk.bf16.gmra.mrb[20].mxu1 %vm232_vm0, %v1171_v14 }
  0x33   :  { %400 = vmatprep.mubr.bf16.mxu0 %v1191_v1  ;;  %681 = vmatprep.mubr.bf16.mxu1 %v1191_v1 }
  0x3a   :  { %1109 = vmatmul.mubr.msk.bf16.gmra.mrb[24].mxu0 %vm232_vm0, %v1172_v15  ;;  %1134 = vmatmul.mubr.msk.bf16.gmra.mrb[24].mxu1 %vm232_vm0, %v1172_v15 }
  0x3b   :  { %410 = vmatprep.mubr.bf16.mxu0 %v1191_v1  ;;  %691 = vmatprep.mubr.bf16.mxu1 %v1191_v1 }
  0x42   :  { %1110 = vmatmul.mubr.msk.bf16.gmra.mrb[28].mxu0 %vm232_vm0, %v1173_v16  ;;  %1135 = vmatmul.mubr.msk.bf16.gmra.mrb[28].mxu1 %vm232_vm0, %v1173_v16 }
  0x43   :  { %420 = vmatprep.mubr.bf16.mxu0 %v1191_v1  ;;  %701 = vmatprep.mubr.bf16.mxu1 %v1191_v1 }
  0x4a   :  { %1111 = vmatmul.mubr.msk.bf16.gmra.mrb[32].mxu0 %vm232_vm0, %v1174_v17  ;;  %1136 = vmatmul.mubr.msk.bf16.gmra.mrb[32].mxu1 %vm232_vm0, %v1174_v17 }
  0x4b   :  { %430 = vmatprep.mubr.bf16.mxu0 %v1191_v1  ;;  %711 = vmatprep.mubr.bf16.mxu1 %v1191_v1 }
  0x52   :  { %1112 = vmatmul.mubr.msk.bf16.gmra.mrb[36].mxu0 %vm232_vm0, %v1175_v18  ;;  %1137 = vmatmul.mubr.msk.bf16.gmra.mrb[36].mxu1 %vm232_vm0, %v1175_v18 }
  0x53   :  { %440 = vmatprep.mubr.bf16.mxu0 %v1191_v1  ;;  %721 = vmatprep.mubr.bf16.mxu1 %v1191_v1 }
  0x5a   :  { %1113 = vmatmul.mubr.msk.bf16.gmra.mrb[40].mxu0 %vm232_vm0, %v1176_v19  ;;  %1138 = vmatmul.mubr.msk.bf16.gmra.mrb[40].mxu1 %vm232_vm0, %v1176_v19 }
  0x5b   :  { %450 = vmatprep.mubr.bf16.mxu0 %v1191_v1  ;;  %731 = vmatprep.mubr.bf16.mxu1 %v1191_v1 }
  0x62   :  { %1114 = vmatmul.mubr.msk.bf16.gmra.mrb[44].mxu0 %vm232_vm0, %v1177_v20  ;;  %1139 = vmatmul.mubr.msk.bf16.gmra.mrb[44].mxu1 %vm232_vm0, %v1177_v20 }
  0x63   :  { %460 = vmatprep.mubr.bf16.mxu0 %v1191_v1  ;;  %741 = vmatprep.mubr.bf16.mxu1 %v1191_v1 }
  0x6a   :  { %1115 = vmatmul.mubr.msk.bf16.gmra.mrb[48].mxu0 %vm232_vm0, %v1178_v21  ;;  %1140 = vmatmul.mubr.msk.bf16.gmra.mrb[48].mxu1 %vm232_vm0, %v1178_v21 }
  0x6b   :  { %470 = vmatprep.mubr.bf16.mxu0 %v1191_v1  ;;  %751 = vmatprep.mubr.bf16.mxu1 %v1191_v1 }
  0x72   :  { %1116 = vmatmul.mubr.msk.bf16.gmra.mrb[52].mxu0 %vm232_vm0, %v1179_v22  ;;  %1141 = vmatmul.mubr.msk.bf16.gmra.mrb[52].mxu1 %vm232_vm0, %v1179_v22 }
  0x73   :  { %480 = vmatprep.mubr.bf16.mxu0 %v1191_v1  ;;  %761 = vmatprep.mubr.bf16.mxu1 %v1191_v1 }
  0x7a   :  { %1117 = vmatmul.mubr.msk.bf16.gmra.mrb[56].mxu0 %vm232_vm0, %v1180_v23  ;;  %1142 = vmatmul.mubr.msk.bf16.gmra.mrb[56].mxu1 %vm232_vm0, %v1180_v23 }
  0x7b   :  { %490 = vmatprep.mubr.bf16.mxu0 %v1191_v1  ;;  %771 = vmatprep.mubr.bf16.mxu1 %v1191_v1 }
  0x82   :  { %1118 = vmatmul.mubr.msk.bf16.gmra.mrb[60].mxu0 %vm232_vm0, %v1181_v24  ;;  %1143 = vmatmul.mubr.msk.bf16.gmra.mrb[60].mxu1 %vm232_vm0, %v1181_v24 }
  0x83   :  { %500 = vmatprep.mubr.bf16.mxu0 %v1191_v1  ;;  %781 = vmatprep.mubr.bf16.mxu1 %v1191_v1 }
  0x8a   :  { %1119 = vmatmul.mubr.msk.bf16.gmra.mrb[64].mxu0 %vm232_vm0, %v1182_v25  ;;  %1144 = vmatmul.mubr.msk.bf16.gmra.mrb[64].mxu1 %vm232_vm0, %v1182_v25 }
  0x8b   :  { %510 = vmatprep.mubr.bf16.mxu0 %v1191_v1  ;;  %791 = vmatprep.mubr.bf16.mxu1 %v1191_v1 }
  0x92   :  { %1120 = vmatmul.mubr.msk.bf16.gmra.mrb[68].mxu0 %vm232_vm0, %v1183_v26  ;;  %1145 = vmatmul.mubr.msk.bf16.gmra.mrb[68].mxu1 %vm232_vm0, %v1183_v26 }
  0x93   :  { %520 = vmatprep.mubr.bf16.mxu0 %v1191_v1  ;;  %801 = vmatprep.mubr.bf16.mxu1 %v1191_v1 }
  0x9a   :  { %1121 = vmatmul.mubr.msk.bf16.gmra.mrb[72].mxu0 %vm232_vm0, %v1184_v27  ;;  %1146 = vmatmul.mubr.msk.bf16.gmra.mrb[72].mxu1 %vm232_vm0, %v1184_v27 }
  0x9b   :  { %530 = vmatprep.mubr.bf16.mxu0 %v1191_v1  ;;  %811 = vmatprep.mubr.bf16.mxu1 %v1191_v1 }
  0xa2   :  { %1122 = vmatmul.mubr.msk.bf16.gmra.mrb[76].mxu0 %vm232_vm0, %v1185_v28  ;;  %1147 = vmatmul.mubr.msk.bf16.gmra.mrb[76].mxu1 %vm232_vm0, %v1185_v28 }
  0xa3   :  { %540 = vmatprep.mubr.bf16.mxu0 %v1191_v1  ;;  %821 = vmatprep.mubr.bf16.mxu1 %v1191_v1 }
  0xaa   :  { %1123 = vmatmul.mubr.msk.bf16.gmra.mrb[80].mxu0 %vm232_vm0, %v1186_v29  ;;  %1148 = vmatmul.mubr.msk.bf16.gmra.mrb[80].mxu1 %vm232_vm0, %v1186_v29 }
  0xab   :  { %550 = vmatprep.mubr.bf16.mxu0 %v1191_v1  ;;  %831 = vmatprep.mubr.bf16.mxu1 %v1191_v1 }
  0xb2   :  { %1124 = vmatmul.mubr.msk.bf16.gmra.mrb[84].mxu0 %vm232_vm0, %v1187_v30  ;;  %1149 = vmatmul.mubr.msk.bf16.gmra.mrb[84].mxu1 %vm232_vm0, %v1187_v30 }
  0xb3   :  { %560 = vmatprep.mubr.bf16.mxu0 %v1191_v1  ;;  %841 = vmatprep.mubr.bf16.mxu1 %v1191_v1 }
  0xba   :  { %1125 = vmatmul.mubr.msk.bf16.gmra.mrb[88].mxu0 %vm232_vm0, %v1188_v31  ;;  %1150 = vmatmul.mubr.msk.bf16.gmra.mrb[88].mxu1 %vm232_vm0, %v1188_v31 }
  0xbb   :  { %570 = vmatprep.mubr.bf16.mxu0 %v1191_v1  ;;  %851 = vmatprep.mubr.bf16.mxu1 %v1191_v1 }
  0xc2   :  { %1126 = vmatmul.mubr.msk.bf16.gmra.mrb[92].mxu0 %vm232_vm0, %v1189_v32  ;;  %1151 = vmatmul.mubr.msk.bf16.gmra.mrb[92].mxu1 %vm232_vm0, %v1189_v32 }
  0xc3   :  { %580 = vmatprep.mubr.bf16.mxu0 %v1191_v1  ;;  %861 = vmatprep.mubr.bf16.mxu1 %v1191_v1 }
  0xca   :  { %1127 = vmatmul.mubr.msk.bf16.gmra.mrb[96].mxu0 %vm232_vm0, %v1190_v33  ;;  %1152 = vmatmul.mubr.msk.bf16.gmra.mrb[96].mxu1 %vm232_vm0, %v1190_v33 }
  0xdd   :  { %v342_v34 = vpop.f32.mrb[0].mxu0  ;;  %v623_v35 = vpop.f32.mrb[0].mxu1 }
  0xde   :  { %870 = vst [vmem:[%s1996_s2] sm:$0xff] %v342_v34  ;;  %872 = vst [vmem:[%s1996_s2 + $0x10] sm:$0xff] %v623_v35  ;;  %v344_v36 = vpop.f32.mrb[1].mxu0  ;;  %v625_v37 = vpop.f32.mrb[1].mxu1 }
  0xdf   :  { %871 = vst [vmem:[%s1996_s2 + $0x8] sm:$0xff] %v344_v36  ;;  %873 = vst [vmem:[%s1996_s2 + $0x18] sm:$0xff] %v625_v37  ;;  %v346_v38 = vpop.f32.mrb[2].mxu0  ;;  %v627_v39 = vpop.f32.mrb[2].mxu1 }
  0xe0   :  { %874 = vst [vmem:[%s1996_s2 + $0x20] sm:$0xff] %v346_v38  ;;  %876 = vst [vmem:[%s1996_s2 + $0x30] sm:$0xff] %v627_v39  ;;  %v348_v40 = vpop.f32.mrb[3].mxu0  ;;  %v629_v41 = vpop.f32.mrb[3].mxu1 }
  0xe1   :  { %875 = vst [vmem:[%s1996_s2 + $0x28] sm:$0xff] %v348_v40  ;;  %877 = vst [vmem:[%s1996_s2 + $0x38] sm:$0xff] %v629_v41 }
  0xe5   :  { %v352_v42 = vpop.f32.mrb[4].mxu0  ;;  %v633_v43 = vpop.f32.mrb[4].mxu1 }
  0xe6   :  { %878 = vst [vmem:[%s1996_s2 + $0x40] sm:$0xff] %v352_v42  ;;  %880 = vst [vmem:[%s1996_s2 + $0x50] sm:$0xff] %v633_v43  ;;  %v354_v44 = vpop.f32.mrb[5].mxu0  ;;  %v635_v45 = vpop.f32.mrb[5].mxu1 }
  0xe7   :  { %879 = vst [vmem:[%s1996_s2 + $0x48] sm:$0xff] %v354_v44  ;;  %881 = vst [vmem:[%s1996_s2 + $0x58] sm:$0xff] %v635_v45  ;;  %v356_v46 = vpop.f32.mrb[6].mxu0  ;;  %v637_v47 = vpop.f32.mrb[6].mxu1 }
  0xe8   :  { %882 = vst [vmem:[%s1996_s2 + $0x60] sm:$0xff] %v356_v46  ;;  %884 = vst [vmem:[%s1996_s2 + $0x70] sm:$0xff] %v637_v47  ;;  %v358_v48 = vpop.f32.mrb[7].mxu0  ;;  %v639_v49 = vpop.f32.mrb[7].mxu1 }
  0xe9   :  { %883 = vst [vmem:[%s1996_s2 + $0x68] sm:$0xff] %v358_v48  ;;  %885 = vst [vmem:[%s1996_s2 + $0x78] sm:$0xff] %v639_v49 }
  0xed   :  { %v362_v50 = vpop.f32.mrb[8].mxu0  ;;  %v643_v51 = vpop.f32.mrb[8].mxu1 }
  0xee   :  { %886 = vst [vmem:[%s1996_s2 + $0x80] sm:$0xff] %v362_v50  ;;  %888 = vst [vmem:[%s1996_s2 + $0x90] sm:$0xff] %v643_v51  ;;  %v364_v52 = vpop.f32.mrb[9].mxu0  ;;  %v645_v53 = vpop.f32.mrb[9].mxu1 }
  0xef   :  { %887 = vst [vmem:[%s1996_s2 + $0x88] sm:$0xff] %v364_v52  ;;  %889 = vst [vmem:[%s1996_s2 + $0x98] sm:$0xff] %v645_v53  ;;  %v366_v54 = vpop.f32.mrb[10].mxu0  ;;  %v647_v55 = vpop.f32.mrb[10].mxu1 }
  0xf0   :  { %890 = vst [vmem:[%s1996_s2 + $0xa0] sm:$0xff] %v366_v54  ;;  %892 = vst [vmem:[%s1996_s2 + $0xb0] sm:$0xff] %v647_v55  ;;  %v368_v56 = vpop.f32.mrb[11].mxu0  ;;  %v649_v57 = vpop.f32.mrb[11].mxu1 }
  0xf1   :  { %891 = vst [vmem:[%s1996_s2 + $0xa8] sm:$0xff] %v368_v56  ;;  %893 = vst [vmem:[%s1996_s2 + $0xb8] sm:$0xff] %v649_v57 }
  0xf5   :  { %v372_v58 = vpop.f32.mrb[12].mxu0  ;;  %v653_v59 = vpop.f32.mrb[12].mxu1 }
  0xf6   :  { %894 = vst [vmem:[%s1996_s2 + $0xc0] sm:$0xff] %v372_v58  ;;  %896 = vst [vmem:[%s1996_s2 + $0xd0] sm:$0xff] %v653_v59  ;;  %v374_v60 = vpop.f32.mrb[13].mxu0  ;;  %v655_v61 = vpop.f32.mrb[13].mxu1 }
  0xf7   :  { %895 = vst [vmem:[%s1996_s2 + $0xc8] sm:$0xff] %v374_v60  ;;  %897 = vst [vmem:[%s1996_s2 + $0xd8] sm:$0xff] %v655_v61  ;;  %v376_v62 = vpop.f32.mrb[14].mxu0  ;;  %v657_v63 = vpop.f32.mrb[14].mxu1 }
  0xf8   :  { %898 = vst [vmem:[%s1996_s2 + $0xe0] sm:$0xff] %v376_v62  ;;  %900 = vst [vmem:[%s1996_s2 + $0xf0] sm:$0xff] %v657_v63  ;;  %v378_v0 = vpop.f32.mrb[15].mxu0  ;;  %v659_v1 = vpop.f32.mrb[15].mxu1 }
  0xf9   :  { %899 = vst [vmem:[%s1996_s2 + $0xe8] sm:$0xff] %v378_v0  ;;  %901 = vst [vmem:[%s1996_s2 + $0xf8] sm:$0xff] %v659_v1 }
  0xfd   :  { %v382_v2 = vpop.f32.mrb[16].mxu0  ;;  %v663_v3 = vpop.f32.mrb[16].mxu1 }
  0xfe   :  { %902 = vst [vmem:[%s1996_s2 + $0x100] sm:$0xff] %v382_v2  ;;  %904 = vst [vmem:[%s1996_s2 + $0x110] sm:$0xff] %v663_v3  ;;  %v384_v4 = vpop.f32.mrb[17].mxu0  ;;  %v665_v5 = vpop.f32.mrb[17].mxu1 }
  0xff   :  { %903 = vst [vmem:[%s1996_s2 + $0x108] sm:$0xff] %v384_v4  ;;  %905 = vst [vmem:[%s1996_s2 + $0x118] sm:$0xff] %v665_v5  ;;  %v386_v6 = vpop.f32.mrb[18].mxu0  ;;  %v667_v7 = vpop.f32.mrb[18].mxu1 }
 0x100   :  { %906 = vst [vmem:[%s1996_s2 + $0x120] sm:$0xff] %v386_v6  ;;  %908 = vst [vmem:[%s1996_s2 + $0x130] sm:$0xff] %v667_v7  ;;  %v388_v8 = vpop.f32.mrb[19].mxu0  ;;  %v669_v9 = vpop.f32.mrb[19].mxu1 }
 0x101   :  { %907 = vst [vmem:[%s1996_s2 + $0x128] sm:$0xff] %v388_v8  ;;  %909 = vst [vmem:[%s1996_s2 + $0x138] sm:$0xff] %v669_v9 }
 0x105   :  { %v392_v10 = vpop.f32.mrb[20].mxu0  ;;  %v673_v11 = vpop.f32.mrb[20].mxu1 }
 0x106   :  { %910 = vst [vmem:[%s1996_s2 + $0x140] sm:$0xff] %v392_v10  ;;  %912 = vst [vmem:[%s1996_s2 + $0x150] sm:$0xff] %v673_v11  ;;  %v394_v12 = vpop.f32.mrb[21].mxu0  ;;  %v675_v13 = vpop.f32.mrb[21].mxu1 }
 0x107   :  { %911 = vst [vmem:[%s1996_s2 + $0x148] sm:$0xff] %v394_v12  ;;  %913 = vst [vmem:[%s1996_s2 + $0x158] sm:$0xff] %v675_v13  ;;  %v396_v14 = vpop.f32.mrb[22].mxu0  ;;  %v677_v15 = vpop.f32.mrb[22].mxu1 }
 0x108   :  { %914 = vst [vmem:[%s1996_s2 + $0x160] sm:$0xff] %v396_v14  ;;  %916 = vst [vmem:[%s1996_s2 + $0x170] sm:$0xff] %v677_v15  ;;  %v398_v16 = vpop.f32.mrb[23].mxu0  ;;  %v679_v17 = vpop.f32.mrb[23].mxu1 }
 0x109   :  { %915 = vst [vmem:[%s1996_s2 + $0x168] sm:$0xff] %v398_v16  ;;  %917 = vst [vmem:[%s1996_s2 + $0x178] sm:$0xff] %v679_v17 }
 0x10d   :  { %v402_v18 = vpop.f32.mrb[24].mxu0  ;;  %v683_v19 = vpop.f32.mrb[24].mxu1 }
 0x10e   :  { %918 = vst [vmem:[%s1996_s2 + $0x180] sm:$0xff] %v402_v18  ;;  %920 = vst [vmem:[%s1996_s2 + $0x190] sm:$0xff] %v683_v19  ;;  %v404_v20 = vpop.f32.mrb[25].mxu0  ;;  %v685_v21 = vpop.f32.mrb[25].mxu1 }
 0x10f   :  { %919 = vst [vmem:[%s1996_s2 + $0x188] sm:$0xff] %v404_v20  ;;  %921 = vst [vmem:[%s1996_s2 + $0x198] sm:$0xff] %v685_v21  ;;  %v406_v22 = vpop.f32.mrb[26].mxu0  ;;  %v687_v23 = vpop.f32.mrb[26].mxu1 }
 0x110   :  { %922 = vst [vmem:[%s1996_s2 + $0x1a0] sm:$0xff] %v406_v22  ;;  %924 = vst [vmem:[%s1996_s2 + $0x1b0] sm:$0xff] %v687_v23  ;;  %v408_v24 = vpop.f32.mrb[27].mxu0  ;;  %v689_v25 = vpop.f32.mrb[27].mxu1 }
 0x111   :  { %923 = vst [vmem:[%s1996_s2 + $0x1a8] sm:$0xff] %v408_v24  ;;  %925 = vst [vmem:[%s1996_s2 + $0x1b8] sm:$0xff] %v689_v25 }
 0x115   :  { %v412_v26 = vpop.f32.mrb[28].mxu0  ;;  %v693_v27 = vpop.f32.mrb[28].mxu1 }
 0x116   :  { %926 = vst [vmem:[%s1996_s2 + $0x1c0] sm:$0xff] %v412_v26  ;;  %928 = vst [vmem:[%s1996_s2 + $0x1d0] sm:$0xff] %v693_v27  ;;  %v414_v28 = vpop.f32.mrb[29].mxu0  ;;  %v695_v29 = vpop.f32.mrb[29].mxu1 }
 0x117   :  { %927 = vst [vmem:[%s1996_s2 + $0x1c8] sm:$0xff] %v414_v28  ;;  %929 = vst [vmem:[%s1996_s2 + $0x1d8] sm:$0xff] %v695_v29  ;;  %v416_v30 = vpop.f32.mrb[30].mxu0  ;;  %v697_v31 = vpop.f32.mrb[30].mxu1 }
 0x118   :  { %930 = vst [vmem:[%s1996_s2 + $0x1e0] sm:$0xff] %v416_v30  ;;  %932 = vst [vmem:[%s1996_s2 + $0x1f0] sm:$0xff] %v697_v31  ;;  %v418_v32 = vpop.f32.mrb[31].mxu0  ;;  %v699_v33 = vpop.f32.mrb[31].mxu1 }
 0x119   :  { %931 = vst [vmem:[%s1996_s2 + $0x1e8] sm:$0xff] %v418_v32  ;;  %933 = vst [vmem:[%s1996_s2 + $0x1f8] sm:$0xff] %v699_v33 }
 0x11d   :  { %v422_v34 = vpop.f32.mrb[32].mxu0  ;;  %v703_v35 = vpop.f32.mrb[32].mxu1 }
 0x11e   :  { %934 = vst [vmem:[%s1996_s2 + $0x200] sm:$0xff] %v422_v34  ;;  %936 = vst [vmem:[%s1996_s2 + $0x210] sm:$0xff] %v703_v35  ;;  %v424_v36 = vpop.f32.mrb[33].mxu0  ;;  %v705_v37 = vpop.f32.mrb[33].mxu1 }
 0x11f   :  { %935 = vst [vmem:[%s1996_s2 + $0x208] sm:$0xff] %v424_v36  ;;  %937 = vst [vmem:[%s1996_s2 + $0x218] sm:$0xff] %v705_v37  ;;  %v426_v38 = vpop.f32.mrb[34].mxu0  ;;  %v707_v39 = vpop.f32.mrb[34].mxu1 }
 0x120   :  { %938 = vst [vmem:[%s1996_s2 + $0x220] sm:$0xff] %v426_v38  ;;  %940 = vst [vmem:[%s1996_s2 + $0x230] sm:$0xff] %v707_v39  ;;  %v428_v40 = vpop.f32.mrb[35].mxu0  ;;  %v709_v41 = vpop.f32.mrb[35].mxu1 }
 0x121   :  { %939 = vst [vmem:[%s1996_s2 + $0x228] sm:$0xff] %v428_v40  ;;  %941 = vst [vmem:[%s1996_s2 + $0x238] sm:$0xff] %v709_v41 }
 0x125   :  { %v432_v42 = vpop.f32.mrb[36].mxu0  ;;  %v713_v43 = vpop.f32.mrb[36].mxu1 }
 0x126   :  { %942 = vst [vmem:[%s1996_s2 + $0x240] sm:$0xff] %v432_v42  ;;  %944 = vst [vmem:[%s1996_s2 + $0x250] sm:$0xff] %v713_v43  ;;  %v434_v44 = vpop.f32.mrb[37].mxu0  ;;  %v715_v45 = vpop.f32.mrb[37].mxu1 }
 0x127   :  { %943 = vst [vmem:[%s1996_s2 + $0x248] sm:$0xff] %v434_v44  ;;  %945 = vst [vmem:[%s1996_s2 + $0x258] sm:$0xff] %v715_v45  ;;  %v436_v46 = vpop.f32.mrb[38].mxu0  ;;  %v717_v47 = vpop.f32.mrb[38].mxu1 }
 0x128   :  { %946 = vst [vmem:[%s1996_s2 + $0x260] sm:$0xff] %v436_v46  ;;  %948 = vst [vmem:[%s1996_s2 + $0x270] sm:$0xff] %v717_v47  ;;  %v438_v48 = vpop.f32.mrb[39].mxu0  ;;  %v719_v49 = vpop.f32.mrb[39].mxu1 }
 0x129   :  { %947 = vst [vmem:[%s1996_s2 + $0x268] sm:$0xff] %v438_v48  ;;  %949 = vst [vmem:[%s1996_s2 + $0x278] sm:$0xff] %v719_v49 }
 0x12d   :  { %v442_v50 = vpop.f32.mrb[40].mxu0  ;;  %v723_v51 = vpop.f32.mrb[40].mxu1 }
 0x12e   :  { %950 = vst [vmem:[%s1996_s2 + $0x280] sm:$0xff] %v442_v50  ;;  %952 = vst [vmem:[%s1996_s2 + $0x290] sm:$0xff] %v723_v51  ;;  %v444_v52 = vpop.f32.mrb[41].mxu0  ;;  %v725_v53 = vpop.f32.mrb[41].mxu1 }
 0x12f   :  { %951 = vst [vmem:[%s1996_s2 + $0x288] sm:$0xff] %v444_v52  ;;  %953 = vst [vmem:[%s1996_s2 + $0x298] sm:$0xff] %v725_v53  ;;  %v446_v54 = vpop.f32.mrb[42].mxu0  ;;  %v727_v55 = vpop.f32.mrb[42].mxu1 }
 0x130   :  { %954 = vst [vmem:[%s1996_s2 + $0x2a0] sm:$0xff] %v446_v54  ;;  %956 = vst [vmem:[%s1996_s2 + $0x2b0] sm:$0xff] %v727_v55  ;;  %v448_v56 = vpop.f32.mrb[43].mxu0  ;;  %v729_v57 = vpop.f32.mrb[43].mxu1 }
 0x131   :  { %955 = vst [vmem:[%s1996_s2 + $0x2a8] sm:$0xff] %v448_v56  ;;  %957 = vst [vmem:[%s1996_s2 + $0x2b8] sm:$0xff] %v729_v57 }
 0x135   :  { %v452_v58 = vpop.f32.mrb[44].mxu0  ;;  %v733_v59 = vpop.f32.mrb[44].mxu1 }
 0x136   :  { %958 = vst [vmem:[%s1996_s2 + $0x2c0] sm:$0xff] %v452_v58  ;;  %960 = vst [vmem:[%s1996_s2 + $0x2d0] sm:$0xff] %v733_v59  ;;  %v454_v60 = vpop.f32.mrb[45].mxu0  ;;  %v735_v61 = vpop.f32.mrb[45].mxu1 }
 0x137   :  { %959 = vst [vmem:[%s1996_s2 + $0x2c8] sm:$0xff] %v454_v60  ;;  %961 = vst [vmem:[%s1996_s2 + $0x2d8] sm:$0xff] %v735_v61  ;;  %v456_v62 = vpop.f32.mrb[46].mxu0  ;;  %v737_v63 = vpop.f32.mrb[46].mxu1 }
 0x138   :  { %962 = vst [vmem:[%s1996_s2 + $0x2e0] sm:$0xff] %v456_v62  ;;  %964 = vst [vmem:[%s1996_s2 + $0x2f0] sm:$0xff] %v737_v63  ;;  %v458_v0 = vpop.f32.mrb[47].mxu0  ;;  %v739_v1 = vpop.f32.mrb[47].mxu1 }
 0x139   :  { %963 = vst [vmem:[%s1996_s2 + $0x2e8] sm:$0xff] %v458_v0  ;;  %965 = vst [vmem:[%s1996_s2 + $0x2f8] sm:$0xff] %v739_v1 }
 0x13d   :  { %v462_v2 = vpop.f32.mrb[48].mxu0  ;;  %v743_v3 = vpop.f32.mrb[48].mxu1 }
 0x13e   :  { %966 = vst [vmem:[%s1996_s2 + $0x300] sm:$0xff] %v462_v2  ;;  %968 = vst [vmem:[%s1996_s2 + $0x310] sm:$0xff] %v743_v3  ;;  %v464_v4 = vpop.f32.mrb[49].mxu0  ;;  %v745_v5 = vpop.f32.mrb[49].mxu1 }
 0x13f   :  { %967 = vst [vmem:[%s1996_s2 + $0x308] sm:$0xff] %v464_v4  ;;  %969 = vst [vmem:[%s1996_s2 + $0x318] sm:$0xff] %v745_v5  ;;  %v466_v6 = vpop.f32.mrb[50].mxu0  ;;  %v747_v7 = vpop.f32.mrb[50].mxu1 }
 0x140   :  { %970 = vst [vmem:[%s1996_s2 + $0x320] sm:$0xff] %v466_v6  ;;  %972 = vst [vmem:[%s1996_s2 + $0x330] sm:$0xff] %v747_v7  ;;  %v468_v8 = vpop.f32.mrb[51].mxu0  ;;  %v749_v9 = vpop.f32.mrb[51].mxu1 }
 0x141   :  { %971 = vst [vmem:[%s1996_s2 + $0x328] sm:$0xff] %v468_v8  ;;  %973 = vst [vmem:[%s1996_s2 + $0x338] sm:$0xff] %v749_v9 }
 0x145   :  { %v472_v10 = vpop.f32.mrb[52].mxu0  ;;  %v753_v11 = vpop.f32.mrb[52].mxu1 }
 0x146   :  { %974 = vst [vmem:[%s1996_s2 + $0x340] sm:$0xff] %v472_v10  ;;  %976 = vst [vmem:[%s1996_s2 + $0x350] sm:$0xff] %v753_v11  ;;  %v474_v12 = vpop.f32.mrb[53].mxu0  ;;  %v755_v13 = vpop.f32.mrb[53].mxu1 }
 0x147   :  { %975 = vst [vmem:[%s1996_s2 + $0x348] sm:$0xff] %v474_v12  ;;  %977 = vst [vmem:[%s1996_s2 + $0x358] sm:$0xff] %v755_v13  ;;  %v476_v14 = vpop.f32.mrb[54].mxu0  ;;  %v757_v15 = vpop.f32.mrb[54].mxu1 }
 0x148   :  { %978 = vst [vmem:[%s1996_s2 + $0x360] sm:$0xff] %v476_v14  ;;  %980 = vst [vmem:[%s1996_s2 + $0x370] sm:$0xff] %v757_v15  ;;  %v478_v16 = vpop.f32.mrb[55].mxu0  ;;  %v759_v17 = vpop.f32.mrb[55].mxu1 }
 0x149   :  { %979 = vst [vmem:[%s1996_s2 + $0x368] sm:$0xff] %v478_v16  ;;  %981 = vst [vmem:[%s1996_s2 + $0x378] sm:$0xff] %v759_v17 }
 0x14d   :  { %v482_v18 = vpop.f32.mrb[56].mxu0  ;;  %v763_v19 = vpop.f32.mrb[56].mxu1 }
 0x14e   :  { %982 = vst [vmem:[%s1996_s2 + $0x380] sm:$0xff] %v482_v18  ;;  %984 = vst [vmem:[%s1996_s2 + $0x390] sm:$0xff] %v763_v19  ;;  %v484_v20 = vpop.f32.mrb[57].mxu0  ;;  %v765_v21 = vpop.f32.mrb[57].mxu1 }
 0x14f   :  { %983 = vst [vmem:[%s1996_s2 + $0x388] sm:$0xff] %v484_v20  ;;  %985 = vst [vmem:[%s1996_s2 + $0x398] sm:$0xff] %v765_v21  ;;  %v486_v22 = vpop.f32.mrb[58].mxu0  ;;  %v767_v23 = vpop.f32.mrb[58].mxu1 }
 0x150   :  { %986 = vst [vmem:[%s1996_s2 + $0x3a0] sm:$0xff] %v486_v22  ;;  %988 = vst [vmem:[%s1996_s2 + $0x3b0] sm:$0xff] %v767_v23  ;;  %v488_v24 = vpop.f32.mrb[59].mxu0  ;;  %v769_v25 = vpop.f32.mrb[59].mxu1 }
 0x151   :  { %987 = vst [vmem:[%s1996_s2 + $0x3a8] sm:$0xff] %v488_v24  ;;  %989 = vst [vmem:[%s1996_s2 + $0x3b8] sm:$0xff] %v769_v25 }
 0x155   :  { %v492_v26 = vpop.f32.mrb[60].mxu0  ;;  %v773_v27 = vpop.f32.mrb[60].mxu1 }
 0x156   :  { %990 = vst [vmem:[%s1996_s2 + $0x3c0] sm:$0xff] %v492_v26  ;;  %992 = vst [vmem:[%s1996_s2 + $0x3d0] sm:$0xff] %v773_v27  ;;  %v494_v28 = vpop.f32.mrb[61].mxu0  ;;  %v775_v29 = vpop.f32.mrb[61].mxu1 }
 0x157   :  { %991 = vst [vmem:[%s1996_s2 + $0x3c8] sm:$0xff] %v494_v28  ;;  %993 = vst [vmem:[%s1996_s2 + $0x3d8] sm:$0xff] %v775_v29  ;;  %v496_v30 = vpop.f32.mrb[62].mxu0  ;;  %v777_v31 = vpop.f32.mrb[62].mxu1 }
 0x158   :  { %994 = vst [vmem:[%s1996_s2 + $0x3e0] sm:$0xff] %v496_v30  ;;  %996 = vst [vmem:[%s1996_s2 + $0x3f0] sm:$0xff] %v777_v31  ;;  %v498_v32 = vpop.f32.mrb[63].mxu0  ;;  %v779_v33 = vpop.f32.mrb[63].mxu1 }
 0x159   :  { %995 = vst [vmem:[%s1996_s2 + $0x3e8] sm:$0xff] %v498_v32  ;;  %997 = vst [vmem:[%s1996_s2 + $0x3f8] sm:$0xff] %v779_v33 }
 0x15d   :  { %v502_v34 = vpop.f32.mrb[64].mxu0  ;;  %v783_v35 = vpop.f32.mrb[64].mxu1 }
 0x15e   :  { %998 = vst [vmem:[%s1996_s2 + $0x400] sm:$0xff] %v502_v34  ;;  %1000 = vst [vmem:[%s1996_s2 + $0x410] sm:$0xff] %v783_v35  ;;  %v504_v36 = vpop.f32.mrb[65].mxu0  ;;  %v785_v37 = vpop.f32.mrb[65].mxu1 }
 0x15f   :  { %999 = vst [vmem:[%s1996_s2 + $0x408] sm:$0xff] %v504_v36  ;;  %1001 = vst [vmem:[%s1996_s2 + $0x418] sm:$0xff] %v785_v37  ;;  %v506_v38 = vpop.f32.mrb[66].mxu0  ;;  %v787_v39 = vpop.f32.mrb[66].mxu1 }
 0x160   :  { %1002 = vst [vmem:[%s1996_s2 + $0x420] sm:$0xff] %v506_v38  ;;  %1004 = vst [vmem:[%s1996_s2 + $0x430] sm:$0xff] %v787_v39  ;;  %v508_v40 = vpop.f32.mrb[67].mxu0  ;;  %v789_v41 = vpop.f32.mrb[67].mxu1 }
 0x161   :  { %1003 = vst [vmem:[%s1996_s2 + $0x428] sm:$0xff] %v508_v40  ;;  %1005 = vst [vmem:[%s1996_s2 + $0x438] sm:$0xff] %v789_v41 }
 0x165   :  { %v512_v42 = vpop.f32.mrb[68].mxu0  ;;  %v793_v43 = vpop.f32.mrb[68].mxu1 }
 0x166   :  { %1006 = vst [vmem:[%s1996_s2 + $0x440] sm:$0xff] %v512_v42  ;;  %1008 = vst [vmem:[%s1996_s2 + $0x450] sm:$0xff] %v793_v43  ;;  %v514_v44 = vpop.f32.mrb[69].mxu0  ;;  %v795_v45 = vpop.f32.mrb[69].mxu1 }
 0x167   :  { %1007 = vst [vmem:[%s1996_s2 + $0x448] sm:$0xff] %v514_v44  ;;  %1009 = vst [vmem:[%s1996_s2 + $0x458] sm:$0xff] %v795_v45  ;;  %v516_v46 = vpop.f32.mrb[70].mxu0  ;;  %v797_v47 = vpop.f32.mrb[70].mxu1 }
 0x168   :  { %1010 = vst [vmem:[%s1996_s2 + $0x460] sm:$0xff] %v516_v46  ;;  %1012 = vst [vmem:[%s1996_s2 + $0x470] sm:$0xff] %v797_v47  ;;  %v518_v48 = vpop.f32.mrb[71].mxu0  ;;  %v799_v49 = vpop.f32.mrb[71].mxu1 }
 0x169   :  { %1011 = vst [vmem:[%s1996_s2 + $0x468] sm:$0xff] %v518_v48  ;;  %1013 = vst [vmem:[%s1996_s2 + $0x478] sm:$0xff] %v799_v49 }
 0x16d   :  { %v522_v50 = vpop.f32.mrb[72].mxu0  ;;  %v803_v51 = vpop.f32.mrb[72].mxu1 }
 0x16e   :  { %1014 = vst [vmem:[%s1996_s2 + $0x480] sm:$0xff] %v522_v50  ;;  %1016 = vst [vmem:[%s1996_s2 + $0x490] sm:$0xff] %v803_v51  ;;  %v524_v52 = vpop.f32.mrb[73].mxu0  ;;  %v805_v53 = vpop.f32.mrb[73].mxu1 }
 0x16f   :  { %1015 = vst [vmem:[%s1996_s2 + $0x488] sm:$0xff] %v524_v52  ;;  %1017 = vst [vmem:[%s1996_s2 + $0x498] sm:$0xff] %v805_v53  ;;  %v526_v54 = vpop.f32.mrb[74].mxu0  ;;  %v807_v55 = vpop.f32.mrb[74].mxu1 }
 0x170   :  { %1018 = vst [vmem:[%s1996_s2 + $0x4a0] sm:$0xff] %v526_v54  ;;  %1020 = vst [vmem:[%s1996_s2 + $0x4b0] sm:$0xff] %v807_v55  ;;  %v528_v56 = vpop.f32.mrb[75].mxu0  ;;  %v809_v57 = vpop.f32.mrb[75].mxu1 }
 0x171   :  { %1019 = vst [vmem:[%s1996_s2 + $0x4a8] sm:$0xff] %v528_v56  ;;  %1021 = vst [vmem:[%s1996_s2 + $0x4b8] sm:$0xff] %v809_v57 }
 0x175   :  { %v532_v58 = vpop.f32.mrb[76].mxu0  ;;  %v813_v59 = vpop.f32.mrb[76].mxu1 }
 0x176   :  { %1022 = vst [vmem:[%s1996_s2 + $0x4c0] sm:$0xff] %v532_v58  ;;  %1024 = vst [vmem:[%s1996_s2 + $0x4d0] sm:$0xff] %v813_v59  ;;  %v534_v60 = vpop.f32.mrb[77].mxu0  ;;  %v815_v61 = vpop.f32.mrb[77].mxu1 }
 0x177   :  { %1023 = vst [vmem:[%s1996_s2 + $0x4c8] sm:$0xff] %v534_v60  ;;  %1025 = vst [vmem:[%s1996_s2 + $0x4d8] sm:$0xff] %v815_v61  ;;  %v536_v62 = vpop.f32.mrb[78].mxu0  ;;  %v817_v63 = vpop.f32.mrb[78].mxu1 }
 0x178   :  { %1026 = vst [vmem:[%s1996_s2 + $0x4e0] sm:$0xff] %v536_v62  ;;  %1028 = vst [vmem:[%s1996_s2 + $0x4f0] sm:$0xff] %v817_v63  ;;  %v538_v0 = vpop.f32.mrb[79].mxu0  ;;  %v819_v1 = vpop.f32.mrb[79].mxu1 }
 0x179   :  { %1027 = vst [vmem:[%s1996_s2 + $0x4e8] sm:$0xff] %v538_v0  ;;  %1029 = vst [vmem:[%s1996_s2 + $0x4f8] sm:$0xff] %v819_v1 }
 0x17d   :  { %v542_v2 = vpop.f32.mrb[80].mxu0  ;;  %v823_v3 = vpop.f32.mrb[80].mxu1 }
 0x17e   :  { %1030 = vst [vmem:[%s1996_s2 + $0x500] sm:$0xff] %v542_v2  ;;  %1032 = vst [vmem:[%s1996_s2 + $0x510] sm:$0xff] %v823_v3  ;;  %v544_v4 = vpop.f32.mrb[81].mxu0  ;;  %v825_v5 = vpop.f32.mrb[81].mxu1 }
 0x17f   :  { %1031 = vst [vmem:[%s1996_s2 + $0x508] sm:$0xff] %v544_v4  ;;  %1033 = vst [vmem:[%s1996_s2 + $0x518] sm:$0xff] %v825_v5  ;;  %v546_v6 = vpop.f32.mrb[82].mxu0  ;;  %v827_v7 = vpop.f32.mrb[82].mxu1 }
 0x180   :  { %1034 = vst [vmem:[%s1996_s2 + $0x520] sm:$0xff] %v546_v6  ;;  %1036 = vst [vmem:[%s1996_s2 + $0x530] sm:$0xff] %v827_v7  ;;  %v548_v8 = vpop.f32.mrb[83].mxu0  ;;  %v829_v9 = vpop.f32.mrb[83].mxu1 }
 0x181   :  { %1035 = vst [vmem:[%s1996_s2 + $0x528] sm:$0xff] %v548_v8  ;;  %1037 = vst [vmem:[%s1996_s2 + $0x538] sm:$0xff] %v829_v9 }
 0x185   :  { %v552_v10 = vpop.f32.mrb[84].mxu0  ;;  %v833_v11 = vpop.f32.mrb[84].mxu1 }
 0x186   :  { %1038 = vst [vmem:[%s1996_s2 + $0x540] sm:$0xff] %v552_v10  ;;  %1040 = vst [vmem:[%s1996_s2 + $0x550] sm:$0xff] %v833_v11  ;;  %v554_v12 = vpop.f32.mrb[85].mxu0  ;;  %v835_v13 = vpop.f32.mrb[85].mxu1 }
 0x187   :  { %1039 = vst [vmem:[%s1996_s2 + $0x548] sm:$0xff] %v554_v12  ;;  %1041 = vst [vmem:[%s1996_s2 + $0x558] sm:$0xff] %v835_v13  ;;  %v556_v14 = vpop.f32.mrb[86].mxu0  ;;  %v837_v15 = vpop.f32.mrb[86].mxu1 }
 0x188   :  { %1042 = vst [vmem:[%s1996_s2 + $0x560] sm:$0xff] %v556_v14  ;;  %1044 = vst [vmem:[%s1996_s2 + $0x570] sm:$0xff] %v837_v15  ;;  %v558_v16 = vpop.f32.mrb[87].mxu0  ;;  %v839_v17 = vpop.f32.mrb[87].mxu1 }
 0x189   :  { %1043 = vst [vmem:[%s1996_s2 + $0x568] sm:$0xff] %v558_v16  ;;  %1045 = vst [vmem:[%s1996_s2 + $0x578] sm:$0xff] %v839_v17 }
 0x18d   :  { %v562_v18 = vpop.f32.mrb[88].mxu0  ;;  %v843_v19 = vpop.f32.mrb[88].mxu1 }
 0x18e   :  { %1046 = vst [vmem:[%s1996_s2 + $0x580] sm:$0xff] %v562_v18  ;;  %1048 = vst [vmem:[%s1996_s2 + $0x590] sm:$0xff] %v843_v19  ;;  %v564_v20 = vpop.f32.mrb[89].mxu0  ;;  %v845_v21 = vpop.f32.mrb[89].mxu1 }
 0x18f   :  { %1047 = vst [vmem:[%s1996_s2 + $0x588] sm:$0xff] %v564_v20  ;;  %1049 = vst [vmem:[%s1996_s2 + $0x598] sm:$0xff] %v845_v21  ;;  %v566_v22 = vpop.f32.mrb[90].mxu0  ;;  %v847_v23 = vpop.f32.mrb[90].mxu1 }
 0x190   :  { %1050 = vst [vmem:[%s1996_s2 + $0x5a0] sm:$0xff] %v566_v22  ;;  %1052 = vst [vmem:[%s1996_s2 + $0x5b0] sm:$0xff] %v847_v23  ;;  %v568_v24 = vpop.f32.mrb[91].mxu0  ;;  %v849_v25 = vpop.f32.mrb[91].mxu1 }
 0x191   :  { %1051 = vst [vmem:[%s1996_s2 + $0x5a8] sm:$0xff] %v568_v24  ;;  %1053 = vst [vmem:[%s1996_s2 + $0x5b8] sm:$0xff] %v849_v25 }
 0x195   :  { %v572_v26 = vpop.f32.mrb[92].mxu0  ;;  %v853_v27 = vpop.f32.mrb[92].mxu1 }
 0x196   :  { %1054 = vst [vmem:[%s1996_s2 + $0x5c0] sm:$0xff] %v572_v26  ;;  %1056 = vst [vmem:[%s1996_s2 + $0x5d0] sm:$0xff] %v853_v27  ;;  %v574_v28 = vpop.f32.mrb[93].mxu0  ;;  %v855_v29 = vpop.f32.mrb[93].mxu1 }
 0x197   :  { %1055 = vst [vmem:[%s1996_s2 + $0x5c8] sm:$0xff] %v574_v28  ;;  %1057 = vst [vmem:[%s1996_s2 + $0x5d8] sm:$0xff] %v855_v29  ;;  %v576_v30 = vpop.f32.mrb[94].mxu0  ;;  %v857_v31 = vpop.f32.mrb[94].mxu1 }
 0x198   :  { %1058 = vst [vmem:[%s1996_s2 + $0x5e0] sm:$0xff] %v576_v30  ;;  %1060 = vst [vmem:[%s1996_s2 + $0x5f0] sm:$0xff] %v857_v31  ;;  %v578_v32 = vpop.f32.mrb[95].mxu0  ;;  %v859_v33 = vpop.f32.mrb[95].mxu1 }
 0x199   :  { %1059 = vst [vmem:[%s1996_s2 + $0x5e8] sm:$0xff] %v578_v32  ;;  %1061 = vst [vmem:[%s1996_s2 + $0x5f8] sm:$0xff] %v859_v33 }
 0x19d   :  { %v582_v34 = vpop.f32.mrb[96].mxu0  ;;  %v863_v35 = vpop.f32.mrb[96].mxu1 }
 0x19e   :  { %1062 = vst [vmem:[%s1996_s2 + $0x600] sm:$0xff] %v582_v34  ;;  %1064 = vst [vmem:[%s1996_s2 + $0x610] sm:$0xff] %v863_v35  ;;  %v584_v36 = vpop.f32.mrb[97].mxu0  ;;  %v865_v37 = vpop.f32.mrb[97].mxu1 }
 0x19f   :  { %1063 = vst [vmem:[%s1996_s2 + $0x608] sm:$0xff] %v584_v36  ;;  %1065 = vst [vmem:[%s1996_s2 + $0x618] sm:$0xff] %v865_v37  ;;  %v586_v38 = vpop.f32.mrb[98].mxu0  ;;  %v867_v39 = vpop.f32.mrb[98].mxu1 }
 0x1a0   :  { %v587_v40 = vpop.f32.mrb[99].mxu0  ;;  %v868_v41 = vpop.f32.mrb[99].mxu1 }

// kernel: vae_forward.13
= control target key start
LH: loop header
LB: loop body
LE: loop exit
PB: predicated region body
PF: predicated region fallthrough
CT: control target
= control target key end

     0   :  { %s12642_s0 = inlined_call_operand.vmem [shape: bf16[1568,512], index: 0, kind: input, shape index: {}]   ;;  %s12643_s1 = inlined_call_operand.vmem [shape: bf16[512,1], index: 1, kind: input, shape index: {}]   ;;  %s12644_s2 = inlined_call_operand.<no memory space> [shape: f32[1,1], index: 2, kind: input, shape index: {}]   ;;  %s12645_s3 = inlined_call_operand.vmem [shape: f32[1568,1], index: 3, kind: input, shape index: {}]   ;;  %s12646_s5 = inlined_call_operand.hbm [shape: f32[1,1], index: 5, kind: output, shape index: {}]   ;;  %s12647_s4 = inlined_call_operand.<no memory space> [shape: f32[1,1], index: 4, kind: input, shape index: {}]  }
   0x1   :  { %v10_v0 = vstv %s12644_s2  ;;  %v12_v1 = vstv %s12647_s4 }
   0x2   :  { %11 = vst [vmem:[#allocation2] sm:$0x1] %v10_v0  ;;  %13 = vst [vmem:[#allocation3] sm:$0x1] %v12_v1 }
   0x3   :  { %v7869_v2 = vld [vmem:[%s12643_s1] sm:$0xff]   ;;  %v9306_v3 = vmov 0   ;;  %v7871_v5 = vld [vmem:[%s12643_s1 + $0x8] sm:$0xff]   ;;  %v7873_v7 = vld [vmem:[%s12643_s1 + $0x10] sm:$0xff]  }
   0x4   :  { %2641 = vmatprep.subr.bf16.mxu1 %v9306_v3  ;;  %3458 = vmatprep.subr.bf16.mxu0 %v9306_v3  ;;  %v7870_v4 = vld [vmem:[%s12643_s1 + $0x80] sm:$0xff]   ;;  %v7872_v6 = vld [vmem:[%s12643_s1 + $0x88] sm:$0xff]   ;;  %v7874_v8 = vld [vmem:[%s12643_s1 + $0x90] sm:$0xff]  }
   0x5   :  { %2642 = vmatpush1.bf16.msra.mxu1 %v7869_v2  ;;  %3459 = vmatpush1.bf16.msra.mxu0 %v7870_v4  ;;  %v7875_v9 = vld [vmem:[%s12643_s1 + $0x18] sm:$0xff]   ;;  %v7877_v11 = vld [vmem:[%s12643_s1 + $0x20] sm:$0xff]   ;;  %v7879_v13 = vld [vmem:[%s12643_s1 + $0x28] sm:$0xff]  }
   0x6   :  { %2643 = vmatprep.subr.bf16.mxu1 %v9306_v3  ;;  %3460 = vmatprep.subr.bf16.mxu0 %v9306_v3  ;;  %v7876_v10 = vld [vmem:[%s12643_s1 + $0x98] sm:$0xff]   ;;  %v7878_v12 = vld [vmem:[%s12643_s1 + $0xa0] sm:$0xff]   ;;  %v7880_v14 = vld [vmem:[%s12643_s1 + $0xa8] sm:$0xff]  }
   0x7   :  { %v7881_v15 = vld [vmem:[%s12643_s1 + $0x30] sm:$0xff]   ;;  %v7883_v17 = vld [vmem:[%s12643_s1 + $0x38] sm:$0xff]   ;;  %v7885_v19 = vld [vmem:[%s12643_s1 + $0x40] sm:$0xff]  }
   0x8   :  { %v7882_v16 = vld [vmem:[%s12643_s1 + $0xb0] sm:$0xff]   ;;  %v7884_v18 = vld [vmem:[%s12643_s1 + $0xb8] sm:$0xff]   ;;  %v7886_v20 = vld [vmem:[%s12643_s1 + $0xc0] sm:$0xff]  }
   0x9   :  { %2644 = vmatpush1.bf16.msra.mxu1 %v7871_v5  ;;  %3461 = vmatpush1.bf16.msra.mxu0 %v7872_v6  ;;  %v7903_v21 = vld [vmem:[%s12642_s0 + $0x4] ss:$16 sps:$4 sm:$0xff]   ;;  %v7887_v22 = vld [vmem:[%s12643_s1 + $0x48] sm:$0xff]   ;;  %v7891_v27 = vld [vmem:[%s12643_s1 + $0x58] sm:$0xff]  }
   0xa   :  { %2645 = vmatprep.subr.bf16.mxu1 %v9306_v3  ;;  %3462 = vmatprep.subr.bf16.mxu0 %v9306_v3  ;;  %v7906_v23 = vld [vmem:[%s12642_s0 + $0xc] ss:$16 sps:$4 sm:$0xff]   ;;  %v7889_v25 = vld [vmem:[%s12643_s1 + $0x50] sm:$0xff]   ;;  %v7893_v29 = vld [vmem:[%s12643_s1 + $0x60] sm:$0xff]  }
   0xb   :  { %v7888_v24 = vld [vmem:[%s12643_s1 + $0xc8] sm:$0xff]   ;;  %2673 = vmatprep.mubr.bf16.mxu1 %v7903_v21  ;;  %3490 = vmatprep.mubr.bf16.mxu0 %v7906_v23  ;;  %v7890_v26 = vld [vmem:[%s12643_s1 + $0xd0] sm:$0xff]   ;;  %v7892_v28 = vld [vmem:[%s12643_s1 + $0xd8] sm:$0xff]  }
   0xc   :  { %v7894_v30 = vld [vmem:[%s12643_s1 + $0xe0] sm:$0xff]   ;;  %v7895_v31 = vld [vmem:[%s12643_s1 + $0x68] sm:$0xff]   ;;  %v7897_v33 = vld [vmem:[%s12643_s1 + $0x70] sm:$0xff]  }
   0xd   :  { %2646 = vmatpush1.bf16.msra.mxu1 %v7873_v7  ;;  %3463 = vmatpush1.bf16.msra.mxu0 %v7874_v8  ;;  %v7896_v32 = vld [vmem:[%s12643_s1 + $0xe8] sm:$0xff]   ;;  %v7898_v34 = vld [vmem:[%s12643_s1 + $0xf0] sm:$0xff]   ;;  %v7899_v35 = vld [vmem:[%s12643_s1 + $0x78] sm:$0xff]  }
   0xe   :  { %2647 = vmatprep.subr.bf16.mxu1 %v9306_v3  ;;  %3464 = vmatprep.subr.bf16.mxu0 %v9306_v3  ;;  %v7900_v36 = vld [vmem:[%s12643_s1 + $0xf8] sm:$0xff]   ;;  %v7901_v37 = vld [vmem:[%s12642_s0] ss:$16 sps:$4 sm:$0xff]   ;;  %v7907_v39 = vld [vmem:[%s12642_s0 + $0x24] ss:$16 sps:$4 sm:$0xff]  }
   0xf   :  { %v7904_v38 = vld [vmem:[%s12642_s0 + $0x8] ss:$16 sps:$4 sm:$0xff]   ;;  %v7909_v40 = vld [vmem:[%s12642_s0 + $0x2c] ss:$16 sps:$4 sm:$0xff]   ;;  %v7911_v41 = vld [vmem:[%s12642_s0 + $0x20] ss:$16 sps:$4 sm:$0xff]  }
  0x10   :  { %v7912_v42 = vld [vmem:[%s12642_s0 + $0x28] ss:$16 sps:$4 sm:$0xff]   ;;  %v7913_v43 = vld [vmem:[%s12642_s0 + $0x44] ss:$16 sps:$4 sm:$0xff]   ;;  %v7915_v44 = vld [vmem:[%s12642_s0 + $0x4c] ss:$16 sps:$4 sm:$0xff]  }
  0x11   :  { %2648 = vmatpush1.bf16.msra.mxu1 %v7875_v9  ;;  %3465 = vmatpush1.bf16.msra.mxu0 %v7876_v10  ;;  %v7917_v45 = vld [vmem:[%s12642_s0 + $0x40] ss:$16 sps:$4 sm:$0xff]   ;;  %v7918_v46 = vld [vmem:[%s12642_s0 + $0x48] ss:$16 sps:$4 sm:$0xff]   ;;  %v7919_v47 = vld [vmem:[%s12642_s0 + $0x64] ss:$16 sps:$4 sm:$0xff]  }
  0x12   :  { %2649 = vmatprep.subr.bf16.mxu1 %v9306_v3  ;;  %3466 = vmatprep.subr.bf16.mxu0 %v9306_v3  ;;  %v7921_v48 = vld [vmem:[%s12642_s0 + $0x6c] ss:$16 sps:$4 sm:$0xff]   ;;  %v7923_v49 = vld [vmem:[%s12642_s0 + $0x60] ss:$16 sps:$4 sm:$0xff]   ;;  %v7924_v50 = vld [vmem:[%s12642_s0 + $0x68] ss:$16 sps:$4 sm:$0xff]  }
  0x13   :  { %v7925_v51 = vld [vmem:[%s12642_s0 + $0x84] ss:$16 sps:$4 sm:$0xff]   ;;  %v7927_v52 = vld [vmem:[%s12642_s0 + $0x8c] ss:$16 sps:$4 sm:$0xff]   ;;  %v7929_v53 = vld [vmem:[%s12642_s0 + $0x80] ss:$16 sps:$4 sm:$0xff]  }
  0x14   :  { %v7930_v54 = vld [vmem:[%s12642_s0 + $0x88] ss:$16 sps:$4 sm:$0xff]   ;;  %v7931_v55 = vld [vmem:[%s12642_s0 + $0xa4] ss:$16 sps:$4 sm:$0xff]   ;;  %v7933_v56 = vld [vmem:[%s12642_s0 + $0xac] ss:$16 sps:$4 sm:$0xff]  }
  0x15   :  { %2650 = vmatpush1.bf16.msra.mxu1 %v7877_v11  ;;  %3467 = vmatpush1.bf16.msra.mxu0 %v7878_v12  ;;  %v7935_v57 = vld [vmem:[%s12642_s0 + $0xa0] ss:$16 sps:$4 sm:$0xff]   ;;  %v7936_v58 = vld [vmem:[%s12642_s0 + $0xa8] ss:$16 sps:$4 sm:$0xff]   ;;  %v7937_v59 = vld [vmem:[%s12642_s0 + $0xc4] ss:$16 sps:$4 sm:$0xff]  }
  0x16   :  { %2651 = vmatprep.subr.bf16.mxu1 %v9306_v3  ;;  %3468 = vmatprep.subr.bf16.mxu0 %v9306_v3  ;;  %v7939_v60 = vld [vmem:[%s12642_s0 + $0xcc] ss:$16 sps:$4 sm:$0xff]   ;;  %v7941_v61 = vld [vmem:[%s12642_s0 + $0xc0] ss:$16 sps:$4 sm:$0xff]   ;;  %v7942_v62 = vld [vmem:[%s12642_s0 + $0xc8] ss:$16 sps:$4 sm:$0xff]  }
  0x17   :  { %v7943_v63 = vld [vmem:[%s12642_s0 + $0xe4] ss:$16 sps:$4 sm:$0xff]   ;;  %v7945_v0 = vld [vmem:[%s12642_s0 + $0xec] ss:$16 sps:$4 sm:$0xff]   ;;  %v7947_v1 = vld [vmem:[%s12642_s0 + $0xe0] ss:$16 sps:$4 sm:$0xff]  }
  0x18   :  { %v7948_v2 = vld [vmem:[%s12642_s0 + $0xe8] ss:$16 sps:$4 sm:$0xff]   ;;  %v7951_v4 = vld [vmem:[%s12642_s0 + $0x10c] ss:$16 sps:$4 sm:$0xff]   ;;  %v7953_v5 = vld [vmem:[%s12642_s0 + $0x100] ss:$16 sps:$4 sm:$0xff]  }
  0x19   :  { %2652 = vmatpush1.bf16.msra.mxu1 %v7879_v13  ;;  %3469 = vmatpush1.bf16.msra.mxu0 %v7880_v14  ;;  %v7954_v6 = vld [vmem:[%s12642_s0 + $0x108] ss:$16 sps:$4 sm:$0xff]   ;;  %v7955_v7 = vld [vmem:[%s12642_s0 + $0x124] ss:$16 sps:$4 sm:$0xff]   ;;  %v7957_v8 = vld [vmem:[%s12642_s0 + $0x12c] ss:$16 sps:$4 sm:$0xff]  }
  0x1a   :  { %2653 = vmatprep.subr.bf16.mxu1 %v9306_v3  ;;  %3470 = vmatprep.subr.bf16.mxu0 %v9306_v3  ;;  %v7959_v9 = vld [vmem:[%s12642_s0 + $0x120] ss:$16 sps:$4 sm:$0xff]   ;;  %v7960_v10 = vld [vmem:[%s12642_s0 + $0x128] ss:$16 sps:$4 sm:$0xff]   ;;  %v7961_v11 = vld [vmem:[%s12642_s0 + $0x144] ss:$16 sps:$4 sm:$0xff]  }
  0x1b   :  { %v7963_v12 = vld [vmem:[%s12642_s0 + $0x14c] ss:$16 sps:$4 sm:$0xff]   ;;  %v7965_v13 = vld [vmem:[%s12642_s0 + $0x140] ss:$16 sps:$4 sm:$0xff]   ;;  %v7966_v14 = vld [vmem:[%s12642_s0 + $0x148] ss:$16 sps:$4 sm:$0xff]  }
  0x1c   :  { %v7977_v21 = vld [vmem:[%s12642_s0 + $0x180] ss:$16 sps:$4 sm:$0xff]   ;;  %v7979_v23 = vld [vmem:[%s12642_s0 + $0x1a4] ss:$16 sps:$4 sm:$0xff]  }
  0x1d   :  { %2654 = vmatpush1.bf16.msra.mxu1 %v7881_v15  ;;  %3471 = vmatpush1.bf16.msra.mxu0 %v7882_v16  ;;  %v7967_v15 = vld [vmem:[%s12642_s0 + $0x164] ss:$16 sps:$4 sm:$0xff]   ;;  %v7969_v16 = vld [vmem:[%s12642_s0 + $0x16c] ss:$16 sps:$4 sm:$0xff]  }
  0x1e   :  { %2655 = vmatprep.subr.bf16.mxu1 %v9306_v3  ;;  %3472 = vmatprep.subr.bf16.mxu0 %v9306_v3 }
  0x21   :  { %2656 = vmatpush1.bf16.msra.mxu1 %v7883_v17  ;;  %3473 = vmatpush1.bf16.msra.mxu0 %v7884_v18  ;;  %v7971_v17 = vld [vmem:[%s12642_s0 + $0x160] ss:$16 sps:$4 sm:$0xff]   ;;  %v7972_v18 = vld [vmem:[%s12642_s0 + $0x168] ss:$16 sps:$4 sm:$0xff]  }
  0x22   :  { %2657 = vmatprep.subr.bf16.mxu1 %v9306_v3  ;;  %3474 = vmatprep.subr.bf16.mxu0 %v9306_v3 }
  0x25   :  { %2658 = vmatpush1.bf16.msra.mxu1 %v7885_v19  ;;  %3475 = vmatpush1.bf16.msra.mxu0 %v7886_v20  ;;  %v7973_v19 = vld [vmem:[%s12642_s0 + $0x184] ss:$16 sps:$4 sm:$0xff]   ;;  %v7975_v20 = vld [vmem:[%s12642_s0 + $0x18c] ss:$16 sps:$4 sm:$0xff]  }
  0x26   :  { %2659 = vmatprep.subr.bf16.mxu1 %v9306_v3  ;;  %3476 = vmatprep.subr.bf16.mxu0 %v9306_v3 }
  0x29   :  { %2660 = vmatpush1.bf16.msra.mxu1 %v7887_v22  ;;  %3477 = vmatpush1.bf16.msra.mxu0 %v7888_v24  ;;  %v7978_v22 = vld [vmem:[%s12642_s0 + $0x188] ss:$16 sps:$4 sm:$0xff]   ;;  %v7981_v24 = vld [vmem:[%s12642_s0 + $0x1ac] ss:$16 sps:$4 sm:$0xff]  }
  0x2a   :  { %2661 = vmatprep.subr.bf16.mxu1 %v9306_v3  ;;  %3478 = vmatprep.subr.bf16.mxu0 %v9306_v3 }
  0x2d   :  { %2662 = vmatpush1.bf16.msra.mxu1 %v7889_v25  ;;  %3479 = vmatpush1.bf16.msra.mxu0 %v7890_v26  ;;  %v7983_v25 = vld [vmem:[%s12642_s0 + $0x1a0] ss:$16 sps:$4 sm:$0xff]   ;;  %v7984_v26 = vld [vmem:[%s12642_s0 + $0x1a8] ss:$16 sps:$4 sm:$0xff]  }
  0x2e   :  { %2663 = vmatprep.subr.bf16.mxu1 %v9306_v3  ;;  %3480 = vmatprep.subr.bf16.mxu0 %v9306_v3 }
  0x31   :  { %2664 = vmatpush1.bf16.msra.mxu1 %v7891_v27  ;;  %3481 = vmatpush1.bf16.msra.mxu0 %v7892_v28  ;;  %v7985_v27 = vld [vmem:[%s12642_s0 + $0x1c4] ss:$16 sps:$4 sm:$0xff]   ;;  %v7987_v28 = vld [vmem:[%s12642_s0 + $0x1cc] ss:$16 sps:$4 sm:$0xff]  }
  0x32   :  { %2665 = vmatprep.subr.bf16.mxu1 %v9306_v3  ;;  %3482 = vmatprep.subr.bf16.mxu0 %v9306_v3 }
  0x35   :  { %2666 = vmatpush1.bf16.msra.mxu1 %v7893_v29  ;;  %3483 = vmatpush1.bf16.msra.mxu0 %v7894_v30  ;;  %v7989_v29 = vld [vmem:[%s12642_s0 + $0x1c0] ss:$16 sps:$4 sm:$0xff]   ;;  %v7990_v30 = vld [vmem:[%s12642_s0 + $0x1c8] ss:$16 sps:$4 sm:$0xff]  }
  0x36   :  { %2667 = vmatprep.subr.bf16.mxu1 %v9306_v3  ;;  %3484 = vmatprep.subr.bf16.mxu0 %v9306_v3 }
  0x39   :  { %2668 = vmatpush1.bf16.msra.mxu1 %v7895_v31  ;;  %3485 = vmatpush1.bf16.msra.mxu0 %v7896_v32  ;;  %v7991_v31 = vld [vmem:[%s12642_s0 + $0x1e4] ss:$16 sps:$4 sm:$0xff]   ;;  %v7993_v32 = vld [vmem:[%s12642_s0 + $0x1ec] ss:$16 sps:$4 sm:$0xff]  }
  0x3a   :  { %2669 = vmatprep.subr.bf16.mxu1 %v9306_v3  ;;  %3486 = vmatprep.subr.bf16.mxu0 %v9306_v3 }
  0x3d   :  { %2670 = vmatpush1.bf16.msra.mxu1 %v7897_v33  ;;  %3487 = vmatpush1.bf16.msra.mxu0 %v7898_v34  ;;  %v7995_v33 = vld [vmem:[%s12642_s0 + $0x1e0] ss:$16 sps:$4 sm:$0xff]   ;;  %v7996_v34 = vld [vmem:[%s12642_s0 + $0x1e8] ss:$16 sps:$4 sm:$0xff]  }
  0x3e   :  { %2671 = vmatprep.subr.bf16.mxu1 %v9306_v3  ;;  %3488 = vmatprep.subr.bf16.mxu0 %v9306_v3  ;;  %v7949_v3 = vld [vmem:[%s12642_s0 + $0x104] ss:$16 sps:$4 sm:$0xff]  }
  0x41   :  { %2672 = vmatpush1.bf16.msra.mxu1 %v7899_v35  ;;  %3489 = vmatpush1.bf16.msra.mxu0 %v7900_v36  ;;  %v7997_v35 = vld [vmem:[%s12642_s0 + $0x204] ss:$16 sps:$4 sm:$0xff]   ;;  %v7999_v36 = vld [vmem:[%s12642_s0 + $0x20c] ss:$16 sps:$4 sm:$0xff]  }
  0x44   :  { %2674 = vmatmul.mubr.bf16.vlgmr.msra.gmra.mrb[0].mxu1 %v7901_v37  ;;  %3491 = vmatmul.mubr.bf16.vlgmr.msra.gmra.mrb[0].mxu0 %v7904_v38  ;;  %v8001_v37 = vld [vmem:[%s12642_s0 + $0x200] ss:$16 sps:$4 sm:$0xff]   ;;  %v8002_v38 = vld [vmem:[%s12642_s0 + $0x208] ss:$16 sps:$4 sm:$0xff]  }
  0x45   :  { %2681 = vmatprep.mubr.bf16.mxu1 %v7907_v39  ;;  %3498 = vmatprep.mubr.bf16.mxu0 %v7909_v40  ;;  %v8003_v39 = vld [vmem:[%s12642_s0 + $0x224] ss:$16 sps:$4 sm:$0xff]   ;;  %v8005_v40 = vld [vmem:[%s12642_s0 + $0x22c] ss:$16 sps:$4 sm:$0xff]  }
  0x4c   :  { %2682 = vmatmul.mubr.bf16.gmra.mrb[4].mxu1 %v7911_v41  ;;  %3499 = vmatmul.mubr.bf16.gmra.mrb[4].mxu0 %v7912_v42  ;;  %v8007_v41 = vld [vmem:[%s12642_s0 + $0x220] ss:$16 sps:$4 sm:$0xff]   ;;  %v8008_v42 = vld [vmem:[%s12642_s0 + $0x228] ss:$16 sps:$4 sm:$0xff]  }
  0x4d   :  { %2689 = vmatprep.mubr.bf16.mxu1 %v7913_v43  ;;  %3506 = vmatprep.mubr.bf16.mxu0 %v7915_v44  ;;  %v8009_v43 = vld [vmem:[%s12642_s0 + $0x244] ss:$16 sps:$4 sm:$0xff]   ;;  %v8011_v44 = vld [vmem:[%s12642_s0 + $0x24c] ss:$16 sps:$4 sm:$0xff]  }
  0x54   :  { %2690 = vmatmul.mubr.bf16.gmra.mrb[8].mxu1 %v7917_v45  ;;  %3507 = vmatmul.mubr.bf16.gmra.mrb[8].mxu0 %v7918_v46  ;;  %v8013_v45 = vld [vmem:[%s12642_s0 + $0x240] ss:$16 sps:$4 sm:$0xff]   ;;  %v8014_v46 = vld [vmem:[%s12642_s0 + $0x248] ss:$16 sps:$4 sm:$0xff]  }
  0x55   :  { %2697 = vmatprep.mubr.bf16.mxu1 %v7919_v47  ;;  %3514 = vmatprep.mubr.bf16.mxu0 %v7921_v48  ;;  %v8015_v47 = vld [vmem:[%s12642_s0 + $0x264] ss:$16 sps:$4 sm:$0xff]   ;;  %v8017_v48 = vld [vmem:[%s12642_s0 + $0x26c] ss:$16 sps:$4 sm:$0xff]  }
  0x5c   :  { %2698 = vmatmul.mubr.bf16.gmra.mrb[12].mxu1 %v7923_v49  ;;  %3515 = vmatmul.mubr.bf16.gmra.mrb[12].mxu0 %v7924_v50  ;;  %v8019_v49 = vld [vmem:[%s12642_s0 + $0x260] ss:$16 sps:$4 sm:$0xff]   ;;  %v8020_v50 = vld [vmem:[%s12642_s0 + $0x268] ss:$16 sps:$4 sm:$0xff]  }
  0x5d   :  { %2705 = vmatprep.mubr.bf16.mxu1 %v7925_v51  ;;  %3522 = vmatprep.mubr.bf16.mxu0 %v7927_v52  ;;  %v8021_v51 = vld [vmem:[%s12642_s0 + $0x284] ss:$16 sps:$4 sm:$0xff]   ;;  %v8023_v52 = vld [vmem:[%s12642_s0 + $0x28c] ss:$16 sps:$4 sm:$0xff]  }
  0x64   :  { %2706 = vmatmul.mubr.bf16.gmra.mrb[16].mxu1 %v7929_v53  ;;  %3523 = vmatmul.mubr.bf16.gmra.mrb[16].mxu0 %v7930_v54 }
  0x65   :  { %2713 = vmatprep.mubr.bf16.mxu1 %v7931_v55  ;;  %3530 = vmatprep.mubr.bf16.mxu0 %v7933_v56 }
  0x6c   :  { %2714 = vmatmul.mubr.bf16.gmra.mrb[20].mxu1 %v7935_v57  ;;  %3531 = vmatmul.mubr.bf16.gmra.mrb[20].mxu0 %v7936_v58 }
  0x6d   :  { %2721 = vmatprep.mubr.bf16.mxu1 %v7937_v59  ;;  %3538 = vmatprep.mubr.bf16.mxu0 %v7939_v60 }
  0x74   :  { %2722 = vmatmul.mubr.bf16.gmra.mrb[24].mxu1 %v7941_v61  ;;  %3539 = vmatmul.mubr.bf16.gmra.mrb[24].mxu0 %v7942_v62 }
  0x75   :  { %2729 = vmatprep.mubr.bf16.mxu1 %v7943_v63  ;;  %3546 = vmatprep.mubr.bf16.mxu0 %v7945_v0 }
  0x7c   :  { %2730 = vmatmul.mubr.bf16.gmra.mrb[28].mxu1 %v7947_v1  ;;  %3547 = vmatmul.mubr.bf16.gmra.mrb[28].mxu0 %v7948_v2 }
  0x7d   :  { %2737 = vmatprep.mubr.bf16.mxu1 %v7949_v3  ;;  %3554 = vmatprep.mubr.bf16.mxu0 %v7951_v4 }
  0x84   :  { %2738 = vmatmul.mubr.bf16.gmra.mrb[32].mxu1 %v7953_v5  ;;  %3555 = vmatmul.mubr.bf16.gmra.mrb[32].mxu0 %v7954_v6 }
  0x85   :  { %2745 = vmatprep.mubr.bf16.mxu1 %v7955_v7  ;;  %3562 = vmatprep.mubr.bf16.mxu0 %v7957_v8 }
  0x8c   :  { %2746 = vmatmul.mubr.bf16.gmra.mrb[36].mxu1 %v7959_v9  ;;  %3563 = vmatmul.mubr.bf16.gmra.mrb[36].mxu0 %v7960_v10 }
  0x8d   :  { %2753 = vmatprep.mubr.bf16.mxu1 %v7961_v11  ;;  %3570 = vmatprep.mubr.bf16.mxu0 %v7963_v12 }
  0x94   :  { %2754 = vmatmul.mubr.bf16.gmra.mrb[40].mxu1 %v7965_v13  ;;  %3571 = vmatmul.mubr.bf16.gmra.mrb[40].mxu0 %v7966_v14 }
  0x95   :  { %2761 = vmatprep.mubr.bf16.mxu1 %v7967_v15  ;;  %3578 = vmatprep.mubr.bf16.mxu0 %v7969_v16 }
  0x9c   :  { %2762 = vmatmul.mubr.bf16.gmra.mrb[44].mxu1 %v7971_v17  ;;  %3579 = vmatmul.mubr.bf16.gmra.mrb[44].mxu0 %v7972_v18 }
  0x9d   :  { %2769 = vmatprep.mubr.bf16.mxu1 %v7973_v19  ;;  %3586 = vmatprep.mubr.bf16.mxu0 %v7975_v20 }
  0xa4   :  { %2770 = vmatmul.mubr.bf16.gmra.mrb[48].mxu1 %v7977_v21  ;;  %3587 = vmatmul.mubr.bf16.gmra.mrb[48].mxu0 %v7978_v22 }
  0xa5   :  { %2777 = vmatprep.mubr.bf16.mxu1 %v7979_v23  ;;  %3594 = vmatprep.mubr.bf16.mxu0 %v7981_v24 }
  0xac   :  { %2778 = vmatmul.mubr.bf16.gmra.mrb[52].mxu1 %v7983_v25  ;;  %3595 = vmatmul.mubr.bf16.gmra.mrb[52].mxu0 %v7984_v26 }
  0xad   :  { %2785 = vmatprep.mubr.bf16.mxu1 %v7985_v27  ;;  %3602 = vmatprep.mubr.bf16.mxu0 %v7987_v28 }
  0xb4   :  { %2786 = vmatmul.mubr.bf16.gmra.mrb[56].mxu1 %v7989_v29  ;;  %3603 = vmatmul.mubr.bf16.gmra.mrb[56].mxu0 %v7990_v30 }
  0xb5   :  { %2793 = vmatprep.mubr.bf16.mxu1 %v7991_v31  ;;  %3610 = vmatprep.mubr.bf16.mxu0 %v7993_v32 }
  0xbc   :  { %2794 = vmatmul.mubr.bf16.gmra.mrb[60].mxu1 %v7995_v33  ;;  %3611 = vmatmul.mubr.bf16.gmra.mrb[60].mxu0 %v7996_v34 }
  0xbd   :  { %2801 = vmatprep.mubr.bf16.mxu1 %v7997_v35  ;;  %3618 = vmatprep.mubr.bf16.mxu0 %v7999_v36 }
  0xc4   :  { %2802 = vmatmul.mubr.bf16.gmra.mrb[64].mxu1 %v8001_v37  ;;  %3619 = vmatmul.mubr.bf16.gmra.mrb[64].mxu0 %v8002_v38 }
  0xc5   :  { %2809 = vmatprep.mubr.bf16.mxu1 %v8003_v39  ;;  %3626 = vmatprep.mubr.bf16.mxu0 %v8005_v40 }
  0xcc   :  { %2810 = vmatmul.mubr.bf16.gmra.mrb[68].mxu1 %v8007_v41  ;;  %3627 = vmatmul.mubr.bf16.gmra.mrb[68].mxu0 %v8008_v42 }
  0xcd   :  { %2817 = vmatprep.mubr.bf16.mxu1 %v8009_v43  ;;  %3634 = vmatprep.mubr.bf16.mxu0 %v8011_v44 }
  0xd4   :  { %2818 = vmatmul.mubr.bf16.gmra.mrb[72].mxu1 %v8013_v45  ;;  %3635 = vmatmul.mubr.bf16.gmra.mrb[72].mxu0 %v8014_v46 }
  0xd5   :  { %2825 = vmatprep.mubr.bf16.mxu1 %v8015_v47  ;;  %3642 = vmatprep.mubr.bf16.mxu0 %v8017_v48 }
  0xd6   :  { %14 = vsyncpa [#allocation5], 0  ;;  %v8025_v53 = vld [vmem:[%s12642_s0 + $0x280] ss:$16 sps:$4 sm:$0xff]   ;;  %v8026_v54 = vld [vmem:[%s12642_s0 + $0x288] ss:$16 sps:$4 sm:$0xff]  }
  0xd7   :  { %v8027_v55 = vld [vmem:[%s12642_s0 + $0x2a4] ss:$16 sps:$4 sm:$0xff]   ;;  %v8029_v56 = vld [vmem:[%s12642_s0 + $0x2ac] ss:$16 sps:$4 sm:$0xff]   ;;  %v8031_v57 = vld [vmem:[%s12642_s0 + $0x2a0] ss:$16 sps:$4 sm:$0xff]  }
  0xd8   :  { %v8032_v58 = vld [vmem:[%s12642_s0 + $0x2a8] ss:$16 sps:$4 sm:$0xff]   ;;  %v8033_v59 = vld [vmem:[%s12642_s0 + $0x2c4] ss:$16 sps:$4 sm:$0xff]   ;;  %v8035_v60 = vld [vmem:[%s12642_s0 + $0x2cc] ss:$16 sps:$4 sm:$0xff]  }
  0xd9   :  { %v8037_v61 = vld [vmem:[%s12642_s0 + $0x2c0] ss:$16 sps:$4 sm:$0xff]   ;;  %v8038_v62 = vld [vmem:[%s12642_s0 + $0x2c8] ss:$16 sps:$4 sm:$0xff]   ;;  %v8039_v63 = vld [vmem:[%s12642_s0 + $0x2e4] ss:$16 sps:$4 sm:$0xff]  }
  0xda   :  { %v8041_v0 = vld [vmem:[%s12642_s0 + $0x2ec] ss:$16 sps:$4 sm:$0xff]   ;;  %v8043_v1 = vld [vmem:[%s12642_s0 + $0x2e0] ss:$16 sps:$4 sm:$0xff]   ;;  %v8044_v2 = vld [vmem:[%s12642_s0 + $0x2e8] ss:$16 sps:$4 sm:$0xff]  }
  0xdb   :  { %v8045_v3 = vld [vmem:[%s12642_s0 + $0x304] ss:$16 sps:$4 sm:$0xff]   ;;  %v8047_v4 = vld [vmem:[%s12642_s0 + $0x30c] ss:$16 sps:$4 sm:$0xff]   ;;  %v8049_v5 = vld [vmem:[%s12642_s0 + $0x300] ss:$16 sps:$4 sm:$0xff]  }
  0xdc   :  { %2826 = vmatmul.mubr.bf16.gmra.mrb[76].mxu1 %v8019_v49  ;;  %3643 = vmatmul.mubr.bf16.gmra.mrb[76].mxu0 %v8020_v50  ;;  %v8050_v6 = vld [vmem:[%s12642_s0 + $0x308] ss:$16 sps:$4 sm:$0xff]   ;;  %v8051_v7 = vld [vmem:[%s12642_s0 + $0x324] ss:$16 sps:$4 sm:$0xff]   ;;  %v8053_v8 = vld [vmem:[%s12642_s0 + $0x32c] ss:$16 sps:$4 sm:$0xff]  }
  0xdd   :  { %2833 = vmatprep.mubr.bf16.mxu1 %v8021_v51  ;;  %3650 = vmatprep.mubr.bf16.mxu0 %v8023_v52  ;;  %v8055_v9 = vld [vmem:[%s12642_s0 + $0x320] ss:$16 sps:$4 sm:$0xff]   ;;  %v8056_v10 = vld [vmem:[%s12642_s0 + $0x328] ss:$16 sps:$4 sm:$0xff]   ;;  %v8057_v11 = vld [vmem:[%s12642_s0 + $0x344] ss:$16 sps:$4 sm:$0xff]  }
  0xde   :  { %v8059_v12 = vld [vmem:[%s12642_s0 + $0x34c] ss:$16 sps:$4 sm:$0xff]   ;;  %v8061_v13 = vld [vmem:[%s12642_s0 + $0x340] ss:$16 sps:$4 sm:$0xff]   ;;  %v8062_v14 = vld [vmem:[%s12642_s0 + $0x348] ss:$16 sps:$4 sm:$0xff]  }
  0xdf   :  { %v8063_v15 = vld [vmem:[%s12642_s0 + $0x364] ss:$16 sps:$4 sm:$0xff]   ;;  %v8065_v16 = vld [vmem:[%s12642_s0 + $0x36c] ss:$16 sps:$4 sm:$0xff]   ;;  %v9802_v17 = vld [vmem:[#allocation2] ss:$0 sm:$0xff] }
  0xe0   :  { %v8067_v22 = vld [vmem:[%s12642_s0 + $0x360] ss:$16 sps:$4 sm:$0xff]   ;;  %v8068_v25 = vld [vmem:[%s12642_s0 + $0x368] ss:$16 sps:$4 sm:$0xff]   ;;  %v8069_v26 = vld [vmem:[%s12642_s0 + $0x384] ss:$16 sps:$4 sm:$0xff]  }
  0xe1   :  { %v8071_v31 = vld [vmem:[%s12642_s0 + $0x38c] ss:$16 sps:$4 sm:$0xff]   ;;  %v8073_v38 = vld [vmem:[%s12642_s0 + $0x380] ss:$16 sps:$4 sm:$0xff]   ;;  %v8074_v46 = vld [vmem:[%s12642_s0 + $0x388] ss:$16 sps:$4 sm:$0xff]  }
  0xe2   :  { %v8075_v47 = vld [vmem:[%s12642_s0 + $0x3a4] ss:$16 sps:$4 sm:$0xff]   ;;  %vm6627_vm0 = vcmask 7168   ;;  %s9307_s26 = smov [#allocation4]   ;;  %vm7032_vm1 = vcmask 0  }
  0xe3   :  { %s7040_s4 = sshll.u32 %s9307_s26, 4  ;;  %s7041_s4 = int_to_ptr.vmem [resolvable:$true] %s7040_s4 }
  0xe4   :  { %2834 = vmatmul.mubr.bf16.gmra.mrb[80].mxu1 %v8025_v53  ;;  %3651 = vmatmul.mubr.bf16.gmra.mrb[80].mxu0 %v8026_v54  ;;  %v8077_v53 = vld [vmem:[%s12642_s0 + $0x3ac] ss:$16 sps:$4 sm:$0xff]   ;;  %s9282_s27 = scalar_lea.vmem %s7041_s4, 16  ;;  %s9286_s28 = scalar_lea.vmem %s7041_s4, 32 }
  0xe5   :  { %2841 = vmatprep.mubr.bf16.mxu1 %v8027_v55  ;;  %3658 = vmatprep.mubr.bf16.mxu0 %v8029_v56  ;;  %p9283_p0 = scmp.ne.s32.totalorder %s7041_s4, %s9282_s27  ;;  %p9287_p1 = scmp.lt.s32.totalorder %s7041_s4, %s7041_s4 }
  0xe6   :  { %p9288_p2 = scmp.lt.s32.totalorder %s9286_s28, %s9282_s27 }
  0xe8   :  { %p9289_p3 = por %p9288_p2, %p9287_p1 }
  0xea   :  { %p9290_p4 = pnand %p9289_p3, %p9283_p0 }
  0xec   :  { %2842 = vmatmul.mubr.bf16.gmra.mrb[84].mxu1 %v8031_v57  ;;  %3659 = vmatmul.mubr.bf16.gmra.mrb[84].mxu0 %v8032_v58 }
  0xed   :  { %2849 = vmatprep.mubr.bf16.mxu1 %v8033_v59  ;;  %3666 = vmatprep.mubr.bf16.mxu0 %v8035_v60  ;;  %v8079_v60 = vld [vmem:[%s12642_s0 + $0x3a0] ss:$16 sps:$4 sm:$0xff]  }
  0xf4   :  { %2850 = vmatmul.mubr.bf16.gmra.mrb[88].mxu1 %v8037_v61  ;;  %3667 = vmatmul.mubr.bf16.gmra.mrb[88].mxu0 %v8038_v62 }
  0xf5   :  { %2857 = vmatprep.mubr.bf16.mxu1 %v8039_v63  ;;  %3674 = vmatprep.mubr.bf16.mxu0 %v8041_v0 }
  0xfc   :  { %2858 = vmatmul.mubr.bf16.gmra.mrb[92].mxu1 %v8043_v1  ;;  %3675 = vmatmul.mubr.bf16.gmra.mrb[92].mxu0 %v8044_v2  ;;  %v8080_v1 = vld [vmem:[%s12642_s0 + $0x3a8] ss:$16 sps:$4 sm:$0xff]  }
  0xfd   :  { %2865 = vmatprep.mubr.bf16.mxu1 %v8045_v3  ;;  %3682 = vmatprep.mubr.bf16.mxu0 %v8047_v4 }
 0x104   :  { %2866 = vmatmul.mubr.bf16.gmra.mrb[96].mxu1 %v8049_v5  ;;  %3683 = vmatmul.mubr.bf16.gmra.mrb[96].mxu0 %v8050_v6  ;;  %v8081_v5 = vld [vmem:[%s12642_s0 + $0x3c4] ss:$16 sps:$4 sm:$0xff]  }
 0x105   :  { %2873 = vmatprep.mubr.bf16.mxu1 %v8051_v7  ;;  %3690 = vmatprep.mubr.bf16.mxu0 %v8053_v8 }
 0x10c   :  { %2874 = vmatmul.mubr.bf16.gmra.mrb[100].mxu1 %v8055_v9  ;;  %3691 = vmatmul.mubr.bf16.gmra.mrb[100].mxu0 %v8056_v10  ;;  %v8083_v10 = vld [vmem:[%s12642_s0 + $0x3cc] ss:$16 sps:$4 sm:$0xff]  }
 0x10d   :  { %2881 = vmatprep.mubr.bf16.mxu1 %v8057_v11  ;;  %3698 = vmatprep.mubr.bf16.mxu0 %v8059_v12 }
 0x114   :  { %2882 = vmatmul.mubr.bf16.gmra.mrb[104].mxu1 %v8061_v13  ;;  %3699 = vmatmul.mubr.bf16.gmra.mrb[104].mxu0 %v8062_v14 }
 0x115   :  { %2889 = vmatprep.mubr.bf16.mxu1 %v8063_v15  ;;  %3706 = vmatprep.mubr.bf16.mxu0 %v8065_v16 }
 0x117   :  { %v2675_v18 = vpop.f32.mrb[0].mxu1  ;;  %v3492_v20 = vpop.f32.mrb[0].mxu0 }
 0x118   :  { %v2676_v19 = vadd.f32 %v9802_v17, %v2675_v18  ;;  %v2677_v21 = vpop.f32.mrb[1].mxu1  ;;  %v3494_v23 = vpop.f32.mrb[1].mxu0 }
 0x119   :  { %v2678_v24 = vpop.f32.mrb[2].mxu1  ;;  %v3495_v29 = vpop.f32.mrb[2].mxu0  ;;  %v8085_v23 = vld [vmem:[%s12642_s0 + $0x3c0] ss:$16 sps:$4 sm:$0xff]  }
 0x11a   :  { %v9814_v27 = vadd.f32 %v3492_v20, %v2676_v19  ;;  %v2679_v28 = vadd.f32 %v9802_v17, %v2678_v24  ;;  %v2680_v30 = vpop.f32.mrb[3].mxu1  ;;  %v3497_v32 = vpop.f32.mrb[3].mxu0 }
 0x11b   :  { %v8086_v32 = vld [vmem:[%s12642_s0 + $0x3c8] ss:$16 sps:$4 sm:$0xff]  }
 0x11c   :  { %v4667_v33 = vand.u32 2147483647, %v9814_v27  ;;  %v9821_v34 = vadd.f32 %v3495_v29, %v2679_v28  ;;  %2890 = vmatmul.mubr.bf16.gmra.mrb[108].mxu1 %v8067_v22  ;;  %3707 = vmatmul.mubr.bf16.gmra.mrb[108].mxu0 %v8068_v25 }
 0x11d   :  { %2897 = vmatprep.mubr.bf16.mxu1 %v8069_v26  ;;  %3714 = vmatprep.mubr.bf16.mxu0 %v8071_v31 }
 0x11e   :  { %v4863_v35 = vsub.f32 0.0, %v4667_v33  ;;  %v4668_v36 = vand.u32 2147483647, %v9821_v34  ;;  %v8087_v33 = vld [vmem:[%s12642_s0 + $0x3e4] ss:$16 sps:$4 sm:$0xff]  }
 0x11f   :  { %v2683_v37 = vpop.f32.mrb[4].mxu1  ;;  %v3500_v42 = vpop.f32.mrb[4].mxu0 }
 0x120   :  { %v5059_v39 = vmul.f32 1.442695, %v4863_v35  ;;  %v4864_v40 = vsub.f32 0.0, %v4668_v36  ;;  %v2684_v41 = vadd.f32 %v9802_v17, %v2683_v37  ;;  %v2685_v43 = vpop.f32.mrb[5].mxu1  ;;  %v3502_v44 = vpop.f32.mrb[5].mxu0 }
 0x121   :  { %v2686_v45 = vpop.f32.mrb[6].mxu1  ;;  %v3503_v51 = vpop.f32.mrb[6].mxu0 }
 0x122   :  { %8489 = vpow2.f32 %v5059_v39  ;;  %v5061_v48 = vmul.f32 1.442695, %v4864_v40  ;;  %v9834_v49 = vadd.f32 %v3500_v42, %v2684_v41  ;;  %v2687_v50 = vadd.f32 %v9802_v17, %v2686_v45  ;;  %v2688_v52 = vpop.f32.mrb[7].mxu1  ;;  %v3505_v54 = vpop.f32.mrb[7].mxu0  ;;  %v8089_v40 = vld [vmem:[%s12642_s0 + $0x3ec] ss:$16 sps:$4 sm:$0xff]  }
 0x123   :  { %v8092_v52 = vld [vmem:[%s12642_s0 + $0x3e8] ss:$16 sps:$4 sm:$0xff]  }
 0x124   :  { %8491 = vpow2.f32 %v5061_v48  ;;  %v4669_v55 = vand.u32 2147483647, %v9834_v49  ;;  %2898 = vmatmul.mubr.bf16.gmra.mrb[112].mxu1 %v8073_v38  ;;  %v9841_v56 = vadd.f32 %v3503_v51, %v2687_v50  ;;  %3715 = vmatmul.mubr.bf16.gmra.mrb[112].mxu0 %v8074_v46 }
 0x125   :  { %2905 = vmatprep.mubr.bf16.mxu1 %v8075_v47  ;;  %3722 = vmatprep.mubr.bf16.mxu0 %v8077_v53  ;;  %v8091_v47 = vld [vmem:[%s12642_s0 + $0x3e0] ss:$16 sps:$4 sm:$0xff]  }
 0x126   :  { %v4865_v57 = vsub.f32 0.0, %v4669_v55  ;;  %v4670_v58 = vand.u32 2147483647, %v9841_v56  ;;  %v4275_v53 = vld [vmem:[%s12645_s3] sm:$0xff] }
 0x127   :  { %v2691_v59 = vpop.f32.mrb[8].mxu1  ;;  %v3508_v63 = vpop.f32.mrb[8].mxu0 }
 0x128   :  { %v5063_v61 = vmul.f32 1.442695, %v4865_v57  ;;  %v2692_v62 = vadd.f32 %v9802_v17, %v2691_v59  ;;  %v2693_v0 = vpop.f32.mrb[9].mxu1  ;;  %v4866_v2 = vsub.f32 0.0, %v4670_v58  ;;  %v3510_v3 = vpop.f32.mrb[9].mxu0 }
 0x129   :  { %v2694_v4 = vpop.f32.mrb[10].mxu1  ;;  %v3511_v8 = vpop.f32.mrb[10].mxu0 }
 0x12a   :  { %8493 = vpow2.f32 %v5063_v61  ;;  %v9854_v6 = vadd.f32 %v3508_v63, %v2692_v62  ;;  %v2695_v7 = vadd.f32 %v9802_v17, %v2694_v4  ;;  %v2696_v9 = vpop.f32.mrb[11].mxu1  ;;  %v5065_v11 = vmul.f32 1.442695, %v4866_v2  ;;  %v3513_v12 = vpop.f32.mrb[11].mxu0 }
 0x12b   :  { %v4471_v61 = vmax.f32 %v9814_v27, 0.0 }
 0x12c   :  { %v8490_v13 = vpop.eup %8489  ;;  %v4671_v14 = vand.u32 2147483647, %v9854_v6  ;;  %v9861_v15 = vadd.f32 %v3511_v8, %v2695_v7  ;;  %2906 = vmatmul.mubr.bf16.gmra.mrb[116].mxu1 %v8079_v60  ;;  %8495 = vpow2.f32 %v5065_v11  ;;  %3723 = vmatmul.mubr.bf16.gmra.mrb[116].mxu0 %v8080_v1  ;;  %v8093_v1 = vld [vmem:[%s12642_s0 + $0x404] ss:$16 sps:$4 sm:$0xff]   ;;  %v8095_v8 = vld [vmem:[%s12642_s0 + $0x40c] ss:$16 sps:$4 sm:$0xff]  }
 0x12d   :  { %v5451_v16 = vadd.f32 1.0, %v8490_v13  ;;  %2913 = vmatprep.mubr.bf16.mxu1 %v8081_v5  ;;  %3730 = vmatprep.mubr.bf16.mxu0 %v8083_v10  ;;  %v6235_v10 = vmul.f32 %v4275_v53, %v9814_v27  ;;  %v4276_v11 = vld [vmem:[%s12645_s3 + $0x8] sm:$0xff] }
 0x12e   :  { %v8492_v18 = vpop.eup %8491  ;;  %v4867_v19 = vsub.f32 0.0, %v4671_v14  ;;  %v4672_v20 = vand.u32 2147483647, %v9861_v15 }
 0x12f   :  { %8497 = vlog2.f32 %v5451_v16  ;;  %v5452_v21 = vadd.f32 1.0, %v8492_v18  ;;  %v2699_v22 = vpop.f32.mrb[12].mxu1  ;;  %v3516_v28 = vpop.f32.mrb[12].mxu0  ;;  %v4472_v18 = vmax.f32 %v9821_v34, 0.0 }
 0x130   :  { %v5067_v24 = vmul.f32 1.442695, %v4867_v19  ;;  %v4868_v25 = vsub.f32 0.0, %v4672_v20  ;;  %v2700_v26 = vadd.f32 %v9802_v17, %v2699_v22  ;;  %v2701_v29 = vpop.f32.mrb[13].mxu1  ;;  %v3518_v30 = vpop.f32.mrb[13].mxu0 }
 0x131   :  { %8499 = vlog2.f32 %v5452_v21  ;;  %v2702_v31 = vpop.f32.mrb[14].mxu1  ;;  %v3519_v38 = vpop.f32.mrb[14].mxu0 }
 0x132   :  { %8501 = vpow2.f32 %v5067_v24  ;;  %v5069_v35 = vmul.f32 1.442695, %v4868_v25  ;;  %v9874_v36 = vadd.f32 %v3516_v28, %v2700_v26  ;;  %v2703_v37 = vadd.f32 %v9802_v17, %v2702_v31  ;;  %v2704_v39 = vpop.f32.mrb[15].mxu1  ;;  %v3521_v41 = vpop.f32.mrb[15].mxu0  ;;  %v8097_v28 = vld [vmem:[%s12642_s0 + $0x400] ss:$16 sps:$4 sm:$0xff]  }
 0x133   :  { %v6236_v25 = vmul.f32 %v4276_v11, %v9821_v34 }
 0x134   :  { %v8494_v42 = vpop.eup %8493  ;;  %8503 = vpow2.f32 %v5069_v35  ;;  %v4673_v43 = vand.u32 2147483647, %v9874_v36  ;;  %2914 = vmatmul.mubr.bf16.gmra.mrb[120].mxu1 %v8085_v23  ;;  %v9881_v45 = vadd.f32 %v3519_v38, %v2703_v37  ;;  %3731 = vmatmul.mubr.bf16.gmra.mrb[120].mxu0 %v8086_v32  ;;  %v8098_v32 = vld [vmem:[%s12642_s0 + $0x408] ss:$16 sps:$4 sm:$0xff]   ;;  %v4277_v35 = vld [vmem:[%s12645_s3 + $0x10] sm:$0xff]  ;;  %v4473_v37 = vmax.f32 %v9834_v49, 0.0 }
 0x135   :  { %v5453_v44 = vadd.f32 1.0, %v8494_v42  ;;  %2921 = vmatprep.mubr.bf16.mxu1 %v8087_v33  ;;  %3738 = vmatprep.mubr.bf16.mxu0 %v8089_v40  ;;  %v8099_v33 = vld [vmem:[%s12642_s0 + $0x424] ss:$16 sps:$4 sm:$0xff]  }
 0x136   :  { %v4869_v46 = vsub.f32 0.0, %v4673_v43  ;;  %v8496_v48 = vpop.eup %8495  ;;  %v4674_v50 = vand.u32 2147483647, %v9881_v45 }
 0x137   :  { %8505 = vlog2.f32 %v5453_v44  ;;  %v2707_v51 = vpop.f32.mrb[16].mxu1  ;;  %v5454_v54 = vadd.f32 1.0, %v8496_v48  ;;  %v3524_v58 = vpop.f32.mrb[16].mxu0  ;;  %v8101_v48 = vld [vmem:[%s12642_s0 + $0x42c] ss:$16 sps:$4 sm:$0xff]  }
 0x138   :  { %v5071_v55 = vmul.f32 1.442695, %v4869_v46  ;;  %v2708_v57 = vadd.f32 %v9802_v17, %v2707_v51  ;;  %v2709_v59 = vpop.f32.mrb[17].mxu1  ;;  %v4870_v62 = vsub.f32 0.0, %v4674_v50  ;;  %v3526_v63 = vpop.f32.mrb[17].mxu0 }
 0x139   :  { %v8498_v60 = vpop.eup %8497  ;;  %v2710_v0 = vpop.f32.mrb[18].mxu1  ;;  %8507 = vlog2.f32 %v5454_v54  ;;  %v6237_v63 = vmul.f32 %v4277_v35, %v9834_v49  ;;  %v8103_v49 = vld [vmem:[%s12642_s0 + $0x420] ss:$16 sps:$4 sm:$0xff]  }
 0x13a   :  { %v5648_v2 = vmul.f32 0.6931472, %v8498_v60  ;;  %v9898_v3 = vadd.f32 %v3524_v58, %v2708_v57  ;;  %v2711_v4 = vadd.f32 %v9802_v17, %v2710_v0  ;;  %v3527_v5 = vpop.f32.mrb[18].mxu0  ;;  %v2712_v7 = vpop.f32.mrb[19].mxu1  ;;  %8509 = vpow2.f32 %v5071_v55  ;;  %v4278_v57 = vld [vmem:[%s12645_s3 + $0x18] sm:$0xff] }
 0x13b   :  { %v8500_v9 = vpop.eup %8499  ;;  %v5073_v12 = vmul.f32 1.442695, %v4870_v62  ;;  %v3529_v13 = vpop.f32.mrb[19].mxu0 }
 0x13c   :  { %v8502_v14 = vpop.eup %8501  ;;  %v6039_v16 = vadd.f32 %v5648_v2, %v4471_v61  ;;  %v5650_v19 = vmul.f32 0.6931472, %v8500_v9  ;;  %v4675_v20 = vand.u32 2147483647, %v9898_v3  ;;  %2922 = vmatmul.mubr.bf16.gmra.mrb[124].mxu1 %v8091_v47  ;;  %v9910_v22 = vadd.f32 %v3527_v5, %v2711_v4  ;;  %3739 = vmatmul.mubr.bf16.gmra.mrb[124].mxu0 %v8092_v52 }
 0x13d   :  { %v5455_v21 = vadd.f32 1.0, %v8502_v14  ;;  %8511 = vpow2.f32 %v5073_v12  ;;  %2929 = vmatprep.mubr.bf16.mxu1 %v8093_v1  ;;  %3746 = vmatprep.mubr.bf16.mxu0 %v8095_v8  ;;  %v4474_v2 = vmax.f32 %v9841_v56, 0.0  ;;  %v6238_v8 = vmul.f32 %v4278_v57, %v9841_v56  ;;  %v4279_v12 = vld [vmem:[%s12645_s3 + $0x20] sm:$0xff]  ;;  %v8104_v56 = vld [vmem:[%s12642_s0 + $0x428] ss:$16 sps:$4 sm:$0xff]  }
 0x13e   :  { %v8504_v27 = vpop.eup %8503  ;;  %v6431_v23 = vsub.f32 %v6039_v16, %v6235_v10  ;;  %v6040_v24 = vadd.f32 %v5650_v19, %v4472_v18  ;;  %v4871_v26 = vsub.f32 0.0, %v4675_v20  ;;  %v4676_v30 = vand.u32 2147483647, %v9910_v22 }
 0x13f   :  { %8513 = vlog2.f32 %v5455_v21  ;;  %v5456_v29 = vadd.f32 1.0, %v8504_v27  ;;  %v2715_v31 = vpop.f32.mrb[20].mxu1  ;;  %v3532_v39 = vpop.f32.mrb[20].mxu0  ;;  %v4475_v13 = vmax.f32 %v9854_v6, 0.0 }
 0x140   :  { %v6432_v34 = vsub.f32 %v6040_v24, %v6236_v25  ;;  %v5075_v38 = vmul.f32 1.442695, %v4871_v26  ;;  %v2717_v40 = vpop.f32.mrb[21].mxu1  ;;  %v6628_v42 = vsel %vm6627_vm0, %v6431_v23, 0.0  ;;  %v4872_v43 = vsub.f32 0.0, %v4676_v30  ;;  %v3534_v46 = vpop.f32.mrb[21].mxu0 }
 0x141   :  { %v8506_v41 = vpop.eup %8505  ;;  %8515 = vlog2.f32 %v5456_v29  ;;  %v2716_v44 = vadd.f32 %v9802_v17, %v2715_v31  ;;  %v2718_v47 = vpop.f32.mrb[22].mxu1  ;;  %v8105_v24 = vld [vmem:[%s12642_s0 + $0x444] ss:$16 sps:$4 sm:$0xff]  }
 0x142   :  { %v6629_v50 = vsel %vm6627_vm0, %v6432_v34, 0.0  ;;  %v5652_v51 = vmul.f32 0.6931472, %v8506_v41  ;;  %8517 = vpow2.f32 %v5075_v38  ;;  %v2719_v52 = vadd.f32 %v9802_v17, %v2718_v47  ;;  %v3535_v53 = vpop.f32.mrb[22].mxu0  ;;  %v2720_v54 = vpop.f32.mrb[23].mxu1 }
 0x143   :  { %v6630_v55 = vadd.f32 %v6629_v50, %v6628_v42  ;;  %v5077_v58 = vmul.f32 1.442695, %v4872_v43  ;;  %v9937_v59 = vadd.f32 %v3532_v39, %v2716_v44  ;;  %v3537_v60 = vpop.f32.mrb[23].mxu0  ;;  %v8508_v61 = vpop.eup %8507  ;;  %v8107_v39 = vld [vmem:[%s12642_s0 + $0x44c] ss:$16 sps:$4 sm:$0xff]   ;;  %v6239_v42 = vmul.f32 %v4279_v12, %v9854_v6 }
 0x144   :  { %v6041_v62 = vadd.f32 %v5652_v51, %v4473_v37  ;;  %v9940_v0 = vadd.f32 %v3535_v53, %v2719_v52  ;;  %2930 = vmatmul.mubr.bf16.gmra.mrb[128].mxu1 %v8097_v28  ;;  %v8510_v1 = vpop.eup %8509  ;;  %v5654_v4 = vmul.f32 0.6931472, %v8508_v61  ;;  %3747 = vmatmul.mubr.bf16.gmra.mrb[128].mxu0 %v8098_v32  ;;  %v4280_v43 = vld [vmem:[%s12645_s3 + $0x28] sm:$0xff]  ;;  %v4476_v51 = vmax.f32 %v9861_v15, 0.0  ;;  %v8109_v60 = vld [vmem:[%s12642_s0 + $0x440] ss:$16 sps:$4 sm:$0xff]  }
 0x145   :  { %8519 = vpow2.f32 %v5077_v58  ;;  %v4677_v5 = vand.u32 2147483647, %v9937_v59  ;;  %2937 = vmatprep.mubr.bf16.mxu1 %v8099_v33  ;;  %v5457_v9 = vadd.f32 1.0, %v8510_v1  ;;  %3754 = vmatprep.mubr.bf16.mxu0 %v8101_v48  ;;  %v6240_v57 = vmul.f32 %v4280_v43, %v9861_v15  ;;  %v8110_v1 = vld [vmem:[%s12642_s0 + $0x448] ss:$16 sps:$4 sm:$0xff]  }
 0x146   :  { %v6433_v7 = vsub.f32 %v6041_v62, %v6237_v63  ;;  %v6042_v11 = vadd.f32 %v5654_v4, %v4474_v2  ;;  %v4678_v16 = vand.u32 2147483647, %v9940_v0  ;;  %v8111_v2 = vld [vmem:[%s12642_s0 + $0x464] ss:$16 sps:$4 sm:$0xff]  }
 0x147   :  { %v8512_v10 = vpop.eup %8511  ;;  %v4873_v14 = vsub.f32 0.0, %v4677_v5  ;;  %v2723_v18 = vpop.f32.mrb[24].mxu1  ;;  %8521 = vlog2.f32 %v5457_v9  ;;  %v4281_v5 = vld [vmem:[%s12645_s3 + $0x30] sm:$0xff] }
 0x148   :  { %v6631_v19 = vsel %vm6627_vm0, %v6433_v7, 0.0  ;;  %v5458_v20 = vadd.f32 1.0, %v8512_v10  ;;  %v2724_v21 = vadd.f32 %v9802_v17, %v2723_v18  ;;  %v3540_v27 = vpop.f32.mrb[24].mxu0  ;;  %v2725_v23 = vpop.f32.mrb[25].mxu1  ;;  %v6434_v28 = vsub.f32 %v6042_v11, %v6238_v8 }
 0x149   :  { %v8514_v25 = vpop.eup %8513  ;;  %v6632_v26 = vadd.f32 %v6631_v19, %v6630_v55  ;;  %v5079_v29 = vmul.f32 1.442695, %v4873_v14  ;;  %v4874_v30 = vsub.f32 0.0, %v4678_v16  ;;  %v3542_v31 = vpop.f32.mrb[25].mxu0  ;;  %v4477_v7 = vmax.f32 %v9874_v36, 0.0 }
 0x14a   :  { %v2726_v32 = vpop.f32.mrb[26].mxu1  ;;  %v5656_v33 = vmul.f32 0.6931472, %v8514_v25  ;;  %8523 = vlog2.f32 %v5458_v20  ;;  %v9961_v34 = vadd.f32 %v3540_v27, %v2724_v21  ;;  %v3543_v37 = vpop.f32.mrb[26].mxu0  ;;  %v6633_v41 = vsel %vm6627_vm0, %v6434_v28, 0.0 }
 0x14b   :  { %v2727_v35 = vadd.f32 %v9802_v17, %v2726_v32  ;;  %v2728_v38 = vpop.f32.mrb[27].mxu1  ;;  %v8516_v40 = vpop.eup %8515  ;;  %8525 = vpow2.f32 %v5079_v29  ;;  %v5081_v44 = vmul.f32 1.442695, %v4874_v30  ;;  %v6634_v48 = vadd.f32 %v6633_v41, %v6632_v26  ;;  %v8113_v27 = vld [vmem:[%s12642_s0 + $0x46c] ss:$16 sps:$4 sm:$0xff]  }
 0x14c   :  { %v3545_v46 = vpop.f32.mrb[27].mxu0  ;;  %v8518_v47 = vpop.eup %8517  ;;  %v6043_v50 = vadd.f32 %v5656_v33, %v4475_v13  ;;  %v5658_v52 = vmul.f32 0.6931472, %v8516_v40  ;;  %2938 = vmatmul.mubr.bf16.gmra.mrb[132].mxu1 %v8103_v49  ;;  %v4679_v54 = vand.u32 2147483647, %v9961_v34  ;;  %3755 = vmatmul.mubr.bf16.gmra.mrb[132].mxu0 %v8104_v56  ;;  %v6241_v29 = vmul.f32 %v4281_v5, %v9874_v36  ;;  %v4282_v30 = vld [vmem:[%s12645_s3 + $0x38] sm:$0xff] }
 0x14d   :  { %v5459_v53 = vadd.f32 1.0, %v8518_v47  ;;  %8527 = vpow2.f32 %v5081_v44  ;;  %2945 = vmatprep.mubr.bf16.mxu1 %v8105_v24  ;;  %v9975_v58 = vadd.f32 %v3543_v37, %v2727_v35  ;;  %3762 = vmatprep.mubr.bf16.mxu0 %v8107_v39  ;;  %v4478_v37 = vmax.f32 %v9881_v45, 0.0  ;;  %v8115_v41 = vld [vmem:[%s12642_s0 + $0x460] ss:$16 sps:$4 sm:$0xff]  }
 0x14e   :  { %v6435_v6 = vsub.f32 %v6043_v50, %v6239_v42  ;;  %v6044_v55 = vadd.f32 %v5658_v52, %v4476_v51  ;;  %v4875_v62 = vsub.f32 0.0, %v4679_v54  ;;  %v6242_v46 = vmul.f32 %v4282_v30, %v9881_v45  ;;  %v4283_v47 = vld [vmem:[%s12645_s3 + $0x40] sm:$0xff]  ;;  %v8116_v50 = vld [vmem:[%s12642_s0 + $0x468] ss:$16 sps:$4 sm:$0xff]  }
 0x14f   :  { %v8520_v61 = vpop.eup %8519  ;;  %8529 = vlog2.f32 %v5459_v53  ;;  %v2731_v63 = vpop.f32.mrb[28].mxu1  ;;  %v4680_v12 = vand.u32 2147483647, %v9975_v58  ;;  %v8117_v51 = vld [vmem:[%s12642_s0 + $0x484] ss:$16 sps:$4 sm:$0xff]  }
 0x150   :  { %v6635_v15 = vsel %vm6627_vm0, %v6435_v6, 0.0  ;;  %v6436_v4 = vsub.f32 %v6044_v55, %v6240_v57  ;;  %v5460_v8 = vadd.f32 1.0, %v8520_v61  ;;  %v3548_v9 = vpop.f32.mrb[28].mxu0  ;;  %v2733_v49 = vpop.f32.mrb[29].mxu1  ;;  %v5083_v11 = vmul.f32 1.442695, %v4875_v62 }
 0x151   :  { %v6636_v10 = vadd.f32 %v6635_v15, %v6634_v48  ;;  %v3550_v13 = vpop.f32.mrb[29].mxu0  ;;  %v2734_v14 = vpop.f32.mrb[30].mxu1  ;;  %v2732_v56 = vadd.f32 %v9802_v17, %v2731_v63  ;;  %v4876_v25 = vsub.f32 0.0, %v4680_v12  ;;  %v4479_v61 = vmax.f32 %v9898_v3, 0.0 }
 0x152   :  { %v8522_v16 = vpop.eup %8521  ;;  %v6637_v18 = vsel %vm6627_vm0, %v6436_v4, 0.0  ;;  %8531 = vlog2.f32 %v5460_v8  ;;  %v2735_v19 = vadd.f32 %v9802_v17, %v2734_v14  ;;  %v3551_v20 = vpop.f32.mrb[30].mxu0 }
 0x153   :  { %v2736_v21 = vpop.f32.mrb[31].mxu1  ;;  %v6638_v23 = vadd.f32 %v6637_v18, %v6636_v10  ;;  %v5660_v24 = vmul.f32 0.6931472, %v8522_v16  ;;  %8533 = vpow2.f32 %v5083_v11  ;;  %v3553_v26 = vpop.f32.mrb[31].mxu0  ;;  %v10002_v31 = vadd.f32 %v3548_v9, %v2732_v56  ;;  %v4284_v56 = vld [vmem:[%s12645_s3 + $0x48] sm:$0xff] }
 0x154   :  { %v8524_v28 = vpop.eup %8523  ;;  %v10004_v32 = vadd.f32 %v3551_v20, %v2735_v19  ;;  %2946 = vmatmul.mubr.bf16.gmra.mrb[136].mxu1 %v8109_v60  ;;  %v5085_v39 = vmul.f32 1.442695, %v4876_v25  ;;  %3763 = vmatmul.mubr.bf16.gmra.mrb[136].mxu0 %v8110_v1  ;;  %v6243_v18 = vmul.f32 %v4283_v47, %v9898_v3  ;;  %v4480_v20 = vmax.f32 %v9910_v22, 0.0 }
 0x155   :  { %v8526_v33 = vpop.eup %8525  ;;  %v6045_v35 = vadd.f32 %v5660_v24, %v4477_v7  ;;  %v5662_v38 = vmul.f32 0.6931472, %v8524_v28  ;;  %2953 = vmatprep.mubr.bf16.mxu1 %v8111_v2  ;;  %v4681_v36 = vand.u32 2147483647, %v10002_v31  ;;  %3770 = vmatprep.mubr.bf16.mxu0 %v8113_v27  ;;  %v8119_v2 = vld [vmem:[%s12642_s0 + $0x48c] ss:$16 sps:$4 sm:$0xff]   ;;  %v6244_v30 = vmul.f32 %v4284_v56, %v9910_v22 }
 0x156   :  { %v5461_v40 = vadd.f32 1.0, %v8526_v33  ;;  %8535 = vpow2.f32 %v5085_v39  ;;  %v4682_v54 = vand.u32 2147483647, %v10004_v32  ;;  %v4285_v24 = vld [vmem:[%s12645_s3 + $0x50] sm:$0xff]  ;;  %v4481_v39 = vmax.f32 %v9937_v59, 0.0 }
 0x157   :  { %v8528_v42 = vpop.eup %8527  ;;  %v6437_v43 = vsub.f32 %v6045_v35, %v6241_v29  ;;  %v6046_v44 = vadd.f32 %v5662_v38, %v4478_v37  ;;  %v2739_v48 = vpop.f32.mrb[32].mxu1  ;;  %v4877_v53 = vsub.f32 0.0, %v4681_v36  ;;  %v8121_v28 = vld [vmem:[%s12642_s0 + $0x480] ss:$16 sps:$4 sm:$0xff]   ;;  %v8122_v35 = vld [vmem:[%s12642_s0 + $0x488] ss:$16 sps:$4 sm:$0xff]  }
 0x158   :  { %8537 = vlog2.f32 %v5461_v40  ;;  %v5462_v52 = vadd.f32 1.0, %v8528_v42  ;;  %v3556_v45 = vpop.f32.mrb[32].mxu0  ;;  %v2741_v6 = vpop.f32.mrb[33].mxu1  ;;  %v2740_v62 = vadd.f32 %v9802_v17, %v2739_v48  ;;  %v4878_v49 = vsub.f32 0.0, %v4682_v54  ;;  %v8123_v37 = vld [vmem:[%s12642_s0 + $0x4a4] ss:$16 sps:$4 sm:$0xff]  }
 0x159   :  { %v8530_v55 = vpop.eup %8529  ;;  %v6639_v57 = vsel %vm6627_vm0, %v6437_v43, 0.0  ;;  %v6438_v60 = vsub.f32 %v6046_v44, %v6242_v46  ;;  %v3558_v63 = vpop.f32.mrb[33].mxu0  ;;  %v5087_v5 = vmul.f32 1.442695, %v4877_v53  ;;  %v6245_v44 = vmul.f32 %v4285_v24, %v9937_v59  ;;  %v8128_v56 = vld [vmem:[%s12642_s0 + $0x4a8] ss:$16 sps:$4 sm:$0xff]  }
 0x15a   :  { %v2742_v1 = vpop.f32.mrb[34].mxu1  ;;  %v6640_v15 = vadd.f32 %v6639_v57, %v6638_v23  ;;  %v5664_v4 = vmul.f32 0.6931472, %v8530_v55  ;;  %8539 = vlog2.f32 %v5462_v52  ;;  %v3559_v7 = vpop.f32.mrb[34].mxu0  ;;  %v10029_v10 = vadd.f32 %v3556_v45, %v2740_v62  ;;  %v4286_v52 = vld [vmem:[%s12645_s3 + $0x58] sm:$0xff] }
 0x15b   :  { %v2744_v8 = vpop.f32.mrb[35].mxu1  ;;  %v6641_v9 = vsel %vm6627_vm0, %v6438_v60, 0.0  ;;  %v2743_v11 = vadd.f32 %v9802_v17, %v2742_v1  ;;  %v3561_v12 = vpop.f32.mrb[35].mxu0  ;;  %8541 = vpow2.f32 %v5087_v5  ;;  %v5089_v27 = vmul.f32 1.442695, %v4878_v49 }
 0x15c   :  { %v8532_v13 = vpop.eup %8531  ;;  %v6642_v14 = vadd.f32 %v6641_v9, %v6640_v15  ;;  %v6047_v16 = vadd.f32 %v5664_v4, %v4479_v61  ;;  %2954 = vmatmul.mubr.bf16.gmra.mrb[140].mxu1 %v8115_v41  ;;  %3771 = vmatmul.mubr.bf16.gmra.mrb[140].mxu0 %v8116_v50  ;;  %v4683_v3 = vand.u32 2147483647, %v10029_v10  ;;  %v8125_v50 = vld [vmem:[%s12642_s0 + $0x4ac] ss:$16 sps:$4 sm:$0xff]   ;;  %v4482_v61 = vmax.f32 %v9940_v0, 0.0 }
 0x15d   :  { %v8534_v19 = vpop.eup %8533  ;;  %v5666_v21 = vmul.f32 0.6931472, %v8532_v13  ;;  %2961 = vmatprep.mubr.bf16.mxu1 %v8117_v51  ;;  %v10041_v26 = vadd.f32 %v3559_v7, %v2743_v11  ;;  %3778 = vmatprep.mubr.bf16.mxu0 %v8119_v2  ;;  %8543 = vpow2.f32 %v5089_v27  ;;  %v6246_v49 = vmul.f32 %v4286_v52, %v9940_v0  ;;  %v8127_v12 = vld [vmem:[%s12642_s0 + $0x4a0] ss:$16 sps:$4 sm:$0xff]   ;;  %v8129_v0 = vld [vmem:[%s12642_s0 + $0x4c4] ss:$16 sps:$4 sm:$0xff]  }
 0x15e   :  { %v6439_v23 = vsub.f32 %v6047_v16, %v6243_v18  ;;  %v5463_v25 = vadd.f32 1.0, %v8534_v19  ;;  %v4879_v40 = vsub.f32 0.0, %v4683_v3  ;;  %v4287_v19 = vld [vmem:[%s12645_s3 + $0x60] sm:$0xff] }
 0x15f   :  { %v6048_v29 = vadd.f32 %v5666_v21, %v4480_v20  ;;  %v2747_v33 = vpop.f32.mrb[36].mxu1  ;;  %v3564_v36 = vpop.f32.mrb[36].mxu0  ;;  %v4684_v46 = vand.u32 2147483647, %v10041_v26  ;;  %v6247_v52 = vmul.f32 %v4287_v19, %v9961_v34 }
 0x160   :  { %v6643_v38 = vsel %vm6627_vm0, %v6439_v23, 0.0  ;;  %8545 = vlog2.f32 %v5463_v25  ;;  %v2749_v41 = vpop.f32.mrb[37].mxu1  ;;  %v8536_v42 = vpop.eup %8535  ;;  %v5091_v54 = vmul.f32 1.442695, %v4879_v40  ;;  %v2748_v45 = vadd.f32 %v9802_v17, %v2747_v33 }
 0x161   :  { %v6644_v22 = vadd.f32 %v6643_v38, %v6642_v14  ;;  %v6440_v43 = vsub.f32 %v6048_v29, %v6244_v30  ;;  %v3566_v47 = vpop.f32.mrb[37].mxu0  ;;  %v2750_v48 = vpop.f32.mrb[38].mxu1  ;;  %v5464_v53 = vadd.f32 1.0, %v8536_v42  ;;  %v4880_v62 = vsub.f32 0.0, %v4684_v46 }
 0x162   :  { %v8538_v51 = vpop.eup %8537  ;;  %v2751_v6 = vadd.f32 %v9802_v17, %v2750_v48  ;;  %v3567_v59 = vpop.f32.mrb[38].mxu0  ;;  %v10067_v15 = vadd.f32 %v3564_v36, %v2748_v45  ;;  %v4483_v29 = vmax.f32 %v9961_v34, 0.0 }
 0x163   :  { %v2752_v55 = vpop.f32.mrb[39].mxu1  ;;  %v6645_v57 = vsel %vm6627_vm0, %v6440_v43, 0.0  ;;  %v5668_v60 = vmul.f32 0.6931472, %v8538_v51  ;;  %v3569_v63 = vpop.f32.mrb[39].mxu0  ;;  %8547 = vlog2.f32 %v5464_v53  ;;  %v4288_v53 = vld [vmem:[%s12645_s3 + $0x68] sm:$0xff] }
 0x164   :  { %v8540_v1 = vpop.eup %8539  ;;  %v6646_v2 = vadd.f32 %v6645_v57, %v6644_v22  ;;  %v10069_v4 = vadd.f32 %v3567_v59, %v2751_v6  ;;  %2962 = vmatmul.mubr.bf16.gmra.mrb[144].mxu1 %v8121_v28  ;;  %8549 = vpow2.f32 %v5091_v54  ;;  %v5093_v8 = vmul.f32 1.442695, %v4880_v62  ;;  %3779 = vmatmul.mubr.bf16.gmra.mrb[144].mxu0 %v8122_v35  ;;  %v8131_v35 = vld [vmem:[%s12642_s0 + $0x4cc] ss:$16 sps:$4 sm:$0xff]   ;;  %v8133_v59 = vld [vmem:[%s12642_s0 + $0x4c0] ss:$16 sps:$4 sm:$0xff]  }
 0x165   :  { %v6049_v5 = vadd.f32 %v5668_v60, %v4481_v39  ;;  %v5670_v7 = vmul.f32 0.6931472, %v8540_v1  ;;  %2969 = vmatprep.mubr.bf16.mxu1 %v8123_v37  ;;  %v8542_v9 = vpop.eup %8541  ;;  %v4685_v11 = vand.u32 2147483647, %v10067_v15  ;;  %3786 = vmatprep.mubr.bf16.mxu0 %v8125_v50  ;;  %v4484_v57 = vmax.f32 %v9975_v58, 0.0 }
 0x166   :  { %v5465_v16 = vadd.f32 1.0, %v8542_v9  ;;  %8551 = vpow2.f32 %v5093_v8  ;;  %v4686_v21 = vand.u32 2147483647, %v10069_v4  ;;  %v8134_v63 = vld [vmem:[%s12642_s0 + $0x4c8] ss:$16 sps:$4 sm:$0xff]  }
 0x167   :  { %v6441_v13 = vsub.f32 %v6049_v5, %v6245_v44  ;;  %v6050_v14 = vadd.f32 %v5670_v7, %v4482_v61  ;;  %v2755_v18 = vpop.f32.mrb[40].mxu1  ;;  %v4881_v20 = vsub.f32 0.0, %v4685_v11  ;;  %v3572_v23 = vpop.f32.mrb[40].mxu0  ;;  %v8135_v1 = vld [vmem:[%s12642_s0 + $0x4e4] ss:$16 sps:$4 sm:$0xff]  }
 0x168   :  { %v2756_v27 = vadd.f32 %v9802_v17, %v2755_v18  ;;  %v2757_v24 = vpop.f32.mrb[41].mxu1  ;;  %v8544_v25 = vpop.eup %8543  ;;  %8553 = vlog2.f32 %v5465_v16  ;;  %v4882_v36 = vsub.f32 0.0, %v4686_v21 }
 0x169   :  { %v6647_v3 = vsel %vm6627_vm0, %v6441_v13, 0.0  ;;  %v6442_v28 = vsub.f32 %v6050_v14, %v6246_v49  ;;  %v3574_v30 = vpop.f32.mrb[41].mxu0  ;;  %v2758_v33 = vpop.f32.mrb[42].mxu1  ;;  %v5466_v39 = vadd.f32 1.0, %v8544_v25  ;;  %v5095_v40 = vmul.f32 1.442695, %v4881_v20 }
 0x16a   :  { %v8546_v37 = vpop.eup %8545  ;;  %v6648_v38 = vadd.f32 %v6647_v3, %v6646_v2  ;;  %v3575_v41 = vpop.f32.mrb[42].mxu0  ;;  %v10093_v44 = vadd.f32 %v3572_v23, %v2756_v27  ;;  %v2759_v46 = vadd.f32 %v9802_v17, %v2758_v33  ;;  %v5097_v50 = vmul.f32 1.442695, %v4882_v36  ;;  %v4289_v13 = vld [vmem:[%s12645_s3 + $0x70] sm:$0xff]  ;;  %v8137_v27 = vld [vmem:[%s12642_s0 + $0x4ec] ss:$16 sps:$4 sm:$0xff]  }
 0x16b   :  { %v2760_v42 = vpop.f32.mrb[43].mxu1  ;;  %v6649_v22 = vsel %vm6627_vm0, %v6442_v28, 0.0  ;;  %v5672_v43 = vmul.f32 0.6931472, %v8546_v37  ;;  %v3577_v47 = vpop.f32.mrb[43].mxu0  ;;  %8555 = vlog2.f32 %v5466_v39  ;;  %v6248_v2 = vmul.f32 %v4288_v53, %v9975_v58 }
 0x16c   :  { %v6650_v48 = vadd.f32 %v6649_v22, %v6648_v38  ;;  %2970 = vmatmul.mubr.bf16.gmra.mrb[148].mxu1 %v8127_v12  ;;  %8557 = vpow2.f32 %v5095_v40  ;;  %v4687_v54 = vand.u32 2147483647, %v10093_v44  ;;  %3787 = vmatmul.mubr.bf16.gmra.mrb[148].mxu0 %v8128_v56  ;;  %v10101_v6 = vadd.f32 %v3575_v41, %v2759_v46  ;;  %v8139_v42 = vld [vmem:[%s12642_s0 + $0x4e0] ss:$16 sps:$4 sm:$0xff]  }
 0x16d   :  { %v6051_v51 = vadd.f32 %v5672_v43, %v4483_v29  ;;  %2977 = vmatprep.mubr.bf16.mxu1 %v8129_v0  ;;  %v8548_v45 = vpop.eup %8547  ;;  %8559 = vpow2.f32 %v5097_v50  ;;  %3794 = vmatprep.mubr.bf16.mxu0 %v8131_v35  ;;  %v4485_v29 = vmax.f32 %v10002_v31, 0.0  ;;  %v6249_v37 = vmul.f32 %v4289_v13, %v10002_v31  ;;  %v8141_v50 = vld [vmem:[%s12642_s0 + $0x504] ss:$16 sps:$4 sm:$0xff]  }
 0x16e   :  { %v8550_v55 = vpop.eup %8549  ;;  %v5674_v60 = vmul.f32 0.6931472, %v8548_v45  ;;  %v4883_v61 = vsub.f32 0.0, %v4687_v54  ;;  %v4688_v7 = vand.u32 2147483647, %v10101_v6  ;;  %v4486_v22 = vmax.f32 %v10004_v32, 0.0 }
 0x16f   :  { %v6443_v34 = vsub.f32 %v6051_v51, %v6247_v52  ;;  %v2763_v62 = vpop.f32.mrb[44].mxu1  ;;  %v5467_v5 = vadd.f32 1.0, %v8550_v55  ;;  %v3580_v8 = vpop.f32.mrb[44].mxu0 }
 0x170   :  { %v2765_v9 = vpop.f32.mrb[45].mxu1  ;;  %v8552_v49 = vpop.eup %8551  ;;  %v6052_v12 = vadd.f32 %v5674_v60, %v4484_v57  ;;  %v5099_v14 = vmul.f32 1.442695, %v4883_v61  ;;  %v2764_v16 = vadd.f32 %v9802_v17, %v2763_v62  ;;  %v4884_v19 = vsub.f32 0.0, %v4688_v7 }
 0x171   :  { %v6651_v11 = vsel %vm6627_vm0, %v6443_v34, 0.0  ;;  %v3582_v18 = vpop.f32.mrb[45].mxu0  ;;  %v2766_v56 = vpop.f32.mrb[46].mxu1  ;;  %8561 = vlog2.f32 %v5467_v5  ;;  %v5468_v58 = vadd.f32 1.0, %v8552_v49  ;;  %v8143_v9 = vld [vmem:[%s12642_s0 + $0x50c] ss:$16 sps:$4 sm:$0xff]  }
 0x172   :  { %v6652_v0 = vadd.f32 %v6651_v11, %v6650_v48  ;;  %v3583_v20 = vpop.f32.mrb[46].mxu0  ;;  %v2768_v21 = vpop.f32.mrb[47].mxu1  ;;  %v6444_v24 = vsub.f32 %v6052_v12, %v6248_v2  ;;  %8563 = vpow2.f32 %v5099_v14  ;;  %v10123_v25 = vadd.f32 %v3580_v8, %v2764_v16  ;;  %v8140_v48 = vld [vmem:[%s12642_s0 + $0x4e8] ss:$16 sps:$4 sm:$0xff]   ;;  %v10148_v2 = vld [vmem:[#allocation2] ss:$0 sm:$0xff] }
 0x173   :  { %v8554_v23 = vpop.eup %8553  ;;  %v2767_v3 = vadd.f32 %v9802_v17, %v2766_v56  ;;  %v3585_v28 = vpop.f32.mrb[47].mxu0  ;;  %8565 = vlog2.f32 %v5468_v58  ;;  %v5101_v33 = vmul.f32 1.442695, %v4884_v19  ;;  %v4290_v17 = vld [vmem:[%s12645_s3 + $0x78] sm:$0xff]  ;;  %v4291_v11 = vld [vmem:[%s12645_s3 + $0x80] sm:$0xff]  ;;  %v4487_v58 = vmax.f32 %v10029_v10, 0.0 }
 0x174   :  { %v5676_v30 = vmul.f32 0.6931472, %v8554_v23  ;;  %2978 = vmatmul.mubr.bf16.gmra.mrb[152].mxu1 %v8133_v59  ;;  %v6653_v35 = vsel %vm6627_vm0, %v6444_v24, 0.0  ;;  %v4689_v38 = vand.u32 2147483647, %v10123_v25  ;;  %3795 = vmatmul.mubr.bf16.gmra.mrb[152].mxu0 %v8134_v63  ;;  %v6250_v34 = vmul.f32 %v4290_v17, %v10004_v32 }
 0x175   :  { %2985 = vmatprep.mubr.bf16.mxu1 %v8135_v1  ;;  %v8556_v39 = vpop.eup %8555  ;;  %v6654_v40 = vadd.f32 %v6653_v35, %v6652_v0  ;;  %8567 = vpow2.f32 %v5101_v33  ;;  %v10133_v41 = vadd.f32 %v3583_v20, %v2767_v3  ;;  %3802 = vmatprep.mubr.bf16.mxu0 %v8137_v27  ;;  %v4292_v20 = vld [vmem:[%s12645_s3 + $0x88] sm:$0xff]  ;;  %v6251_v24 = vmul.f32 %v4291_v11, %v10029_v10  ;;  %v8145_v28 = vld [vmem:[%s12642_s0 + $0x500] ss:$16 sps:$4 sm:$0xff]  }
 0x176   :  { %v6053_v36 = vadd.f32 %v5676_v30, %v4485_v29  ;;  %v8558_v31 = vpop.eup %8557  ;;  %v5678_v43 = vmul.f32 0.6931472, %v8556_v39  ;;  %v4885_v46 = vsub.f32 0.0, %v4689_v38  ;;  %v4488_v30 = vmax.f32 %v10041_v26, 0.0  ;;  %v8146_v17 = vld [vmem:[%s12642_s0 + $0x508] ss:$16 sps:$4 sm:$0xff]  }
 0x177   :  { %v2771_v47 = vpop.f32.mrb[48].mxu1  ;;  %v8560_v51 = vpop.eup %8559  ;;  %v5469_v53 = vadd.f32 1.0, %v8558_v31  ;;  %v4690_v54 = vand.u32 2147483647, %v10133_v41  ;;  %v6252_v39 = vmul.f32 %v4292_v20, %v10041_v26  ;;  %v8152_v20 = vld [vmem:[%s12642_s0 + $0x528] ss:$16 sps:$4 sm:$0xff]  }
 0x178   :  { %v6445_v52 = vsub.f32 %v6053_v36, %v6249_v37  ;;  %v3588_v45 = vpop.f32.mrb[48].mxu0  ;;  %v2773_v59 = vpop.f32.mrb[49].mxu1  ;;  %v6054_v55 = vadd.f32 %v5678_v43, %v4486_v22  ;;  %v5470_v57 = vadd.f32 1.0, %v8560_v51  ;;  %v5103_v60 = vmul.f32 1.442695, %v4885_v46 }
 0x179   :  { %v3590_v61 = vpop.f32.mrb[49].mxu0  ;;  %v2774_v62 = vpop.f32.mrb[50].mxu1  ;;  %8569 = vlog2.f32 %v5469_v53  ;;  %v4886_v1 = vsub.f32 0.0, %v4690_v54  ;;  %v2772_v5 = vadd.f32 %v10148_v2, %v2771_v47  ;;  %v8149_v54 = vld [vmem:[%s12642_s0 + $0x52c] ss:$16 sps:$4 sm:$0xff]  }
 0x17a   :  { %v6655_v63 = vsel %vm6627_vm0, %v6445_v52, 0.0  ;;  %v3591_v7 = vpop.f32.mrb[50].mxu0  ;;  %v2776_v8 = vpop.f32.mrb[51].mxu1  ;;  %v6446_v32 = vsub.f32 %v6054_v55, %v6250_v34  ;;  %8571 = vlog2.f32 %v5470_v57  ;;  %v2775_v12 = vadd.f32 %v10148_v2, %v2774_v62  ;;  %v4293_v61 = vld [vmem:[%s12645_s3 + $0x90] sm:$0xff] }
 0x17b   :  { %v6656_v49 = vadd.f32 %v6655_v63, %v6654_v40  ;;  %v3593_v13 = vpop.f32.mrb[51].mxu0  ;;  %v8562_v14 = vpop.eup %8561  ;;  %8573 = vpow2.f32 %v5103_v60  ;;  %v5105_v16 = vmul.f32 1.442695, %v4886_v1  ;;  %v10158_v18 = vadd.f32 %v3588_v45, %v2772_v5 }
 0x17c   :  { %2986 = vmatmul.mubr.bf16.gmra.mrb[156].mxu1 %v8139_v42  ;;  %v8564_v56 = vpop.eup %8563  ;;  %v6657_v0 = vsel %vm6627_vm0, %v6446_v32, 0.0  ;;  %v5680_v19 = vmul.f32 0.6931472, %v8562_v14  ;;  %v10165_v21 = vadd.f32 %v3591_v7, %v2775_v12  ;;  %3803 = vmatmul.mubr.bf16.gmra.mrb[156].mxu0 %v8140_v48  ;;  %v8147_v48 = vld [vmem:[%s12642_s0 + $0x524] ss:$16 sps:$4 sm:$0xff]   ;;  %v4489_v8 = vmax.f32 %v10067_v15, 0.0 }
 0x17d   :  { %2993 = vmatprep.mubr.bf16.mxu1 %v8141_v50  ;;  %v8566_v27 = vpop.eup %8565  ;;  %v6658_v23 = vadd.f32 %v6657_v0, %v6656_v49  ;;  %v5471_v3 = vadd.f32 1.0, %v8564_v56  ;;  %8575 = vpow2.f32 %v5105_v16  ;;  %3810 = vmatprep.mubr.bf16.mxu0 %v8143_v9  ;;  %v4691_v35 = vand.u32 2147483647, %v10158_v18  ;;  %v4294_v49 = vld [vmem:[%s12645_s3 + $0x98] sm:$0xff]  ;;  %v8151_v14 = vld [vmem:[%s12642_s0 + $0x520] ss:$16 sps:$4 sm:$0xff]  }
 0x17e   :  { %v6055_v29 = vadd.f32 %v5680_v19, %v4487_v58  ;;  %v5682_v33 = vmul.f32 0.6931472, %v8566_v27  ;;  %v4692_v10 = vand.u32 2147483647, %v10165_v21  ;;  %v4490_v12 = vmax.f32 %v10069_v4, 0.0 }
 0x17f   :  { %v2779_v37 = vpop.f32.mrb[52].mxu1  ;;  %v8568_v38 = vpop.eup %8567  ;;  %8577 = vlog2.f32 %v5471_v3  ;;  %v4887_v43 = vsub.f32 0.0, %v4691_v35  ;;  %v6253_v56 = vmul.f32 %v4293_v61, %v10067_v15  ;;  %v4491_v3 = vmax.f32 %v10093_v44, 0.0 }
 0x180   :  { %v3596_v40 = vpop.f32.mrb[52].mxu0  ;;  %v2781_v36 = vpop.f32.mrb[53].mxu1  ;;  %v6447_v42 = vsub.f32 %v6055_v29, %v6251_v24  ;;  %v6056_v31 = vadd.f32 %v5682_v33, %v4488_v30  ;;  %v5472_v22 = vadd.f32 1.0, %v8568_v38  ;;  %v4888_v26 = vsub.f32 0.0, %v4692_v10 }
 0x181   :  { %v3598_v46 = vpop.f32.mrb[53].mxu0  ;;  %v2782_v47 = vpop.f32.mrb[54].mxu1  ;;  %v2780_v50 = vadd.f32 %v10148_v2, %v2779_v37  ;;  %v5107_v55 = vmul.f32 1.442695, %v4887_v43  ;;  %v6254_v24 = vmul.f32 %v4294_v49, %v10069_v4  ;;  %v4295_v4 = vld [vmem:[%s12645_s3 + $0xa0] sm:$0xff] }
 0x182   :  { %v2783_v51 = vadd.f32 %v10148_v2, %v2782_v47  ;;  %v3599_v52 = vpop.f32.mrb[54].mxu0  ;;  %v2784_v53 = vpop.f32.mrb[55].mxu1  ;;  %v6659_v45 = vsel %vm6627_vm0, %v6447_v42, 0.0  ;;  %v6448_v59 = vsub.f32 %v6056_v31, %v6252_v39  ;;  %8579 = vlog2.f32 %v5472_v22  ;;  %v8153_v39 = vld [vmem:[%s12642_s0 + $0x544] ss:$16 sps:$4 sm:$0xff]  }
 0x183   :  { %v3601_v34 = vpop.f32.mrb[55].mxu0  ;;  %v8570_v57 = vpop.eup %8569  ;;  %v6660_v60 = vadd.f32 %v6659_v45, %v6658_v23  ;;  %v5109_v62 = vmul.f32 1.442695, %v4888_v26  ;;  %v10190_v63 = vadd.f32 %v3596_v40, %v2780_v50  ;;  %8581 = vpow2.f32 %v5107_v55  ;;  %v8155_v43 = vld [vmem:[%s12642_s0 + $0x54c] ss:$16 sps:$4 sm:$0xff]  }
 0x184   :  { %v10192_v1 = vadd.f32 %v3599_v52, %v2783_v51  ;;  %2994 = vmatmul.mubr.bf16.gmra.mrb[160].mxu1 %v8145_v28  ;;  %v8572_v5 = vpop.eup %8571  ;;  %v6661_v7 = vsel %vm6627_vm0, %v6448_v59, 0.0  ;;  %v5684_v9 = vmul.f32 0.6931472, %v8570_v57  ;;  %3811 = vmatmul.mubr.bf16.gmra.mrb[160].mxu0 %v8146_v17  ;;  %v6255_v59 = vmul.f32 %v4295_v4, %v10093_v44  ;;  %v4296_v55 = vld [vmem:[%s12645_s3 + $0xa8] sm:$0xff]  ;;  %v8159_v49 = vld [vmem:[%s12642_s0 + $0x564] ss:$16 sps:$4 sm:$0xff]  }
 0x185   :  { %3001 = vmatprep.mubr.bf16.mxu1 %v8147_v48  ;;  %v8574_v32 = vpop.eup %8573  ;;  %v6662_v11 = vadd.f32 %v6661_v7, %v6660_v60  ;;  %v5686_v13 = vmul.f32 0.6931472, %v8572_v5  ;;  %8583 = vpow2.f32 %v5109_v62  ;;  %3818 = vmatprep.mubr.bf16.mxu0 %v8149_v54  ;;  %v4693_v58 = vand.u32 2147483647, %v10190_v63  ;;  %v8157_v62 = vld [vmem:[%s12642_s0 + $0x540] ss:$16 sps:$4 sm:$0xff]  }
 0x186   :  { %v6057_v16 = vadd.f32 %v5684_v9, %v4489_v8  ;;  %v5473_v0 = vadd.f32 1.0, %v8574_v32  ;;  %v4694_v28 = vand.u32 2147483647, %v10192_v1  ;;  %v4492_v60 = vmax.f32 %v10101_v6, 0.0  ;;  %v8158_v9 = vld [vmem:[%s12642_s0 + $0x548] ss:$16 sps:$4 sm:$0xff]  }
 0x187   :  { %v2787_v19 = vpop.f32.mrb[56].mxu1  ;;  %v8576_v27 = vpop.eup %8575  ;;  %v6058_v23 = vadd.f32 %v5686_v13, %v4490_v12  ;;  %v4889_v35 = vsub.f32 0.0, %v4693_v58  ;;  %v6256_v12 = vmul.f32 %v4296_v55, %v10101_v6  ;;  %v4493_v4 = vmax.f32 %v10123_v25, 0.0 }
 0x188   :  { %v3604_v29 = vpop.f32.mrb[56].mxu0  ;;  %v2789_v30 = vpop.f32.mrb[57].mxu1  ;;  %v6449_v33 = vsub.f32 %v6057_v16, %v6253_v56  ;;  %8585 = vlog2.f32 %v5473_v0  ;;  %v5474_v15 = vadd.f32 1.0, %v8576_v27  ;;  %v4890_v36 = vsub.f32 0.0, %v4694_v28  ;;  %v4297_v28 = vld [vmem:[%s12645_s3 + $0xb0] sm:$0xff] }
 0x189   :  { %v3606_v37 = vpop.f32.mrb[57].mxu0  ;;  %v2790_v38 = vpop.f32.mrb[58].mxu1  ;;  %v6450_v40 = vsub.f32 %v6058_v23, %v6254_v24  ;;  %v2788_v17 = vadd.f32 %v10148_v2, %v2787_v19  ;;  %v5111_v48 = vmul.f32 1.442695, %v4889_v35  ;;  %v4298_v35 = vld [vmem:[%s12645_s3 + $0xb8] sm:$0xff] }
 0x18a   :  { %v8578_v10 = vpop.eup %8577  ;;  %v2791_v42 = vadd.f32 %v10148_v2, %v2790_v38  ;;  %v3607_v31 = vpop.f32.mrb[58].mxu0  ;;  %v6663_v46 = vsel %vm6627_vm0, %v6449_v33, 0.0  ;;  %8587 = vlog2.f32 %v5474_v15  ;;  %v5113_v52 = vmul.f32 1.442695, %v4890_v36  ;;  %v8161_v33 = vld [vmem:[%s12642_s0 + $0x56c] ss:$16 sps:$4 sm:$0xff]  }
 0x18b   :  { %v2792_v22 = vpop.f32.mrb[59].mxu1  ;;  %v5688_v47 = vmul.f32 0.6931472, %v8578_v10  ;;  %v3609_v26 = vpop.f32.mrb[59].mxu0  ;;  %v6664_v50 = vadd.f32 %v6663_v46, %v6662_v11  ;;  %v6665_v51 = vsel %vm6627_vm0, %v6450_v40, 0.0  ;;  %v10224_v53 = vadd.f32 %v3604_v29, %v2788_v17 }
 0x18c   :  { %3002 = vmatmul.mubr.bf16.gmra.mrb[164].mxu1 %v8151_v14  ;;  %v8580_v54 = vpop.eup %8579  ;;  %8589 = vpow2.f32 %v5111_v48  ;;  %v10230_v34 = vadd.f32 %v3607_v31, %v2791_v42  ;;  %3819 = vmatmul.mubr.bf16.gmra.mrb[164].mxu0 %v8152_v20  ;;  %v6257_v22 = vmul.f32 %v4297_v28, %v10123_v25  ;;  %v8163_v25 = vld [vmem:[%s12642_s0 + $0x560] ss:$16 sps:$4 sm:$0xff]   ;;  %v4495_v28 = vmax.f32 %v10158_v18, 0.0 }
 0x18d   :  { %v6059_v45 = vadd.f32 %v5688_v47, %v4491_v3  ;;  %3009 = vmatprep.mubr.bf16.mxu1 %v8153_v39  ;;  %v6666_v57 = vadd.f32 %v6665_v51, %v6664_v50  ;;  %v5690_v61 = vmul.f32 0.6931472, %v8580_v54  ;;  %8591 = vpow2.f32 %v5113_v52  ;;  %3826 = vmatprep.mubr.bf16.mxu0 %v8155_v43  ;;  %v8582_v44 = vpop.eup %8581 }
 0x18e   :  { %v4695_v7 = vand.u32 2147483647, %v10224_v53  ;;  %v5475_v13 = vadd.f32 1.0, %v8582_v44  ;;  %v4696_v14 = vand.u32 2147483647, %v10230_v34  ;;  %v4494_v47 = vmax.f32 %v10133_v41, 0.0 }
 0x18f   :  { %v6451_v5 = vsub.f32 %v6059_v45, %v6255_v59  ;;  %v2795_v8 = vpop.f32.mrb[60].mxu1  ;;  %v8584_v32 = vpop.eup %8583  ;;  %v6060_v11 = vadd.f32 %v5690_v61, %v4492_v60  ;;  %v6258_v50 = vmul.f32 %v4298_v35, %v10133_v41  ;;  %v8164_v45 = vld [vmem:[%s12642_s0 + $0x568] ss:$16 sps:$4 sm:$0xff]   ;;  %v8165_v44 = vld [vmem:[%s12642_s0 + $0x584] ss:$16 sps:$4 sm:$0xff]  }
 0x190   :  { %v3612_v16 = vpop.f32.mrb[60].mxu0  ;;  %v2797_v56 = vpop.f32.mrb[61].mxu1  ;;  %v5476_v58 = vadd.f32 1.0, %v8584_v32  ;;  %v4891_v19 = vsub.f32 0.0, %v4695_v7  ;;  %v2796_v20 = vadd.f32 %v10148_v2, %v2795_v8  ;;  %8593 = vlog2.f32 %v5475_v13 }
 0x191   :  { %v6667_v0 = vsel %vm6627_vm0, %v6451_v5, 0.0  ;;  %v3614_v27 = vpop.f32.mrb[61].mxu0  ;;  %v2798_v23 = vpop.f32.mrb[62].mxu1  ;;  %v6452_v3 = vsub.f32 %v6060_v11, %v6256_v12  ;;  %v4892_v6 = vsub.f32 0.0, %v4696_v14  ;;  %v8167_v12 = vld [vmem:[%s12642_s0 + $0x58c] ss:$16 sps:$4 sm:$0xff]  }
 0x192   :  { %v6668_v24 = vadd.f32 %v6667_v0, %v6666_v57  ;;  %v3615_v29 = vpop.f32.mrb[62].mxu0  ;;  %v2800_v30 = vpop.f32.mrb[63].mxu1  ;;  %8595 = vlog2.f32 %v5476_v58  ;;  %v5115_v37 = vmul.f32 1.442695, %v4891_v19  ;;  %v10256_v38 = vadd.f32 %v3612_v16, %v2796_v20  ;;  %v4299_v20 = vld [vmem:[%s12645_s3 + $0xc0] sm:$0xff] }
 0x193   :  { %v8586_v15 = vpop.eup %8585  ;;  %v2799_v39 = vadd.f32 %v10148_v2, %v2798_v23  ;;  %v3617_v10 = vpop.f32.mrb[63].mxu0  ;;  %v6669_v40 = vsel %vm6627_vm0, %v6452_v3, 0.0  ;;  %v5117_v17 = vmul.f32 1.442695, %v4892_v6 }
 0x194   :  { %v5692_v36 = vmul.f32 0.6931472, %v8586_v15  ;;  %3010 = vmatmul.mubr.bf16.gmra.mrb[168].mxu1 %v8157_v62  ;;  %v8588_v42 = vpop.eup %8587  ;;  %v6670_v31 = vadd.f32 %v6669_v40, %v6668_v24  ;;  %8597 = vpow2.f32 %v5115_v37  ;;  %v4697_v43 = vand.u32 2147483647, %v10256_v38  ;;  %3827 = vmatmul.mubr.bf16.gmra.mrb[168].mxu0 %v8158_v9 }
 0x195   :  { %3017 = vmatprep.mubr.bf16.mxu1 %v8159_v49  ;;  %v5694_v48 = vmul.f32 0.6931472, %v8588_v42  ;;  %8599 = vpow2.f32 %v5117_v17  ;;  %3834 = vmatprep.mubr.bf16.mxu0 %v8161_v33  ;;  %v10265_v52 = vadd.f32 %v3615_v29, %v2799_v39  ;;  %v4300_v29 = vld [vmem:[%s12645_s3 + $0xc8] sm:$0xff]  ;;  %v4496_v33 = vmax.f32 %v10165_v21, 0.0 }
 0x196   :  { %v6061_v46 = vadd.f32 %v5692_v36, %v4493_v4  ;;  %v8590_v26 = vpop.eup %8589  ;;  %v4893_v51 = vsub.f32 0.0, %v4697_v43  ;;  %v6259_v40 = vmul.f32 %v4299_v20, %v10158_v18  ;;  %v8169_v36 = vld [vmem:[%s12642_s0 + $0x580] ss:$16 sps:$4 sm:$0xff]   ;;  %v8170_v17 = vld [vmem:[%s12642_s0 + $0x588] ss:$16 sps:$4 sm:$0xff]  }
 0x197   :  { %v2803_v54 = vpop.f32.mrb[64].mxu1  ;;  %v8592_v59 = vpop.eup %8591  ;;  %v6062_v57 = vadd.f32 %v5694_v48, %v4494_v47  ;;  %v5477_v60 = vadd.f32 1.0, %v8590_v26  ;;  %v4698_v8 = vand.u32 2147483647, %v10265_v52  ;;  %v8171_v18 = vld [vmem:[%s12642_s0 + $0x5a4] ss:$16 sps:$4 sm:$0xff]  }
 0x198   :  { %v6453_v55 = vsub.f32 %v6061_v46, %v6257_v22  ;;  %v2804_v61 = vadd.f32 %v10148_v2, %v2803_v54  ;;  %v3620_v62 = vpop.f32.mrb[64].mxu0  ;;  %v2805_v41 = vpop.f32.mrb[65].mxu1  ;;  %v5478_v5 = vadd.f32 1.0, %v8592_v59  ;;  %v5119_v7 = vmul.f32 1.442695, %v4893_v51 }
 0x199   :  { %v6454_v49 = vsub.f32 %v6062_v57, %v6258_v50  ;;  %8601 = vlog2.f32 %v5477_v60  ;;  %v3622_v32 = vpop.f32.mrb[65].mxu0  ;;  %v2806_v11 = vpop.f32.mrb[66].mxu1  ;;  %v4894_v14 = vsub.f32 0.0, %v4698_v8  ;;  %v6260_v22 = vmul.f32 %v4300_v29, %v10165_v21  ;;  %v8173_v60 = vld [vmem:[%s12642_s0 + $0x5ac] ss:$16 sps:$4 sm:$0xff]  }
 0x19a   :  { %v6671_v9 = vsel %vm6627_vm0, %v6453_v55, 0.0  ;;  %8603 = vlog2.f32 %v5478_v5  ;;  %v10282_v16 = vadd.f32 %v3620_v62, %v2804_v61  ;;  %v3623_v56 = vpop.f32.mrb[66].mxu0  ;;  %v2808_v0 = vpop.f32.mrb[67].mxu1  ;;  %v2807_v27 = vadd.f32 %v10148_v2, %v2806_v11  ;;  %v8176_v29 = vld [vmem:[%s12642_s0 + $0x5a8] ss:$16 sps:$4 sm:$0xff]  }
 0x19b   :  { %v6672_v13 = vadd.f32 %v6671_v9, %v6670_v31  ;;  %v8594_v58 = vpop.eup %8593  ;;  %v6673_v19 = vsel %vm6627_vm0, %v6454_v49, 0.0  ;;  %8605 = vpow2.f32 %v5119_v7  ;;  %v3625_v23 = vpop.f32.mrb[67].mxu0  ;;  %v5121_v30 = vmul.f32 1.442695, %v4894_v14  ;;  %v4301_v9 = vld [vmem:[%s12645_s3 + $0xd0] sm:$0xff] }
 0x19c   :  { %3018 = vmatmul.mubr.bf16.gmra.mrb[172].mxu1 %v8163_v25  ;;  %v8596_v24 = vpop.eup %8595  ;;  %v5696_v6 = vmul.f32 0.6931472, %v8594_v58  ;;  %3835 = vmatmul.mubr.bf16.gmra.mrb[172].mxu0 %v8164_v45  ;;  %v4699_v35 = vand.u32 2147483647, %v10282_v16  ;;  %v10295_v37 = vadd.f32 %v3623_v56, %v2807_v27  ;;  %v4497_v11 = vmax.f32 %v10190_v63, 0.0 }
 0x19d   :  { %v6674_v3 = vadd.f32 %v6673_v19, %v6672_v13  ;;  %3025 = vmatprep.mubr.bf16.mxu1 %v8165_v44  ;;  %v5698_v15 = vmul.f32 0.6931472, %v8596_v24  ;;  %3842 = vmatprep.mubr.bf16.mxu0 %v8167_v12  ;;  %8607 = vpow2.f32 %v5121_v30  ;;  %v4302_v13 = vld [vmem:[%s12645_s3 + $0xd8] sm:$0xff]  ;;  %v4498_v19 = vmax.f32 %v10192_v1, 0.0 }
 0x19e   :  { %v8598_v39 = vpop.eup %8597  ;;  %v6063_v10 = vadd.f32 %v5696_v6, %v4495_v28  ;;  %v4895_v46 = vsub.f32 0.0, %v4699_v35  ;;  %v4700_v51 = vand.u32 2147483647, %v10295_v37  ;;  %v6261_v24 = vmul.f32 %v4301_v9, %v10190_v63  ;;  %v8175_v6 = vld [vmem:[%s12642_s0 + $0x5a0] ss:$16 sps:$4 sm:$0xff]  }
 0x19f   :  { %v2811_v4 = vpop.f32.mrb[68].mxu1  ;;  %v8600_v42 = vpop.eup %8599  ;;  %v6064_v31 = vadd.f32 %v5698_v15, %v4496_v33  ;;  %v5479_v43 = vadd.f32 1.0, %v8598_v39  ;;  %v6262_v33 = vmul.f32 %v4302_v13, %v10192_v1  ;;  %v4303_v15 = vld [vmem:[%s12645_s3 + $0xe0] sm:$0xff] }
 0x1a0   :  { %v3628_v47 = vpop.f32.mrb[68].mxu0  ;;  %v2813_v48 = vpop.f32.mrb[69].mxu1  ;;  %v6455_v26 = vsub.f32 %v6063_v10, %v6259_v40  ;;  %v5480_v50 = vadd.f32 1.0, %v8600_v42  ;;  %v5123_v59 = vmul.f32 1.442695, %v4895_v46  ;;  %v2812_v55 = vadd.f32 %v10148_v2, %v2811_v4 }
 0x1a1   :  { %v3630_v54 = vpop.f32.mrb[69].mxu0  ;;  %v2814_v25 = vpop.f32.mrb[70].mxu1  ;;  %v6456_v45 = vsub.f32 %v6064_v31, %v6260_v22  ;;  %8609 = vlog2.f32 %v5479_v43  ;;  %v4896_v62 = vsub.f32 0.0, %v4700_v51  ;;  %v8177_v1 = vld [vmem:[%s12642_s0 + $0x5c4] ss:$16 sps:$4 sm:$0xff]  }
 0x1a2   :  { %v3631_v21 = vpop.f32.mrb[70].mxu0  ;;  %v2816_v57 = vpop.f32.mrb[71].mxu1  ;;  %v6675_v61 = vsel %vm6627_vm0, %v6455_v26, 0.0  ;;  %8611 = vlog2.f32 %v5480_v50  ;;  %v2815_v41 = vadd.f32 %v10148_v2, %v2814_v25  ;;  %v10319_v49 = vadd.f32 %v3628_v47, %v2812_v55  ;;  %v8179_v31 = vld [vmem:[%s12642_s0 + $0x5cc] ss:$16 sps:$4 sm:$0xff]  }
 0x1a3   :  { %v3633_v44 = vpop.f32.mrb[71].mxu0  ;;  %v8602_v5 = vpop.eup %8601  ;;  %v6676_v7 = vadd.f32 %v6675_v61, %v6674_v3  ;;  %v6677_v8 = vsel %vm6627_vm0, %v6456_v45, 0.0  ;;  %8613 = vpow2.f32 %v5123_v59  ;;  %v5125_v14 = vmul.f32 1.442695, %v4896_v62  ;;  %v4304_v62 = vld [vmem:[%s12645_s3 + $0xe8] sm:$0xff] }
 0x1a4   :  { %3026 = vmatmul.mubr.bf16.gmra.mrb[176].mxu1 %v8169_v36  ;;  %v8604_v32 = vpop.eup %8603  ;;  %v5700_v12 = vmul.f32 0.6931472, %v8602_v5  ;;  %v10325_v56 = vadd.f32 %v3631_v21, %v2815_v41  ;;  %3843 = vmatmul.mubr.bf16.gmra.mrb[176].mxu0 %v8170_v17  ;;  %v4701_v27 = vand.u32 2147483647, %v10319_v49  ;;  %v4499_v50 = vmax.f32 %v10224_v53, 0.0 }
 0x1a5   :  { %3033 = vmatprep.mubr.bf16.mxu1 %v8171_v18  ;;  %v8606_v0 = vpop.eup %8605  ;;  %v6678_v58 = vadd.f32 %v6677_v8, %v6676_v7  ;;  %v5702_v20 = vmul.f32 0.6931472, %v8604_v32  ;;  %3850 = vmatprep.mubr.bf16.mxu0 %v8173_v60  ;;  %8615 = vpow2.f32 %v5125_v14  ;;  %v6263_v61 = vmul.f32 %v4303_v15, %v10224_v53  ;;  %v8181_v13 = vld [vmem:[%s12642_s0 + $0x5c0] ss:$16 sps:$4 sm:$0xff]  }
 0x1a6   :  { %v6065_v23 = vadd.f32 %v5700_v12, %v4497_v11  ;;  %v5481_v3 = vadd.f32 1.0, %v8606_v0  ;;  %v4897_v35 = vsub.f32 0.0, %v4701_v27  ;;  %v4702_v63 = vand.u32 2147483647, %v10325_v56 }
 0x1a7   :  { %v2819_v28 = vpop.f32.mrb[72].mxu1  ;;  %v6066_v30 = vadd.f32 %v5702_v20, %v4498_v19  ;;  %v3636_v39 = vpop.f32.mrb[72].mxu0  ;;  %v4500_v7 = vmax.f32 %v10230_v34, 0.0  ;;  %v6264_v0 = vmul.f32 %v4304_v62, %v10230_v34  ;;  %v4501_v15 = vmax.f32 %v10256_v38, 0.0 }
 0x1a8   :  { %v2821_v10 = vpop.f32.mrb[73].mxu1  ;;  %v8608_v40 = vpop.eup %8607  ;;  %v6457_v4 = vsub.f32 %v6065_v23, %v6261_v24  ;;  %8617 = vlog2.f32 %v5481_v3  ;;  %v2820_v36 = vadd.f32 %v10148_v2, %v2819_v28  ;;  %v5127_v46 = vmul.f32 1.442695, %v4897_v35  ;;  %v8182_v23 = vld [vmem:[%s12642_s0 + $0x5c8] ss:$16 sps:$4 sm:$0xff]  }
 0x1a9   :  { %v3638_v17 = vpop.f32.mrb[73].mxu0  ;;  %v2822_v42 = vpop.f32.mrb[74].mxu1  ;;  %v6458_v22 = vsub.f32 %v6066_v30, %v6262_v33  ;;  %v5482_v43 = vadd.f32 1.0, %v8608_v40  ;;  %v4898_v47 = vsub.f32 0.0, %v4702_v63  ;;  %v8183_v24 = vld [vmem:[%s12642_s0 + $0x5e4] ss:$16 sps:$4 sm:$0xff]  }
 0x1aa   :  { %v3639_v48 = vpop.f32.mrb[74].mxu0  ;;  %v2824_v18 = vpop.f32.mrb[75].mxu1  ;;  %v6679_v26 = vsel %vm6627_vm0, %v6457_v4, 0.0  ;;  %v10350_v51 = vadd.f32 %v3636_v39, %v2820_v36  ;;  %v2823_v54 = vadd.f32 %v10148_v2, %v2822_v42  ;;  %v8185_v30 = vld [vmem:[%s12642_s0 + $0x5ec] ss:$16 sps:$4 sm:$0xff]  }
 0x1ab   :  { %v3641_v25 = vpop.f32.mrb[75].mxu0  ;;  %v8610_v45 = vpop.eup %8609  ;;  %v6680_v59 = vadd.f32 %v6679_v26, %v6678_v58  ;;  %v6681_v55 = vsel %vm6627_vm0, %v6458_v22, 0.0  ;;  %8619 = vlog2.f32 %v5482_v43  ;;  %v5129_v21 = vmul.f32 1.442695, %v4898_v47  ;;  %v4305_v58 = vld [vmem:[%s12645_s3 + $0xf0] sm:$0xff] }
 0x1ac   :  { %3034 = vmatmul.mubr.bf16.gmra.mrb[180].mxu1 %v8175_v6  ;;  %v8612_v57 = vpop.eup %8611  ;;  %v5704_v60 = vmul.f32 0.6931472, %v8610_v45  ;;  %8621 = vpow2.f32 %v5127_v46  ;;  %v4703_v41 = vand.u32 2147483647, %v10350_v51  ;;  %3851 = vmatmul.mubr.bf16.gmra.mrb[180].mxu0 %v8176_v29  ;;  %v10360_v53 = vadd.f32 %v3639_v48, %v2823_v54  ;;  %v4306_v46 = vld [vmem:[%s12645_s3 + $0xf8] sm:$0xff] }
 0x1ad   :  { %3041 = vmatprep.mubr.bf16.mxu1 %v8177_v1  ;;  %v8614_v44 = vpop.eup %8613  ;;  %v6682_v5 = vadd.f32 %v6681_v55, %v6680_v59  ;;  %v5706_v8 = vmul.f32 0.6931472, %v8612_v57  ;;  %8623 = vpow2.f32 %v5129_v21  ;;  %3858 = vmatprep.mubr.bf16.mxu0 %v8179_v31  ;;  %v6265_v43 = vmul.f32 %v4305_v58, %v10256_v38  ;;  %v8187_v38 = vld [vmem:[%s12642_s0 + $0x5e0] ss:$16 sps:$4 sm:$0xff]  }
 0x1ae   :  { %v6067_v9 = vadd.f32 %v5704_v60, %v4499_v50  ;;  %v5483_v32 = vadd.f32 1.0, %v8614_v44  ;;  %v4899_v11 = vsub.f32 0.0, %v4703_v41  ;;  %v4704_v63 = vand.u32 2147483647, %v10360_v53  ;;  %v8188_v60 = vld [vmem:[%s12642_s0 + $0x5e8] ss:$16 sps:$4 sm:$0xff]  }
 0x1af   :  { %v2827_v12 = vpop.f32.mrb[76].mxu1  ;;  %v6068_v14 = vadd.f32 %v5706_v8, %v4500_v7  ;;  %v3644_v20 = vpop.f32.mrb[76].mxu0  ;;  %v4502_v54 = vmax.f32 %v10265_v52, 0.0  ;;  %v6266_v44 = vmul.f32 %v4306_v46, %v10265_v52  ;;  %v4307_v52 = vld [vmem:[%s12645_s3 + $0x100] sm:$0xff] }
 0x1b0   :  { %v2828_v19 = vadd.f32 %v10148_v2, %v2827_v12  ;;  %v2829_v27 = vpop.f32.mrb[77].mxu1  ;;  %v8616_v3 = vpop.eup %8615  ;;  %v6459_v28 = vsub.f32 %v6067_v9, %v6263_v61  ;;  %8625 = vlog2.f32 %v5483_v32  ;;  %v5131_v34 = vmul.f32 1.442695, %v4899_v11  ;;  %v8189_v61 = vld [vmem:[%s12642_s0 + $0x604] ss:$16 sps:$4 sm:$0xff]  }
 0x1b1   :  { %v3646_v6 = vpop.f32.mrb[77].mxu0  ;;  %v2830_v29 = vpop.f32.mrb[78].mxu1  ;;  %v6460_v33 = vsub.f32 %v6068_v14, %v6264_v0  ;;  %v5484_v35 = vadd.f32 1.0, %v8616_v3  ;;  %v4900_v47 = vsub.f32 0.0, %v4704_v63  ;;  %v8191_v32 = vld [vmem:[%s12642_s0 + $0x60c] ss:$16 sps:$4 sm:$0xff]   ;;  %v6267_v63 = vmul.f32 %v4307_v52, %v10282_v16 }
 0x1b2   :  { %v3647_v39 = vpop.f32.mrb[78].mxu0  ;;  %v2832_v10 = vpop.f32.mrb[79].mxu1  ;;  %v6683_v4 = vsel %vm6627_vm0, %v6459_v28, 0.0  ;;  %8627 = vpow2.f32 %v5131_v34  ;;  %v10382_v36 = vadd.f32 %v3644_v20, %v2828_v19  ;;  %v2831_v17 = vadd.f32 %v10148_v2, %v2830_v29 }
 0x1b3   :  { %v8618_v40 = vpop.eup %8617  ;;  %v3649_v42 = vpop.f32.mrb[79].mxu0  ;;  %v6684_v1 = vadd.f32 %v6683_v4, %v6682_v5  ;;  %v6685_v31 = vsel %vm6627_vm0, %v6460_v33, 0.0  ;;  %8629 = vlog2.f32 %v5484_v35  ;;  %v5133_v55 = vmul.f32 1.442695, %v4900_v47 }
 0x1b4   :  { %v5708_v22 = vmul.f32 0.6931472, %v8618_v40  ;;  %3042 = vmatmul.mubr.bf16.gmra.mrb[184].mxu1 %v8181_v13  ;;  %v4705_v48 = vand.u32 2147483647, %v10382_v36  ;;  %3859 = vmatmul.mubr.bf16.gmra.mrb[184].mxu0 %v8182_v23  ;;  %v10392_v25 = vadd.f32 %v3647_v39, %v2831_v17  ;;  %v4503_v19 = vmax.f32 %v10282_v16, 0.0  ;;  %v4308_v17 = vld [vmem:[%s12645_s3 + $0x108] sm:$0xff] }
 0x1b5   :  { %3049 = vmatprep.mubr.bf16.mxu1 %v8183_v24  ;;  %v8620_v18 = vpop.eup %8619  ;;  %v6686_v26 = vadd.f32 %v6685_v31, %v6684_v1  ;;  %3866 = vmatprep.mubr.bf16.mxu0 %v8185_v30  ;;  %8631 = vpow2.f32 %v5133_v55  ;;  %v8193_v1 = vld [vmem:[%s12642_s0 + $0x600] ss:$16 sps:$4 sm:$0xff]   ;;  %v4504_v16 = vmax.f32 %v10295_v37, 0.0 }
 0x1b6   :  { %v6069_v50 = vadd.f32 %v5708_v22, %v4501_v15  ;;  %v8622_v45 = vpop.eup %8621  ;;  %v5710_v59 = vmul.f32 0.6931472, %v8620_v18  ;;  %v4901_v21 = vsub.f32 0.0, %v4705_v48  ;;  %v4706_v7 = vand.u32 2147483647, %v10392_v25 }
 0x1b7   :  { %v2835_v57 = vpop.f32.mrb[80].mxu1  ;;  %v8624_v62 = vpop.eup %8623  ;;  %v5485_v5 = vadd.f32 1.0, %v8622_v45  ;;  %v6268_v45 = vmul.f32 %v4308_v17, %v10295_v37 }
 0x1b8   :  { %v6461_v41 = vsub.f32 %v6069_v50, %v6265_v43  ;;  %v3652_v8 = vpop.f32.mrb[80].mxu0  ;;  %v2837_v9 = vpop.f32.mrb[81].mxu1  ;;  %v6070_v11 = vadd.f32 %v5710_v59, %v4502_v54  ;;  %v5486_v12 = vadd.f32 1.0, %v8624_v62  ;;  %v5135_v13 = vmul.f32 1.442695, %v4901_v21  ;;  %v4309_v59 = vld [vmem:[%s12645_s3 + $0x110] sm:$0xff] }
 0x1b9   :  { %v3654_v14 = vpop.f32.mrb[81].mxu0  ;;  %v2838_v0 = vpop.f32.mrb[82].mxu1  ;;  %8633 = vlog2.f32 %v5485_v5  ;;  %v4902_v20 = vsub.f32 0.0, %v4706_v7  ;;  %v2836_v34 = vadd.f32 %v10148_v2, %v2835_v57  ;;  %v8194_v50 = vld [vmem:[%s12642_s0 + $0x608] ss:$16 sps:$4 sm:$0xff]   ;;  %v4505_v62 = vmax.f32 %v10319_v49, 0.0 }
 0x1ba   :  { %v6687_v58 = vsel %vm6627_vm0, %v6461_v41, 0.0  ;;  %v3655_v27 = vpop.f32.mrb[82].mxu0  ;;  %v2840_v23 = vpop.f32.mrb[83].mxu1  ;;  %v6462_v28 = vsub.f32 %v6070_v11, %v6266_v44  ;;  %8635 = vlog2.f32 %v5486_v12  ;;  %v2839_v33 = vadd.f32 %v10148_v2, %v2838_v0  ;;  %v8195_v54 = vld [vmem:[%s12642_s0 + $0x624] ss:$16 sps:$4 sm:$0xff]   ;;  %v4310_v14 = vld [vmem:[%s12645_s3 + $0x118] sm:$0xff] }
 0x1bb   :  { %v8626_v24 = vpop.eup %8625  ;;  %v6688_v3 = vadd.f32 %v6687_v58, %v6686_v26  ;;  %v3657_v6 = vpop.f32.mrb[83].mxu0  ;;  %8637 = vpow2.f32 %v5135_v13  ;;  %v5137_v30 = vmul.f32 1.442695, %v4902_v20  ;;  %v10417_v39 = vadd.f32 %v3652_v8, %v2836_v34 }
 0x1bc   :  { %v5712_v29 = vmul.f32 0.6931472, %v8626_v24  ;;  %3050 = vmatmul.mubr.bf16.gmra.mrb[188].mxu1 %v8187_v38  ;;  %v8628_v15 = vpop.eup %8627  ;;  %v6689_v35 = vsel %vm6627_vm0, %v6462_v28, 0.0  ;;  %3867 = vmatmul.mubr.bf16.gmra.mrb[188].mxu0 %v8188_v60  ;;  %v10427_v47 = vadd.f32 %v3655_v27, %v2839_v33  ;;  %v8197_v60 = vld [vmem:[%s12642_s0 + $0x62c] ss:$16 sps:$4 sm:$0xff]   ;;  %v6269_v13 = vmul.f32 %v4309_v59, %v10319_v49 }
 0x1bd   :  { %3057 = vmatprep.mubr.bf16.mxu1 %v8189_v61  ;;  %v8630_v10 = vpop.eup %8629  ;;  %v6690_v40 = vadd.f32 %v6689_v35, %v6688_v3  ;;  %v5487_v42 = vadd.f32 1.0, %v8628_v15  ;;  %8639 = vpow2.f32 %v5137_v30  ;;  %3874 = vmatprep.mubr.bf16.mxu0 %v8191_v32  ;;  %v4707_v22 = vand.u32 2147483647, %v10417_v39  ;;  %v8199_v15 = vld [vmem:[%s12642_s0 + $0x620] ss:$16 sps:$4 sm:$0xff]  }
 0x1be   :  { %v6071_v4 = vadd.f32 %v5712_v29, %v4503_v19  ;;  %v5714_v31 = vmul.f32 0.6931472, %v8630_v10  ;;  %v4708_v41 = vand.u32 2147483647, %v10427_v47  ;;  %v4506_v23 = vmax.f32 %v10325_v56, 0.0 }
 0x1bf   :  { %v2843_v43 = vpop.f32.mrb[84].mxu1  ;;  %8641 = vlog2.f32 %v5487_v42  ;;  %v3660_v18 = vpop.f32.mrb[84].mxu0  ;;  %v4903_v55 = vsub.f32 0.0, %v4707_v22  ;;  %v6270_v6 = vmul.f32 %v4310_v14, %v10325_v56  ;;  %v8200_v56 = vld [vmem:[%s12642_s0 + $0x628] ss:$16 sps:$4 sm:$0xff]  }
 0x1c0   :  { %v6463_v46 = vsub.f32 %v6071_v4, %v6267_v63  ;;  %v2844_v48 = vadd.f32 %v10148_v2, %v2843_v43  ;;  %v2845_v26 = vpop.f32.mrb[85].mxu1  ;;  %v6072_v38 = vadd.f32 %v5714_v31, %v4504_v16  ;;  %v3662_v21 = vpop.f32.mrb[85].mxu0  ;;  %v4904_v58 = vsub.f32 0.0, %v4708_v41  ;;  %v8201_v42 = vld [vmem:[%s12642_s0 + $0x644] ss:$16 sps:$4 sm:$0xff]  }
 0x1c1   :  { %v2846_v57 = vpop.f32.mrb[86].mxu1  ;;  %v3663_v44 = vpop.f32.mrb[86].mxu0  ;;  %v5139_v9 = vmul.f32 1.442695, %v4903_v55  ;;  %v4507_v26 = vmax.f32 %v10350_v51, 0.0 }
 0x1c2   :  { %v6691_v61 = vsel %vm6627_vm0, %v6463_v46, 0.0  ;;  %v2848_v5 = vpop.f32.mrb[87].mxu1  ;;  %v8632_v37 = vpop.eup %8631  ;;  %v6464_v8 = vsub.f32 %v6072_v38, %v6268_v45  ;;  %v10446_v32 = vadd.f32 %v3660_v18, %v2844_v48  ;;  %v2847_v52 = vadd.f32 %v10148_v2, %v2846_v57  ;;  %v4311_v18 = vld [vmem:[%s12645_s3 + $0x120] sm:$0xff] }
 0x1c3   :  { %v6692_v7 = vadd.f32 %v6691_v61, %v6690_v40  ;;  %v3665_v11 = vpop.f32.mrb[87].mxu0  ;;  %v8634_v12 = vpop.eup %8633  ;;  %v5488_v0 = vadd.f32 1.0, %v8632_v37  ;;  %8643 = vpow2.f32 %v5139_v9  ;;  %v5141_v28 = vmul.f32 1.442695, %v4904_v58  ;;  %v10482_v5 = vld [vmem:[#allocation2] ss:$0 sm:$0xff] }
 0x1c4   :  { %3058 = vmatmul.mubr.bf16.gmra.mrb[192].mxu1 %v8193_v1  ;;  %v8636_v19 = vpop.eup %8635  ;;  %v6693_v20 = vsel %vm6627_vm0, %v6464_v8, 0.0  ;;  %v5716_v27 = vmul.f32 0.6931472, %v8634_v12  ;;  %3875 = vmatmul.mubr.bf16.gmra.mrb[192].mxu0 %v8194_v50  ;;  %v4709_v30 = vand.u32 2147483647, %v10446_v32  ;;  %v10460_v10 = vadd.f32 %v3663_v44, %v2847_v52 }
 0x1c5   :  { %3065 = vmatprep.mubr.bf16.mxu1 %v8195_v54  ;;  %v8638_v24 = vpop.eup %8637  ;;  %v6694_v49 = vadd.f32 %v6693_v20, %v6692_v7  ;;  %v5718_v3 = vmul.f32 0.6931472, %v8636_v19  ;;  %8645 = vlog2.f32 %v5488_v0  ;;  %3882 = vmatprep.mubr.bf16.mxu0 %v8197_v60  ;;  %v6271_v44 = vmul.f32 %v4311_v18, %v10350_v51  ;;  %v8205_v0 = vld [vmem:[%s12642_s0 + $0x640] ss:$16 sps:$4 sm:$0xff]   ;;  %v8206_v58 = vld [vmem:[%s12642_s0 + $0x648] ss:$16 sps:$4 sm:$0xff]  }
 0x1c6   :  { %v6073_v34 = vadd.f32 %v5716_v27, %v4505_v62  ;;  %v5489_v29 = vadd.f32 1.0, %v8638_v24  ;;  %8647 = vpow2.f32 %v5141_v28  ;;  %v4905_v31 = vsub.f32 0.0, %v4709_v30  ;;  %v4313_v19 = vld [vmem:[%s12645_s3 + $0x130] sm:$0xff] }
 0x1c7   :  { %v2851_v33 = vpop.f32.mrb[88].mxu1  ;;  %v8640_v35 = vpop.eup %8639  ;;  %v6074_v63 = vadd.f32 %v5718_v3, %v4506_v23  ;;  %v4710_v50 = vand.u32 2147483647, %v10460_v10  ;;  %v8207_v3 = vld [vmem:[%s12642_s0 + $0x664] ss:$16 sps:$4 sm:$0xff]  }
 0x1c8   :  { %v2852_v40 = vadd.f32 %v10148_v2, %v2851_v33  ;;  %v3668_v4 = vpop.f32.mrb[88].mxu0  ;;  %v2853_v17 = vpop.f32.mrb[89].mxu1  ;;  %v6465_v1 = vsub.f32 %v6073_v34, %v6269_v13  ;;  %8649 = vlog2.f32 %v5489_v29  ;;  %v5490_v16 = vadd.f32 1.0, %v8640_v35  ;;  %v8203_v2 = vld [vmem:[%s12642_s0 + $0x64c] ss:$16 sps:$4 sm:$0xff]  }
 0x1c9   :  { %v3670_v22 = vpop.f32.mrb[89].mxu0  ;;  %v2854_v43 = vpop.f32.mrb[90].mxu1  ;;  %v6466_v48 = vsub.f32 %v6074_v63, %v6270_v6  ;;  %v5143_v55 = vmul.f32 1.442695, %v4905_v31  ;;  %v4906_v61 = vsub.f32 0.0, %v4710_v50  ;;  %v4312_v13 = vld [vmem:[%s12645_s3 + $0x128] sm:$0xff]  ;;  %v6273_v50 = vmul.f32 %v4313_v19, %v10382_v36 }
 0x1ca   :  { %v8642_v46 = vpop.eup %8641  ;;  %v3671_v54 = vpop.f32.mrb[90].mxu0  ;;  %v6695_v45 = vsel %vm6627_vm0, %v6465_v1, 0.0  ;;  %8651 = vlog2.f32 %v5490_v16  ;;  %v10479_v62 = vadd.f32 %v3668_v4, %v2852_v40  ;;  %v2855_v37 = vadd.f32 %v10482_v5, %v2854_v43  ;;  %v8209_v4 = vld [vmem:[%s12642_s0 + $0x66c] ss:$16 sps:$4 sm:$0xff]  }
 0x1cb   :  { %v2856_v38 = vpop.f32.mrb[91].mxu1  ;;  %v5720_v59 = vmul.f32 0.6931472, %v8642_v46  ;;  %v3673_v21 = vpop.f32.mrb[91].mxu0  ;;  %v6696_v57 = vadd.f32 %v6695_v45, %v6694_v49  ;;  %v6697_v60 = vsel %vm6627_vm0, %v6466_v48, 0.0  ;;  %8653 = vpow2.f32 %v5143_v55 }
 0x1cc   :  { %3066 = vmatmul.mubr.bf16.gmra.mrb[196].mxu1 %v8199_v15  ;;  %3883 = vmatmul.mubr.bf16.gmra.mrb[196].mxu0 %v8200_v56  ;;  %v5145_v8 = vmul.f32 1.442695, %v4906_v61  ;;  %v4711_v9 = vand.u32 2147483647, %v10479_v62  ;;  %v10489_v14 = vadd.f32 %v3671_v54, %v2855_v37  ;;  %v4508_v34 = vmax.f32 %v10360_v53, 0.0 }
 0x1cd   :  { %v6075_v41 = vadd.f32 %v5720_v59, %v4507_v26  ;;  %3073 = vmatprep.mubr.bf16.mxu1 %v8201_v42  ;;  %v6698_v7 = vadd.f32 %v6697_v60, %v6696_v57  ;;  %3890 = vmatprep.mubr.bf16.mxu0 %v8203_v2  ;;  %v8644_v11 = vpop.eup %8643  ;;  %v6272_v15 = vmul.f32 %v4312_v13, %v10360_v53  ;;  %v4509_v43 = vmax.f32 %v10382_v36, 0.0  ;;  %v4314_v53 = vld [vmem:[%s12645_s3 + $0x138] sm:$0xff] }
 0x1ce   :  { %v5491_v20 = vadd.f32 1.0, %v8644_v11  ;;  %8655 = vpow2.f32 %v5145_v8  ;;  %v4907_v27 = vsub.f32 0.0, %v4711_v9  ;;  %v4712_v29 = vand.u32 2147483647, %v10489_v14 }
 0x1cf   :  { %v6467_v12 = vsub.f32 %v6075_v41, %v6271_v44  ;;  %v2859_v51 = vpop.f32.mrb[92].mxu1  ;;  %v8646_v52 = vpop.eup %8645  ;;  %v4510_v45 = vmax.f32 %v10392_v25, 0.0  ;;  %v6274_v60 = vmul.f32 %v4314_v53, %v10392_v25  ;;  %v8211_v41 = vld [vmem:[%s12642_s0 + $0x660] ss:$16 sps:$4 sm:$0xff]   ;;  %v8212_v44 = vld [vmem:[%s12642_s0 + $0x668] ss:$16 sps:$4 sm:$0xff]  }
 0x1d0   :  { %v2860_v23 = vadd.f32 %v10482_v5, %v2859_v51  ;;  %v3676_v24 = vpop.f32.mrb[92].mxu0  ;;  %v2861_v49 = vpop.f32.mrb[93].mxu1  ;;  %v5722_v6 = vmul.f32 0.6931472, %v8646_v52  ;;  %8657 = vlog2.f32 %v5491_v20  ;;  %v5147_v35 = vmul.f32 1.442695, %v4907_v27 }
 0x1d1   :  { %v6699_v28 = vsel %vm6627_vm0, %v6467_v12, 0.0  ;;  %v8648_v30 = vpop.eup %8647  ;;  %v3678_v63 = vpop.f32.mrb[93].mxu0  ;;  %v4908_v1 = vsub.f32 0.0, %v4712_v29  ;;  %v8213_v25 = vld [vmem:[%s12642_s0 + $0x684] ss:$16 sps:$4 sm:$0xff]  }
 0x1d2   :  { %v6700_v33 = vadd.f32 %v6699_v28, %v6698_v7  ;;  %v2862_v40 = vpop.f32.mrb[94].mxu1  ;;  %v8650_v17 = vpop.eup %8649  ;;  %v6076_v56 = vadd.f32 %v5722_v6, %v4508_v34  ;;  %v5492_v42 = vadd.f32 1.0, %v8648_v30  ;;  %v10511_v16 = vadd.f32 %v3676_v24, %v2860_v23  ;;  %v8215_v49 = vld [vmem:[%s12642_s0 + $0x68c] ss:$16 sps:$4 sm:$0xff]   ;;  %v4315_v28 = vld [vmem:[%s12645_s3 + $0x140] sm:$0xff] }
 0x1d3   :  { %v3679_v31 = vpop.f32.mrb[94].mxu0  ;;  %v2864_v22 = vpop.f32.mrb[95].mxu1  ;;  %v5724_v2 = vmul.f32 0.6931472, %v8650_v17  ;;  %8659 = vpow2.f32 %v5147_v35  ;;  %v2863_v46 = vadd.f32 %v10482_v5, %v2862_v40  ;;  %v5149_v54 = vmul.f32 1.442695, %v4908_v1 }
 0x1d4   :  { %v3681_v48 = vpop.f32.mrb[95].mxu0  ;;  %3074 = vmatmul.mubr.bf16.gmra.mrb[200].mxu1 %v8205_v0  ;;  %v8652_v18 = vpop.eup %8651  ;;  %v6468_v26 = vsub.f32 %v6076_v56, %v6272_v15  ;;  %8661 = vlog2.f32 %v5492_v42  ;;  %3891 = vmatmul.mubr.bf16.gmra.mrb[200].mxu0 %v8206_v58  ;;  %v4713_v55 = vand.u32 2147483647, %v10511_v16  ;;  %v4511_v35 = vmax.f32 %v10417_v39, 0.0 }
 0x1d5   :  { %3081 = vmatprep.mubr.bf16.mxu1 %v8207_v3  ;;  %v6077_v38 = vadd.f32 %v5724_v2, %v4509_v43  ;;  %v5726_v59 = vmul.f32 0.6931472, %v8652_v18  ;;  %3898 = vmatprep.mubr.bf16.mxu0 %v8209_v4  ;;  %v8654_v21 = vpop.eup %8653  ;;  %8663 = vpow2.f32 %v5149_v54  ;;  %v10523_v61 = vadd.f32 %v3679_v31, %v2863_v46  ;;  %v4316_v31 = vld [vmem:[%s12645_s3 + $0x148] sm:$0xff]  ;;  %v8217_v43 = vld [vmem:[%s12642_s0 + $0x680] ss:$16 sps:$4 sm:$0xff]  }
 0x1d6   :  { %v6701_v57 = vsel %vm6627_vm0, %v6468_v26, 0.0  ;;  %v5493_v9 = vadd.f32 1.0, %v8654_v21  ;;  %v4909_v13 = vsub.f32 0.0, %v4713_v55  ;;  %v6275_v1 = vmul.f32 %v4315_v28, %v10417_v39  ;;  %v8218_v39 = vld [vmem:[%s12642_s0 + $0x688] ss:$16 sps:$4 sm:$0xff]  }
 0x1d7   :  { %v2867_v36 = vpop.f32.mrb[96].mxu1  ;;  %v6702_v37 = vadd.f32 %v6701_v57, %v6700_v33  ;;  %v6469_v7 = vsub.f32 %v6077_v38, %v6273_v50  ;;  %v6078_v8 = vadd.f32 %v5726_v59, %v4510_v45  ;;  %v3684_v11 = vpop.f32.mrb[96].mxu0  ;;  %v4714_v51 = vand.u32 2147483647, %v10523_v61  ;;  %v8219_v26 = vld [vmem:[%s12642_s0 + $0x6a4] ss:$16 sps:$4 sm:$0xff]  }
 0x1d8   :  { %v2869_v12 = vpop.f32.mrb[97].mxu1  ;;  %v3686_v0 = vpop.f32.mrb[97].mxu0  ;;  %8665 = vlog2.f32 %v5493_v9  ;;  %v2868_v27 = vadd.f32 %v10482_v5, %v2867_v36  ;;  %v5151_v6 = vmul.f32 1.442695, %v4909_v13  ;;  %v4512_v50 = vmax.f32 %v10427_v47, 0.0  ;;  %v4317_v13 = vld [vmem:[%s12645_s3 + $0x150] sm:$0xff] }
 0x1d9   :  { %v2870_v58 = vpop.f32.mrb[98].mxu1  ;;  %v8656_v52 = vpop.eup %8655  ;;  %v6703_v19 = vsel %vm6627_vm0, %v6469_v7, 0.0  ;;  %v6470_v20 = vsub.f32 %v6078_v8, %v6274_v60  ;;  %v4910_v29 = vsub.f32 0.0, %v4714_v51  ;;  %v6276_v7 = vmul.f32 %v4316_v31, %v10427_v47 }
 0x1da   :  { %v3687_v23 = vpop.f32.mrb[98].mxu0  ;;  %v2872_v24 = vpop.f32.mrb[99].mxu1  ;;  %v6704_v3 = vadd.f32 %v6703_v19, %v6702_v37  ;;  %v5494_v34 = vadd.f32 1.0, %v8656_v52  ;;  %v10545_v63 = vadd.f32 %v3684_v11, %v2868_v27  ;;  %v2871_v40 = vadd.f32 %v10482_v5, %v2870_v58 }
 0x1db   :  { %v3689_v30 = vpop.f32.mrb[99].mxu0  ;;  %v8658_v33 = vpop.eup %8657  ;;  %v6705_v15 = vsel %vm6627_vm0, %v6470_v20, 0.0  ;;  %v5153_v56 = vmul.f32 1.442695, %v4910_v29  ;;  %v4513_v47 = vmax.f32 %v10446_v32, 0.0  ;;  %v4318_v24 = vld [vmem:[%s12645_s3 + $0x158] sm:$0xff]  ;;  %v6277_v28 = vmul.f32 %v4317_v13, %v10446_v32 }
 0x1dc   :  { %3082 = vmatmul.mubr.bf16.gmra.mrb[204].mxu1 %v8211_v41  ;;  %v6706_v4 = vadd.f32 %v6705_v15, %v6704_v3  ;;  %v5728_v17 = vmul.f32 0.6931472, %v8658_v33  ;;  %8667 = vlog2.f32 %v5494_v34  ;;  %3899 = vmatmul.mubr.bf16.gmra.mrb[204].mxu0 %v8212_v44  ;;  %v4715_v22 = vand.u32 2147483647, %v10545_v63  ;;  %v8221_v44 = vld [vmem:[%s12642_s0 + $0x6ac] ss:$16 sps:$4 sm:$0xff]  }
 0x1dd   :  { %3089 = vmatprep.mubr.bf16.mxu1 %v8213_v25  ;;  %v8660_v42 = vpop.eup %8659  ;;  %8669 = vpow2.f32 %v5151_v6  ;;  %3906 = vmatprep.mubr.bf16.mxu0 %v8215_v49  ;;  %v10556_v48 = vadd.f32 %v3687_v23, %v2871_v40  ;;  %v8223_v29 = vld [vmem:[%s12642_s0 + $0x6a0] ss:$16 sps:$4 sm:$0xff]   ;;  %v8224_v32 = vld [vmem:[%s12642_s0 + $0x6a8] ss:$16 sps:$4 sm:$0xff]  }
 0x1de   :  { %v8662_v2 = vpop.eup %8661  ;;  %v6079_v53 = vadd.f32 %v5728_v17, %v4511_v35  ;;  %v5495_v46 = vadd.f32 1.0, %v8660_v42  ;;  %8671 = vpow2.f32 %v5153_v56  ;;  %v4911_v38 = vsub.f32 0.0, %v4715_v22 }
 0x1df   :  { %v2875_v18 = vpop.f32.mrb[100].mxu1  ;;  %v5730_v54 = vmul.f32 0.6931472, %v8662_v2  ;;  %v3692_v59 = vpop.f32.mrb[100].mxu0  ;;  %v4716_v60 = vand.u32 2147483647, %v10556_v48  ;;  %v6278_v42 = vmul.f32 %v4318_v24, %v10460_v10 }
 0x1e0   :  { %v2876_v45 = vadd.f32 %v10482_v5, %v2875_v18  ;;  %v2877_v55 = vpop.f32.mrb[101].mxu1  ;;  %v8664_v21 = vpop.eup %8663  ;;  %v6471_v57 = vsub.f32 %v6079_v53, %v6275_v1  ;;  %8673 = vlog2.f32 %v5495_v46  ;;  %v5155_v9 = vmul.f32 1.442695, %v4911_v38  ;;  %v4319_v1 = vld [vmem:[%s12645_s3 + $0x160] sm:$0xff] }
 0x1e1   :  { %v3694_v36 = vpop.f32.mrb[101].mxu0  ;;  %v2878_v41 = vpop.f32.mrb[102].mxu1  ;;  %v6080_v37 = vadd.f32 %v5730_v54, %v4512_v50  ;;  %v5496_v8 = vadd.f32 1.0, %v8664_v21  ;;  %v4912_v51 = vsub.f32 0.0, %v4716_v60  ;;  %v4514_v35 = vmax.f32 %v10460_v10, 0.0 }
 0x1e2   :  { %v3695_v11 = vpop.f32.mrb[102].mxu0  ;;  %v2880_v12 = vpop.f32.mrb[103].mxu1  ;;  %v6707_v25 = vsel %vm6627_vm0, %v6471_v57, 0.0  ;;  %v10575_v0 = vadd.f32 %v3692_v59, %v2876_v45  ;;  %v2879_v58 = vadd.f32 %v10482_v5, %v2878_v41  ;;  %v4515_v53 = vmax.f32 %v10479_v62, 0.0  ;;  %v8227_v10 = vld [vmem:[%s12642_s0 + $0x6cc] ss:$16 sps:$4 sm:$0xff]  }
 0x1e3   :  { %v3697_v52 = vpop.f32.mrb[103].mxu0  ;;  %v8666_v19 = vpop.eup %8665  ;;  %v6708_v20 = vadd.f32 %v6707_v25, %v6706_v4  ;;  %v6472_v27 = vsub.f32 %v6080_v37, %v6276_v7  ;;  %8675 = vlog2.f32 %v5496_v8  ;;  %v5157_v49 = vmul.f32 1.442695, %v4912_v51  ;;  %v8225_v4 = vld [vmem:[%s12642_s0 + $0x6c4] ss:$16 sps:$4 sm:$0xff]  }
 0x1e4   :  { %3090 = vmatmul.mubr.bf16.gmra.mrb[208].mxu1 %v8217_v43  ;;  %v5732_v23 = vmul.f32 0.6931472, %v8666_v19  ;;  %8677 = vpow2.f32 %v5155_v9  ;;  %3907 = vmatmul.mubr.bf16.gmra.mrb[208].mxu0 %v8218_v39  ;;  %v4717_v34 = vand.u32 2147483647, %v10575_v0  ;;  %v10585_v6 = vadd.f32 %v3695_v11, %v2879_v58  ;;  %v4320_v52 = vld [vmem:[%s12645_s3 + $0x168] sm:$0xff] }
 0x1e5   :  { %3097 = vmatprep.mubr.bf16.mxu1 %v8219_v26  ;;  %v6709_v3 = vsel %vm6627_vm0, %v6472_v27, 0.0  ;;  %3914 = vmatprep.mubr.bf16.mxu0 %v8221_v44  ;;  %8679 = vpow2.f32 %v5157_v49  ;;  %v6279_v11 = vmul.f32 %v4319_v1, %v10479_v62  ;;  %v4516_v19 = vmax.f32 %v10489_v14, 0.0  ;;  %v8229_v62 = vld [vmem:[%s12642_s0 + $0x6c0] ss:$16 sps:$4 sm:$0xff]   ;;  %v8233_v1 = vld [vmem:[%s12642_s0 + $0x6ec] ss:$16 sps:$4 sm:$0xff]  }
 0x1e6   :  { %v8668_v30 = vpop.eup %8667  ;;  %v6710_v33 = vadd.f32 %v6709_v3, %v6708_v20  ;;  %v6081_v15 = vadd.f32 %v5732_v23, %v4513_v47  ;;  %v4913_v31 = vsub.f32 0.0, %v4717_v34  ;;  %v4718_v22 = vand.u32 2147483647, %v10585_v6  ;;  %v8230_v3 = vld [vmem:[%s12642_s0 + $0x6c8] ss:$16 sps:$4 sm:$0xff]  }
 0x1e7   :  { %v2883_v40 = vpop.f32.mrb[104].mxu1  ;;  %v8670_v17 = vpop.eup %8669  ;;  %v5734_v56 = vmul.f32 0.6931472, %v8668_v30 }
 0x1e8   :  { %v8672_v43 = vpop.eup %8671  ;;  %v6473_v2 = vsub.f32 %v6081_v15, %v6277_v28  ;;  %v5497_v46 = vadd.f32 1.0, %v8670_v17  ;;  %v2884_v18 = vadd.f32 %v10482_v5, %v2883_v40  ;;  %v3700_v39 = vpop.f32.mrb[104].mxu0  ;;  %v5159_v38 = vmul.f32 1.442695, %v4913_v31  ;;  %v8231_v28 = vld [vmem:[%s12642_s0 + $0x6e4] ss:$16 sps:$4 sm:$0xff]  }
 0x1e9   :  { %v2885_v26 = vpop.f32.mrb[105].mxu1  ;;  %v6082_v50 = vadd.f32 %v5734_v56, %v4514_v35  ;;  %v5498_v54 = vadd.f32 1.0, %v8672_v43  ;;  %v4914_v45 = vsub.f32 0.0, %v4718_v22  ;;  %v3702_v59 = vpop.f32.mrb[105].mxu0 }
 0x1ea   :  { %v2886_v55 = vpop.f32.mrb[106].mxu1  ;;  %v8674_v21 = vpop.eup %8673  ;;  %v6711_v57 = vsel %vm6627_vm0, %v6473_v2, 0.0  ;;  %8681 = vlog2.f32 %v5497_v46  ;;  %v10608_v60 = vadd.f32 %v3700_v39, %v2884_v18 }
 0x1eb   :  { %v2887_v36 = vadd.f32 %v10482_v5, %v2886_v55  ;;  %v3703_v41 = vpop.f32.mrb[106].mxu0  ;;  %v2888_v44 = vpop.f32.mrb[107].mxu1  ;;  %v6712_v37 = vadd.f32 %v6711_v57, %v6710_v33  ;;  %v6474_v7 = vsub.f32 %v6082_v50, %v6278_v42  ;;  %v5736_v8 = vmul.f32 0.6931472, %v8674_v21 }
 0x1ec   :  { %8683 = vlog2.f32 %v5498_v54  ;;  %v3705_v9 = vpop.f32.mrb[107].mxu0  ;;  %3098 = vmatmul.mubr.bf16.gmra.mrb[212].mxu1 %v8223_v29  ;;  %v5161_v12 = vmul.f32 1.442695, %v4914_v45  ;;  %v4719_v25 = vand.u32 2147483647, %v10608_v60  ;;  %3915 = vmatmul.mubr.bf16.gmra.mrb[212].mxu0 %v8224_v32  ;;  %v6280_v32 = vmul.f32 %v4320_v52, %v10489_v14 }
 0x1ed   :  { %8685 = vpow2.f32 %v5159_v38  ;;  %3105 = vmatprep.mubr.bf16.mxu1 %v8225_v4  ;;  %v8676_v13 = vpop.eup %8675  ;;  %v6713_v51 = vsel %vm6627_vm0, %v6474_v7, 0.0  ;;  %v6083_v58 = vadd.f32 %v5736_v8, %v4515_v53  ;;  %v10618_v20 = vadd.f32 %v3703_v41, %v2887_v36  ;;  %3922 = vmatprep.mubr.bf16.mxu0 %v8227_v10  ;;  %v4321_v38 = vld [vmem:[%s12645_s3 + $0x170] sm:$0xff]  ;;  %v4322_v36 = vld [vmem:[%s12645_s3 + $0x178] sm:$0xff] }
 0x1ee   :  { %v8678_v27 = vpop.eup %8677  ;;  %v6714_v47 = vadd.f32 %v6713_v51, %v6712_v37  ;;  %v5738_v23 = vmul.f32 0.6931472, %v8676_v13  ;;  %8687 = vpow2.f32 %v5161_v12  ;;  %v4915_v24 = vsub.f32 0.0, %v4719_v25  ;;  %v8235_v44 = vld [vmem:[%s12642_s0 + $0x6e0] ss:$16 sps:$4 sm:$0xff]  }
 0x1ef   :  { %v2891_v49 = vpop.f32.mrb[108].mxu1  ;;  %v6475_v34 = vsub.f32 %v6083_v58, %v6279_v11  ;;  %v5499_v29 = vadd.f32 1.0, %v8678_v27  ;;  %v4720_v30 = vand.u32 2147483647, %v10618_v20  ;;  %v3708_v33 = vpop.f32.mrb[108].mxu0  ;;  %v4517_v45 = vmax.f32 %v10511_v16, 0.0 }
 0x1f0   :  { %v2893_v15 = vpop.f32.mrb[109].mxu1  ;;  %v8680_v35 = vpop.eup %8679  ;;  %v6084_v40 = vadd.f32 %v5738_v23, %v4516_v19  ;;  %v5163_v4 = vmul.f32 1.442695, %v4915_v24  ;;  %v2892_v17 = vadd.f32 %v10482_v5, %v2891_v49  ;;  %v4518_v7 = vmax.f32 %v10523_v61, 0.0  ;;  %v8236_v12 = vld [vmem:[%s12642_s0 + $0x6e8] ss:$16 sps:$4 sm:$0xff]  }
 0x1f1   :  { %v3710_v56 = vpop.f32.mrb[109].mxu0  ;;  %v2894_v42 = vpop.f32.mrb[110].mxu1  ;;  %v6715_v31 = vsel %vm6627_vm0, %v6475_v34, 0.0  ;;  %8689 = vlog2.f32 %v5499_v29  ;;  %v5500_v22 = vadd.f32 1.0, %v8680_v35  ;;  %v4916_v43 = vsub.f32 0.0, %v4720_v30  ;;  %v4323_v51 = vld [vmem:[%s12645_s3 + $0x180] sm:$0xff] }
 0x1f2   :  { %v3711_v2 = vpop.f32.mrb[110].mxu0  ;;  %v2896_v53 = vpop.f32.mrb[111].mxu1  ;;  %v6716_v46 = vadd.f32 %v6715_v31, %v6714_v47  ;;  %v6476_v18 = vsub.f32 %v6084_v40, %v6280_v32  ;;  %8691 = vpow2.f32 %v5163_v4  ;;  %v10636_v14 = vadd.f32 %v3708_v33, %v2892_v17  ;;  %v8239_v35 = vld [vmem:[%s12642_s0 + $0x70c] ss:$16 sps:$4 sm:$0xff]  }
 0x1f3   :  { %v3713_v39 = vpop.f32.mrb[111].mxu0  ;;  %8693 = vlog2.f32 %v5500_v22  ;;  %v5165_v26 = vmul.f32 1.442695, %v4916_v43  ;;  %v2895_v10 = vadd.f32 %v10482_v5, %v2894_v42  ;;  %v6281_v13 = vmul.f32 %v4321_v38, %v10511_v16  ;;  %v8237_v16 = vld [vmem:[%s12642_s0 + $0x704] ss:$16 sps:$4 sm:$0xff]  }
 0x1f4   :  { %3106 = vmatmul.mubr.bf16.gmra.mrb[216].mxu1 %v8229_v62  ;;  %v8682_v50 = vpop.eup %8681  ;;  %v6717_v54 = vsel %vm6627_vm0, %v6476_v18, 0.0  ;;  %v4721_v59 = vand.u32 2147483647, %v10636_v14  ;;  %3923 = vmatmul.mubr.bf16.gmra.mrb[216].mxu0 %v8230_v3  ;;  %v6282_v23 = vmul.f32 %v4322_v36, %v10523_v61  ;;  %v4519_v42 = vmax.f32 %v10545_v63, 0.0 }
 0x1f5   :  { %3113 = vmatprep.mubr.bf16.mxu1 %v8231_v28  ;;  %v6718_v21 = vadd.f32 %v6717_v54, %v6716_v46  ;;  %v5740_v57 = vmul.f32 0.6931472, %v8682_v50  ;;  %8695 = vpow2.f32 %v5165_v26  ;;  %v10648_v41 = vadd.f32 %v3711_v2, %v2895_v10  ;;  %3930 = vmatprep.mubr.bf16.mxu0 %v8233_v1  ;;  %v4324_v46 = vld [vmem:[%s12645_s3 + $0x188] sm:$0xff]  ;;  %v8241_v50 = vld [vmem:[%s12642_s0 + $0x700] ss:$16 sps:$4 sm:$0xff]  }
 0x1f6   :  { %v8684_v55 = vpop.eup %8683  ;;  %v4917_v9 = vsub.f32 0.0, %v4721_v59  ;;  %v6283_v53 = vmul.f32 %v4323_v51, %v10545_v63  ;;  %v4520_v39 = vmax.f32 %v10556_v48, 0.0 }
 0x1f7   :  { %v8686_v37 = vpop.eup %8685  ;;  %v5742_v8 = vmul.f32 0.6931472, %v8684_v55  ;;  %v2899_v11 = vpop.f32.mrb[112].mxu1  ;;  %v6085_v25 = vadd.f32 %v5740_v57, %v4517_v45  ;;  %v4722_v52 = vand.u32 2147483647, %v10648_v41 }
 0x1f8   :  { %v5501_v58 = vadd.f32 1.0, %v8686_v37  ;;  %v3716_v19 = vpop.f32.mrb[112].mxu0  ;;  %v2901_v62 = vpop.f32.mrb[113].mxu1  ;;  %v5167_v24 = vmul.f32 1.442695, %v4917_v9  ;;  %v2900_v49 = vadd.f32 %v10482_v5, %v2899_v11  ;;  %v6284_v11 = vmul.f32 %v4324_v46, %v10556_v48 }
 0x1f9   :  { %v8688_v27 = vpop.eup %8687  ;;  %v6086_v47 = vadd.f32 %v5742_v8, %v4518_v7  ;;  %v3718_v3 = vpop.f32.mrb[113].mxu0  ;;  %v6477_v34 = vsub.f32 %v6085_v25, %v6281_v13  ;;  %v4918_v30 = vsub.f32 0.0, %v4722_v52  ;;  %v8242_v55 = vld [vmem:[%s12642_s0 + $0x708] ss:$16 sps:$4 sm:$0xff]   ;;  %v8243_v7 = vld [vmem:[%s12642_s0 + $0x724] ss:$16 sps:$4 sm:$0xff]  }
 0x1fa   :  { %v2902_v28 = vpop.f32.mrb[114].mxu1  ;;  %8697 = vlog2.f32 %v5501_v58  ;;  %v5502_v29 = vadd.f32 1.0, %v8688_v27  ;;  %v3719_v33 = vpop.f32.mrb[114].mxu0  ;;  %v10670_v40 = vadd.f32 %v3716_v19, %v2900_v49  ;;  %v8245_v58 = vld [vmem:[%s12642_s0 + $0x72c] ss:$16 sps:$4 sm:$0xff]  }
 0x1fb   :  { %v2904_v15 = vpop.f32.mrb[115].mxu1  ;;  %v6478_v61 = vsub.f32 %v6086_v47, %v6282_v23  ;;  %8699 = vpow2.f32 %v5167_v24  ;;  %v2903_v32 = vadd.f32 %v10482_v5, %v2902_v28  ;;  %v3721_v4 = vpop.f32.mrb[115].mxu0  ;;  %v6719_v56 = vsel %vm6627_vm0, %v6477_v34, 0.0  ;;  %v8249_v46 = vld [vmem:[%s12642_s0 + $0x744] ss:$16 sps:$4 sm:$0xff]  }
 0x1fc   :  { %v8690_v17 = vpop.eup %8689  ;;  %8701 = vlog2.f32 %v5502_v29  ;;  %v5169_v1 = vmul.f32 1.442695, %v4918_v30  ;;  %3114 = vmatmul.mubr.bf16.gmra.mrb[220].mxu1 %v8235_v44  ;;  %v6720_v22 = vadd.f32 %v6719_v56, %v6718_v21  ;;  %3931 = vmatmul.mubr.bf16.gmra.mrb[220].mxu0 %v8236_v12  ;;  %v4723_v10 = vand.u32 2147483647, %v10670_v40  ;;  %v4325_v12 = vld [vmem:[%s12645_s3 + $0x190] sm:$0xff] }
 0x1fd   :  { %v8692_v31 = vpop.eup %8691  ;;  %v6721_v43 = vsel %vm6627_vm0, %v6478_v61, 0.0  ;;  %v5744_v2 = vmul.f32 0.6931472, %v8690_v17  ;;  %3121 = vmatprep.mubr.bf16.mxu1 %v8237_v16  ;;  %3938 = vmatprep.mubr.bf16.mxu0 %v8239_v35  ;;  %v10685_v45 = vadd.f32 %v3719_v33, %v2903_v32  ;;  %v4521_v16 = vmax.f32 %v10575_v0, 0.0  ;;  %v4326_v35 = vld [vmem:[%s12645_s3 + $0x198] sm:$0xff] }
 0x1fe   :  { %v8694_v18 = vpop.eup %8693  ;;  %v5503_v26 = vadd.f32 1.0, %v8692_v31  ;;  %8703 = vpow2.f32 %v5169_v1  ;;  %v6722_v54 = vadd.f32 %v6721_v43, %v6720_v22  ;;  %v4919_v57 = vsub.f32 0.0, %v4723_v10  ;;  %v8247_v1 = vld [vmem:[%s12642_s0 + $0x720] ss:$16 sps:$4 sm:$0xff]  }
 0x1ff   :  { %v6087_v63 = vadd.f32 %v5744_v2, %v4519_v42  ;;  %v5746_v38 = vmul.f32 0.6931472, %v8694_v18  ;;  %v2907_v59 = vpop.f32.mrb[116].mxu1  ;;  %v8696_v21 = vpop.eup %8695  ;;  %v4724_v19 = vand.u32 2147483647, %v10685_v45  ;;  %v6285_v15 = vmul.f32 %v4325_v12, %v10575_v0 }
 0x200   :  { %8705 = vlog2.f32 %v5503_v26  ;;  %v2908_v36 = vadd.f32 %v10482_v5, %v2907_v59  ;;  %v3724_v44 = vpop.f32.mrb[116].mxu0  ;;  %v2909_v37 = vpop.f32.mrb[117].mxu1  ;;  %v5504_v25 = vadd.f32 1.0, %v8696_v21  ;;  %v5171_v52 = vmul.f32 1.442695, %v4919_v57 }
 0x201   :  { %v6479_v8 = vsub.f32 %v6087_v63, %v6283_v53  ;;  %v6088_v9 = vadd.f32 %v5746_v38, %v4520_v39  ;;  %v3726_v13 = vpop.f32.mrb[117].mxu0  ;;  %v2910_v51 = vpop.f32.mrb[118].mxu1  ;;  %v4920_v34 = vsub.f32 0.0, %v4724_v19  ;;  %v4522_v31 = vmax.f32 %v10585_v6, 0.0  ;;  %v8248_v53 = vld [vmem:[%s12642_s0 + $0x728] ss:$16 sps:$4 sm:$0xff]  }
 0x202   :  { %v10702_v62 = vadd.f32 %v3724_v44, %v2908_v36  ;;  %v3727_v27 = vpop.f32.mrb[118].mxu0  ;;  %v2912_v47 = vpop.f32.mrb[119].mxu1  ;;  %8707 = vlog2.f32 %v5504_v25  ;;  %v2911_v24 = vadd.f32 %v10482_v5, %v2910_v51  ;;  %v6286_v39 = vmul.f32 %v4326_v35, %v10585_v6  ;;  %v8251_v57 = vld [vmem:[%s12642_s0 + $0x74c] ss:$16 sps:$4 sm:$0xff]   ;;  %v4327_v6 = vld [vmem:[%s12645_s3 + $0x1a0] sm:$0xff] }
 0x203   :  { %v6723_v48 = vsel %vm6627_vm0, %v6479_v8, 0.0  ;;  %v6480_v23 = vsub.f32 %v6088_v9, %v6284_v11  ;;  %v3729_v49 = vpop.f32.mrb[119].mxu0  ;;  %8709 = vpow2.f32 %v5171_v52  ;;  %v5173_v56 = vmul.f32 1.442695, %v4920_v34 }
 0x204   :  { %v8698_v3 = vpop.eup %8697  ;;  %v6724_v28 = vadd.f32 %v6723_v48, %v6722_v54  ;;  %3122 = vmatmul.mubr.bf16.gmra.mrb[224].mxu1 %v8241_v50  ;;  %v4725_v61 = vand.u32 2147483647, %v10702_v62  ;;  %3939 = vmatmul.mubr.bf16.gmra.mrb[224].mxu0 %v8242_v55  ;;  %v10713_v42 = vadd.f32 %v3727_v27, %v2911_v24  ;;  %v4523_v26 = vmax.f32 %v10608_v60, 0.0  ;;  %v4328_v24 = vld [vmem:[%s12645_s3 + $0x1a8] sm:$0xff] }
 0x205   :  { %v8700_v29 = vpop.eup %8699  ;;  %v6725_v30 = vsel %vm6627_vm0, %v6480_v23, 0.0  ;;  %v5748_v33 = vmul.f32 0.6931472, %v8698_v3  ;;  %3129 = vmatprep.mubr.bf16.mxu1 %v8243_v7  ;;  %3946 = vmatprep.mubr.bf16.mxu0 %v8245_v58  ;;  %v6287_v23 = vmul.f32 %v4327_v6, %v10608_v60 }
 0x206   :  { %v8702_v32 = vpop.eup %8701  ;;  %v6726_v4 = vadd.f32 %v6725_v30, %v6724_v28  ;;  %v5505_v17 = vadd.f32 1.0, %v8700_v29  ;;  %v4921_v43 = vsub.f32 0.0, %v4725_v61  ;;  %v4726_v10 = vand.u32 2147483647, %v10713_v42 }
 0x207   :  { %v6089_v0 = vadd.f32 %v5748_v33, %v4521_v16  ;;  %v5750_v22 = vmul.f32 0.6931472, %v8702_v32  ;;  %v2915_v2 = vpop.f32.mrb[120].mxu1  ;;  %v3732_v50 = vpop.f32.mrb[120].mxu0  ;;  %v4524_v16 = vmax.f32 %v10618_v20, 0.0  ;;  %v6288_v61 = vmul.f32 %v4328_v24, %v10618_v20 }
 0x208   :  { %v8704_v18 = vpop.eup %8703  ;;  %8711 = vlog2.f32 %v5505_v17  ;;  %v2917_v54 = vpop.f32.mrb[121].mxu1  ;;  %v5175_v44 = vmul.f32 1.442695, %v4921_v43  ;;  %v4922_v37 = vsub.f32 0.0, %v4726_v10  ;;  %v2916_v7 = vadd.f32 %v10482_v5, %v2915_v2  ;;  %v8255_v20 = vld [vmem:[%s12642_s0 + $0x764] ss:$16 sps:$4 sm:$0xff]  }
 0x209   :  { %v6481_v63 = vsub.f32 %v6089_v0, %v6285_v15  ;;  %v6090_v38 = vadd.f32 %v5750_v22, %v4522_v31  ;;  %v5506_v59 = vadd.f32 1.0, %v8704_v18  ;;  %8713 = vpow2.f32 %v5173_v56  ;;  %v3734_v55 = vpop.f32.mrb[121].mxu0  ;;  %v2918_v21 = vpop.f32.mrb[122].mxu1  ;;  %v8253_v15 = vld [vmem:[%s12642_s0 + $0x740] ss:$16 sps:$4 sm:$0xff]  }
 0x20a   :  { %v8706_v36 = vpop.eup %8705  ;;  %v2919_v8 = vadd.f32 %v10482_v5, %v2918_v21  ;;  %v3735_v9 = vpop.f32.mrb[122].mxu0  ;;  %v5177_v52 = vmul.f32 1.442695, %v4922_v37  ;;  %v10737_v19 = vadd.f32 %v3732_v50, %v2916_v7  ;;  %v8254_v56 = vld [vmem:[%s12642_s0 + $0x748] ss:$16 sps:$4 sm:$0xff]   ;;  %v4329_v18 = vld [vmem:[%s12645_s3 + $0x1b0] sm:$0xff] }
 0x20b   :  { %v2920_v11 = vpop.f32.mrb[123].mxu1  ;;  %v6727_v12 = vsel %vm6627_vm0, %v6481_v63, 0.0  ;;  %v6482_v25 = vsub.f32 %v6090_v38, %v6286_v39  ;;  %v5752_v13 = vmul.f32 0.6931472, %v8706_v36  ;;  %8715 = vlog2.f32 %v5506_v59  ;;  %v3737_v51 = vpop.f32.mrb[123].mxu0 }
 0x20c   :  { %v6728_v58 = vadd.f32 %v6727_v12, %v6726_v4  ;;  %8717 = vpow2.f32 %v5175_v44  ;;  %3130 = vmatmul.mubr.bf16.gmra.mrb[228].mxu1 %v8247_v1  ;;  %v8708_v27 = vpop.eup %8707  ;;  %v10744_v49 = vadd.f32 %v3735_v9, %v2919_v8  ;;  %3947 = vmatmul.mubr.bf16.gmra.mrb[228].mxu0 %v8248_v53  ;;  %v4727_v33 = vand.u32 2147483647, %v10737_v19  ;;  %v8257_v54 = vld [vmem:[%s12642_s0 + $0x76c] ss:$16 sps:$4 sm:$0xff]  }
 0x20d   :  { %v6729_v47 = vsel %vm6627_vm0, %v6482_v25, 0.0  ;;  %v6091_v48 = vadd.f32 %v5752_v13, %v4523_v26  ;;  %3137 = vmatprep.mubr.bf16.mxu1 %v8249_v46  ;;  %v8710_v3 = vpop.eup %8709  ;;  %v5754_v34 = vmul.f32 0.6931472, %v8708_v27  ;;  %8719 = vpow2.f32 %v5177_v52  ;;  %3954 = vmatprep.mubr.bf16.mxu0 %v8251_v57  ;;  %v4330_v12 = vld [vmem:[%s12645_s3 + $0x1b8] sm:$0xff]  ;;  %v8259_v52 = vld [vmem:[%s12642_s0 + $0x760] ss:$16 sps:$4 sm:$0xff]  }
 0x20e   :  { %v6730_v28 = vadd.f32 %v6729_v47, %v6728_v58  ;;  %v5507_v30 = vadd.f32 1.0, %v8710_v3  ;;  %v4728_v32 = vand.u32 2147483647, %v10744_v49  ;;  %v4923_v0 = vsub.f32 0.0, %v4727_v33 }
 0x20f   :  { %v6483_v29 = vsub.f32 %v6091_v48, %v6287_v23  ;;  %v2923_v60 = vpop.f32.mrb[124].mxu1  ;;  %v6092_v35 = vadd.f32 %v5754_v34, %v4524_v16  ;;  %v3740_v4 = vpop.f32.mrb[124].mxu0  ;;  %v4525_v38 = vmax.f32 %v10636_v14, 0.0  ;;  %v6289_v11 = vmul.f32 %v4329_v18, %v10636_v14  ;;  %v8260_v48 = vld [vmem:[%s12642_s0 + $0x768] ss:$16 sps:$4 sm:$0xff]  }
 0x210   :  { %v2925_v17 = vpop.f32.mrb[125].mxu1  ;;  %8721 = vlog2.f32 %v5507_v30  ;;  %v2924_v31 = vadd.f32 %v10482_v5, %v2923_v60  ;;  %v3742_v22 = vpop.f32.mrb[125].mxu0  ;;  %v4924_v39 = vsub.f32 0.0, %v4728_v32  ;;  %v5179_v55 = vmul.f32 1.442695, %v4923_v0 }
 0x211   :  { %v6731_v1 = vsel %vm6627_vm0, %v6483_v29, 0.0  ;;  %v2926_v43 = vpop.f32.mrb[126].mxu1  ;;  %v6484_v46 = vsub.f32 %v6092_v35, %v6288_v61  ;;  %v3743_v10 = vpop.f32.mrb[126].mxu0  ;;  %v4526_v13 = vmax.f32 %v10648_v41, 0.0  ;;  %v8261_v23 = vld [vmem:[%s12642_s0 + $0x784] ss:$16 sps:$4 sm:$0xff]  }
 0x212   :  { %v8712_v2 = vpop.eup %8711  ;;  %v6732_v53 = vadd.f32 %v6731_v1, %v6730_v28  ;;  %v2927_v26 = vadd.f32 %v10482_v5, %v2926_v43  ;;  %v2928_v50 = vpop.f32.mrb[127].mxu1  ;;  %v10769_v21 = vadd.f32 %v3740_v4, %v2924_v31  ;;  %v5181_v44 = vmul.f32 1.442695, %v4924_v39  ;;  %v8263_v32 = vld [vmem:[%s12642_s0 + $0x78c] ss:$16 sps:$4 sm:$0xff]   ;;  %v4331_v22 = vld [vmem:[%s12645_s3 + $0x1c0] sm:$0xff] }
 0x213   :  { %v8714_v63 = vpop.eup %8713  ;;  %v5756_v59 = vmul.f32 0.6931472, %v8712_v2  ;;  %v3745_v57 = vpop.f32.mrb[127].mxu0  ;;  %v6733_v36 = vsel %vm6627_vm0, %v6484_v46, 0.0  ;;  %8723 = vpow2.f32 %v5179_v55  ;;  %v6290_v28 = vmul.f32 %v4330_v12, %v10648_v41 }
 0x214   :  { %v5508_v6 = vadd.f32 1.0, %v8714_v63  ;;  %v10772_v37 = vadd.f32 %v3743_v10, %v2927_v26  ;;  %3138 = vmatmul.mubr.bf16.gmra.mrb[232].mxu1 %v8253_v15  ;;  %v6734_v8 = vadd.f32 %v6733_v36, %v6732_v53  ;;  %3955 = vmatmul.mubr.bf16.gmra.mrb[232].mxu0 %v8254_v56  ;;  %v4729_v58 = vand.u32 2147483647, %v10769_v21  ;;  %v4332_v63 = vld [vmem:[%s12645_s3 + $0x1c8] sm:$0xff] }
 0x215   :  { %v8716_v7 = vpop.eup %8715  ;;  %v6093_v9 = vadd.f32 %v5756_v59, %v4525_v38  ;;  %3145 = vmatprep.mubr.bf16.mxu1 %v8255_v20  ;;  %3962 = vmatprep.mubr.bf16.mxu0 %v8257_v54  ;;  %v4527_v43 = vmax.f32 %v10670_v40, 0.0  ;;  %v10802_v20 = vld [vmem:[#allocation2] ss:$0 sm:$0xff]  ;;  %v6291_v54 = vmul.f32 %v4331_v22, %v10670_v40  ;;  %v4528_v57 = vmax.f32 %v10685_v45, 0.0  ;;  %v8266_v40 = vld [vmem:[%s12642_s0 + $0x788] ss:$16 sps:$4 sm:$0xff]  }
 0x216   :  { %v8718_v25 = vpop.eup %8717  ;;  %v5758_v51 = vmul.f32 0.6931472, %v8716_v7  ;;  %8725 = vlog2.f32 %v5508_v6  ;;  %v4925_v16 = vsub.f32 0.0, %v4729_v58  ;;  %v4730_v34 = vand.u32 2147483647, %v10772_v37 }
 0x217   :  { %v6485_v14 = vsub.f32 %v6093_v9, %v6289_v11  ;;  %v5509_v27 = vadd.f32 1.0, %v8718_v25  ;;  %8727 = vpow2.f32 %v5181_v44  ;;  %v2931_v47 = vpop.f32.mrb[128].mxu1  ;;  %v8720_v24 = vpop.eup %8719  ;;  %v8265_v59 = vld [vmem:[%s12642_s0 + $0x780] ss:$16 sps:$4 sm:$0xff]   ;;  %v8267_v44 = vld [vmem:[%s12642_s0 + $0x7a4] ss:$16 sps:$4 sm:$0xff]  }
 0x218   :  { %v6094_v3 = vadd.f32 %v5758_v51, %v4526_v13  ;;  %v3748_v29 = vpop.f32.mrb[128].mxu0  ;;  %v2933_v30 = vpop.f32.mrb[129].mxu1  ;;  %v5510_v60 = vadd.f32 1.0, %v8720_v24  ;;  %v2932_v15 = vadd.f32 %v10482_v5, %v2931_v47  ;;  %v5183_v41 = vmul.f32 1.442695, %v4925_v16 }
 0x219   :  { %v6735_v33 = vsel %vm6627_vm0, %v6485_v14, 0.0  ;;  %8729 = vlog2.f32 %v5509_v27  ;;  %v3750_v35 = vpop.f32.mrb[129].mxu0  ;;  %v2934_v61 = vpop.f32.mrb[130].mxu1  ;;  %v4926_v56 = vsub.f32 0.0, %v4730_v34  ;;  %v4529_v9 = vmax.f32 %v10702_v62, 0.0 }
 0x21a   :  { %v6736_v4 = vadd.f32 %v6735_v33, %v6734_v8  ;;  %v6486_v17 = vsub.f32 %v6094_v3, %v6290_v28  ;;  %v3751_v1 = vpop.f32.mrb[130].mxu0  ;;  %v2936_v0 = vpop.f32.mrb[131].mxu1  ;;  %8731 = vlog2.f32 %v5510_v60  ;;  %v10800_v5 = vadd.f32 %v3748_v29, %v2932_v15  ;;  %v8269_v51 = vld [vmem:[%s12642_s0 + $0x7ac] ss:$16 sps:$4 sm:$0xff]   ;;  %v4333_v3 = vld [vmem:[%s12645_s3 + $0x1d0] sm:$0xff] }
 0x21b   :  { %v8722_v31 = vpop.eup %8721  ;;  %v2935_v2 = vadd.f32 %v10802_v20, %v2934_v61  ;;  %v3753_v53 = vpop.f32.mrb[131].mxu0  ;;  %8733 = vpow2.f32 %v5183_v41  ;;  %v5185_v39 = vmul.f32 1.442695, %v4926_v56  ;;  %v6292_v14 = vmul.f32 %v4332_v63, %v10685_v45  ;;  %v4334_v56 = vld [vmem:[%s12645_s3 + $0x1d8] sm:$0xff] }
 0x21c   :  { %v6737_v46 = vsel %vm6627_vm0, %v6486_v17, 0.0  ;;  %v5760_v18 = vmul.f32 0.6931472, %v8722_v31  ;;  %3146 = vmatmul.mubr.bf16.gmra.mrb[236].mxu1 %v8259_v52  ;;  %v4731_v10 = vand.u32 2147483647, %v10800_v5  ;;  %3963 = vmatmul.mubr.bf16.gmra.mrb[236].mxu0 %v8260_v48  ;;  %v6293_v41 = vmul.f32 %v4333_v3, %v10702_v62 }
 0x21d   :  { %v6738_v26 = vadd.f32 %v6737_v46, %v6736_v4  ;;  %3153 = vmatprep.mubr.bf16.mxu1 %v8261_v23  ;;  %8735 = vpow2.f32 %v5185_v39  ;;  %v10811_v38 = vadd.f32 %v3751_v1, %v2935_v2  ;;  %3970 = vmatprep.mubr.bf16.mxu0 %v8263_v32  ;;  %v8724_v55 = vpop.eup %8723  ;;  %v4530_v1 = vmax.f32 %v10713_v42, 0.0  ;;  %v8271_v39 = vld [vmem:[%s12642_s0 + $0x7a0] ss:$16 sps:$4 sm:$0xff]  }
 0x21e   :  { %v6095_v50 = vadd.f32 %v5760_v18, %v4527_v43  ;;  %v4927_v36 = vsub.f32 0.0, %v4731_v10  ;;  %v5511_v11 = vadd.f32 1.0, %v8724_v55  ;;  %v6294_v63 = vmul.f32 %v4334_v56, %v10713_v42  ;;  %v8278_v56 = vld [vmem:[%s12642_s0 + $0x7c8] ss:$16 sps:$4 sm:$0xff]  }
 0x21f   :  { %v2939_v6 = vpop.f32.mrb[132].mxu1  ;;  %v4732_v12 = vand.u32 2147483647, %v10811_v38  ;;  %v3756_v25 = vpop.f32.mrb[132].mxu0 }
 0x220   :  { %v8726_v7 = vpop.eup %8725  ;;  %v6487_v8 = vsub.f32 %v6095_v50, %v6291_v54  ;;  %v2941_v13 = vpop.f32.mrb[133].mxu1  ;;  %v5187_v27 = vmul.f32 1.442695, %v4927_v36  ;;  %v2940_v47 = vadd.f32 %v10802_v20, %v2939_v6  ;;  %8737 = vlog2.f32 %v5511_v11  ;;  %v8273_v36 = vld [vmem:[%s12642_s0 + $0x7c4] ss:$16 sps:$4 sm:$0xff]  }
 0x221   :  { %v8728_v58 = vpop.eup %8727  ;;  %v5762_v52 = vmul.f32 0.6931472, %v8726_v7  ;;  %v3758_v48 = vpop.f32.mrb[133].mxu0  ;;  %v4928_v16 = vsub.f32 0.0, %v4732_v12 }
 0x222   :  { %v2942_v23 = vpop.f32.mrb[134].mxu1  ;;  %v6739_v24 = vsel %vm6627_vm0, %v6487_v8, 0.0  ;;  %v5512_v28 = vadd.f32 1.0, %v8728_v58  ;;  %v3759_v34 = vpop.f32.mrb[134].mxu0  ;;  %8739 = vpow2.f32 %v5187_v27  ;;  %v10834_v45 = vadd.f32 %v3756_v25, %v2940_v47  ;;  %v8275_v25 = vld [vmem:[%s12642_s0 + $0x7cc] ss:$16 sps:$4 sm:$0xff]  }
 0x223   :  { %v2944_v29 = vpop.f32.mrb[135].mxu1  ;;  %v8730_v30 = vpop.eup %8729  ;;  %v6740_v33 = vadd.f32 %v6739_v24, %v6738_v26  ;;  %v6096_v60 = vadd.f32 %v5762_v52, %v4528_v57  ;;  %v5189_v61 = vmul.f32 1.442695, %v4928_v16  ;;  %v2943_v32 = vadd.f32 %v10802_v20, %v2942_v23  ;;  %v8272_v57 = vld [vmem:[%s12642_s0 + $0x7a8] ss:$16 sps:$4 sm:$0xff]  }
 0x224   :  { %v3761_v15 = vpop.f32.mrb[135].mxu0  ;;  %v5764_v35 = vmul.f32 0.6931472, %v8730_v30  ;;  %8741 = vlog2.f32 %v5512_v28  ;;  %3154 = vmatmul.mubr.bf16.gmra.mrb[240].mxu1 %v8265_v59  ;;  %v8732_v4 = vpop.eup %8731  ;;  %v4733_v0 = vand.u32 2147483647, %v10834_v45  ;;  %3971 = vmatmul.mubr.bf16.gmra.mrb[240].mxu0 %v8266_v40  ;;  %v4531_v23 = vmax.f32 %v10737_v19, 0.0 }
 0x225   :  { %v6488_v17 = vsub.f32 %v6096_v60, %v6292_v14  ;;  %3161 = vmatprep.mubr.bf16.mxu1 %v8267_v44  ;;  %v8734_v31 = vpop.eup %8733  ;;  %v5766_v43 = vmul.f32 0.6931472, %v8732_v4  ;;  %8743 = vpow2.f32 %v5189_v61  ;;  %v10843_v2 = vadd.f32 %v3759_v34, %v2943_v32  ;;  %3978 = vmatprep.mubr.bf16.mxu0 %v8269_v51  ;;  %v4335_v51 = vld [vmem:[%s12645_s3 + $0x1e0] sm:$0xff]  ;;  %v4336_v34 = vld [vmem:[%s12645_s3 + $0x1e8] sm:$0xff] }
 0x226   :  { %v6097_v22 = vadd.f32 %v5764_v35, %v4529_v9  ;;  %v5513_v62 = vadd.f32 1.0, %v8734_v31  ;;  %v4929_v46 = vsub.f32 0.0, %v4733_v0  ;;  %v6295_v60 = vmul.f32 %v4335_v51, %v10737_v19  ;;  %v8277_v61 = vld [vmem:[%s12642_s0 + $0x7c0] ss:$16 sps:$4 sm:$0xff]   ;;  %v8279_v19 = vld [vmem:[%s12642_s0 + $0x7e4] ss:$16 sps:$4 sm:$0xff]  }
 0x227   :  { %v6741_v53 = vsel %vm6627_vm0, %v6488_v17, 0.0  ;;  %v2947_v18 = vpop.f32.mrb[136].mxu1  ;;  %v8736_v26 = vpop.eup %8735  ;;  %v6098_v54 = vadd.f32 %v5766_v43, %v4530_v1  ;;  %v4734_v44 = vand.u32 2147483647, %v10843_v2  ;;  %v4532_v4 = vmax.f32 %v10744_v49, 0.0  ;;  %v4338_v51 = vld [vmem:[%s12645_s3 + $0x1f8] sm:$0xff] }
 0x228   :  { %v6742_v10 = vadd.f32 %v6741_v53, %v6740_v33  ;;  %v6489_v50 = vsub.f32 %v6097_v22, %v6293_v41  ;;  %v3764_v59 = vpop.f32.mrb[136].mxu0  ;;  %v2949_v55 = vpop.f32.mrb[137].mxu1  ;;  %8745 = vlog2.f32 %v5513_v62  ;;  %v5514_v6 = vadd.f32 1.0, %v8736_v26 }
 0x229   :  { %v5191_v40 = vmul.f32 1.442695, %v4929_v46  ;;  %v3766_v7 = vpop.f32.mrb[137].mxu0  ;;  %v6490_v9 = vsub.f32 %v6098_v54, %v6294_v63  ;;  %v2948_v42 = vadd.f32 %v10802_v20, %v2947_v18  ;;  %v2950_v11 = vpop.f32.mrb[138].mxu1  ;;  %v4930_v58 = vsub.f32 0.0, %v4734_v44  ;;  %v4337_v18 = vld [vmem:[%s12645_s3 + $0x1f0] sm:$0xff] }
 0x22a   :  { %v6743_v8 = vsel %vm6627_vm0, %v6489_v50, 0.0  ;;  %v3767_v12 = vpop.f32.mrb[138].mxu0  ;;  %8747 = vlog2.f32 %v5514_v6  ;;  %v2951_v52 = vadd.f32 %v10802_v20, %v2950_v11  ;;  %v2952_v14 = vpop.f32.mrb[139].mxu1  ;;  %v6296_v0 = vmul.f32 %v4336_v34, %v10744_v49  ;;  %v8281_v49 = vld [vmem:[%s12642_s0 + $0x7ec] ss:$16 sps:$4 sm:$0xff]  }
 0x22b   :  { %v6744_v13 = vadd.f32 %v6743_v8, %v6742_v10  ;;  %v3769_v27 = vpop.f32.mrb[139].mxu0  ;;  %v8738_v47 = vpop.eup %8737  ;;  %v6745_v48 = vsel %vm6627_vm0, %v6490_v9, 0.0  ;;  %8749 = vpow2.f32 %v5191_v40  ;;  %v10868_v24 = vadd.f32 %v3764_v59, %v2948_v42  ;;  %v8284_v34 = vld [vmem:[%s12642_s0 + $0x7e8] ss:$16 sps:$4 sm:$0xff]  }
 0x22c   :  { %3162 = vmatmul.mubr.bf16.gmra.mrb[244].mxu1 %v8271_v39  ;;  %v8740_v3 = vpop.eup %8739  ;;  %v5768_v16 = vmul.f32 0.6931472, %v8738_v47  ;;  %v5193_v29 = vmul.f32 1.442695, %v4930_v58  ;;  %v10873_v30 = vadd.f32 %v3767_v12, %v2951_v52  ;;  %3979 = vmatmul.mubr.bf16.gmra.mrb[244].mxu0 %v8272_v57  ;;  %v4533_v54 = vmax.f32 %v10769_v21, 0.0 }
 0x22d   :  { %v6746_v28 = vadd.f32 %v6745_v48, %v6744_v13  ;;  %3169 = vmatprep.mubr.bf16.mxu1 %v8273_v36  ;;  %v5515_v15 = vadd.f32 1.0, %v8740_v3  ;;  %v4735_v35 = vand.u32 2147483647, %v10868_v24  ;;  %3986 = vmatprep.mubr.bf16.mxu0 %v8275_v25  ;;  %v6297_v13 = vmul.f32 %v4337_v18, %v10769_v21  ;;  %v8283_v21 = vld [vmem:[%s12642_s0 + $0x7e0] ss:$16 sps:$4 sm:$0xff]  }
 0x22e   :  { %v8742_v33 = vpop.eup %8741  ;;  %v6099_v32 = vadd.f32 %v5768_v16, %v4531_v23  ;;  %8751 = vpow2.f32 %v5193_v29  ;;  %v4736_v22 = vand.u32 2147483647, %v10873_v30  ;;  %v4534_v58 = vmax.f32 %v10772_v37, 0.0 }
 0x22f   :  { %v5770_v17 = vmul.f32 0.6931472, %v8742_v33  ;;  %v2955_v41 = vpop.f32.mrb[140].mxu1  ;;  %v8744_v1 = vpop.eup %8743  ;;  %8753 = vlog2.f32 %v5515_v15  ;;  %v4931_v31 = vsub.f32 0.0, %v4735_v35 }
 0x230   :  { %v3772_v43 = vpop.f32.mrb[140].mxu0  ;;  %v2957_v53 = vpop.f32.mrb[141].mxu1  ;;  %v6491_v62 = vsub.f32 %v6099_v32, %v6295_v60  ;;  %v5516_v39 = vadd.f32 1.0, %v8744_v1  ;;  %v2956_v26 = vadd.f32 %v10802_v20, %v2955_v41  ;;  %v4932_v59 = vsub.f32 0.0, %v4736_v22  ;;  %v8287_v32 = vld [vmem:[%s12642_s0 + $0x804] ss:$16 sps:$4 sm:$0xff]  }
 0x231   :  { %v6100_v46 = vadd.f32 %v5770_v17, %v4532_v4  ;;  %v3774_v10 = vpop.f32.mrb[141].mxu0  ;;  %v2958_v50 = vpop.f32.mrb[142].mxu1  ;;  %v5195_v63 = vmul.f32 1.442695, %v4931_v31  ;;  %v6298_v60 = vmul.f32 %v4338_v51, %v10772_v37  ;;  %v8290_v4 = vld [vmem:[%s12642_s0 + $0x80c] ss:$16 sps:$4 sm:$0xff]  }
 0x232   :  { %v2959_v55 = vadd.f32 %v10802_v20, %v2958_v50  ;;  %v3775_v57 = vpop.f32.mrb[142].mxu0  ;;  %v2960_v36 = vpop.f32.mrb[143].mxu1  ;;  %v6747_v40 = vsel %vm6627_vm0, %v6491_v62, 0.0  ;;  %8755 = vlog2.f32 %v5516_v39  ;;  %v10899_v7 = vadd.f32 %v3772_v43, %v2956_v26  ;;  %v4339_v31 = vld [vmem:[%s12645_s3 + $0x200] sm:$0xff] }
 0x233   :  { %v8746_v6 = vpop.eup %8745  ;;  %v6492_v44 = vsub.f32 %v6100_v46, %v6296_v0  ;;  %v3777_v8 = vpop.f32.mrb[143].mxu0  ;;  %v6748_v9 = vadd.f32 %v6747_v40, %v6746_v28  ;;  %8757 = vpow2.f32 %v5195_v63  ;;  %v5197_v11 = vmul.f32 1.442695, %v4932_v59  ;;  %v4340_v36 = vld [vmem:[%s12645_s3 + $0x208] sm:$0xff] }
 0x234   :  { %v5772_v42 = vmul.f32 0.6931472, %v8746_v6  ;;  %3170 = vmatmul.mubr.bf16.gmra.mrb[248].mxu1 %v8277_v61  ;;  %v8748_v12 = vpop.eup %8747  ;;  %v4737_v52 = vand.u32 2147483647, %v10899_v7  ;;  %3987 = vmatmul.mubr.bf16.gmra.mrb[248].mxu0 %v8278_v56  ;;  %v10911_v28 = vadd.f32 %v3775_v57, %v2959_v55  ;;  %v4535_v22 = vmax.f32 %v10800_v5, 0.0 }
 0x235   :  { %v6749_v25 = vsel %vm6627_vm0, %v6492_v44, 0.0  ;;  %3177 = vmatprep.mubr.bf16.mxu1 %v8279_v19  ;;  %v8750_v14 = vpop.eup %8749  ;;  %v5774_v48 = vmul.f32 0.6931472, %v8748_v12  ;;  %8759 = vpow2.f32 %v5197_v11  ;;  %3994 = vmatprep.mubr.bf16.mxu0 %v8281_v49  ;;  %v6299_v57 = vmul.f32 %v4339_v31, %v10800_v5 }
 0x236   :  { %v6750_v27 = vadd.f32 %v6749_v25, %v6748_v9  ;;  %v6101_v47 = vadd.f32 %v5772_v42, %v4533_v54  ;;  %v5517_v23 = vadd.f32 1.0, %v8750_v14  ;;  %v4933_v3 = vsub.f32 0.0, %v4737_v52  ;;  %v8285_v25 = vld [vmem:[%s12642_s0 + $0x800] ss:$16 sps:$4 sm:$0xff]  }
 0x237   :  { %v2963_v16 = vpop.f32.mrb[144].mxu1  ;;  %v6102_v33 = vadd.f32 %v5774_v48, %v4534_v58  ;;  %v3780_v35 = vpop.f32.mrb[144].mxu0  ;;  %v4738_v56 = vand.u32 2147483647, %v10911_v28  ;;  %v4536_v44 = vmax.f32 %v10811_v38, 0.0  ;;  %v6300_v52 = vmul.f32 %v4340_v36, %v10811_v38  ;;  %v4341_v14 = vld [vmem:[%s12645_s3 + $0x210] sm:$0xff] }
 0x238   :  { %v6493_v29 = vsub.f32 %v6101_v47, %v6297_v13  ;;  %v2964_v15 = vadd.f32 %v10802_v20, %v2963_v16  ;;  %v2965_v61 = vpop.f32.mrb[145].mxu1  ;;  %v8752_v17 = vpop.eup %8751  ;;  %8761 = vlog2.f32 %v5517_v23  ;;  %v5199_v41 = vmul.f32 1.442695, %v4933_v3  ;;  %v8288_v13 = vld [vmem:[%s12642_s0 + $0x808] ss:$16 sps:$4 sm:$0xff]  }
 0x239   :  { %v3782_v19 = vpop.f32.mrb[145].mxu0  ;;  %v8754_v1 = vpop.eup %8753  ;;  %v6494_v0 = vsub.f32 %v6102_v33, %v6298_v60  ;;  %v5518_v43 = vadd.f32 1.0, %v8752_v17  ;;  %v4934_v39 = vsub.f32 0.0, %v4738_v56  ;;  %v8293_v23 = vld [vmem:[%s12642_s0 + $0x824] ss:$16 sps:$4 sm:$0xff]   ;;  %v4537_v17 = vmax.f32 %v10834_v45, 0.0 }
 0x23a   :  { %v6751_v37 = vsel %vm6627_vm0, %v6493_v29, 0.0  ;;  %v2966_v53 = vpop.f32.mrb[146].mxu1  ;;  %v3783_v62 = vpop.f32.mrb[146].mxu0  ;;  %v5776_v18 = vmul.f32 0.6931472, %v8754_v1  ;;  %8763 = vpow2.f32 %v5199_v41  ;;  %v10931_v49 = vadd.f32 %v3780_v35, %v2964_v15 }
 0x23b   :  { %v6752_v46 = vadd.f32 %v6751_v37, %v6750_v27  ;;  %v2968_v26 = vpop.f32.mrb[147].mxu1  ;;  %v3785_v10 = vpop.f32.mrb[147].mxu0  ;;  %v6753_v50 = vsel %vm6627_vm0, %v6494_v0, 0.0  ;;  %8765 = vlog2.f32 %v5518_v43  ;;  %v2967_v54 = vadd.f32 %v10802_v20, %v2966_v53  ;;  %v8296_v38 = vld [vmem:[%s12642_s0 + $0x82c] ss:$16 sps:$4 sm:$0xff]  }
 0x23c   :  { %3178 = vmatmul.mubr.bf16.gmra.mrb[252].mxu1 %v8283_v21  ;;  %v8756_v63 = vpop.eup %8755  ;;  %v6103_v55 = vadd.f32 %v5776_v18, %v4535_v22  ;;  %v5201_v6 = vmul.f32 1.442695, %v4934_v39  ;;  %3995 = vmatmul.mubr.bf16.gmra.mrb[252].mxu0 %v8284_v34  ;;  %v4739_v9 = vand.u32 2147483647, %v10931_v49  ;;  %v6301_v43 = vmul.f32 %v4341_v14, %v10834_v45  ;;  %v4342_v53 = vld [vmem:[%s12645_s3 + $0x218] sm:$0xff] }
 0x23d   :  { %v6754_v59 = vadd.f32 %v6753_v50, %v6752_v46  ;;  %3185 = vmatprep.mubr.bf16.mxu1 %v8287_v32  ;;  %v8758_v40 = vpop.eup %8757  ;;  %v5778_v8 = vmul.f32 0.6931472, %v8756_v63  ;;  %4002 = vmatprep.mubr.bf16.mxu0 %v8290_v4  ;;  %v10940_v12 = vadd.f32 %v3783_v62, %v2967_v54  ;;  %v8291_v50 = vld [vmem:[%s12642_s0 + $0x820] ss:$16 sps:$4 sm:$0xff]   ;;  %v4538_v45 = vmax.f32 %v10843_v2, 0.0 }
 0x23e   :  { %v6495_v42 = vsub.f32 %v6103_v55, %v6299_v57  ;;  %v5519_v11 = vadd.f32 1.0, %v8758_v40  ;;  %8767 = vpow2.f32 %v5201_v6  ;;  %v4935_v27 = vsub.f32 0.0, %v4739_v9  ;;  %v8294_v55 = vld [vmem:[%s12642_s0 + $0x828] ss:$16 sps:$4 sm:$0xff]   ;;  %v8299_v57 = vld [vmem:[%s12642_s0 + $0x844] ss:$16 sps:$4 sm:$0xff]  }
 0x23f   :  { %v2971_v5 = vpop.f32.mrb[148].mxu1  ;;  %v8760_v51 = vpop.eup %8759  ;;  %v6104_v58 = vadd.f32 %v5778_v8, %v4536_v44  ;;  %v4740_v35 = vand.u32 2147483647, %v10940_v12  ;;  %v6302_v6 = vmul.f32 %v4342_v53, %v10843_v2  ;;  %v8302_v9 = vld [vmem:[%s12642_s0 + $0x84c] ss:$16 sps:$4 sm:$0xff]   ;;  %v4343_v2 = vld [vmem:[%s12645_s3 + $0x220] sm:$0xff] }
 0x240   :  { %v2972_v47 = vadd.f32 %v10802_v20, %v2971_v5  ;;  %v3788_v48 = vpop.f32.mrb[148].mxu0  ;;  %v2973_v21 = vpop.f32.mrb[149].mxu1  ;;  %v6755_v3 = vsel %vm6627_vm0, %v6495_v42, 0.0  ;;  %8769 = vlog2.f32 %v5519_v11  ;;  %v5520_v16 = vadd.f32 1.0, %v8760_v51 }
 0x241   :  { %v3790_v34 = vpop.f32.mrb[149].mxu0  ;;  %v2974_v29 = vpop.f32.mrb[150].mxu1  ;;  %v6756_v33 = vadd.f32 %v6755_v3, %v6754_v59  ;;  %v6496_v60 = vsub.f32 %v6104_v58, %v6300_v52  ;;  %v5203_v15 = vmul.f32 1.442695, %v4935_v27  ;;  %v4936_v0 = vsub.f32 0.0, %v4740_v35 }
 0x242   :  { %v3791_v61 = vpop.f32.mrb[150].mxu0  ;;  %v2976_v32 = vpop.f32.mrb[151].mxu1  ;;  %8771 = vlog2.f32 %v5520_v16  ;;  %v10962_v41 = vadd.f32 %v3788_v48, %v2972_v47  ;;  %v2975_v56 = vadd.f32 %v10802_v20, %v2974_v29  ;;  %v4539_v5 = vmax.f32 %v10868_v24, 0.0 }
 0x243   :  { %v8762_v4 = vpop.eup %8761  ;;  %v3793_v19 = vpop.f32.mrb[151].mxu0  ;;  %v6757_v1 = vsel %vm6627_vm0, %v6496_v60, 0.0  ;;  %8773 = vpow2.f32 %v5203_v15  ;;  %v5205_v26 = vmul.f32 1.442695, %v4936_v0  ;;  %v6303_v35 = vmul.f32 %v4343_v2, %v10868_v24 }
 0x244   :  { %v5780_v37 = vmul.f32 0.6931472, %v8762_v4  ;;  %3186 = vmatmul.mubr.bf16.gmra.mrb[148].mxu1 %v8285_v25  ;;  %v8764_v31 = vpop.eup %8763  ;;  %v6758_v22 = vadd.f32 %v6757_v1, %v6756_v33  ;;  %v4741_v62 = vand.u32 2147483647, %v10962_v41  ;;  %4003 = vmatmul.mubr.bf16.gmra.mrb[0].mxu0 %v8288_v13  ;;  %v10971_v10 = vadd.f32 %v3791_v61, %v2975_v56  ;;  %v4344_v61 = vld [vmem:[%s12645_s3 + $0x228] sm:$0xff] }
 0x245   :  { %3193 = vmatprep.mubr.bf16.mxu1 %v8293_v23  ;;  %v8766_v46 = vpop.eup %8765  ;;  %v5521_v39 = vadd.f32 1.0, %v8764_v31  ;;  %4010 = vmatprep.mubr.bf16.mxu0 %v8296_v38  ;;  %v4540_v32 = vmax.f32 %v10873_v30, 0.0  ;;  %v8297_v31 = vld [vmem:[%s12642_s0 + $0x840] ss:$16 sps:$4 sm:$0xff]   ;;  %v6304_v53 = vmul.f32 %v4344_v61, %v10873_v30  ;;  %v8311_v61 = vld [vmem:[%s12642_s0 + $0x884] ss:$16 sps:$4 sm:$0xff]  }
 0x246   :  { %v6105_v18 = vadd.f32 %v5780_v37, %v4537_v17  ;;  %v5782_v54 = vmul.f32 0.6931472, %v8766_v46  ;;  %v4937_v63 = vsub.f32 0.0, %v4741_v62  ;;  %v4742_v40 = vand.u32 2147483647, %v10971_v10  ;;  %v4345_v62 = vld [vmem:[%s12645_s3 + $0x230] sm:$0xff] }
 0x247   :  { %v2979_v59 = vpop.f32.mrb[152].mxu1  ;;  %8775 = vlog2.f32 %v5521_v39  ;;  %v3796_v44 = vpop.f32.mrb[152].mxu0 }
 0x248   :  { %v6497_v36 = vsub.f32 %v6105_v18, %v6301_v43  ;;  %v2981_v8 = vpop.f32.mrb[153].mxu1  ;;  %v8768_v42 = vpop.eup %8767  ;;  %v6106_v11 = vadd.f32 %v5782_v54, %v4538_v45  ;;  %8777 = vpow2.f32 %v5205_v26  ;;  %v5207_v25 = vmul.f32 1.442695, %v4937_v63  ;;  %v8300_v26 = vld [vmem:[%s12642_s0 + $0x848] ss:$16 sps:$4 sm:$0xff]  }
 0x249   :  { %v3798_v13 = vpop.f32.mrb[153].mxu0  ;;  %v2982_v51 = vpop.f32.mrb[154].mxu1  ;;  %v5522_v52 = vadd.f32 1.0, %v8768_v42  ;;  %v4938_v14 = vsub.f32 0.0, %v4742_v40  ;;  %v2980_v27 = vadd.f32 %v10802_v20, %v2979_v59  ;;  %v8305_v59 = vld [vmem:[%s12642_s0 + $0x864] ss:$16 sps:$4 sm:$0xff]  }
 0x24a   :  { %v6759_v58 = vsel %vm6627_vm0, %v6497_v36, 0.0  ;;  %v3799_v47 = vpop.f32.mrb[154].mxu0  ;;  %v2984_v48 = vpop.f32.mrb[155].mxu1  ;;  %v6498_v3 = vsub.f32 %v6106_v11, %v6302_v6  ;;  %8779 = vpow2.f32 %v5207_v25  ;;  %v2983_v16 = vadd.f32 %v10802_v20, %v2982_v51 }
 0x24b   :  { %v8770_v21 = vpop.eup %8769  ;;  %v6760_v23 = vadd.f32 %v6759_v58, %v6758_v22  ;;  %v3801_v34 = vpop.f32.mrb[155].mxu0  ;;  %8781 = vlog2.f32 %v5522_v52  ;;  %v5209_v38 = vmul.f32 1.442695, %v4938_v14  ;;  %v10995_v33 = vadd.f32 %v3796_v44, %v2980_v27 }
 0x24c   :  { %v5784_v29 = vmul.f32 0.6931472, %v8770_v21  ;;  %3194 = vmatmul.mubr.bf16.gmra.mrb[152].mxu1 %v8291_v50  ;;  %v8772_v60 = vpop.eup %8771  ;;  %v6761_v15 = vsel %vm6627_vm0, %v6498_v3, 0.0  ;;  %v11003_v4 = vadd.f32 %v3799_v47, %v2983_v16  ;;  %4011 = vmatmul.mubr.bf16.gmra.mrb[4].mxu0 %v8294_v55  ;;  %v4541_v50 = vmax.f32 %v10899_v7, 0.0 }
 0x24d   :  { %3201 = vmatprep.mubr.bf16.mxu1 %v8299_v57  ;;  %v8774_v17 = vpop.eup %8773  ;;  %v6762_v56 = vadd.f32 %v6761_v15, %v6760_v23  ;;  %v5786_v1 = vmul.f32 0.6931472, %v8772_v60  ;;  %8783 = vpow2.f32 %v5209_v38  ;;  %4018 = vmatprep.mubr.bf16.mxu0 %v8302_v9  ;;  %v4743_v0 = vand.u32 2147483647, %v10995_v33  ;;  %v8308_v9 = vld [vmem:[%s12642_s0 + $0x86c] ss:$16 sps:$4 sm:$0xff]  }
 0x24e   :  { %v6107_v19 = vadd.f32 %v5784_v29, %v4539_v5  ;;  %v5523_v37 = vadd.f32 1.0, %v8774_v17  ;;  %v4744_v46 = vand.u32 2147483647, %v11003_v4  ;;  %v6305_v21 = vmul.f32 %v4345_v62, %v10899_v7  ;;  %v4346_v23 = vld [vmem:[%s12645_s3 + $0x238] sm:$0xff]  ;;  %v8303_v29 = vld [vmem:[%s12642_s0 + $0x860] ss:$16 sps:$4 sm:$0xff]  }
 0x24f   :  { %v2987_v24 = vpop.f32.mrb[156].mxu1  ;;  %v6108_v43 = vadd.f32 %v5786_v1, %v4540_v32  ;;  %v3804_v18 = vpop.f32.mrb[156].mxu0  ;;  %v4939_v45 = vsub.f32 0.0, %v4743_v0  ;;  %v4542_v7 = vmax.f32 %v10911_v28, 0.0  ;;  %v6306_v17 = vmul.f32 %v4346_v23, %v10911_v28  ;;  %v8314_v62 = vld [vmem:[%s12642_s0 + $0x88c] ss:$16 sps:$4 sm:$0xff]  }
 0x250   :  { %v6499_v22 = vsub.f32 %v6107_v19, %v6303_v35  ;;  %v2989_v39 = vpop.f32.mrb[157].mxu1  ;;  %8785 = vlog2.f32 %v5523_v37  ;;  %v2988_v54 = vadd.f32 %v10802_v20, %v2987_v24  ;;  %v3806_v63 = vpop.f32.mrb[157].mxu0  ;;  %v4940_v6 = vsub.f32 0.0, %v4744_v46  ;;  %v8306_v35 = vld [vmem:[%s12642_s0 + $0x868] ss:$16 sps:$4 sm:$0xff]  }
 0x251   :  { %v2990_v30 = vpop.f32.mrb[158].mxu1  ;;  %v8776_v55 = vpop.eup %8775  ;;  %v6500_v36 = vsub.f32 %v6108_v43, %v6304_v53  ;;  %v5211_v25 = vmul.f32 1.442695, %v4939_v45  ;;  %v4347_v63 = vld [vmem:[%s12645_s3 + $0x240] sm:$0xff] }
 0x252   :  { %v6763_v57 = vsel %vm6627_vm0, %v6499_v22, 0.0  ;;  %v2991_v40 = vadd.f32 %v10802_v20, %v2990_v30  ;;  %v3807_v44 = vpop.f32.mrb[158].mxu0  ;;  %v2992_v8 = vpop.f32.mrb[159].mxu1  ;;  %v5788_v5 = vmul.f32 0.6931472, %v8776_v55  ;;  %v11027_v13 = vadd.f32 %v3804_v18, %v2988_v54 }
 0x253   :  { %v8778_v42 = vpop.eup %8777  ;;  %v6764_v11 = vadd.f32 %v6763_v57, %v6762_v56  ;;  %v3809_v51 = vpop.f32.mrb[159].mxu0  ;;  %v6765_v58 = vsel %vm6627_vm0, %v6500_v36, 0.0  ;;  %v5213_v52 = vmul.f32 1.442695, %v4940_v6  ;;  %8787 = vpow2.f32 %v5211_v25 }
 0x254   :  { %v5524_v2 = vadd.f32 1.0, %v8778_v42  ;;  %v11030_v14 = vadd.f32 %v3807_v44, %v2991_v40  ;;  %3202 = vmatmul.mubr.bf16.gmra.mrb[156].mxu1 %v8297_v31  ;;  %v8780_v27 = vpop.eup %8779  ;;  %v6109_v48 = vadd.f32 %v5788_v5, %v4541_v50  ;;  %4019 = vmatmul.mubr.bf16.gmra.mrb[8].mxu0 %v8300_v26  ;;  %v4745_v34 = vand.u32 2147483647, %v11027_v13  ;;  %v8309_v5 = vld [vmem:[%s12642_s0 + $0x880] ss:$16 sps:$4 sm:$0xff]  }
 0x255   :  { %v6766_v47 = vadd.f32 %v6765_v58, %v6764_v11  ;;  %3209 = vmatprep.mubr.bf16.mxu1 %v8305_v59  ;;  %v8782_v3 = vpop.eup %8781  ;;  %v5525_v16 = vadd.f32 1.0, %v8780_v27  ;;  %4026 = vmatprep.mubr.bf16.mxu0 %v8308_v9  ;;  %v4543_v30 = vmax.f32 %v10931_v49, 0.0  ;;  %v6307_v42 = vmul.f32 %v4347_v63, %v10931_v49  ;;  %v4348_v11 = vld [vmem:[%s12645_s3 + $0x248] sm:$0xff]  ;;  %v4349_v58 = vld [vmem:[%s12645_s3 + $0x250] sm:$0xff] }
 0x256   :  { %8789 = vlog2.f32 %v5524_v2  ;;  %v6501_v38 = vsub.f32 %v6109_v48, %v6305_v21  ;;  %v5790_v60 = vmul.f32 0.6931472, %v8782_v3  ;;  %v4941_v56 = vsub.f32 0.0, %v4745_v34  ;;  %v8312_v27 = vld [vmem:[%s12642_s0 + $0x888] ss:$16 sps:$4 sm:$0xff]  }
 0x257   :  { %8791 = vpow2.f32 %v5213_v52  ;;  %v2995_v15 = vpop.f32.mrb[160].mxu1  ;;  %v8784_v32 = vpop.eup %8783  ;;  %v4746_v19 = vand.u32 2147483647, %v11030_v14  ;;  %v4544_v51 = vmax.f32 %v10940_v12, 0.0  ;;  %v4545_v21 = vmax.f32 %v10962_v41, 0.0 }
 0x258   :  { %8793 = vlog2.f32 %v5525_v16  ;;  %v3812_v1 = vpop.f32.mrb[160].mxu0  ;;  %v2997_v37 = vpop.f32.mrb[161].mxu1  ;;  %v6767_v0 = vsel %vm6627_vm0, %v6501_v38, 0.0  ;;  %v6110_v24 = vadd.f32 %v5790_v60, %v4542_v7  ;;  %v5526_v31 = vadd.f32 1.0, %v8784_v32 }
 0x259   :  { %v2996_v22 = vadd.f32 %v10802_v20, %v2995_v15  ;;  %v3814_v43 = vpop.f32.mrb[161].mxu0  ;;  %v2998_v53 = vpop.f32.mrb[162].mxu1  ;;  %v6768_v46 = vadd.f32 %v6767_v0, %v6766_v47  ;;  %v5215_v28 = vmul.f32 1.442695, %v4941_v56  ;;  %v4942_v18 = vsub.f32 0.0, %v4746_v19 }
 0x25a   :  { %v2999_v39 = vadd.f32 %v10802_v20, %v2998_v53  ;;  %v3815_v26 = vpop.f32.mrb[162].mxu0  ;;  %v3000_v50 = vpop.f32.mrb[163].mxu1  ;;  %v6502_v54 = vsub.f32 %v6110_v24, %v6306_v17  ;;  %8795 = vlog2.f32 %v5526_v31  ;;  %v6308_v60 = vmul.f32 %v4348_v11, %v10940_v12  ;;  %v8320_v0 = vld [vmem:[%s12642_s0 + $0x8ac] ss:$16 sps:$4 sm:$0xff]  }
 0x25b   :  { %v8786_v45 = vpop.eup %8785  ;;  %v11059_v59 = vadd.f32 %v3812_v1, %v2996_v22  ;;  %v3817_v55 = vpop.f32.mrb[163].mxu0  ;;  %8797 = vpow2.f32 %v5215_v28  ;;  %v5217_v36 = vmul.f32 1.442695, %v4942_v18  ;;  %v4350_v12 = vld [vmem:[%s12645_s3 + $0x258] sm:$0xff]  ;;  %v4546_v50 = vmax.f32 %v10971_v10, 0.0 }
 0x25c   :  { %v5792_v57 = vmul.f32 0.6931472, %v8786_v45  ;;  %v11061_v6 = vadd.f32 %v3815_v26, %v2999_v39  ;;  %3210 = vmatmul.mubr.bf16.gmra.mrb[160].mxu1 %v8303_v29  ;;  %v6769_v40 = vsel %vm6627_vm0, %v6502_v54, 0.0  ;;  %4027 = vmatmul.mubr.bf16.gmra.mrb[12].mxu0 %v8306_v35  ;;  %v8317_v29 = vld [vmem:[%s12642_s0 + $0x8a4] ss:$16 sps:$4 sm:$0xff]  }
 0x25d   :  { %v4747_v44 = vand.u32 2147483647, %v11059_v59  ;;  %3217 = vmatprep.mubr.bf16.mxu1 %v8311_v61  ;;  %v6770_v8 = vadd.f32 %v6769_v40, %v6768_v46  ;;  %8799 = vpow2.f32 %v5217_v36  ;;  %4034 = vmatprep.mubr.bf16.mxu0 %v8314_v62  ;;  %v8788_v25 = vpop.eup %8787  ;;  %v6309_v62 = vmul.f32 %v4349_v58, %v10962_v41 }
 0x25e   :  { %v6111_v9 = vadd.f32 %v5792_v57, %v4543_v30  ;;  %v4748_v49 = vand.u32 2147483647, %v11061_v6  ;;  %v5527_v23 = vadd.f32 1.0, %v8788_v25  ;;  %v6310_v30 = vmul.f32 %v4350_v12, %v10971_v10  ;;  %v4351_v10 = vld [vmem:[%s12645_s3 + $0x260] sm:$0xff] }
 0x25f   :  { %v4943_v2 = vsub.f32 0.0, %v4747_v44  ;;  %v3003_v52 = vpop.f32.mrb[164].mxu1  ;;  %v3820_v16 = vpop.f32.mrb[164].mxu0  ;;  %v4548_v12 = vmax.f32 %v11003_v4, 0.0 }
 0x260   :  { %v8790_v47 = vpop.eup %8789  ;;  %v6503_v48 = vsub.f32 %v6111_v9, %v6307_v42  ;;  %v3004_v3 = vadd.f32 %v10802_v20, %v3003_v52  ;;  %v3005_v34 = vpop.f32.mrb[165].mxu1  ;;  %v4944_v35 = vsub.f32 0.0, %v4748_v49  ;;  %8801 = vlog2.f32 %v5527_v23 }
 0x261   :  { %v8792_v38 = vpop.eup %8791  ;;  %v5794_v7 = vmul.f32 0.6931472, %v8790_v47  ;;  %v5219_v15 = vmul.f32 1.442695, %v4943_v2  ;;  %v3822_v61 = vpop.f32.mrb[165].mxu0 }
 0x262   :  { %v8794_v32 = vpop.eup %8793  ;;  %v6771_v17 = vsel %vm6627_vm0, %v6503_v48, 0.0  ;;  %v5528_v56 = vadd.f32 1.0, %v8792_v38  ;;  %v11087_v19 = vadd.f32 %v3820_v16, %v3004_v3  ;;  %v3006_v1 = vpop.f32.mrb[166].mxu1  ;;  %v5221_v46 = vmul.f32 1.442695, %v4944_v35 }
 0x263   :  { %v3823_v37 = vpop.f32.mrb[166].mxu0  ;;  %v6772_v24 = vadd.f32 %v6771_v17, %v6770_v8  ;;  %v6112_v31 = vadd.f32 %v5794_v7, %v4544_v51  ;;  %v5796_v22 = vmul.f32 0.6931472, %v8794_v32  ;;  %8803 = vpow2.f32 %v5219_v15  ;;  %v3008_v43 = vpop.f32.mrb[167].mxu1  ;;  %v8315_v8 = vld [vmem:[%s12642_s0 + $0x8a0] ss:$16 sps:$4 sm:$0xff]  }
 0x264   :  { %v3825_v53 = vpop.f32.mrb[167].mxu0  ;;  %8805 = vlog2.f32 %v5528_v56  ;;  %v4749_v28 = vand.u32 2147483647, %v11087_v19  ;;  %3218 = vmatmul.mubr.bf16.gmra.mrb[164].mxu1 %v8309_v5  ;;  %v8796_v18 = vpop.eup %8795  ;;  %v3007_v45 = vadd.f32 %v10802_v20, %v3006_v1  ;;  %4035 = vmatmul.mubr.bf16.gmra.mrb[16].mxu0 %v8312_v27  ;;  %v8318_v2 = vld [vmem:[%s12642_s0 + $0x8a8] ss:$16 sps:$4 sm:$0xff]   ;;  %v4547_v61 = vmax.f32 %v10995_v33, 0.0 }
 0x265   :  { %v6504_v39 = vsub.f32 %v6112_v31, %v6308_v60  ;;  %v6113_v26 = vadd.f32 %v5796_v22, %v4545_v21  ;;  %v8798_v54 = vpop.eup %8797  ;;  %v5798_v63 = vmul.f32 0.6931472, %v8796_v18  ;;  %8807 = vpow2.f32 %v5221_v46  ;;  %3225 = vmatprep.mubr.bf16.mxu1 %v8317_v29  ;;  %4042 = vmatprep.mubr.bf16.mxu0 %v8320_v0  ;;  %v8323_v48 = vld [vmem:[%s12642_s0 + $0x8c4] ss:$16 sps:$4 sm:$0xff]   ;;  %v8326_v34 = vld [vmem:[%s12642_s0 + $0x8cc] ss:$16 sps:$4 sm:$0xff]  }
 0x266   :  { %v4945_v55 = vsub.f32 0.0, %v4749_v28  ;;  %v5529_v36 = vadd.f32 1.0, %v8798_v54  ;;  %v11101_v40 = vadd.f32 %v3823_v37, %v3007_v45  ;;  %v11123_v38 = vld [vmem:[#allocation2] ss:$0 sm:$0xff]  ;;  %v4352_v32 = vld [vmem:[%s12645_s3 + $0x268] sm:$0xff]  ;;  %v6311_v0 = vmul.f32 %v4351_v10, %v10995_v33 }
 0x267   :  { %v6773_v41 = vsel %vm6627_vm0, %v6504_v39, 0.0  ;;  %v6505_v57 = vsub.f32 %v6113_v26, %v6309_v62  ;;  %v3011_v44 = vpop.f32.mrb[168].mxu1  ;;  %v8800_v9 = vpop.eup %8799  ;;  %v6114_v11 = vadd.f32 %v5798_v63, %v4546_v50  ;;  %v8321_v46 = vld [vmem:[%s12642_s0 + $0x8c0] ss:$16 sps:$4 sm:$0xff]   ;;  %v6312_v18 = vmul.f32 %v4352_v32, %v11003_v4  ;;  %v8324_v50 = vld [vmem:[%s12642_s0 + $0x8c8] ss:$16 sps:$4 sm:$0xff]  }
 0x268   :  { %v6774_v42 = vadd.f32 %v6773_v41, %v6772_v24  ;;  %v5223_v5 = vmul.f32 1.442695, %v4945_v55  ;;  %v3012_v25 = vadd.f32 %v10802_v20, %v3011_v44  ;;  %v3828_v51 = vpop.f32.mrb[168].mxu0  ;;  %v3013_v58 = vpop.f32.mrb[169].mxu1  ;;  %8809 = vlog2.f32 %v5529_v36  ;;  %v4353_v24 = vld [vmem:[%s12645_s3 + $0x270] sm:$0xff] }
 0x269   :  { %v6775_v49 = vsel %vm6627_vm0, %v6505_v57, 0.0  ;;  %v5530_v52 = vadd.f32 1.0, %v8800_v9  ;;  %v3830_v27 = vpop.f32.mrb[169].mxu0  ;;  %v3014_v47 = vpop.f32.mrb[170].mxu1  ;;  %v6506_v23 = vsub.f32 %v6114_v11, %v6310_v30  ;;  %v4750_v20 = vand.u32 2147483647, %v11101_v40 }
 0x26a   :  { %v6776_v21 = vadd.f32 %v6775_v49, %v6774_v42  ;;  %8811 = vpow2.f32 %v5223_v5  ;;  %v3831_v3 = vpop.f32.mrb[170].mxu0  ;;  %v3016_v16 = vpop.f32.mrb[171].mxu1  ;;  %v11121_v29 = vadd.f32 %v3828_v51, %v3012_v25  ;;  %v3015_v7 = vadd.f32 %v11123_v38, %v3014_v47  ;;  %v8329_v45 = vld [vmem:[%s12642_s0 + $0x8e4] ss:$16 sps:$4 sm:$0xff]   ;;  %v8332_v42 = vld [vmem:[%s12642_s0 + $0x8ec] ss:$16 sps:$4 sm:$0xff]  }
 0x26b   :  { %8813 = vlog2.f32 %v5530_v52  ;;  %v3833_v60 = vpop.f32.mrb[171].mxu0  ;;  %v8802_v15 = vpop.eup %8801  ;;  %v6777_v35 = vsel %vm6627_vm0, %v6506_v23, 0.0  ;;  %v4946_v17 = vsub.f32 0.0, %v4750_v20  ;;  %v4549_v63 = vmax.f32 %v11027_v13, 0.0  ;;  %v4354_v16 = vld [vmem:[%s12645_s3 + $0x278] sm:$0xff] }
 0x26c   :  { %3226 = vmatmul.mubr.bf16.gmra.mrb[168].mxu1 %v8315_v8  ;;  %v6778_v1 = vadd.f32 %v6777_v35, %v6776_v21  ;;  %v5800_v37 = vmul.f32 0.6931472, %v8802_v15  ;;  %v4751_v31 = vand.u32 2147483647, %v11121_v29  ;;  %4043 = vmatmul.mubr.bf16.gmra.mrb[20].mxu0 %v8318_v2  ;;  %v11137_v62 = vadd.f32 %v3831_v3, %v3015_v7 }
 0x26d   :  { %v8804_v56 = vpop.eup %8803  ;;  %3233 = vmatprep.mubr.bf16.mxu1 %v8323_v48  ;;  %v5225_v53 = vmul.f32 1.442695, %v4946_v17  ;;  %4050 = vmatprep.mubr.bf16.mxu0 %v8326_v34  ;;  %v11151_v30 = vmul.f32 %v4353_v24, %v11027_v13  ;;  %v4550_v52 = vmax.f32 %v11030_v14, 0.0  ;;  %v4355_v24 = vld [vmem:[%s12645_s3 + $0x280] sm:$0xff] }
 0x26e   :  { %v8806_v22 = vpop.eup %8805  ;;  %v5531_v43 = vadd.f32 1.0, %v8804_v56  ;;  %v6115_v33 = vadd.f32 %v5800_v37, %v4547_v61  ;;  %v4947_v39 = vsub.f32 0.0, %v4751_v31  ;;  %v4752_v55 = vand.u32 2147483647, %v11137_v62  ;;  %v8327_v56 = vld [vmem:[%s12642_s0 + $0x8e0] ss:$16 sps:$4 sm:$0xff]  }
 0x26f   :  { %v5802_v28 = vmul.f32 0.6931472, %v8806_v22  ;;  %v3019_v26 = vpop.f32.mrb[172].mxu1  ;;  %v8808_v54 = vpop.eup %8807 }
 0x270   :  { %8815 = vlog2.f32 %v5531_v43  ;;  %v3836_v4 = vpop.f32.mrb[172].mxu0  ;;  %v3021_v41 = vpop.f32.mrb[173].mxu1  ;;  %v6507_v57 = vsub.f32 %v6115_v33, %v6311_v0  ;;  %v5532_v44 = vadd.f32 1.0, %v8808_v54  ;;  %v5227_v11 = vmul.f32 1.442695, %v4947_v39 }
 0x271   :  { %v6116_v36 = vadd.f32 %v5802_v28, %v4548_v12  ;;  %8817 = vpow2.f32 %v5225_v53  ;;  %v3838_v8 = vpop.f32.mrb[173].mxu0  ;;  %v3022_v9 = vpop.f32.mrb[174].mxu1  ;;  %v4948_v10 = vsub.f32 0.0, %v4752_v55  ;;  %v3020_v13 = vadd.f32 %v11123_v38, %v3019_v26  ;;  %v8330_v43 = vld [vmem:[%s12642_s0 + $0x8e8] ss:$16 sps:$4 sm:$0xff]  }
 0x272   :  { %v3023_v5 = vadd.f32 %v11123_v38, %v3022_v9  ;;  %v3839_v25 = vpop.f32.mrb[174].mxu0  ;;  %v3024_v51 = vpop.f32.mrb[175].mxu1  ;;  %v6779_v2 = vsel %vm6627_vm0, %v6507_v57, 0.0  ;;  %8819 = vlog2.f32 %v5532_v44  ;;  %v6314_v0 = vmul.f32 %v4354_v16, %v11030_v14  ;;  %v8335_v14 = vld [vmem:[%s12642_s0 + $0x904] ss:$16 sps:$4 sm:$0xff]  }
 0x273   :  { %v8810_v58 = vpop.eup %8809  ;;  %v6508_v49 = vsub.f32 %v6116_v36, %v6312_v18  ;;  %v3841_v27 = vpop.f32.mrb[175].mxu0  ;;  %v6780_v48 = vadd.f32 %v6779_v2, %v6778_v1  ;;  %8821 = vpow2.f32 %v5227_v11  ;;  %v5229_v23 = vmul.f32 1.442695, %v4948_v10  ;;  %v8338_v55 = vld [vmem:[%s12642_s0 + $0x90c] ss:$16 sps:$4 sm:$0xff]  }
 0x274   :  { %v8812_v47 = vpop.eup %8811  ;;  %v5804_v21 = vmul.f32 0.6931472, %v8810_v58  ;;  %3234 = vmatmul.mubr.bf16.gmra.mrb[172].mxu1 %v8321_v46  ;;  %v11165_v7 = vadd.f32 %v3836_v4, %v3020_v13  ;;  %v11167_v60 = vadd.f32 %v3839_v25, %v3023_v5  ;;  %4051 = vmatmul.mubr.bf16.gmra.mrb[24].mxu0 %v8324_v50  ;;  %v4551_v53 = vmax.f32 %v11059_v59, 0.0  ;;  %v8341_v16 = vld [vmem:[%s12642_s0 + $0x924] ss:$16 sps:$4 sm:$0xff]  }
 0x275   :  { %v8814_v20 = vpop.eup %8813  ;;  %v6781_v3 = vsel %vm6627_vm0, %v6508_v49, 0.0  ;;  %v5533_v34 = vadd.f32 1.0, %v8812_v47  ;;  %3241 = vmatprep.mubr.bf16.mxu1 %v8329_v45  ;;  %8823 = vpow2.f32 %v5229_v23  ;;  %4058 = vmatprep.mubr.bf16.mxu0 %v8332_v42  ;;  %v4356_v42 = vld [vmem:[%s12645_s3 + $0x288] sm:$0xff]  ;;  %v6315_v58 = vmul.f32 %v4355_v24, %v11059_v59  ;;  %v8333_v47 = vld [vmem:[%s12642_s0 + $0x900] ss:$16 sps:$4 sm:$0xff]  }
 0x276   :  { %v6782_v15 = vadd.f32 %v6781_v3, %v6780_v48  ;;  %v6117_v35 = vadd.f32 %v5804_v21, %v4549_v63  ;;  %v5806_v61 = vmul.f32 0.6931472, %v8814_v20  ;;  %v4753_v32 = vand.u32 2147483647, %v11165_v7  ;;  %v4357_v59 = vld [vmem:[%s12645_s3 + $0x290] sm:$0xff] }
 0x277   :  { %8825 = vlog2.f32 %v5533_v34  ;;  %v3027_v17 = vpop.f32.mrb[176].mxu1  ;;  %v4754_v31 = vand.u32 2147483647, %v11167_v60  ;;  %v3844_v22 = vpop.f32.mrb[176].mxu0  ;;  %v4552_v49 = vmax.f32 %v11061_v6, 0.0  ;;  %v6316_v21 = vmul.f32 %v4356_v42, %v11061_v6 }
 0x278   :  { %v6509_v1 = vsub.f32 %v6117_v35, %v11151_v30  ;;  %v6118_v37 = vadd.f32 %v5806_v61, %v4550_v52  ;;  %v3029_v12 = vpop.f32.mrb[177].mxu1  ;;  %v4949_v46 = vsub.f32 0.0, %v4753_v32  ;;  %v3028_v33 = vadd.f32 %v11123_v38, %v3027_v17  ;;  %v3846_v28 = vpop.f32.mrb[177].mxu0  ;;  %v8336_v3 = vld [vmem:[%s12642_s0 + $0x908] ss:$16 sps:$4 sm:$0xff]  }
 0x279   :  { %v3030_v18 = vpop.f32.mrb[178].mxu1  ;;  %v4950_v45 = vsub.f32 0.0, %v4754_v31  ;;  %v3847_v63 = vpop.f32.mrb[178].mxu0  ;;  %v4553_v35 = vmax.f32 %v11087_v19, 0.0  ;;  %v8342_v42 = vld [vmem:[%s12642_s0 + $0x928] ss:$16 sps:$4 sm:$0xff]  }
 0x27a   :  { %v8816_v39 = vpop.eup %8815  ;;  %v6783_v26 = vsel %vm6627_vm0, %v6509_v1, 0.0  ;;  %v6510_v50 = vsub.f32 %v6118_v37, %v6314_v0  ;;  %v3031_v54 = vadd.f32 %v11123_v38, %v3030_v18  ;;  %v3032_v30 = vpop.f32.mrb[179].mxu1  ;;  %v5231_v36 = vmul.f32 1.442695, %v4949_v46 }
 0x27b   :  { %v8818_v4 = vpop.eup %8817  ;;  %v6784_v41 = vadd.f32 %v6783_v26, %v6782_v15  ;;  %v5808_v57 = vmul.f32 0.6931472, %v8816_v39  ;;  %v11192_v44 = vadd.f32 %v3844_v22, %v3028_v33  ;;  %v3849_v8 = vpop.f32.mrb[179].mxu0  ;;  %v5233_v10 = vmul.f32 1.442695, %v4950_v45 }
 0x27c   :  { %v6785_v9 = vsel %vm6627_vm0, %v6510_v50, 0.0  ;;  %v5534_v11 = vadd.f32 1.0, %v8818_v4  ;;  %v11198_v13 = vadd.f32 %v3847_v63, %v3031_v54  ;;  %3242 = vmatmul.mubr.bf16.gmra.mrb[176].mxu1 %v8327_v56  ;;  %v8820_v5 = vpop.eup %8819  ;;  %8827 = vpow2.f32 %v5231_v36  ;;  %4059 = vmatmul.mubr.bf16.gmra.mrb[28].mxu0 %v8330_v43  ;;  %v8344_v22 = vld [vmem:[%s12642_s0 + $0x92c] ss:$16 sps:$4 sm:$0xff]   ;;  %v8339_v36 = vld [vmem:[%s12642_s0 + $0x920] ss:$16 sps:$4 sm:$0xff]  }
 0x27d   :  { %v6786_v25 = vadd.f32 %v6785_v9, %v6784_v41  ;;  %v6119_v51 = vadd.f32 %v5808_v57, %v4551_v53  ;;  %3249 = vmatprep.mubr.bf16.mxu1 %v8335_v14  ;;  %v8822_v2 = vpop.eup %8821  ;;  %v5810_v52 = vmul.f32 0.6931472, %v8820_v5  ;;  %v4755_v27 = vand.u32 2147483647, %v11192_v44  ;;  %4066 = vmatprep.mubr.bf16.mxu0 %v8338_v55  ;;  %v4358_v41 = vld [vmem:[%s12645_s3 + $0x298] sm:$0xff] }
 0x27e   :  { %8829 = vlog2.f32 %v5534_v11  ;;  %v5535_v23 = vadd.f32 1.0, %v8822_v2  ;;  %v4756_v61 = vand.u32 2147483647, %v11198_v13  ;;  %v6317_v54 = vmul.f32 %v4357_v59, %v11087_v19  ;;  %v8347_v11 = vld [vmem:[%s12642_s0 + $0x944] ss:$16 sps:$4 sm:$0xff]  }
 0x27f   :  { %v6511_v48 = vsub.f32 %v6119_v51, %v6315_v58  ;;  %8831 = vpow2.f32 %v5233_v10  ;;  %v3035_v20 = vpop.f32.mrb[180].mxu1  ;;  %v8824_v34 = vpop.eup %8823  ;;  %v6120_v15 = vadd.f32 %v5810_v52, %v4552_v49  ;;  %v4951_v6 = vsub.f32 0.0, %v4755_v27  ;;  %v4359_v51 = vld [vmem:[%s12645_s3 + $0x2a0] sm:$0xff] }
 0x280   :  { %v3852_v32 = vpop.f32.mrb[180].mxu0  ;;  %v3037_v17 = vpop.f32.mrb[181].mxu1  ;;  %8833 = vlog2.f32 %v5535_v23  ;;  %v5536_v37 = vadd.f32 1.0, %v8824_v34  ;;  %v3036_v0 = vadd.f32 %v11123_v38, %v3035_v20  ;;  %v4952_v18 = vsub.f32 0.0, %v4756_v61 }
 0x281   :  { %v8826_v56 = vpop.eup %8825  ;;  %v6787_v1 = vsel %vm6627_vm0, %v6511_v48, 0.0  ;;  %v3854_v24 = vpop.f32.mrb[181].mxu0  ;;  %v6512_v43 = vsub.f32 %v6120_v15, %v6316_v21  ;;  %v5235_v46 = vmul.f32 1.442695, %v4951_v6  ;;  %v6318_v48 = vmul.f32 %v4358_v41, %v11101_v40  ;;  %v8348_v41 = vld [vmem:[%s12642_s0 + $0x948] ss:$16 sps:$4 sm:$0xff]  }
 0x282   :  { %v3038_v31 = vpop.f32.mrb[182].mxu1  ;;  %v6788_v12 = vadd.f32 %v6787_v1, %v6786_v25  ;;  %v5812_v53 = vmul.f32 0.6931472, %v8826_v56  ;;  %v3855_v33 = vpop.f32.mrb[182].mxu0  ;;  %8835 = vlog2.f32 %v5536_v37  ;;  %v11223_v14 = vadd.f32 %v3852_v32, %v3036_v0 }
 0x283   :  { %v3040_v28 = vpop.f32.mrb[183].mxu1  ;;  %v3039_v39 = vadd.f32 %v11123_v38, %v3038_v31  ;;  %v3857_v26 = vpop.f32.mrb[183].mxu0  ;;  %v6789_v50 = vsel %vm6627_vm0, %v6512_v43, 0.0  ;;  %8837 = vpow2.f32 %v5235_v46  ;;  %v5237_v30 = vmul.f32 1.442695, %v4952_v18 }
 0x284   :  { %v6121_v45 = vadd.f32 %v5812_v53, %v4553_v35  ;;  %3250 = vmatmul.mubr.bf16.gmra.mrb[180].mxu1 %v8333_v47  ;;  %v6790_v63 = vadd.f32 %v6789_v50, %v6788_v12  ;;  %v4757_v55 = vand.u32 2147483647, %v11223_v14  ;;  %4067 = vmatmul.mubr.bf16.gmra.mrb[32].mxu0 %v8336_v3  ;;  %v4554_v25 = vmax.f32 %v11101_v40, 0.0  ;;  %v8350_v35 = vld [vmem:[%s12642_s0 + $0x94c] ss:$16 sps:$4 sm:$0xff]  }
 0x285   :  { %3257 = vmatprep.mubr.bf16.mxu1 %v8341_v16  ;;  %v11232_v57 = vadd.f32 %v3855_v33, %v3039_v39  ;;  %4074 = vmatprep.mubr.bf16.mxu0 %v8344_v22  ;;  %8839 = vpow2.f32 %v5237_v30  ;;  %v4555_v32 = vmax.f32 %v11121_v29, 0.0  ;;  %v6319_v22 = vmul.f32 %v4359_v51, %v11121_v29  ;;  %v4360_v12 = vld [vmem:[%s12645_s3 + $0x2a8] sm:$0xff]  ;;  %v8345_v18 = vld [vmem:[%s12642_s0 + $0x940] ss:$16 sps:$4 sm:$0xff]  }
 0x286   :  { %v6513_v4 = vsub.f32 %v6121_v45, %v6317_v54  ;;  %v8828_v19 = vpop.eup %8827  ;;  %v4953_v8 = vsub.f32 0.0, %v4757_v55  ;;  %v4556_v33 = vmax.f32 %v11137_v62, 0.0  ;;  %v6320_v30 = vmul.f32 %v4360_v12, %v11137_v62 }
 0x287   :  { %v3043_v9 = vpop.f32.mrb[184].mxu1  ;;  %v5537_v58 = vadd.f32 1.0, %v8828_v19  ;;  %v4758_v2 = vand.u32 2147483647, %v11232_v57  ;;  %v3860_v49 = vpop.f32.mrb[184].mxu0 }
 0x288   :  { %v8830_v10 = vpop.eup %8829  ;;  %v6791_v5 = vsel %vm6627_vm0, %v6513_v4, 0.0  ;;  %v5239_v21 = vmul.f32 1.442695, %v4953_v8  ;;  %v3045_v59 = vpop.f32.mrb[185].mxu1  ;;  %v3044_v16 = vadd.f32 %v11123_v38, %v3043_v9 }
 0x289   :  { %v8832_v52 = vpop.eup %8831  ;;  %v6792_v27 = vadd.f32 %v6791_v5, %v6790_v63  ;;  %v5814_v47 = vmul.f32 0.6931472, %v8830_v10  ;;  %v3862_v23 = vpop.f32.mrb[185].mxu0  ;;  %8841 = vlog2.f32 %v5537_v58  ;;  %v4954_v3 = vsub.f32 0.0, %v4758_v2  ;;  %v8356_v2 = vld [vmem:[%s12642_s0 + $0x96c] ss:$16 sps:$4 sm:$0xff]  }
 0x28a   :  { %v5538_v20 = vadd.f32 1.0, %v8832_v52  ;;  %v3046_v34 = vpop.f32.mrb[186].mxu1  ;;  %v3863_v15 = vpop.f32.mrb[186].mxu0  ;;  %8843 = vpow2.f32 %v5239_v21  ;;  %v11256_v0 = vadd.f32 %v3860_v49, %v3044_v16  ;;  %v4361_v52 = vld [vmem:[%s12645_s3 + $0x2b0] sm:$0xff] }
 0x28b   :  { %v8834_v6 = vpop.eup %8833  ;;  %v6122_v61 = vadd.f32 %v5814_v47, %v4554_v25  ;;  %v3047_v40 = vadd.f32 %v11123_v38, %v3046_v34  ;;  %v3048_v17 = vpop.f32.mrb[187].mxu1  ;;  %v5241_v37 = vmul.f32 1.442695, %v4954_v3 }
 0x28c   :  { %v3865_v56 = vpop.f32.mrb[187].mxu0  ;;  %v5816_v1 = vmul.f32 0.6931472, %v8834_v6  ;;  %8845 = vlog2.f32 %v5538_v20  ;;  %3258 = vmatmul.mubr.bf16.gmra.mrb[184].mxu1 %v8339_v36  ;;  %v8836_v24 = vpop.eup %8835  ;;  %4075 = vmatmul.mubr.bf16.gmra.mrb[36].mxu0 %v8342_v42  ;;  %v4759_v26 = vand.u32 2147483647, %v11256_v0  ;;  %v4557_v20 = vmax.f32 %v11165_v7, 0.0 }
 0x28d   :  { %v6514_v31 = vsub.f32 %v6122_v61, %v6318_v48  ;;  %v11262_v43 = vadd.f32 %v3863_v15, %v3047_v40  ;;  %3265 = vmatprep.mubr.bf16.mxu1 %v8347_v11  ;;  %v8838_v53 = vpop.eup %8837  ;;  %v5818_v28 = vmul.f32 0.6931472, %v8836_v24  ;;  %8847 = vpow2.f32 %v5241_v37  ;;  %4082 = vmatprep.mubr.bf16.mxu0 %v8350_v35  ;;  %v8353_v36 = vld [vmem:[%s12642_s0 + $0x964] ss:$16 sps:$4 sm:$0xff]   ;;  %v4362_v35 = vld [vmem:[%s12645_s3 + $0x2b8] sm:$0xff] }
 0x28e   :  { %v6123_v46 = vadd.f32 %v5816_v1, %v4555_v32  ;;  %v5539_v39 = vadd.f32 1.0, %v8838_v53  ;;  %v4955_v8 = vsub.f32 0.0, %v4759_v26  ;;  %v6321_v32 = vmul.f32 %v4361_v52, %v11165_v7  ;;  %v8351_v1 = vld [vmem:[%s12642_s0 + $0x960] ss:$16 sps:$4 sm:$0xff]   ;;  %v8354_v7 = vld [vmem:[%s12642_s0 + $0x968] ss:$16 sps:$4 sm:$0xff]  }
 0x28f   :  { %v6793_v29 = vsel %vm6627_vm0, %v6514_v31, 0.0  ;;  %v3051_v50 = vpop.f32.mrb[188].mxu1  ;;  %v6124_v63 = vadd.f32 %v5818_v28, %v4556_v33  ;;  %v3868_v55 = vpop.f32.mrb[188].mxu0  ;;  %v4760_v9 = vand.u32 2147483647, %v11262_v43  ;;  %v4558_v40 = vmax.f32 %v11167_v60, 0.0 }
 0x290   :  { %v6794_v45 = vadd.f32 %v6793_v29, %v6792_v27  ;;  %v6515_v54 = vsub.f32 %v6123_v46, %v6319_v22  ;;  %v3053_v4 = vpop.f32.mrb[189].mxu1  ;;  %v8840_v19 = vpop.eup %8839  ;;  %8849 = vlog2.f32 %v5539_v39  ;;  %v3052_v25 = vadd.f32 %v11123_v38, %v3051_v50  ;;  %v4363_v46 = vld [vmem:[%s12645_s3 + $0x2c0] sm:$0xff] }
 0x291   :  { %v3870_v42 = vpop.f32.mrb[189].mxu0  ;;  %v3054_v11 = vpop.f32.mrb[190].mxu1  ;;  %v6516_v62 = vsub.f32 %v6124_v63, %v6320_v30  ;;  %v5540_v5 = vadd.f32 1.0, %v8840_v19  ;;  %v5243_v27 = vmul.f32 1.442695, %v4955_v8  ;;  %v4956_v47 = vsub.f32 0.0, %v4760_v9 }
 0x292   :  { %v6795_v10 = vsel %vm6627_vm0, %v6515_v54, 0.0  ;;  %v3871_v51 = vpop.f32.mrb[190].mxu0  ;;  %v3056_v58 = vpop.f32.mrb[191].mxu1  ;;  %v3055_v48 = vadd.f32 %v11123_v38, %v3054_v11  ;;  %v11289_v3 = vadd.f32 %v3868_v55, %v3052_v25  ;;  %v6322_v53 = vmul.f32 %v4362_v35, %v11167_v60  ;;  %v8359_v39 = vld [vmem:[%s12642_s0 + $0x984] ss:$16 sps:$4 sm:$0xff]  }
 0x293   :  { %v6796_v49 = vadd.f32 %v6795_v10, %v6794_v45  ;;  %v3873_v21 = vpop.f32.mrb[191].mxu0  ;;  %v8842_v59 = vpop.eup %8841  ;;  %v6797_v23 = vsel %vm6627_vm0, %v6516_v62, 0.0  ;;  %8851 = vlog2.f32 %v5540_v5  ;;  %v5245_v6 = vmul.f32 1.442695, %v4956_v47  ;;  %v8362_v30 = vld [vmem:[%s12642_s0 + $0x98c] ss:$16 sps:$4 sm:$0xff]  }
 0x294   :  { %3266 = vmatmul.mubr.bf16.gmra.mrb[188].mxu1 %v8345_v18  ;;  %v8844_v16 = vpop.eup %8843  ;;  %v5820_v15 = vmul.f32 0.6931472, %v8842_v59  ;;  %8853 = vpow2.f32 %v5243_v27  ;;  %4083 = vmatmul.mubr.bf16.gmra.mrb[40].mxu0 %v8348_v41  ;;  %v4761_v56 = vand.u32 2147483647, %v11289_v3  ;;  %v11300_v31 = vadd.f32 %v3871_v51, %v3055_v48  ;;  %v4364_v47 = vld [vmem:[%s12645_s3 + $0x2c8] sm:$0xff] }
 0x295   :  { %v6798_v34 = vadd.f32 %v6797_v23, %v6796_v49  ;;  %3273 = vmatprep.mubr.bf16.mxu1 %v8353_v36  ;;  %v5541_v17 = vadd.f32 1.0, %v8844_v16  ;;  %4090 = vmatprep.mubr.bf16.mxu0 %v8356_v2  ;;  %8855 = vpow2.f32 %v5245_v6  ;;  %v4559_v45 = vmax.f32 %v11192_v44, 0.0  ;;  %v8357_v59 = vld [vmem:[%s12642_s0 + $0x980] ss:$16 sps:$4 sm:$0xff]  }
 0x296   :  { %v8846_v61 = vpop.eup %8845  ;;  %v6125_v37 = vadd.f32 %v5820_v15, %v4557_v20  ;;  %v4957_v33 = vsub.f32 0.0, %v4761_v56  ;;  %v4762_v4 = vand.u32 2147483647, %v11300_v31  ;;  %v6323_v58 = vmul.f32 %v4363_v46, %v11192_v44  ;;  %v8360_v15 = vld [vmem:[%s12642_s0 + $0x988] ss:$16 sps:$4 sm:$0xff]   ;;  %v4365_v6 = vld [vmem:[%s12645_s3 + $0x2d0] sm:$0xff] }
 0x297   :  { %v5822_v24 = vmul.f32 0.6931472, %v8846_v61  ;;  %v3059_v22 = vpop.f32.mrb[192].mxu1  ;;  %v8848_v12 = vpop.eup %8847  ;;  %8857 = vlog2.f32 %v5541_v17  ;;  %v4560_v23 = vmax.f32 %v11198_v13, 0.0  ;;  %v4561_v61 = vmax.f32 %v11223_v14, 0.0 }
 0x298   :  { %v3060_v28 = vadd.f32 %v11123_v38, %v3059_v22  ;;  %v3876_v18 = vpop.f32.mrb[192].mxu0  ;;  %v3061_v29 = vpop.f32.mrb[193].mxu1  ;;  %v6517_v26 = vsub.f32 %v6125_v37, %v6321_v32  ;;  %v5542_v54 = vadd.f32 1.0, %v8848_v12  ;;  %v5247_v55 = vmul.f32 1.442695, %v4957_v33 }
 0x299   :  { %v6126_v50 = vadd.f32 %v5822_v24, %v4558_v40  ;;  %v3878_v60 = vpop.f32.mrb[193].mxu0  ;;  %v3062_v63 = vpop.f32.mrb[194].mxu1  ;;  %v4958_v25 = vsub.f32 0.0, %v4762_v4  ;;  %v8365_v56 = vld [vmem:[%s12642_s0 + $0x9a4] ss:$16 sps:$4 sm:$0xff]   ;;  %v6324_v24 = vmul.f32 %v4364_v47, %v11198_v13 }
 0x29a   :  { %v11318_v41 = vadd.f32 %v3876_v18, %v3060_v28  ;;  %v3879_v36 = vpop.f32.mrb[194].mxu0  ;;  %v3064_v19 = vpop.f32.mrb[195].mxu1  ;;  %v6799_v9 = vsel %vm6627_vm0, %v6517_v26, 0.0  ;;  %8859 = vlog2.f32 %v5542_v54  ;;  %v3063_v11 = vadd.f32 %v11123_v38, %v3062_v63  ;;  %v8368_v26 = vld [vmem:[%s12642_s0 + $0x9ac] ss:$16 sps:$4 sm:$0xff]  }
 0x29b   :  { %v8850_v8 = vpop.eup %8849  ;;  %v6518_v42 = vsub.f32 %v6126_v50, %v6322_v53  ;;  %v3881_v10 = vpop.f32.mrb[195].mxu0  ;;  %v6800_v62 = vadd.f32 %v6799_v9, %v6798_v34  ;;  %8861 = vpow2.f32 %v5247_v55  ;;  %v5249_v48 = vmul.f32 1.442695, %v4958_v25  ;;  %v4366_v60 = vld [vmem:[%s12645_s3 + $0x2d8] sm:$0xff] }
 0x29c   :  { %v5824_v5 = vmul.f32 0.6931472, %v8850_v8  ;;  %3274 = vmatmul.mubr.bf16.gmra.mrb[192].mxu1 %v8351_v1  ;;  %v4763_v2 = vand.u32 2147483647, %v11318_v41  ;;  %4091 = vmatmul.mubr.bf16.gmra.mrb[44].mxu0 %v8354_v7  ;;  %v11328_v21 = vadd.f32 %v3879_v36, %v3063_v11  ;;  %v6325_v8 = vmul.f32 %v4365_v6, %v11223_v14  ;;  %v4367_v14 = vld [vmem:[%s12645_s3 + $0x2e0] sm:$0xff] }
 0x29d   :  { %v6801_v51 = vsel %vm6627_vm0, %v6518_v42, 0.0  ;;  %3281 = vmatprep.mubr.bf16.mxu1 %v8359_v39  ;;  %v8852_v49 = vpop.eup %8851  ;;  %4098 = vmatprep.mubr.bf16.mxu0 %v8362_v30  ;;  %8863 = vpow2.f32 %v5249_v48  ;;  %v4562_v11 = vmax.f32 %v11232_v57, 0.0  ;;  %v6326_v25 = vmul.f32 %v4366_v60, %v11232_v57  ;;  %v8363_v57 = vld [vmem:[%s12642_s0 + $0x9a0] ss:$16 sps:$4 sm:$0xff]  }
 0x29e   :  { %v6802_v52 = vadd.f32 %v6801_v51, %v6800_v62  ;;  %v6127_v27 = vadd.f32 %v5824_v5, %v4559_v45  ;;  %v8854_v44 = vpop.eup %8853  ;;  %v5826_v20 = vmul.f32 0.6931472, %v8852_v49  ;;  %v4959_v16 = vsub.f32 0.0, %v4763_v2 }
 0x29f   :  { %v3067_v34 = vpop.f32.mrb[196].mxu1  ;;  %v5543_v32 = vadd.f32 1.0, %v8854_v44  ;;  %v3884_v40 = vpop.f32.mrb[196].mxu0  ;;  %v4764_v7 = vand.u32 2147483647, %v11328_v21 }
 0x2a0   :  { %v6519_v35 = vsub.f32 %v6127_v27, %v6323_v58  ;;  %v3069_v17 = vpop.f32.mrb[197].mxu1  ;;  %v8856_v1 = vpop.eup %8855  ;;  %v6128_v37 = vadd.f32 %v5826_v20, %v4560_v23  ;;  %v5251_v22 = vmul.f32 1.442695, %v4959_v16  ;;  %v3068_v18 = vadd.f32 %v11123_v38, %v3067_v34  ;;  %v8371_v34 = vld [vmem:[%s12642_s0 + $0x9c4] ss:$16 sps:$4 sm:$0xff]  }
 0x2a1   :  { %v3886_v12 = vpop.f32.mrb[197].mxu0  ;;  %v3070_v53 = vpop.f32.mrb[198].mxu1  ;;  %8865 = vlog2.f32 %v5543_v32  ;;  %v5544_v28 = vadd.f32 1.0, %v8856_v1  ;;  %v4960_v63 = vsub.f32 0.0, %v4764_v7  ;;  %v8374_v17 = vld [vmem:[%s12642_s0 + $0x9cc] ss:$16 sps:$4 sm:$0xff]  }
 0x2a2   :  { %v8858_v46 = vpop.eup %8857  ;;  %v6803_v33 = vsel %vm6627_vm0, %v6519_v35, 0.0  ;;  %v3887_v29 = vpop.f32.mrb[198].mxu0  ;;  %v6520_v13 = vsub.f32 %v6128_v37, %v6324_v24  ;;  %8867 = vpow2.f32 %v5251_v22  ;;  %v11354_v30 = vadd.f32 %v3884_v40, %v3068_v18 }
 0x2a3   :  { %v3072_v39 = vpop.f32.mrb[199].mxu1  ;;  %v6804_v50 = vadd.f32 %v6803_v33, %v6802_v52  ;;  %v5828_v45 = vmul.f32 0.6931472, %v8858_v46  ;;  %v3889_v54 = vpop.f32.mrb[199].mxu0  ;;  %8869 = vlog2.f32 %v5544_v28  ;;  %v3071_v55 = vadd.f32 %v11123_v38, %v3070_v53 }
 0x2a4   :  { %3282 = vmatmul.mubr.bf16.gmra.mrb[196].mxu1 %v8357_v59  ;;  %v8860_v4 = vpop.eup %8859  ;;  %v6805_v36 = vsel %vm6627_vm0, %v6520_v13, 0.0  ;;  %4099 = vmatmul.mubr.bf16.gmra.mrb[48].mxu0 %v8360_v15  ;;  %v5253_v62 = vmul.f32 1.442695, %v4960_v63  ;;  %v4765_v58 = vand.u32 2147483647, %v11354_v30  ;;  %v4563_v12 = vmax.f32 %v11256_v0, 0.0 }
 0x2a5   :  { %v6129_v19 = vadd.f32 %v5828_v45, %v4561_v61  ;;  %3289 = vmatprep.mubr.bf16.mxu1 %v8365_v56  ;;  %v8862_v9 = vpop.eup %8861  ;;  %v6806_v42 = vadd.f32 %v6805_v36, %v6804_v50  ;;  %v5830_v10 = vmul.f32 0.6931472, %v8860_v4  ;;  %4106 = vmatprep.mubr.bf16.mxu0 %v8368_v26  ;;  %v11365_v52 = vadd.f32 %v3887_v29, %v3071_v55  ;;  %v8366_v59 = vld [vmem:[%s12642_s0 + $0x9a8] ss:$16 sps:$4 sm:$0xff]   ;;  %v8369_v54 = vld [vmem:[%s12642_s0 + $0x9c0] ss:$16 sps:$4 sm:$0xff]  }
 0x2a6   :  { %v5545_v51 = vadd.f32 1.0, %v8862_v9  ;;  %8871 = vpow2.f32 %v5253_v62  ;;  %v4961_v23 = vsub.f32 0.0, %v4765_v58  ;;  %v6327_v29 = vmul.f32 %v4367_v14, %v11256_v0  ;;  %v4368_v39 = vld [vmem:[%s12645_s3 + $0x2e8] sm:$0xff] }
 0x2a7   :  { %v6521_v5 = vsub.f32 %v6129_v19, %v6325_v8  ;;  %v3075_v2 = vpop.f32.mrb[200].mxu1  ;;  %v6130_v49 = vadd.f32 %v5830_v10, %v4562_v11  ;;  %v3892_v47 = vpop.f32.mrb[200].mxu0  ;;  %v4766_v61 = vand.u32 2147483647, %v11365_v52  ;;  %v4564_v0 = vmax.f32 %v11262_v43, 0.0 }
 0x2a8   :  { %v3076_v27 = vadd.f32 %v11123_v38, %v3075_v2  ;;  %v3077_v48 = vpop.f32.mrb[201].mxu1  ;;  %8873 = vlog2.f32 %v5545_v51  ;;  %v3894_v20 = vpop.f32.mrb[201].mxu0  ;;  %v5255_v1 = vmul.f32 1.442695, %v4961_v23  ;;  %v8372_v36 = vld [vmem:[%s12642_s0 + $0x9c8] ss:$16 sps:$4 sm:$0xff]   ;;  %v6328_v19 = vmul.f32 %v4368_v39, %v11262_v43 }
 0x2a9   :  { %v6807_v44 = vsel %vm6627_vm0, %v6521_v5, 0.0  ;;  %v3078_v16 = vpop.f32.mrb[202].mxu1  ;;  %v8864_v15 = vpop.eup %8863  ;;  %v6522_v6 = vsub.f32 %v6130_v49, %v6326_v25  ;;  %v4962_v53 = vsub.f32 0.0, %v4766_v61  ;;  %v8377_v10 = vld [vmem:[%s12642_s0 + $0x9e4] ss:$16 sps:$4 sm:$0xff]   ;;  %v4565_v25 = vmax.f32 %v11289_v3, 0.0 }
 0x2aa   :  { %v6808_v35 = vadd.f32 %v6807_v44, %v6806_v42  ;;  %v3895_v32 = vpop.f32.mrb[202].mxu0  ;;  %v3080_v40 = vpop.f32.mrb[203].mxu1  ;;  %v5546_v56 = vadd.f32 1.0, %v8864_v15  ;;  %v11382_v37 = vadd.f32 %v3892_v47, %v3076_v27  ;;  %v3079_v46 = vadd.f32 %v11123_v38, %v3078_v16  ;;  %v8380_v43 = vld [vmem:[%s12642_s0 + $0x9ec] ss:$16 sps:$4 sm:$0xff]   ;;  %v4369_v23 = vld [vmem:[%s12645_s3 + $0x2f0] sm:$0xff] }
 0x2ab   :  { %v3897_v24 = vpop.f32.mrb[203].mxu0  ;;  %v8866_v22 = vpop.eup %8865  ;;  %v6809_v7 = vsel %vm6627_vm0, %v6522_v6, 0.0  ;;  %v5257_v13 = vmul.f32 1.442695, %v4962_v53 }
 0x2ac   :  { %3290 = vmatmul.mubr.bf16.gmra.mrb[200].mxu1 %v8363_v57  ;;  %v8868_v33 = vpop.eup %8867  ;;  %v6810_v28 = vadd.f32 %v6809_v7, %v6808_v35  ;;  %v5832_v18 = vmul.f32 0.6931472, %v8866_v22  ;;  %8875 = vlog2.f32 %v5546_v56  ;;  %4107 = vmatmul.mubr.bf16.gmra.mrb[52].mxu0 %v8366_v59  ;;  %v4767_v45 = vand.u32 2147483647, %v11382_v37  ;;  %v8375_v22 = vld [vmem:[%s12642_s0 + $0x9e0] ss:$16 sps:$4 sm:$0xff]  }
 0x2ad   :  { %3297 = vmatprep.mubr.bf16.mxu1 %v8371_v34  ;;  %v8870_v26 = vpop.eup %8869  ;;  %v5547_v50 = vadd.f32 1.0, %v8868_v33  ;;  %8877 = vpow2.f32 %v5255_v1  ;;  %4114 = vmatprep.mubr.bf16.mxu0 %v8374_v17  ;;  %v11396_v55 = vadd.f32 %v3895_v32, %v3079_v46  ;;  %v6329_v56 = vmul.f32 %v4369_v23, %v11289_v3  ;;  %v4370_v1 = vld [vmem:[%s12645_s3 + $0x2f8] sm:$0xff] }
 0x2ae   :  { %v6131_v60 = vadd.f32 %v5832_v18, %v4563_v12  ;;  %v5834_v63 = vmul.f32 0.6931472, %v8870_v26  ;;  %v4963_v8 = vsub.f32 0.0, %v4767_v45  ;;  %v4566_v12 = vmax.f32 %v11300_v31, 0.0  ;;  %v8378_v3 = vld [vmem:[%s12642_s0 + $0x9e8] ss:$16 sps:$4 sm:$0xff]  }
 0x2af   :  { %v3083_v4 = vpop.f32.mrb[204].mxu1  ;;  %8879 = vlog2.f32 %v5547_v50  ;;  %v3900_v42 = vpop.f32.mrb[204].mxu0  ;;  %v4768_v14 = vand.u32 2147483647, %v11396_v55  ;;  %v6330_v45 = vmul.f32 %v4370_v1, %v11300_v31  ;;  %v8386_v31 = vld [vmem:[%s12642_s0 + $0xa0c] ss:$16 sps:$4 sm:$0xff]  }
 0x2b0   :  { %v3084_v9 = vadd.f32 %v11123_v38, %v3083_v4  ;;  %v3085_v11 = vpop.f32.mrb[205].mxu1  ;;  %v6523_v62 = vsub.f32 %v6131_v60, %v6327_v29  ;;  %v6132_v5 = vadd.f32 %v5834_v63, %v4564_v0  ;;  %8881 = vpow2.f32 %v5257_v13  ;;  %v3902_v51 = vpop.f32.mrb[205].mxu0  ;;  %v8383_v13 = vld [vmem:[%s12642_s0 + $0xa04] ss:$16 sps:$4 sm:$0xff]  }
 0x2b1   :  { %v3086_v58 = vpop.f32.mrb[206].mxu1  ;;  %v8872_v2 = vpop.eup %8871  ;;  %v5259_v49 = vmul.f32 1.442695, %v4963_v8  ;;  %v4964_v6 = vsub.f32 0.0, %v4768_v14  ;;  %v4568_v23 = vmax.f32 %v11328_v21, 0.0 }
 0x2b2   :  { %v11411_v27 = vadd.f32 %v3900_v42, %v3084_v9  ;;  %v3903_v47 = vpop.f32.mrb[206].mxu0  ;;  %v3088_v48 = vpop.f32.mrb[207].mxu1  ;;  %v6811_v59 = vsel %vm6627_vm0, %v6523_v62, 0.0  ;;  %v6524_v44 = vsub.f32 %v6132_v5, %v6328_v19  ;;  %v5548_v20 = vadd.f32 1.0, %v8872_v2 }
 0x2b3   :  { %v8874_v57 = vpop.eup %8873  ;;  %v3087_v16 = vadd.f32 %v11123_v38, %v3086_v58  ;;  %v3905_v34 = vpop.f32.mrb[207].mxu0  ;;  %v6812_v15 = vadd.f32 %v6811_v59, %v6810_v28  ;;  %8883 = vpow2.f32 %v5259_v49  ;;  %v5261_v24 = vmul.f32 1.442695, %v4964_v6 }
 0x2b4   :  { %v5836_v35 = vmul.f32 0.6931472, %v8874_v57  ;;  %3298 = vmatmul.mubr.bf16.gmra.mrb[204].mxu1 %v8369_v54  ;;  %v6813_v61 = vsel %vm6627_vm0, %v6524_v44, 0.0  ;;  %8885 = vlog2.f32 %v5548_v20  ;;  %v4769_v32 = vand.u32 2147483647, %v11411_v27  ;;  %4115 = vmatmul.mubr.bf16.gmra.mrb[56].mxu0 %v8372_v36  ;;  %v4371_v54 = vld [vmem:[%s12645_s3 + $0x300] sm:$0xff] }
 0x2b5   :  { %3305 = vmatprep.mubr.bf16.mxu1 %v8377_v10  ;;  %v6814_v40 = vadd.f32 %v6813_v61, %v6812_v15  ;;  %4122 = vmatprep.mubr.bf16.mxu0 %v8380_v43  ;;  %v11428_v46 = vadd.f32 %v3903_v47, %v3087_v16  ;;  %8887 = vpow2.f32 %v5261_v24  ;;  %v4567_v19 = vmax.f32 %v11318_v41, 0.0  ;;  %v4372_v44 = vld [vmem:[%s12645_s3 + $0x308] sm:$0xff]  ;;  %v11456_v20 = vld [vmem:[#allocation2] ss:$0 sm:$0xff] }
 0x2b6   :  { %v6133_v17 = vadd.f32 %v5836_v35, %v4565_v25  ;;  %v8876_v7 = vpop.eup %8875  ;;  %v4965_v53 = vsub.f32 0.0, %v4769_v32  ;;  %v6331_v14 = vmul.f32 %v4371_v54, %v11318_v41  ;;  %v8381_v61 = vld [vmem:[%s12642_s0 + $0xa00] ss:$16 sps:$4 sm:$0xff]   ;;  %v8384_v32 = vld [vmem:[%s12642_s0 + $0xa08] ss:$16 sps:$4 sm:$0xff]  }
 0x2b7   :  { %v3091_v33 = vpop.f32.mrb[208].mxu1  ;;  %v8878_v28 = vpop.eup %8877  ;;  %v5838_v29 = vmul.f32 0.6931472, %v8876_v7  ;;  %v4770_v63 = vand.u32 2147483647, %v11428_v46 }
 0x2b8   :  { %v6525_v18 = vsub.f32 %v6133_v17, %v6329_v56  ;;  %v3092_v39 = vadd.f32 %v11123_v38, %v3091_v33  ;;  %v3908_v26 = vpop.f32.mrb[208].mxu0  ;;  %v3093_v50 = vpop.f32.mrb[209].mxu1  ;;  %v5549_v60 = vadd.f32 1.0, %v8878_v28  ;;  %v5263_v0 = vmul.f32 1.442695, %v4965_v53 }
 0x2b9   :  { %v8880_v4 = vpop.eup %8879  ;;  %v6134_v38 = vadd.f32 %v5838_v29, %v4566_v12  ;;  %v3910_v9 = vpop.f32.mrb[209].mxu0  ;;  %v4966_v5 = vsub.f32 0.0, %v4770_v63  ;;  %v4373_v12 = vld [vmem:[%s12645_s3 + $0x310] sm:$0xff] }
 0x2ba   :  { %v6815_v36 = vsel %vm6627_vm0, %v6525_v18, 0.0  ;;  %v11444_v8 = vadd.f32 %v3908_v26, %v3092_v39  ;;  %v3094_v42 = vpop.f32.mrb[210].mxu1  ;;  %v8882_v11 = vpop.eup %8881  ;;  %v5840_v62 = vmul.f32 0.6931472, %v8880_v4  ;;  %8889 = vlog2.f32 %v5549_v60  ;;  %v4374_v9 = vld [vmem:[%s12645_s3 + $0x318] sm:$0xff] }
 0x2bb   :  { %v6816_v10 = vadd.f32 %v6815_v36, %v6814_v40  ;;  %v3911_v25 = vpop.f32.mrb[210].mxu0  ;;  %v3096_v51 = vpop.f32.mrb[211].mxu1  ;;  %v6526_v58 = vsub.f32 %v6134_v38, %v6330_v45  ;;  %v5550_v43 = vadd.f32 1.0, %v8882_v11  ;;  %8891 = vpow2.f32 %v5263_v0  ;;  %v8392_v45 = vld [vmem:[%s12642_s0 + $0xa2c] ss:$16 sps:$4 sm:$0xff]  }
 0x2bc   :  { %v3913_v2 = vpop.f32.mrb[211].mxu0  ;;  %3306 = vmatmul.mubr.bf16.gmra.mrb[208].mxu1 %v8375_v22  ;;  %v6135_v49 = vadd.f32 %v5840_v62, %v4567_v19  ;;  %v5265_v47 = vmul.f32 1.442695, %v4966_v5  ;;  %v4771_v48 = vand.u32 2147483647, %v11444_v8  ;;  %4123 = vmatmul.mubr.bf16.gmra.mrb[60].mxu0 %v8378_v3  ;;  %v3095_v16 = vadd.f32 %v11456_v20, %v3094_v42 }
 0x2bd   :  { %3313 = vmatprep.mubr.bf16.mxu1 %v8383_v13  ;;  %v8884_v57 = vpop.eup %8883  ;;  %v6817_v59 = vsel %vm6627_vm0, %v6526_v58, 0.0  ;;  %8893 = vlog2.f32 %v5550_v43  ;;  %4130 = vmatprep.mubr.bf16.mxu0 %v8386_v31  ;;  %v8389_v3 = vld [vmem:[%s12642_s0 + $0xa24] ss:$16 sps:$4 sm:$0xff]   ;;  %v6332_v39 = vmul.f32 %v4372_v44, %v11328_v21  ;;  %v4569_v36 = vmax.f32 %v11354_v30, 0.0 }
 0x2be   :  { %v8886_v41 = vpop.eup %8885  ;;  %v6818_v34 = vadd.f32 %v6817_v59, %v6816_v10  ;;  %v6527_v15 = vsub.f32 %v6135_v49, %v6331_v14  ;;  %v5551_v35 = vadd.f32 1.0, %v8884_v57  ;;  %8895 = vpow2.f32 %v5265_v47  ;;  %v8390_v14 = vld [vmem:[%s12642_s0 + $0xa28] ss:$16 sps:$4 sm:$0xff]   ;;  %v8395_v47 = vld [vmem:[%s12642_s0 + $0xa44] ss:$16 sps:$4 sm:$0xff]  }
 0x2bf   :  { %v3099_v6 = vpop.f32.mrb[212].mxu1  ;;  %v5842_v40 = vmul.f32 0.6931472, %v8886_v41  ;;  %v4967_v17 = vsub.f32 0.0, %v4771_v48  ;;  %v11465_v56 = vadd.f32 %v3911_v25, %v3095_v16  ;;  %v3916_v24 = vpop.f32.mrb[212].mxu0  ;;  %v6333_v19 = vmul.f32 %v4373_v12, %v11354_v30 }
 0x2c0   :  { %v3100_v1 = vadd.f32 %v11456_v20, %v3099_v6  ;;  %v3101_v22 = vpop.f32.mrb[213].mxu1  ;;  %v6819_v7 = vsel %vm6627_vm0, %v6527_v15, 0.0  ;;  %8897 = vlog2.f32 %v5551_v35  ;;  %v3918_v53 = vpop.f32.mrb[213].mxu0  ;;  %v4570_v5 = vmax.f32 %v11365_v52, 0.0  ;;  %v8387_v30 = vld [vmem:[%s12642_s0 + $0xa20] ss:$16 sps:$4 sm:$0xff]  }
 0x2c1   :  { %v3102_v33 = vpop.f32.mrb[214].mxu1  ;;  %v8888_v28 = vpop.eup %8887  ;;  %v6820_v18 = vadd.f32 %v6819_v7, %v6818_v34  ;;  %v6136_v29 = vadd.f32 %v5842_v40, %v4568_v23  ;;  %v5267_v26 = vmul.f32 1.442695, %v4967_v17  ;;  %v4772_v60 = vand.u32 2147483647, %v11465_v56  ;;  %v4375_v53 = vld [vmem:[%s12645_s3 + $0x320] sm:$0xff] }
 0x2c2   :  { %v3919_v50 = vpop.f32.mrb[214].mxu0  ;;  %v3104_v13 = vpop.f32.mrb[215].mxu1  ;;  %v5552_v54 = vadd.f32 1.0, %v8888_v28  ;;  %v11480_v0 = vadd.f32 %v3916_v24, %v3100_v1  ;;  %v3103_v38 = vadd.f32 %v11456_v20, %v3102_v33  ;;  %v6334_v59 = vmul.f32 %v4374_v9, %v11365_v52  ;;  %v8398_v22 = vld [vmem:[%s12642_s0 + $0xa4c] ss:$16 sps:$4 sm:$0xff]  }
 0x2c3   :  { %v3921_v63 = vpop.f32.mrb[215].mxu0  ;;  %v6528_v4 = vsub.f32 %v6136_v29, %v6332_v39  ;;  %8899 = vpow2.f32 %v5267_v26  ;;  %v4968_v42 = vsub.f32 0.0, %v4772_v60  ;;  %v4571_v44 = vmax.f32 %v11382_v37, 0.0 }
 0x2c4   :  { %3314 = vmatmul.mubr.bf16.gmra.mrb[212].mxu1 %v8381_v61  ;;  %v8890_v21 = vpop.eup %8889  ;;  %8901 = vlog2.f32 %v5552_v54  ;;  %v4773_v31 = vand.u32 2147483647, %v11480_v0  ;;  %4131 = vmatmul.mubr.bf16.gmra.mrb[64].mxu0 %v8384_v32  ;;  %v11491_v25 = vadd.f32 %v3919_v50, %v3103_v38  ;;  %v6335_v60 = vmul.f32 %v4375_v53, %v11382_v37  ;;  %v4376_v63 = vld [vmem:[%s12645_s3 + $0x328] sm:$0xff] }
 0x2c5   :  { %3321 = vmatprep.mubr.bf16.mxu1 %v8389_v3  ;;  %v8892_v11 = vpop.eup %8891  ;;  %v6821_v10 = vsel %vm6627_vm0, %v6528_v4, 0.0  ;;  %v5844_v62 = vmul.f32 0.6931472, %v8890_v21  ;;  %4138 = vmatprep.mubr.bf16.mxu0 %v8392_v45  ;;  %v5269_v43 = vmul.f32 1.442695, %v4968_v42 }
 0x2c6   :  { %v6822_v51 = vadd.f32 %v6821_v10, %v6820_v18  ;;  %v5553_v58 = vadd.f32 1.0, %v8892_v11  ;;  %v4969_v2 = vsub.f32 0.0, %v4773_v31  ;;  %v4774_v23 = vand.u32 2147483647, %v11491_v25  ;;  %v8396_v37 = vld [vmem:[%s12642_s0 + $0xa48] ss:$16 sps:$4 sm:$0xff]  }
 0x2c7   :  { %v3107_v49 = vpop.f32.mrb[216].mxu1  ;;  %v8894_v48 = vpop.eup %8893  ;;  %v6137_v57 = vadd.f32 %v5844_v62, %v4569_v36  ;;  %v8393_v36 = vld [vmem:[%s12642_s0 + $0xa40] ss:$16 sps:$4 sm:$0xff]   ;;  %v8401_v31 = vld [vmem:[%s12642_s0 + $0xa64] ss:$16 sps:$4 sm:$0xff]   ;;  %v4572_v62 = vmax.f32 %v11396_v55, 0.0 }
 0x2c8   :  { %v3924_v16 = vpop.f32.mrb[216].mxu0  ;;  %v3109_v41 = vpop.f32.mrb[217].mxu1  ;;  %v5846_v15 = vmul.f32 0.6931472, %v8894_v48  ;;  %8903 = vlog2.f32 %v5553_v58  ;;  %v5271_v35 = vmul.f32 1.442695, %v4969_v2  ;;  %v3108_v6 = vadd.f32 %v11456_v20, %v3107_v49 }
 0x2c9   :  { %v8896_v34 = vpop.eup %8895  ;;  %v3926_v61 = vpop.f32.mrb[217].mxu0  ;;  %v6529_v40 = vsub.f32 %v6137_v57, %v6333_v19  ;;  %8905 = vpow2.f32 %v5269_v43  ;;  %v4970_v1 = vsub.f32 0.0, %v4774_v23  ;;  %v6336_v58 = vmul.f32 %v4376_v63, %v11396_v55  ;;  %v4377_v57 = vld [vmem:[%s12645_s3 + $0x330] sm:$0xff]  ;;  %v8404_v55 = vld [vmem:[%s12642_s0 + $0xa6c] ss:$16 sps:$4 sm:$0xff]   ;;  %v4379_v63 = vld [vmem:[%s12645_s3 + $0x340] sm:$0xff] }
 0x2ca   :  { %v3110_v32 = vpop.f32.mrb[218].mxu1  ;;  %v5554_v17 = vadd.f32 1.0, %v8896_v34  ;;  %v3927_v24 = vpop.f32.mrb[218].mxu0  ;;  %v6138_v12 = vadd.f32 %v5846_v15, %v4570_v5  ;;  %8907 = vpow2.f32 %v5271_v35  ;;  %v11512_v33 = vadd.f32 %v3924_v16, %v3108_v6 }
 0x2cb   :  { %v3112_v52 = vpop.f32.mrb[219].mxu1  ;;  %v8898_v7 = vpop.eup %8897  ;;  %v3111_v3 = vadd.f32 %v11456_v20, %v3110_v32  ;;  %v6823_v18 = vsel %vm6627_vm0, %v6529_v40, 0.0  ;;  %v5273_v39 = vmul.f32 1.442695, %v4970_v1  ;;  %v4573_v15 = vmax.f32 %v11411_v27, 0.0 }
 0x2cc   :  { %v3929_v28 = vpop.f32.mrb[219].mxu0  ;;  %v5848_v29 = vmul.f32 0.6931472, %v8898_v7  ;;  %8909 = vlog2.f32 %v5554_v17  ;;  %3322 = vmatmul.mubr.bf16.gmra.mrb[216].mxu1 %v8387_v30  ;;  %v6824_v26 = vadd.f32 %v6823_v18, %v6822_v51  ;;  %v6530_v50 = vsub.f32 %v6138_v12, %v6334_v59  ;;  %4139 = vmatmul.mubr.bf16.gmra.mrb[68].mxu0 %v8390_v14 }
 0x2cd   :  { %v4775_v13 = vand.u32 2147483647, %v11512_v33  ;;  %3329 = vmatprep.mubr.bf16.mxu1 %v8395_v47  ;;  %v8900_v45 = vpop.eup %8899  ;;  %8911 = vpow2.f32 %v5273_v39  ;;  %v11521_v4 = vadd.f32 %v3927_v24, %v3111_v3  ;;  %4146 = vmatprep.mubr.bf16.mxu0 %v8398_v22  ;;  %v6337_v52 = vmul.f32 %v4377_v57, %v11411_v27  ;;  %v4378_v22 = vld [vmem:[%s12645_s3 + $0x338] sm:$0xff]  ;;  %v8399_v39 = vld [vmem:[%s12642_s0 + $0xa60] ss:$16 sps:$4 sm:$0xff]  }
 0x2ce   :  { %v6139_v54 = vadd.f32 %v5848_v29, %v4571_v44  ;;  %v8902_v38 = vpop.eup %8901  ;;  %v6825_v21 = vsel %vm6627_vm0, %v6530_v50, 0.0  ;;  %v5555_v19 = vadd.f32 1.0, %v8900_v45  ;;  %v4574_v18 = vmax.f32 %v11428_v46, 0.0 }
 0x2cf   :  { %v4971_v9 = vsub.f32 0.0, %v4775_v13  ;;  %v3115_v42 = vpop.f32.mrb[220].mxu1  ;;  %v6826_v11 = vadd.f32 %v6825_v21, %v6824_v26  ;;  %v5850_v5 = vmul.f32 0.6931472, %v8902_v38  ;;  %v3932_v30 = vpop.f32.mrb[220].mxu0 }
 0x2d0   :  { %v6531_v10 = vsub.f32 %v6139_v54, %v6335_v60  ;;  %v3117_v51 = vpop.f32.mrb[221].mxu1  ;;  %8913 = vlog2.f32 %v5555_v19  ;;  %v4776_v2 = vand.u32 2147483647, %v11521_v4  ;;  %v3934_v49 = vpop.f32.mrb[221].mxu0  ;;  %v3116_v59 = vadd.f32 %v11456_v20, %v3115_v42  ;;  %v8402_v21 = vld [vmem:[%s12642_s0 + $0xa68] ss:$16 sps:$4 sm:$0xff]  }
 0x2d1   :  { %v5275_v43 = vmul.f32 1.442695, %v4971_v9  ;;  %v3118_v14 = vpop.f32.mrb[222].mxu1  ;;  %v6140_v48 = vadd.f32 %v5850_v5, %v4572_v62  ;;  %v3935_v23 = vpop.f32.mrb[222].mxu0  ;;  %v6338_v60 = vmul.f32 %v4378_v22, %v11428_v46  ;;  %v8407_v19 = vld [vmem:[%s12642_s0 + $0xa84] ss:$16 sps:$4 sm:$0xff]  }
 0x2d2   :  { %v6827_v47 = vsel %vm6627_vm0, %v6531_v10, 0.0  ;;  %v3119_v44 = vadd.f32 %v11456_v20, %v3118_v14  ;;  %v3120_v16 = vpop.f32.mrb[223].mxu1  ;;  %v8904_v41 = vpop.eup %8903  ;;  %v4972_v35 = vsub.f32 0.0, %v4776_v2  ;;  %v11546_v17 = vadd.f32 %v3932_v30, %v3116_v59 }
 0x2d3   :  { %v6828_v34 = vadd.f32 %v6827_v47, %v6826_v11  ;;  %8915 = vpow2.f32 %v5275_v43  ;;  %v3937_v6 = vpop.f32.mrb[223].mxu0  ;;  %v8906_v61 = vpop.eup %8905  ;;  %v6532_v32 = vsub.f32 %v6140_v48, %v6336_v58  ;;  %v5852_v40 = vmul.f32 0.6931472, %v8904_v41  ;;  %v8410_v11 = vld [vmem:[%s12642_s0 + $0xa8c] ss:$16 sps:$4 sm:$0xff]  }
 0x2d4   :  { %v11548_v1 = vadd.f32 %v3935_v23, %v3119_v44  ;;  %3330 = vmatmul.mubr.bf16.gmra.mrb[220].mxu1 %v8393_v36  ;;  %v8908_v24 = vpop.eup %8907  ;;  %v5556_v7 = vadd.f32 1.0, %v8906_v61  ;;  %v5277_v12 = vmul.f32 1.442695, %v4972_v35  ;;  %4147 = vmatmul.mubr.bf16.gmra.mrb[72].mxu0 %v8396_v37  ;;  %v4777_v50 = vand.u32 2147483647, %v11546_v17 }
 0x2d5   :  { %3337 = vmatprep.mubr.bf16.mxu1 %v8401_v31  ;;  %v6829_v3 = vsel %vm6627_vm0, %v6532_v32, 0.0  ;;  %v6141_v28 = vadd.f32 %v5852_v40, %v4573_v15  ;;  %v5557_v29 = vadd.f32 1.0, %v8908_v24  ;;  %4154 = vmatprep.mubr.bf16.mxu0 %v8404_v55  ;;  %v4575_v62 = vmax.f32 %v11444_v8, 0.0  ;;  %v4380_v15 = vld [vmem:[%s12645_s3 + $0x348] sm:$0xff]  ;;  %v8405_v61 = vld [vmem:[%s12642_s0 + $0xa80] ss:$16 sps:$4 sm:$0xff]  }
 0x2d6   :  { %v8910_v53 = vpop.eup %8909  ;;  %v6830_v27 = vadd.f32 %v6829_v3, %v6828_v34  ;;  %8917 = vlog2.f32 %v5556_v7  ;;  %v4973_v37 = vsub.f32 0.0, %v4777_v50  ;;  %v4778_v5 = vand.u32 2147483647, %v11548_v1  ;;  %v8408_v24 = vld [vmem:[%s12642_s0 + $0xa88] ss:$16 sps:$4 sm:$0xff]  }
 0x2d7   :  { %v5854_v26 = vmul.f32 0.6931472, %v8910_v53  ;;  %v3123_v13 = vpop.f32.mrb[224].mxu1  ;;  %v8912_v45 = vpop.eup %8911  ;;  %v6533_v54 = vsub.f32 %v6141_v28, %v6337_v52  ;;  %8919 = vlog2.f32 %v5557_v29  ;;  %v6339_v55 = vmul.f32 %v4379_v63, %v11444_v8  ;;  %v8413_v52 = vld [vmem:[%s12642_s0 + $0xaa4] ss:$16 sps:$4 sm:$0xff]  }
 0x2d8   :  { %v3940_v36 = vpop.f32.mrb[224].mxu0  ;;  %v3125_v38 = vpop.f32.mrb[225].mxu1  ;;  %v5558_v42 = vadd.f32 1.0, %v8912_v45  ;;  %8921 = vpow2.f32 %v5277_v12  ;;  %v3124_v30 = vadd.f32 %v11456_v20, %v3123_v13  ;;  %v5279_v14 = vmul.f32 1.442695, %v4973_v37 }
 0x2d9   :  { %v6142_v9 = vadd.f32 %v5854_v26, %v4574_v18  ;;  %v3942_v46 = vpop.f32.mrb[225].mxu0  ;;  %v3126_v31 = vpop.f32.mrb[226].mxu1  ;;  %v6831_v10 = vsel %vm6627_vm0, %v6533_v54, 0.0  ;;  %v4974_v57 = vsub.f32 0.0, %v4778_v5  ;;  %v4576_v7 = vmax.f32 %v11465_v56, 0.0 }
 0x2da   :  { %v3943_v51 = vpop.f32.mrb[226].mxu0  ;;  %v3128_v58 = vpop.f32.mrb[227].mxu1  ;;  %v6832_v2 = vadd.f32 %v6831_v10, %v6830_v27  ;;  %8923 = vlog2.f32 %v5558_v42  ;;  %v11577_v59 = vadd.f32 %v3940_v36, %v3124_v30  ;;  %v3127_v44 = vadd.f32 %v11456_v20, %v3126_v31  ;;  %v8416_v28 = vld [vmem:[%s12642_s0 + $0xaac] ss:$16 sps:$4 sm:$0xff]  }
 0x2db   :  { %v8914_v43 = vpop.eup %8913  ;;  %v6534_v49 = vsub.f32 %v6142_v9, %v6338_v60  ;;  %v3945_v47 = vpop.f32.mrb[227].mxu0  ;;  %8925 = vpow2.f32 %v5279_v14  ;;  %v5281_v6 = vmul.f32 1.442695, %v4974_v57  ;;  %v6340_v29 = vmul.f32 %v4380_v15, %v11465_v56  ;;  %v4382_v10 = vld [vmem:[%s12645_s3 + $0x358] sm:$0xff] }
 0x2dc   :  { %v5856_v48 = vmul.f32 0.6931472, %v8914_v43  ;;  %3338 = vmatmul.mubr.bf16.gmra.mrb[224].mxu1 %v8399_v39  ;;  %4155 = vmatmul.mubr.bf16.gmra.mrb[76].mxu0 %v8402_v21  ;;  %v4779_v32 = vand.u32 2147483647, %v11577_v59  ;;  %v11589_v40 = vadd.f32 %v3943_v51, %v3127_v44  ;;  %v4381_v39 = vld [vmem:[%s12645_s3 + $0x350] sm:$0xff]  ;;  %v4577_v63 = vmax.f32 %v11480_v0, 0.0 }
 0x2dd   :  { %v8916_v23 = vpop.eup %8915  ;;  %v6833_v16 = vsel %vm6627_vm0, %v6534_v49, 0.0  ;;  %3345 = vmatprep.mubr.bf16.mxu1 %v8407_v19  ;;  %4162 = vmatprep.mubr.bf16.mxu0 %v8410_v11  ;;  %v6341_v11 = vmul.f32 %v4381_v39, %v11480_v0  ;;  %v4578_v58 = vmax.f32 %v11491_v25, 0.0 }
 0x2de   :  { %v6834_v41 = vadd.f32 %v6833_v16, %v6832_v2  ;;  %v6143_v34 = vadd.f32 %v5856_v48, %v4575_v62  ;;  %v5559_v35 = vadd.f32 1.0, %v8916_v23  ;;  %v4975_v27 = vsub.f32 0.0, %v4779_v32  ;;  %v8411_v23 = vld [vmem:[%s12642_s0 + $0xaa0] ss:$16 sps:$4 sm:$0xff]  }
 0x2df   :  { %v3131_v8 = vpop.f32.mrb[228].mxu1  ;;  %v3948_v53 = vpop.f32.mrb[228].mxu0  ;;  %v4780_v26 = vand.u32 2147483647, %v11589_v40  ;;  %v6342_v48 = vmul.f32 %v4382_v10, %v11491_v25  ;;  %v4383_v25 = vld [vmem:[%s12645_s3 + $0x360] sm:$0xff] }
 0x2e0   :  { %v6535_v22 = vsub.f32 %v6143_v34, %v6339_v55  ;;  %8927 = vlog2.f32 %v5559_v35  ;;  %v3132_v12 = vadd.f32 %v11456_v20, %v3131_v8  ;;  %v3133_v3 = vpop.f32.mrb[229].mxu1  ;;  %v8918_v18 = vpop.eup %8917  ;;  %v5283_v42 = vmul.f32 1.442695, %v4975_v27  ;;  %v8420_v10 = vld [vmem:[%s12642_s0 + $0xac8] ss:$16 sps:$4 sm:$0xff]  }
 0x2e1   :  { %8929 = vpow2.f32 %v5281_v6  ;;  %v3950_v50 = vpop.f32.mrb[229].mxu0  ;;  %v3134_v13 = vpop.f32.mrb[230].mxu1  ;;  %v5858_v60 = vmul.f32 0.6931472, %v8918_v18  ;;  %v4976_v37 = vsub.f32 0.0, %v4780_v26  ;;  %v4579_v26 = vmax.f32 %v11512_v33, 0.0 }
 0x2e2   :  { %v8920_v45 = vpop.eup %8919  ;;  %v6835_v54 = vsel %vm6627_vm0, %v6535_v22, 0.0  ;;  %v11609_v36 = vadd.f32 %v3948_v53, %v3132_v12  ;;  %v3951_v38 = vpop.f32.mrb[230].mxu0  ;;  %8931 = vpow2.f32 %v5283_v42  ;;  %v3135_v57 = vadd.f32 %v11456_v20, %v3134_v13  ;;  %v8414_v22 = vld [vmem:[%s12642_s0 + $0xaa8] ss:$16 sps:$4 sm:$0xff]   ;;  %v8419_v18 = vld [vmem:[%s12642_s0 + $0xac4] ss:$16 sps:$4 sm:$0xff]  }
 0x2e3   :  { %v3136_v56 = vpop.f32.mrb[231].mxu1  ;;  %v8922_v21 = vpop.eup %8921  ;;  %v6836_v19 = vadd.f32 %v6835_v54, %v6834_v41  ;;  %v5860_v9 = vmul.f32 0.6931472, %v8920_v45  ;;  %v6144_v31 = vadd.f32 %v5858_v60, %v4576_v7  ;;  %v5285_v43 = vmul.f32 1.442695, %v4976_v37 }
 0x2e4   :  { %v3953_v46 = vpop.f32.mrb[231].mxu0  ;;  %v5560_v62 = vadd.f32 1.0, %v8922_v21  ;;  %v4781_v5 = vand.u32 2147483647, %v11609_v36  ;;  %3346 = vmatmul.mubr.bf16.gmra.mrb[228].mxu1 %v8405_v61  ;;  %v8924_v30 = vpop.eup %8923  ;;  %4163 = vmatmul.mubr.bf16.gmra.mrb[80].mxu0 %v8408_v24  ;;  %v11627_v32 = vadd.f32 %v3951_v38, %v3135_v57  ;;  %v6343_v54 = vmul.f32 %v4383_v25, %v11512_v33  ;;  %v8417_v33 = vld [vmem:[%s12642_s0 + $0xac0] ss:$16 sps:$4 sm:$0xff]  }
 0x2e5   :  { %v6145_v51 = vadd.f32 %v5860_v9, %v4577_v63  ;;  %3353 = vmatprep.mubr.bf16.mxu1 %v8413_v52  ;;  %v6536_v2 = vsub.f32 %v6144_v31, %v6340_v29  ;;  %v5862_v49 = vmul.f32 0.6931472, %v8924_v30  ;;  %4170 = vmatprep.mubr.bf16.mxu0 %v8416_v28  ;;  %v8926_v14 = vpop.eup %8925  ;;  %v8422_v29 = vld [vmem:[%s12642_s0 + $0xacc] ss:$16 sps:$4 sm:$0xff]   ;;  %v4580_v30 = vmax.f32 %v11521_v4, 0.0 }
 0x2e6   :  { %8933 = vlog2.f32 %v5560_v62  ;;  %v4977_v0 = vsub.f32 0.0, %v4781_v5  ;;  %v5561_v41 = vadd.f32 1.0, %v8926_v14  ;;  %v4782_v63 = vand.u32 2147483647, %v11627_v32  ;;  %v4384_v9 = vld [vmem:[%s12645_s3 + $0x368] sm:$0xff] }
 0x2e7   :  { %v6537_v47 = vsub.f32 %v6145_v51, %v6341_v11  ;;  %8935 = vpow2.f32 %v5285_v43  ;;  %v3139_v44 = vpop.f32.mrb[232].mxu1  ;;  %v6837_v16 = vsel %vm6627_vm0, %v6536_v2, 0.0  ;;  %v6146_v55 = vadd.f32 %v5862_v49, %v4578_v58  ;;  %v3956_v15 = vpop.f32.mrb[232].mxu0  ;;  %v8425_v62 = vld [vmem:[%s12642_s0 + $0xae4] ss:$16 sps:$4 sm:$0xff]  }
 0x2e8   :  { %v5287_v34 = vmul.f32 1.442695, %v4977_v0  ;;  %v3141_v35 = vpop.f32.mrb[233].mxu1  ;;  %v6838_v6 = vadd.f32 %v6837_v16, %v6836_v19  ;;  %v3140_v8 = vadd.f32 %v11456_v20, %v3139_v44  ;;  %v3958_v24 = vpop.f32.mrb[233].mxu0  ;;  %8937 = vlog2.f32 %v5561_v41 }
 0x2e9   :  { %v6839_v61 = vsel %vm6627_vm0, %v6537_v47, 0.0  ;;  %v3142_v52 = vpop.f32.mrb[234].mxu1  ;;  %v6538_v12 = vsub.f32 %v6146_v55, %v6342_v48  ;;  %v3959_v3 = vpop.f32.mrb[234].mxu0  ;;  %v4978_v42 = vsub.f32 0.0, %v4782_v63  ;;  %v6344_v14 = vmul.f32 %v4384_v9, %v11521_v4  ;;  %v8426_v63 = vld [vmem:[%s12642_s0 + $0xae8] ss:$16 sps:$4 sm:$0xff]  }
 0x2ea   :  { %v8928_v7 = vpop.eup %8927  ;;  %v3143_v53 = vadd.f32 %v11456_v20, %v3142_v52  ;;  %v3144_v28 = vpop.f32.mrb[235].mxu1  ;;  %v6840_v27 = vadd.f32 %v6839_v61, %v6838_v6  ;;  %8939 = vpow2.f32 %v5287_v34  ;;  %v11644_v21 = vadd.f32 %v3956_v15, %v3140_v8  ;;  %v8428_v34 = vld [vmem:[%s12642_s0 + $0xaec] ss:$16 sps:$4 sm:$0xff]   ;;  %v4385_v8 = vld [vmem:[%s12645_s3 + $0x370] sm:$0xff] }
 0x2eb   :  { %v8930_v39 = vpop.eup %8929  ;;  %v5864_v50 = vmul.f32 0.6931472, %v8928_v7  ;;  %v3961_v13 = vpop.f32.mrb[235].mxu0  ;;  %v6841_v45 = vsel %vm6627_vm0, %v6538_v12, 0.0  ;;  %v5289_v58 = vmul.f32 1.442695, %v4978_v42 }
 0x2ec   :  { %v5562_v60 = vadd.f32 1.0, %v8930_v39  ;;  %3354 = vmatmul.mubr.bf16.gmra.mrb[232].mxu1 %v8411_v23  ;;  %v6842_v38 = vadd.f32 %v6841_v45, %v6840_v27  ;;  %v11646_v19 = vadd.f32 %v3959_v3, %v3143_v53  ;;  %4171 = vmatmul.mubr.bf16.gmra.mrb[84].mxu0 %v8414_v22  ;;  %v8932_v37 = vpop.eup %8931  ;;  %v4783_v31 = vand.u32 2147483647, %v11644_v21 }
 0x2ed   :  { %v6147_v56 = vadd.f32 %v5864_v50, %v4579_v26  ;;  %3361 = vmatprep.mubr.bf16.mxu1 %v8419_v18  ;;  %4178 = vmatprep.mubr.bf16.mxu0 %v8422_v29  ;;  %v5563_v51 = vadd.f32 1.0, %v8932_v37  ;;  %v4581_v24 = vmax.f32 %v11546_v17, 0.0  ;;  %v4386_v18 = vld [vmem:[%s12645_s3 + $0x378] sm:$0xff]  ;;  %v4387_v29 = vld [vmem:[%s12645_s3 + $0x380] sm:$0xff]  ;;  %v6345_v45 = vmul.f32 %v4385_v8, %v11546_v17 }
 0x2ee   :  { %8941 = vlog2.f32 %v5562_v60  ;;  %v4784_v43 = vand.u32 2147483647, %v11646_v19  ;;  %v4979_v47 = vsub.f32 0.0, %v4783_v31  ;;  %v8423_v26 = vld [vmem:[%s12642_s0 + $0xae0] ss:$16 sps:$4 sm:$0xff]   ;;  %v4582_v9 = vmax.f32 %v11548_v1, 0.0 }
 0x2ef   :  { %v6539_v46 = vsub.f32 %v6147_v56, %v6343_v54  ;;  %v3147_v11 = vpop.f32.mrb[236].mxu1  ;;  %v3964_v48 = vpop.f32.mrb[236].mxu0  ;;  %8943 = vlog2.f32 %v5563_v51  ;;  %v8431_v37 = vld [vmem:[%s12642_s0 + $0xb04] ss:$16 sps:$4 sm:$0xff]   ;;  %v4388_v51 = vld [vmem:[%s12645_s3 + $0x388] sm:$0xff] }
 0x2f0   :  { %v8934_v5 = vpop.eup %8933  ;;  %v3149_v57 = vpop.f32.mrb[237].mxu1  ;;  %v4980_v16 = vsub.f32 0.0, %v4784_v43  ;;  %8945 = vpow2.f32 %v5289_v58  ;;  %v5291_v35 = vmul.f32 1.442695, %v4979_v47  ;;  %v3148_v6 = vadd.f32 %v11456_v20, %v3147_v11 }
 0x2f1   :  { %v8936_v2 = vpop.eup %8935  ;;  %v6843_v49 = vsel %vm6627_vm0, %v6539_v46, 0.0  ;;  %v5866_v0 = vmul.f32 0.6931472, %v8934_v5  ;;  %v3966_v55 = vpop.f32.mrb[237].mxu0  ;;  %v4583_v5 = vmax.f32 %v11577_v59, 0.0 }
 0x2f2   :  { %v6844_v44 = vadd.f32 %v6843_v49, %v6842_v38  ;;  %v5564_v23 = vadd.f32 1.0, %v8936_v2  ;;  %v3150_v41 = vpop.f32.mrb[238].mxu1  ;;  %v3967_v61 = vpop.f32.mrb[238].mxu0  ;;  %v5293_v52 = vmul.f32 1.442695, %v4980_v16  ;;  %v11674_v28 = vadd.f32 %v3964_v48, %v3148_v6 }
 0x2f3   :  { %v6148_v15 = vadd.f32 %v5866_v0, %v4580_v30  ;;  %v3152_v4 = vpop.f32.mrb[239].mxu1  ;;  %v8938_v25 = vpop.eup %8937  ;;  %v3151_v22 = vadd.f32 %v11456_v20, %v3150_v41  ;;  %v11701_v30 = vmul.f32 %v4387_v29, %v11577_v59  ;;  %v8434_v49 = vld [vmem:[%s12642_s0 + $0xb0c] ss:$16 sps:$4 sm:$0xff]  }
 0x2f4   :  { %8947 = vlog2.f32 %v5564_v23  ;;  %v3969_v7 = vpop.f32.mrb[239].mxu0  ;;  %3362 = vmatmul.mubr.bf16.gmra.mrb[236].mxu1 %v8417_v33  ;;  %v8940_v12 = vpop.eup %8939  ;;  %v5868_v3 = vmul.f32 0.6931472, %v8938_v25  ;;  %4179 = vmatmul.mubr.bf16.gmra.mrb[88].mxu0 %v8420_v10  ;;  %v4785_v54 = vand.u32 2147483647, %v11674_v28  ;;  %v4584_v23 = vmax.f32 %v11589_v40, 0.0 }
 0x2f5   :  { %v6540_v53 = vsub.f32 %v6148_v15, %v6344_v14  ;;  %8949 = vpow2.f32 %v5291_v35  ;;  %3369 = vmatprep.mubr.bf16.mxu1 %v8425_v62  ;;  %v5565_v39 = vadd.f32 1.0, %v8940_v12  ;;  %v11682_v27 = vadd.f32 %v3967_v61, %v3151_v22  ;;  %4186 = vmatprep.mubr.bf16.mxu0 %v8428_v34 }
 0x2f6   :  { %8951 = vpow2.f32 %v5293_v52  ;;  %v6149_v13 = vadd.f32 %v5868_v3, %v4581_v24  ;;  %v4981_v31 = vsub.f32 0.0, %v4785_v54  ;;  %v6346_v62 = vmul.f32 %v4386_v18, %v11548_v1  ;;  %v4389_v54 = vld [vmem:[%s12645_s3 + $0x390] sm:$0xff] }
 0x2f7   :  { %v6845_v50 = vsel %vm6627_vm0, %v6540_v53, 0.0  ;;  %v3155_v60 = vpop.f32.mrb[240].mxu1  ;;  %8953 = vlog2.f32 %v5565_v39  ;;  %v3972_v42 = vpop.f32.mrb[240].mxu0  ;;  %v4786_v11 = vand.u32 2147483647, %v11682_v27  ;;  %v6348_v61 = vmul.f32 %v4388_v51, %v11589_v40 }
 0x2f8   :  { %v8942_v38 = vpop.eup %8941  ;;  %v6846_v56 = vadd.f32 %v6845_v50, %v6844_v44  ;;  %v3157_v33 = vpop.f32.mrb[241].mxu1  ;;  %v6541_v46 = vsub.f32 %v6149_v13, %v6345_v45  ;;  %v3156_v58 = vadd.f32 %v11456_v20, %v3155_v60  ;;  %v5295_v14 = vmul.f32 1.442695, %v4981_v31  ;;  %v8429_v53 = vld [vmem:[%s12642_s0 + $0xb00] ss:$16 sps:$4 sm:$0xff]  }
 0x2f9   :  { %v5870_v17 = vmul.f32 0.6931472, %v8942_v38  ;;  %v3974_v10 = vpop.f32.mrb[241].mxu0  ;;  %v3158_v43 = vpop.f32.mrb[242].mxu1  ;;  %v4982_v47 = vsub.f32 0.0, %v4786_v11  ;;  %v4585_v4 = vmax.f32 %v11609_v36, 0.0 }
 0x2fa   :  { %v3975_v2 = vpop.f32.mrb[242].mxu0  ;;  %v6847_v0 = vsel %vm6627_vm0, %v6541_v46, 0.0  ;;  %v3160_v48 = vpop.f32.mrb[243].mxu1  ;;  %v11712_v16 = vadd.f32 %v3972_v42, %v3156_v58  ;;  %v3159_v55 = vadd.f32 %v11456_v20, %v3158_v43  ;;  %8955 = vpow2.f32 %v5295_v14  ;;  %v8432_v50 = vld [vmem:[%s12642_s0 + $0xb08] ss:$16 sps:$4 sm:$0xff]  }
 0x2fb   :  { %v6150_v1 = vadd.f32 %v5870_v17, %v4582_v9  ;;  %v3977_v59 = vpop.f32.mrb[243].mxu0  ;;  %v8944_v57 = vpop.eup %8943  ;;  %v6848_v44 = vadd.f32 %v6847_v0, %v6846_v56  ;;  %v5297_v35 = vmul.f32 1.442695, %v4982_v47  ;;  %v8437_v9 = vld [vmem:[%s12642_s0 + $0xb24] ss:$16 sps:$4 sm:$0xff]   ;;  %v4390_v14 = vld [vmem:[%s12645_s3 + $0x398] sm:$0xff] }
 0x2fc   :  { %3370 = vmatmul.mubr.bf16.gmra.mrb[240].mxu1 %v8423_v26  ;;  %v8946_v41 = vpop.eup %8945  ;;  %v5872_v15 = vmul.f32 0.6931472, %v8944_v57  ;;  %4187 = vmatmul.mubr.bf16.gmra.mrb[92].mxu0 %v8426_v63  ;;  %v4787_v8 = vand.u32 2147483647, %v11712_v16  ;;  %v11729_v63 = vadd.f32 %v3975_v2, %v3159_v55  ;;  %v8440_v11 = vld [vmem:[%s12642_s0 + $0xb2c] ss:$16 sps:$4 sm:$0xff]  }
 0x2fd   :  { %v6542_v34 = vsub.f32 %v6150_v1, %v6346_v62  ;;  %3377 = vmatprep.mubr.bf16.mxu1 %v8431_v37  ;;  %v5566_v25 = vadd.f32 1.0, %v8946_v41  ;;  %4194 = vmatprep.mubr.bf16.mxu0 %v8434_v49  ;;  %8957 = vpow2.f32 %v5297_v35  ;;  %v6349_v49 = vmul.f32 %v4389_v54, %v11609_v36  ;;  %v8435_v59 = vld [vmem:[%s12642_s0 + $0xb20] ss:$16 sps:$4 sm:$0xff]   ;;  %v8438_v55 = vld [vmem:[%s12642_s0 + $0xb28] ss:$16 sps:$4 sm:$0xff]  }
 0x2fe   :  { %v8948_v6 = vpop.eup %8947  ;;  %v6151_v22 = vadd.f32 %v5872_v15, %v4583_v5  ;;  %v4983_v29 = vsub.f32 0.0, %v4787_v8  ;;  %v4788_v58 = vand.u32 2147483647, %v11729_v63  ;;  %v4586_v41 = vmax.f32 %v11627_v32, 0.0 }
 0x2ff   :  { %v8950_v24 = vpop.eup %8949  ;;  %v6849_v52 = vsel %vm6627_vm0, %v6542_v34, 0.0  ;;  %v5874_v7 = vmul.f32 0.6931472, %v8948_v6  ;;  %v3163_v12 = vpop.f32.mrb[244].mxu1  ;;  %8959 = vlog2.f32 %v5566_v25  ;;  %v4391_v34 = vld [vmem:[%s12645_s3 + $0x3a0] sm:$0xff]  ;;  %v6350_v25 = vmul.f32 %v4390_v14, %v11627_v32 }
 0x300   :  { %v8952_v3 = vpop.eup %8951  ;;  %v6850_v18 = vadd.f32 %v6849_v52, %v6848_v44  ;;  %v5567_v40 = vadd.f32 1.0, %v8950_v24  ;;  %v3980_v39 = vpop.f32.mrb[244].mxu0  ;;  %v6543_v13 = vsub.f32 %v6151_v22, %v11701_v30  ;;  %v5299_v33 = vmul.f32 1.442695, %v4983_v29  ;;  %v8446_v32 = vld [vmem:[%s12642_s0 + $0xb4c] ss:$16 sps:$4 sm:$0xff]  }
 0x301   :  { %v3165_v26 = vpop.f32.mrb[245].mxu1  ;;  %v6152_v45 = vadd.f32 %v5874_v7, %v4584_v23  ;;  %v5568_v60 = vadd.f32 1.0, %v8952_v3  ;;  %v3982_v38 = vpop.f32.mrb[245].mxu0  ;;  %v3164_v37 = vadd.f32 %v11456_v20, %v3163_v12  ;;  %v4984_v47 = vsub.f32 0.0, %v4788_v58  ;;  %v8443_v7 = vld [vmem:[%s12642_s0 + $0xb44] ss:$16 sps:$4 sm:$0xff]  }
 0x302   :  { %v3166_v56 = vpop.f32.mrb[246].mxu1  ;;  %v8954_v42 = vpop.eup %8953  ;;  %8961 = vlog2.f32 %v5567_v40  ;;  %v6851_v10 = vsel %vm6627_vm0, %v6543_v13, 0.0  ;;  %v8441_v58 = vld [vmem:[%s12642_s0 + $0xb40] ss:$16 sps:$4 sm:$0xff]  }
 0x303   :  { %v3167_v46 = vadd.f32 %v11456_v20, %v3166_v56  ;;  %v3983_v17 = vpop.f32.mrb[246].mxu0  ;;  %v3168_v31 = vpop.f32.mrb[247].mxu1  ;;  %v6544_v62 = vsub.f32 %v6152_v45, %v6348_v61  ;;  %v5876_v5 = vmul.f32 0.6931472, %v8954_v42  ;;  %8963 = vlog2.f32 %v5568_v60  ;;  %v11790_v14 = vld [vmem:[#allocation2] ss:$0 sm:$0xff] }
 0x304   :  { %v3985_v30 = vpop.f32.mrb[247].mxu0  ;;  %v6852_v51 = vadd.f32 %v6851_v10, %v6850_v18  ;;  %8965 = vpow2.f32 %v5299_v33  ;;  %3378 = vmatmul.mubr.bf16.gmra.mrb[244].mxu1 %v8429_v53  ;;  %v11743_v0 = vadd.f32 %v3980_v39, %v3164_v37  ;;  %4195 = vmatmul.mubr.bf16.gmra.mrb[96].mxu0 %v8432_v50  ;;  %v8956_v57 = vpop.eup %8955  ;;  %v5301_v35 = vmul.f32 1.442695, %v4984_v47 }
 0x305   :  { %v6853_v43 = vsel %vm6627_vm0, %v6544_v62, 0.0  ;;  %v6153_v2 = vadd.f32 %v5876_v5, %v4585_v4  ;;  %3385 = vmatprep.mubr.bf16.mxu1 %v8437_v9  ;;  %v11748_v48 = vadd.f32 %v3983_v17, %v3167_v46  ;;  %4202 = vmatprep.mubr.bf16.mxu0 %v8440_v11  ;;  %v5569_v15 = vadd.f32 1.0, %v8956_v57  ;;  %v4392_v17 = vld [vmem:[%s12645_s3 + $0x3a8] sm:$0xff] }
 0x306   :  { %v6854_v1 = vadd.f32 %v6853_v43, %v6852_v51  ;;  %v4789_v36 = vand.u32 2147483647, %v11743_v0  ;;  %v4587_v60 = vmax.f32 %v11644_v21, 0.0  ;;  %v6351_v46 = vmul.f32 %v4391_v34, %v11644_v21  ;;  %v8444_v43 = vld [vmem:[%s12642_s0 + $0xb48] ss:$16 sps:$4 sm:$0xff]  }
 0x307   :  { %v6545_v44 = vsub.f32 %v6153_v2, %v6349_v49  ;;  %v3171_v23 = vpop.f32.mrb[248].mxu1  ;;  %v4790_v6 = vand.u32 2147483647, %v11748_v48  ;;  %v8958_v61 = vpop.eup %8957  ;;  %8967 = vlog2.f32 %v5569_v15  ;;  %v4588_v11 = vmax.f32 %v11646_v19, 0.0  ;;  %v8452_v34 = vld [vmem:[%s12642_s0 + $0xb6c] ss:$16 sps:$4 sm:$0xff]  }
 0x308   :  { %v4985_v8 = vsub.f32 0.0, %v4789_v36  ;;  %v3172_v24 = vadd.f32 %v11456_v20, %v3171_v23  ;;  %v3988_v52 = vpop.f32.mrb[248].mxu0  ;;  %v3173_v22 = vpop.f32.mrb[249].mxu1  ;;  %v5570_v3 = vadd.f32 1.0, %v8958_v61  ;;  %8969 = vpow2.f32 %v5301_v35 }
 0x309   :  { %v6855_v4 = vsel %vm6627_vm0, %v6545_v44, 0.0  ;;  %v8960_v12 = vpop.eup %8959  ;;  %v4986_v18 = vsub.f32 0.0, %v4790_v6  ;;  %v3990_v40 = vpop.f32.mrb[249].mxu0  ;;  %v6352_v49 = vmul.f32 %v4392_v17, %v11646_v19  ;;  %v8449_v44 = vld [vmem:[%s12642_s0 + $0xb64] ss:$16 sps:$4 sm:$0xff]  }
 0x30a   :  { %v6856_v53 = vadd.f32 %v6855_v4, %v6854_v1  ;;  %v3174_v29 = vpop.f32.mrb[250].mxu1  ;;  %v5878_v39 = vmul.f32 0.6931472, %v8960_v12  ;;  %v5303_v26 = vmul.f32 1.442695, %v4985_v8  ;;  %v11771_v50 = vadd.f32 %v3988_v52, %v3172_v24  ;;  %v3991_v13 = vpop.f32.mrb[250].mxu0 }
 0x30b   :  { %v3176_v45 = vpop.f32.mrb[251].mxu1  ;;  %8971 = vlog2.f32 %v5570_v3  ;;  %v5305_v38 = vmul.f32 1.442695, %v4986_v18  ;;  %v3175_v56 = vadd.f32 %v11456_v20, %v3174_v29  ;;  %v3993_v9 = vpop.f32.mrb[251].mxu0  ;;  %v4589_v40 = vmax.f32 %v11674_v28, 0.0 }
 0x30c   :  { %v8962_v54 = vpop.eup %8961  ;;  %3386 = vmatmul.mubr.bf16.gmra.mrb[248].mxu1 %v8435_v59  ;;  %v6154_v33 = vadd.f32 %v5878_v39, %v4586_v41  ;;  %8973 = vpow2.f32 %v5303_v26  ;;  %4203 = vmatmul.mubr.bf16.gmra.mrb[100].mxu0 %v8438_v55  ;;  %v4791_v20 = vand.u32 2147483647, %v11771_v50  ;;  %v4393_v55 = vld [vmem:[%s12645_s3 + $0x3b0] sm:$0xff]  ;;  %v4394_v39 = vld [vmem:[%s12645_s3 + $0x3b8] sm:$0xff] }
 0x30d   :  { %v8964_v42 = vpop.eup %8963  ;;  %v5880_v37 = vmul.f32 0.6931472, %v8962_v54  ;;  %3393 = vmatprep.mubr.bf16.mxu1 %v8443_v7  ;;  %8975 = vpow2.f32 %v5305_v38  ;;  %4210 = vmatprep.mubr.bf16.mxu0 %v8446_v32  ;;  %v11781_v51 = vadd.f32 %v3991_v13, %v3175_v56  ;;  %v6353_v32 = vmul.f32 %v4393_v55, %v11674_v28  ;;  %v8447_v56 = vld [vmem:[%s12642_s0 + $0xb60] ss:$16 sps:$4 sm:$0xff]   ;;  %v8450_v17 = vld [vmem:[%s12642_s0 + $0xb68] ss:$16 sps:$4 sm:$0xff]  }
 0x30e   :  { %v8966_v31 = vpop.eup %8965  ;;  %v5882_v10 = vmul.f32 0.6931472, %v8964_v42  ;;  %v6546_v62 = vsub.f32 %v6154_v33, %v6350_v25  ;;  %v4987_v1 = vsub.f32 0.0, %v4791_v20  ;;  %v4590_v42 = vmax.f32 %v11682_v27, 0.0 }
 0x30f   :  { %v6155_v5 = vadd.f32 %v5880_v37, %v4587_v60  ;;  %v5571_v30 = vadd.f32 1.0, %v8966_v31  ;;  %v3179_v21 = vpop.f32.mrb[252].mxu1  ;;  %v3996_v59 = vpop.f32.mrb[252].mxu0  ;;  %v4792_v61 = vand.u32 2147483647, %v11781_v51 }
 0x310   :  { %v6156_v2 = vadd.f32 %v5882_v10, %v4588_v11  ;;  %v3180_v47 = vadd.f32 %v11790_v14, %v3179_v21  ;;  %v3181_v57 = vpop.f32.mrb[253].mxu1  ;;  %v6857_v36 = vsel %vm6627_vm0, %v6546_v62, 0.0  ;;  %v3998_v19 = vpop.f32.mrb[253].mxu0  ;;  %v5307_v6 = vmul.f32 1.442695, %v4987_v1 }
 0x311   :  { %v6547_v23 = vsub.f32 %v6155_v5, %v6351_v46  ;;  %8977 = vlog2.f32 %v5571_v30  ;;  %v3182_v41 = vpop.f32.mrb[254].mxu1  ;;  %v6858_v15 = vadd.f32 %v6857_v36, %v6856_v53  ;;  %v3999_v4 = vpop.f32.mrb[254].mxu0  ;;  %v4988_v18 = vsub.f32 0.0, %v4792_v61  ;;  %v8455_v31 = vld [vmem:[%s12642_s0 + $0xb84] ss:$16 sps:$4 sm:$0xff]  }
 0x312   :  { %v6548_v35 = vsub.f32 %v6156_v2, %v6352_v49  ;;  %v3184_v25 = vpop.f32.mrb[255].mxu1  ;;  %v11805_v24 = vadd.f32 %v3996_v59, %v3180_v47  ;;  %v3183_v52 = vadd.f32 %v11790_v14, %v3182_v41  ;;  %v4001_v22 = vpop.f32.mrb[255].mxu0  ;;  %8979 = vpow2.f32 %v5307_v6  ;;  %v8458_v1 = vld [vmem:[%s12642_s0 + $0xb8c] ss:$16 sps:$4 sm:$0xff]   ;;  %v4395_v19 = vld [vmem:[%s12645_s3 + $0x3c0] sm:$0xff] }
 0x313   :  { %v6859_v8 = vsel %vm6627_vm0, %v6547_v23, 0.0  ;;  %v8968_v7 = vpop.eup %8967  ;;  %v5309_v60 = vmul.f32 1.442695, %v4988_v18  ;;  %v6354_v10 = vmul.f32 %v4394_v39, %v11682_v27  ;;  %v4591_v47 = vmax.f32 %v11712_v16, 0.0 }
 0x314   :  { %v6860_v12 = vadd.f32 %v6859_v8, %v6858_v15  ;;  %v6861_v3 = vsel %vm6627_vm0, %v6548_v35, 0.0  ;;  %3394 = vmatmul.mubr.bf16.gmra.mrb[252].mxu1 %v8441_v58  ;;  %v8970_v53 = vpop.eup %8969  ;;  %v5884_v29 = vmul.f32 0.6931472, %v8968_v7  ;;  %v4793_v26 = vand.u32 2147483647, %v11805_v24  ;;  %4211 = vmatmul.mubr.bf16.gmra.mrb[104].mxu0 %v8444_v43 }
 0x315   :  { %3401 = vmatprep.mubr.bf16.mxu1 %v8449_v44  ;;  %v8972_v13 = vpop.eup %8971  ;;  %v5572_v54 = vadd.f32 1.0, %v8970_v53  ;;  %v11815_v38 = vadd.f32 %v3999_v4, %v3183_v52  ;;  %4218 = vmatprep.mubr.bf16.mxu0 %v8452_v34  ;;  %v6355_v7 = vmul.f32 %v4395_v19, %v11712_v16 }
 0x316   :  { %v6862_v45 = vadd.f32 %v6861_v3, %v6860_v12  ;;  %v8974_v28 = vpop.eup %8973  ;;  %v6157_v9 = vadd.f32 %v5884_v29, %v4589_v40  ;;  %v5886_v33 = vmul.f32 0.6931472, %v8972_v13  ;;  %v4989_v37 = vsub.f32 0.0, %v4793_v26  ;;  %v4396_v12 = vld [vmem:[%s12645_s3 + $0x3c8] sm:$0xff]  ;;  %v4397_v3 = vld [vmem:[%s12645_s3 + $0x3d0] sm:$0xff] }
 0x317   :  { %v3187_v46 = vpop.f32.mrb[148].mxu1  ;;  %v8976_v11 = vpop.eup %8975  ;;  %8981 = vlog2.f32 %v5572_v54  ;;  %v5573_v20 = vadd.f32 1.0, %v8974_v28  ;;  %v4794_v62 = vand.u32 2147483647, %v11815_v38  ;;  %v8453_v29 = vld [vmem:[%s12642_s0 + $0xb80] ss:$16 sps:$4 sm:$0xff]  }
 0x318   :  { %v4004_v5 = vpop.f32.mrb[0].mxu0  ;;  %v3189_v30 = vpop.f32.mrb[149].mxu1  ;;  %v6549_v21 = vsub.f32 %v6157_v9, %v6353_v32  ;;  %v6158_v58 = vadd.f32 %v5886_v33, %v4590_v42  ;;  %v5574_v43 = vadd.f32 1.0, %v8976_v11  ;;  %8983 = vpow2.f32 %v5309_v60  ;;  %v8461_v54 = vld [vmem:[%s12642_s0 + $0xba4] ss:$16 sps:$4 sm:$0xff]  }
 0x319   :  { %v4006_v2 = vpop.f32.mrb[1].mxu0  ;;  %v3190_v49 = vpop.f32.mrb[150].mxu1  ;;  %8985 = vlog2.f32 %v5573_v20  ;;  %v5311_v27 = vmul.f32 1.442695, %v4989_v37  ;;  %v4990_v59 = vsub.f32 0.0, %v4794_v62  ;;  %v3188_v41 = vadd.f32 %v11790_v14, %v3187_v46 }
 0x31a   :  { %v4007_v57 = vpop.f32.mrb[2].mxu0  ;;  %v3192_v44 = vpop.f32.mrb[151].mxu1  ;;  %v6863_v23 = vsel %vm6627_vm0, %v6549_v21, 0.0  ;;  %v6550_v55 = vsub.f32 %v6158_v58, %v6354_v10  ;;  %8987 = vlog2.f32 %v5574_v43  ;;  %v3191_v25 = vadd.f32 %v11790_v14, %v3190_v49  ;;  %v8464_v42 = vld [vmem:[%s12642_s0 + $0xbac] ss:$16 sps:$4 sm:$0xff]  }
 0x31b   :  { %v8978_v36 = vpop.eup %8977  ;;  %v4009_v34 = vpop.f32.mrb[3].mxu0  ;;  %v6864_v15 = vadd.f32 %v6863_v23, %v6862_v45  ;;  %8989 = vpow2.f32 %v5311_v27  ;;  %v5313_v6 = vmul.f32 1.442695, %v4990_v59  ;;  %v11839_v4 = vadd.f32 %v4004_v5, %v3188_v41  ;;  %v8456_v45 = vld [vmem:[%s12642_s0 + $0xb88] ss:$16 sps:$4 sm:$0xff]  }
 0x31c   :  { %v5888_v35 = vmul.f32 0.6931472, %v8978_v36  ;;  %3402 = vmatmul.mubr.bf16.gmra.mrb[148].mxu1 %v8447_v56  ;;  %v6865_v61 = vsel %vm6627_vm0, %v6550_v55, 0.0  ;;  %4219 = vmatmul.mubr.bf16.gmra.mrb[108].mxu0 %v8450_v17  ;;  %v8980_v8 = vpop.eup %8979  ;;  %v11853_v16 = vadd.f32 %v4007_v57, %v3191_v25  ;;  %v4592_v60 = vmax.f32 %v11729_v63, 0.0 }
 0x31d   :  { %3409 = vmatprep.mubr.bf16.mxu1 %v8455_v31  ;;  %v6866_v52 = vadd.f32 %v6865_v61, %v6864_v15  ;;  %8991 = vpow2.f32 %v5313_v6  ;;  %4226 = vmatprep.mubr.bf16.mxu0 %v8458_v1  ;;  %v5575_v18 = vadd.f32 1.0, %v8980_v8  ;;  %v4795_v53 = vand.u32 2147483647, %v11839_v4  ;;  %v8459_v6 = vld [vmem:[%s12642_s0 + $0xba0] ss:$16 sps:$4 sm:$0xff]  }
 0x31e   :  { %v6159_v22 = vadd.f32 %v5888_v35, %v4591_v47  ;;  %v6356_v46 = vmul.f32 %v4396_v12, %v11729_v63  ;;  %v4593_v17 = vmax.f32 %v11743_v0, 0.0  ;;  %v4796_v31 = vand.u32 2147483647, %v11853_v16  ;;  %v4398_v63 = vld [vmem:[%s12645_s3 + $0x3d8] sm:$0xff] }
 0x31f   :  { %v3195_v40 = vpop.f32.mrb[152].mxu1  ;;  %v4012_v26 = vpop.f32.mrb[4].mxu0  ;;  %8993 = vlog2.f32 %v5575_v18  ;;  %v4991_v56 = vsub.f32 0.0, %v4795_v53  ;;  %v6357_v2 = vmul.f32 %v4397_v3, %v11743_v0  ;;  %v4594_v44 = vmax.f32 %v11748_v48, 0.0  ;;  %v8462_v12 = vld [vmem:[%s12642_s0 + $0xba8] ss:$16 sps:$4 sm:$0xff]  }
 0x320   :  { %v6551_v32 = vsub.f32 %v6159_v22, %v6355_v7  ;;  %v3196_v39 = vadd.f32 %v11790_v14, %v3195_v40  ;;  %v3197_v13 = vpop.f32.mrb[153].mxu1  ;;  %v4014_v28 = vpop.f32.mrb[5].mxu0  ;;  %v4992_v1 = vsub.f32 0.0, %v4796_v31  ;;  %v6358_v34 = vmul.f32 %v4398_v63, %v11748_v48 }
 0x321   :  { %v3198_v9 = vpop.f32.mrb[154].mxu1  ;;  %v8982_v33 = vpop.eup %8981  ;;  %v5315_v30 = vmul.f32 1.442695, %v4991_v56  ;;  %v4399_v28 = vld [vmem:[%s12645_s3 + $0x3e0] sm:$0xff] }
 0x322   :  { %v6867_v37 = vsel %vm6627_vm0, %v6551_v32, 0.0  ;;  %v4015_v11 = vpop.f32.mrb[6].mxu0  ;;  %v3200_v10 = vpop.f32.mrb[155].mxu1  ;;  %v5890_v5 = vmul.f32 0.6931472, %v8982_v33  ;;  %v11870_v21 = vadd.f32 %v4012_v26, %v3196_v39  ;;  %v3199_v47 = vadd.f32 %v11790_v14, %v3198_v9 }
 0x323   :  { %v8984_v20 = vpop.eup %8983  ;;  %v6868_v62 = vadd.f32 %v6867_v37, %v6866_v52  ;;  %v4017_v58 = vpop.f32.mrb[7].mxu0  ;;  %8995 = vpow2.f32 %v5315_v30  ;;  %v5317_v0 = vmul.f32 1.442695, %v4992_v1  ;;  %v4595_v9 = vmax.f32 %v11771_v50, 0.0  ;;  %v4400_v30 = vld [vmem:[%s12645_s3 + $0x3e8] sm:$0xff] }
 0x324   :  { %v8986_v43 = vpop.eup %8985  ;;  %v5576_v49 = vadd.f32 1.0, %v8984_v20  ;;  %3410 = vmatmul.mubr.bf16.gmra.mrb[152].mxu1 %v8453_v29  ;;  %v6160_v59 = vadd.f32 %v5890_v5, %v4592_v60  ;;  %4227 = vmatmul.mubr.bf16.gmra.mrb[112].mxu0 %v8456_v45  ;;  %v4797_v55 = vand.u32 2147483647, %v11870_v21  ;;  %v11883_v52 = vadd.f32 %v4015_v11, %v3199_v47  ;;  %v8467_v29 = vld [vmem:[%s12642_s0 + $0xbc4] ss:$16 sps:$4 sm:$0xff]  }
 0x325   :  { %v8988_v27 = vpop.eup %8987  ;;  %v5892_v57 = vmul.f32 0.6931472, %v8986_v43  ;;  %3417 = vmatprep.mubr.bf16.mxu1 %v8461_v54  ;;  %4234 = vmatprep.mubr.bf16.mxu0 %v8464_v42  ;;  %v8470_v54 = vld [vmem:[%s12642_s0 + $0xbcc] ss:$16 sps:$4 sm:$0xff]   ;;  %v6359_v5 = vmul.f32 %v4399_v28, %v11771_v50  ;;  %v8465_v58 = vld [vmem:[%s12642_s0 + $0xbc0] ss:$16 sps:$4 sm:$0xff]  }
 0x326   :  { %v8990_v36 = vpop.eup %8989  ;;  %v5894_v23 = vmul.f32 0.6931472, %v8988_v27  ;;  %8997 = vlog2.f32 %v5576_v49  ;;  %v6552_v19 = vsub.f32 %v6160_v59, %v6356_v46  ;;  %v4993_v8 = vsub.f32 0.0, %v4797_v55  ;;  %v8468_v47 = vld [vmem:[%s12642_s0 + $0xbc8] ss:$16 sps:$4 sm:$0xff]  }
 0x327   :  { %v6161_v41 = vadd.f32 %v5892_v57, %v4593_v17  ;;  %v5577_v15 = vadd.f32 1.0, %v8990_v36  ;;  %v3203_v35 = vpop.f32.mrb[156].mxu1  ;;  %v8992_v61 = vpop.eup %8991  ;;  %8999 = vpow2.f32 %v5317_v0  ;;  %v4798_v42 = vand.u32 2147483647, %v11883_v52  ;;  %v8473_v55 = vld [vmem:[%s12642_s0 + $0xbe4] ss:$16 sps:$4 sm:$0xff]  }
 0x328   :  { %v6162_v25 = vadd.f32 %v5894_v23, %v4594_v44  ;;  %v4020_v22 = vpop.f32.mrb[8].mxu0  ;;  %v3205_v7 = vpop.f32.mrb[157].mxu1  ;;  %v6869_v48 = vsel %vm6627_vm0, %v6552_v19, 0.0  ;;  %v5578_v18 = vadd.f32 1.0, %v8992_v61  ;;  %v5319_v26 = vmul.f32 1.442695, %v4993_v8 }
 0x329   :  { %v6553_v3 = vsub.f32 %v6161_v41, %v6357_v2  ;;  %9001 = vlog2.f32 %v5577_v15  ;;  %v4022_v53 = vpop.f32.mrb[9].mxu0  ;;  %v3206_v40 = vpop.f32.mrb[158].mxu1  ;;  %v6870_v32 = vadd.f32 %v6869_v48, %v6868_v62  ;;  %v4994_v31 = vsub.f32 0.0, %v4798_v42  ;;  %v4401_v2 = vld [vmem:[%s12645_s3 + $0x3f0] sm:$0xff]  ;;  %v8476_v7 = vld [vmem:[%s12642_s0 + $0xbec] ss:$16 sps:$4 sm:$0xff]  }
 0x32a   :  { %v6554_v39 = vsub.f32 %v6162_v25, %v6358_v34  ;;  %v4023_v13 = vpop.f32.mrb[10].mxu0  ;;  %v3208_v45 = vpop.f32.mrb[159].mxu1  ;;  %9003 = vlog2.f32 %v5578_v18  ;;  %v3204_v11 = vadd.f32 %v11790_v14, %v3203_v35  ;;  %v3207_v10 = vadd.f32 %v11790_v14, %v3206_v40 }
 0x32b   :  { %v8994_v60 = vpop.eup %8993  ;;  %v6871_v56 = vsel %vm6627_vm0, %v6553_v3, 0.0  ;;  %v4025_v33 = vpop.f32.mrb[11].mxu0  ;;  %9005 = vpow2.f32 %v5319_v26  ;;  %v5321_v63 = vmul.f32 1.442695, %v4994_v31  ;;  %v4596_v57 = vmax.f32 %v11781_v51, 0.0  ;;  %v4402_v3 = vld [vmem:[%s12645_s3 + $0x3f8] sm:$0xff] }
 0x32c   :  { %v6872_v37 = vadd.f32 %v6871_v56, %v6870_v32  ;;  %v6873_v46 = vsel %vm6627_vm0, %v6554_v39, 0.0  ;;  %v5896_v17 = vmul.f32 0.6931472, %v8994_v60  ;;  %3418 = vmatmul.mubr.bf16.gmra.mrb[156].mxu1 %v8459_v6  ;;  %4235 = vmatmul.mubr.bf16.gmra.mrb[116].mxu0 %v8462_v12  ;;  %v11914_v49 = vadd.f32 %v4020_v22, %v3204_v11 }
 0x32d   :  { %3425 = vmatprep.mubr.bf16.mxu1 %v8467_v29  ;;  %4242 = vmatprep.mubr.bf16.mxu0 %v8470_v54  ;;  %v8996_v43 = vpop.eup %8995  ;;  %v11916_v1 = vadd.f32 %v4023_v13, %v3207_v10  ;;  %v6360_v41 = vmul.f32 %v4400_v30, %v11781_v51  ;;  %9007 = vpow2.f32 %v5321_v63  ;;  %v4597_v61 = vmax.f32 %v11805_v24, 0.0 }
 0x32e   :  { %v6874_v20 = vadd.f32 %v6873_v46, %v6872_v37  ;;  %v6163_v62 = vadd.f32 %v5896_v17, %v4595_v9  ;;  %v5579_v44 = vadd.f32 1.0, %v8996_v43  ;;  %v4799_v34 = vand.u32 2147483647, %v11914_v49  ;;  %v8471_v37 = vld [vmem:[%s12642_s0 + $0xbe0] ss:$16 sps:$4 sm:$0xff]  }
 0x32f   :  { %v3211_v50 = vpop.f32.mrb[160].mxu1  ;;  %v4028_v23 = vpop.f32.mrb[12].mxu0  ;;  %v6361_v25 = vmul.f32 %v4401_v2, %v11805_v24  ;;  %v4598_v24 = vmax.f32 %v11815_v38, 0.0  ;;  %v4800_v39 = vand.u32 2147483647, %v11916_v1  ;;  %v6362_v42 = vmul.f32 %v4402_v3, %v11815_v38 }
 0x330   :  { %v8998_v27 = vpop.eup %8997  ;;  %v6555_v59 = vsub.f32 %v6163_v62, %v6359_v5  ;;  %v3212_v36 = vadd.f32 %v11790_v14, %v3211_v50  ;;  %v3213_v0 = vpop.f32.mrb[161].mxu1  ;;  %9009 = vlog2.f32 %v5579_v44  ;;  %v4995_v53 = vsub.f32 0.0, %v4799_v34  ;;  %v8474_v38 = vld [vmem:[%s12642_s0 + $0xbe8] ss:$16 sps:$4 sm:$0xff]   ;;  %v8477_v3 = vld [vmem:[%s12642_s0 + $0xc00] ss:$16 sps:$4 sm:$0xff]  }
 0x331   :  { %v5898_v19 = vmul.f32 0.6931472, %v8998_v27  ;;  %v4030_v15 = vpop.f32.mrb[13].mxu0  ;;  %v9000_v35 = vpop.eup %8999  ;;  %v4996_v33 = vsub.f32 0.0, %v4800_v39  ;;  %v8480_v39 = vld [vmem:[%s12642_s0 + $0xc08] ss:$16 sps:$4 sm:$0xff]  }
 0x332   :  { %v6875_v6 = vsel %vm6627_vm0, %v6555_v59, 0.0  ;;  %v3214_v8 = vpop.f32.mrb[162].mxu1  ;;  %v4031_v22 = vpop.f32.mrb[14].mxu0  ;;  %v5580_v18 = vadd.f32 1.0, %v9000_v35  ;;  %v11939_v26 = vadd.f32 %v4028_v23, %v3212_v36  ;;  %v5323_v54 = vmul.f32 1.442695, %v4995_v53 }
 0x333   :  { %v9002_v12 = vpop.eup %9001  ;;  %v6876_v51 = vadd.f32 %v6875_v6, %v6874_v20  ;;  %v6164_v48 = vadd.f32 %v5898_v19, %v4596_v57  ;;  %v3216_v40 = vpop.f32.mrb[163].mxu1  ;;  %v3215_v60 = vadd.f32 %v11790_v14, %v3214_v8  ;;  %v5325_v5 = vmul.f32 1.442695, %v4996_v33  ;;  %v8482_v23 = vld [vmem:[%s12642_s0 + $0xc0c] ss:$16 sps:$4 sm:$0xff]   ;;  %v4403_v6 = vld [vmem:[%s12645_s3 + $0x400] sm:$0xff] }
 0x334   :  { %v4033_v29 = vpop.f32.mrb[15].mxu0  ;;  %v5900_v32 = vmul.f32 0.6931472, %v9002_v12  ;;  %3426 = vmatmul.mubr.bf16.gmra.mrb[160].mxu1 %v8465_v58  ;;  %v9004_v13 = vpop.eup %9003  ;;  %9011 = vlog2.f32 %v5580_v18  ;;  %4243 = vmatmul.mubr.bf16.gmra.mrb[120].mxu0 %v8468_v47  ;;  %v4801_v31 = vand.u32 2147483647, %v11939_v26  ;;  %v6363_v40 = vmul.f32 %v4403_v6, %v11839_v4 }
 0x335   :  { %v6556_v45 = vsub.f32 %v6164_v48, %v6360_v41  ;;  %3433 = vmatprep.mubr.bf16.mxu1 %v8473_v55  ;;  %v9006_v56 = vpop.eup %9005  ;;  %v5902_v9 = vmul.f32 0.6931472, %v9004_v13  ;;  %4250 = vmatprep.mubr.bf16.mxu0 %v8476_v7  ;;  %9013 = vpow2.f32 %v5323_v54  ;;  %v11951_v2 = vadd.f32 %v4031_v22, %v3215_v60  ;;  %v8479_v47 = vld [vmem:[%s12642_s0 + $0xc04] ss:$16 sps:$4 sm:$0xff]  }
 0x336   :  { %v6165_v28 = vadd.f32 %v5900_v32, %v4597_v61  ;;  %v5581_v17 = vadd.f32 1.0, %v9006_v56  ;;  %v4997_v43 = vsub.f32 0.0, %v4801_v31  ;;  %v4599_v61 = vmax.f32 %v11839_v4, 0.0  ;;  %v8488_v31 = vld [vmem:[%s12642_s0 + $0xc2c] ss:$16 sps:$4 sm:$0xff]  }
 0x337   :  { %v6877_v46 = vsel %vm6627_vm0, %v6556_v45, 0.0  ;;  %v3219_v11 = vpop.f32.mrb[164].mxu1  ;;  %v6166_v62 = vadd.f32 %v5902_v9, %v4598_v24  ;;  %v4036_v30 = vpop.f32.mrb[16].mxu0  ;;  %v4802_v41 = vand.u32 2147483647, %v11951_v2  ;;  %v4600_v13 = vmax.f32 %v11853_v16, 0.0 }
 0x338   :  { %v6878_v10 = vadd.f32 %v6877_v46, %v6876_v51  ;;  %v6557_v20 = vsub.f32 %v6165_v28, %v6361_v25  ;;  %v3221_v58 = vpop.f32.mrb[165].mxu1  ;;  %9015 = vlog2.f32 %v5581_v17  ;;  %v4038_v63 = vpop.f32.mrb[17].mxu0  ;;  %v3220_v57 = vadd.f32 %v11790_v14, %v3219_v11  ;;  %v4404_v51 = vld [vmem:[%s12645_s3 + $0x408] sm:$0xff]  ;;  %v8485_v17 = vld [vmem:[%s12642_s0 + $0xc24] ss:$16 sps:$4 sm:$0xff]  }
 0x339   :  { %v3222_v50 = vpop.f32.mrb[166].mxu1  ;;  %v6558_v59 = vsub.f32 %v6166_v62, %v6362_v42  ;;  %9017 = vpow2.f32 %v5325_v5  ;;  %v4039_v44 = vpop.f32.mrb[18].mxu0  ;;  %v5327_v19 = vmul.f32 1.442695, %v4997_v43  ;;  %v4998_v12 = vsub.f32 0.0, %v4802_v41 }
 0x33a   :  { %v6879_v27 = vsel %vm6627_vm0, %v6557_v20, 0.0  ;;  %v3224_v36 = vpop.f32.mrb[167].mxu1  ;;  %v9008_v0 = vpop.eup %9007  ;;  %v11967_v8 = vadd.f32 %v4036_v30, %v3220_v57  ;;  %v3223_v32 = vadd.f32 %v11790_v14, %v3222_v50  ;;  %v6364_v4 = vmul.f32 %v4404_v51, %v11853_v16 }
 0x33b   :  { %v6880_v55 = vadd.f32 %v6879_v27, %v6878_v10  ;;  %v4041_v34 = vpop.f32.mrb[19].mxu0  ;;  %v9010_v15 = vpop.eup %9009  ;;  %v6881_v35 = vsel %vm6627_vm0, %v6558_v59, 0.0  ;;  %v5582_v25 = vadd.f32 1.0, %v9008_v0  ;;  %9019 = vpow2.f32 %v5327_v19 }
 0x33c   :  { %3434 = vmatmul.mubr.bf16.gmra.mrb[164].mxu1 %v8471_v37  ;;  %v5904_v7 = vmul.f32 0.6931472, %v9010_v15  ;;  %4251 = vmatmul.mubr.bf16.gmra.mrb[124].mxu0 %v8474_v38  ;;  %v4803_v48 = vand.u32 2147483647, %v11967_v8  ;;  %v5329_v29 = vmul.f32 1.442695, %v4998_v12  ;;  %v11984_v33 = vadd.f32 %v4039_v44, %v3223_v32 }
 0x33d   :  { %v6882_v22 = vadd.f32 %v6881_v35, %v6880_v55  ;;  %3441 = vmatprep.mubr.bf16.mxu1 %v8479_v47  ;;  %9021 = vlog2.f32 %v5582_v25  ;;  %4258 = vmatprep.mubr.bf16.mxu0 %v8482_v23  ;;  %v4405_v38 = vld [vmem:[%s12645_s3 + $0x410] sm:$0xff]  ;;  %v4601_v43 = vmax.f32 %v11870_v21, 0.0  ;;  %v4406_v15 = vld [vmem:[%s12645_s3 + $0x418] sm:$0xff] }
 0x33e   :  { %v9012_v18 = vpop.eup %9011  ;;  %v6167_v53 = vadd.f32 %v5904_v7, %v4599_v61  ;;  %v4999_v54 = vsub.f32 0.0, %v4803_v48  ;;  %9023 = vpow2.f32 %v5329_v29  ;;  %v4804_v63 = vand.u32 2147483647, %v11984_v33  ;;  %v8483_v25 = vld [vmem:[%s12642_s0 + $0xc20] ss:$16 sps:$4 sm:$0xff]  }
 0x33f   :  { %v3227_v24 = vpop.f32.mrb[168].mxu1  ;;  %v5906_v45 = vmul.f32 0.6931472, %v9012_v18  ;;  %v4044_v56 = vpop.f32.mrb[20].mxu0  ;;  %v6365_v55 = vmul.f32 %v4405_v38, %v11870_v21  ;;  %v8486_v18 = vld [vmem:[%s12642_s0 + $0xc28] ss:$16 sps:$4 sm:$0xff]  }
 0x340   :  { %v3228_v60 = vadd.f32 %v11790_v14, %v3227_v24  ;;  %v3229_v28 = vpop.f32.mrb[169].mxu1  ;;  %v9014_v9 = vpop.eup %9013  ;;  %v6559_v42 = vsub.f32 %v6167_v53, %v6363_v40  ;;  %v5331_v20 = vmul.f32 1.442695, %v4999_v54  ;;  %v5000_v36 = vsub.f32 0.0, %v4804_v63 }
 0x341   :  { %v4046_v37 = vpop.f32.mrb[21].mxu0  ;;  %v3230_v46 = vpop.f32.mrb[170].mxu1  ;;  %v6168_v11 = vadd.f32 %v5906_v45, %v4600_v13  ;;  %v5583_v10 = vadd.f32 1.0, %v9014_v9  ;;  %v4602_v53 = vmax.f32 %v11883_v52, 0.0 }
 0x342   :  { %v11992_v62 = vadd.f32 %v4044_v56, %v3228_v60  ;;  %v4047_v5 = vpop.f32.mrb[22].mxu0  ;;  %v3232_v16 = vpop.f32.mrb[171].mxu1  ;;  %v6883_v58 = vsel %vm6627_vm0, %v6559_v42, 0.0  ;;  %v5333_v35 = vmul.f32 1.442695, %v5000_v36  ;;  %v3231_v6 = vadd.f32 %v11790_v14, %v3230_v46 }
 0x343   :  { %v9016_v30 = vpop.eup %9015  ;;  %v4049_v50 = vpop.f32.mrb[23].mxu0  ;;  %v6884_v27 = vadd.f32 %v6883_v58, %v6882_v22  ;;  %v6560_v59 = vsub.f32 %v6168_v11, %v6364_v4  ;;  %9025 = vlog2.f32 %v5583_v10  ;;  %v6366_v42 = vmul.f32 %v4406_v15, %v11883_v52  ;;  %v4407_v4 = vld [vmem:[%s12645_s3 + $0x420] sm:$0xff]  ;;  %v4408_v16 = vld [vmem:[%s12645_s3 + $0x428] sm:$0xff] }
 0x344   :  { %v9018_v47 = vpop.eup %9017  ;;  %v5908_v57 = vmul.f32 0.6931472, %v9016_v30  ;;  %3442 = vmatmul.mubr.bf16.gmra.mrb[168].mxu1 %v8477_v3  ;;  %9027 = vpow2.f32 %v5331_v20  ;;  %4259 = vmatmul.mubr.bf16.gmra.mrb[128].mxu0 %v8480_v39  ;;  %v4805_v19 = vand.u32 2147483647, %v11992_v62  ;;  %v12015_v29 = vadd.f32 %v4047_v5, %v3231_v6 }
 0x345   :  { %v5584_v44 = vadd.f32 1.0, %v9018_v47  ;;  %3449 = vmatprep.mubr.bf16.mxu1 %v8485_v17  ;;  %v6885_v23 = vsel %vm6627_vm0, %v6560_v59, 0.0  ;;  %4266 = vmatprep.mubr.bf16.mxu0 %v8488_v31  ;;  %v9020_v41 = vpop.eup %9019  ;;  %v4603_v5 = vmax.f32 %v11914_v49, 0.0  ;;  %v6367_v52 = vmul.f32 %v4407_v4, %v11914_v49 }
 0x346   :  { %v6169_v0 = vadd.f32 %v5908_v57, %v4601_v43  ;;  %v6886_v34 = vadd.f32 %v6885_v23, %v6884_v27  ;;  %v5585_v7 = vadd.f32 1.0, %v9020_v41  ;;  %v5001_v12 = vsub.f32 0.0, %v4805_v19 }
 0x347   :  { %9029 = vlog2.f32 %v5584_v44  ;;  %v3235_v61 = vpop.f32.mrb[172].mxu1  ;;  %v9022_v22 = vpop.eup %9021  ;;  %v4806_v37 = vand.u32 2147483647, %v12015_v29  ;;  %v4604_v27 = vmax.f32 %v11916_v1, 0.0  ;;  %v6368_v15 = vmul.f32 %v4408_v16, %v11916_v1 }
 0x348   :  { %v6561_v21 = vsub.f32 %v6169_v0, %v6365_v55  ;;  %v3236_v51 = vadd.f32 %v11790_v14, %v3235_v61  ;;  %v4052_v48 = vpop.f32.mrb[24].mxu0  ;;  %v3237_v3 = vpop.f32.mrb[173].mxu1  ;;  %v5910_v40 = vmul.f32 0.6931472, %v9022_v22  ;;  %9031 = vpow2.f32 %v5333_v35  ;;  %v4409_v35 = vld [vmem:[%s12645_s3 + $0x430] sm:$0xff] }
 0x349   :  { %v4054_v32 = vpop.f32.mrb[25].mxu0  ;;  %v3238_v24 = vpop.f32.mrb[174].mxu1  ;;  %9033 = vlog2.f32 %v5585_v7  ;;  %v5335_v13 = vmul.f32 1.442695, %v5001_v12  ;;  %v5002_v11 = vsub.f32 0.0, %v4806_v37  ;;  %v4606_v4 = vmax.f32 %v11951_v2, 0.0 }
 0x34a   :  { %v6887_v39 = vsel %vm6627_vm0, %v6561_v21, 0.0  ;;  %v12018_v45 = vadd.f32 %v4052_v48, %v3236_v51  ;;  %v4055_v54 = vpop.f32.mrb[26].mxu0  ;;  %v3240_v60 = vpop.f32.mrb[175].mxu1  ;;  %v6170_v9 = vadd.f32 %v5910_v40, %v4602_v53  ;;  %v3239_v30 = vadd.f32 %v11790_v14, %v3238_v24 }
 0x34b   :  { %v9024_v56 = vpop.eup %9023  ;;  %v6888_v28 = vadd.f32 %v6887_v39, %v6886_v34  ;;  %v4057_v46 = vpop.f32.mrb[27].mxu0  ;;  %9035 = vpow2.f32 %v5335_v13  ;;  %v5337_v63 = vmul.f32 1.442695, %v5002_v11  ;;  %v4605_v21 = vmax.f32 %v11939_v26, 0.0 }
 0x34c   :  { %v5586_v17 = vadd.f32 1.0, %v9024_v56  ;;  %3450 = vmatmul.mubr.bf16.gmra.mrb[172].mxu1 %v8483_v25  ;;  %v6562_v31 = vsub.f32 %v6170_v9, %v6366_v42  ;;  %v4807_v10 = vand.u32 2147483647, %v12018_v45  ;;  %4267 = vmatmul.mubr.bf16.gmra.mrb[132].mxu0 %v8486_v18  ;;  %v12034_v57 = vadd.f32 %v4055_v54, %v3239_v30  ;;  %v4410_v42 = vld [vmem:[%s12645_s3 + $0x438] sm:$0xff] }
 0x34d   :  { %v9026_v20 = vpop.eup %9025  ;;  %v6369_v39 = vmul.f32 %v4409_v35, %v11939_v26 }
 0x34e   :  { %9037 = vlog2.f32 %v5586_v17  ;;  %v9028_v58 = vpop.eup %9027  ;;  %v6889_v38 = vsel %vm6627_vm0, %v6562_v31, 0.0  ;;  %v5912_v43 = vmul.f32 0.6931472, %v9026_v20  ;;  %v5003_v50 = vsub.f32 0.0, %v4807_v10 }
 0x34f   :  { %v6890_v47 = vadd.f32 %v6889_v38, %v6888_v28  ;;  %v5587_v59 = vadd.f32 1.0, %v9028_v58  ;;  %v3243_v49 = vpop.f32.mrb[176].mxu1  ;;  %v4060_v44 = vpop.f32.mrb[28].mxu0  ;;  %9039 = vpow2.f32 %v5337_v63  ;;  %v4808_v6 = vand.u32 2147483647, %v12034_v57 }
 0x350   :  { %v6171_v23 = vadd.f32 %v5912_v43, %v4603_v5  ;;  %v5339_v0 = vmul.f32 1.442695, %v5003_v50  ;;  %v3244_v55 = vadd.f32 %v11790_v14, %v3243_v49  ;;  %v3245_v19 = vpop.f32.mrb[177].mxu1  ;;  %v4062_v41 = vpop.f32.mrb[29].mxu0  ;;  %v6370_v43 = vmul.f32 %v4410_v42, %v11951_v2 }
 0x351   :  { %v9030_v36 = vpop.eup %9029  ;;  %9041 = vlog2.f32 %v5587_v59  ;;  %v3246_v61 = vpop.f32.mrb[178].mxu1  ;;  %v5004_v18 = vsub.f32 0.0, %v4808_v6  ;;  %v4607_v6 = vmax.f32 %v11967_v8, 0.0 }
 0x352   :  { %v5914_v34 = vmul.f32 0.6931472, %v9030_v36  ;;  %v9032_v25 = vpop.eup %9031  ;;  %v6563_v22 = vsub.f32 %v6171_v23, %v6367_v52  ;;  %9043 = vpow2.f32 %v5339_v0  ;;  %v12043_v7 = vadd.f32 %v4060_v44, %v3244_v55  ;;  %v4063_v12 = vpop.f32.mrb[30].mxu0  ;;  %v4411_v44 = vld [vmem:[%s12645_s3 + $0x440] sm:$0xff] }
 0x353   :  { %v3248_v51 = vpop.f32.mrb[179].mxu1  ;;  %v9034_v48 = vpop.eup %9033  ;;  %v5588_v1 = vadd.f32 1.0, %v9032_v25  ;;  %v3247_v53 = vadd.f32 %v11790_v14, %v3246_v61  ;;  %v5341_v28 = vmul.f32 1.442695, %v5004_v18 }
 0x354   :  { %v6172_v3 = vadd.f32 %v5914_v34, %v4604_v27  ;;  %v4065_v40 = vpop.f32.mrb[31].mxu0  ;;  %v6891_v32 = vsel %vm6627_vm0, %v6563_v22, 0.0  ;;  %v5916_v24 = vmul.f32 0.6931472, %v9034_v48  ;;  %v4809_v13 = vand.u32 2147483647, %v12043_v7 }
 0x355   :  { %v9036_v54 = vpop.eup %9035  ;;  %v6892_v60 = vadd.f32 %v6891_v32, %v6890_v47  ;;  %9045 = vlog2.f32 %v5588_v1  ;;  %v12054_v11 = vadd.f32 %v4063_v12, %v3247_v53  ;;  %v6371_v22 = vmul.f32 %v4411_v44, %v11967_v8 }
 0x356   :  { %v6564_v56 = vsub.f32 %v6172_v3, %v6368_v15  ;;  %v6173_v9 = vadd.f32 %v5916_v24, %v4605_v21  ;;  %v5589_v37 = vadd.f32 1.0, %v9036_v54  ;;  %v5005_v46 = vsub.f32 0.0, %v4809_v13  ;;  %v4412_v3 = vld [vmem:[%s12645_s3 + $0x448] sm:$0xff] }
 0x357   :  { %v3251_v17 = vpop.f32.mrb[180].mxu1  ;;  %9047 = vpow2.f32 %v5341_v28  ;;  %v4068_v20 = vpop.f32.mrb[32].mxu0  ;;  %v4810_v50 = vand.u32 2147483647, %v12054_v11  ;;  %v4608_v24 = vmax.f32 %v11984_v33, 0.0 }
 0x358   :  { %v9038_v31 = vpop.eup %9037  ;;  %v6893_v26 = vsel %vm6627_vm0, %v6564_v56, 0.0  ;;  %v3252_v10 = vadd.f32 %v11790_v14, %v3251_v17  ;;  %v3253_v5 = vpop.f32.mrb[181].mxu1  ;;  %v6565_v16 = vsub.f32 %v6173_v9, %v6369_v39  ;;  %9049 = vlog2.f32 %v5589_v37 }
 0x359   :  { %v6894_v52 = vadd.f32 %v6893_v26, %v6892_v60  ;;  %v5918_v30 = vmul.f32 0.6931472, %v9038_v31  ;;  %v4070_v58 = vpop.f32.mrb[33].mxu0  ;;  %v3254_v38 = vpop.f32.mrb[182].mxu1  ;;  %v5343_v63 = vmul.f32 1.442695, %v5005_v46 }
 0x35a   :  { %v4071_v47 = vpop.f32.mrb[34].mxu0  ;;  %v9040_v27 = vpop.eup %9039  ;;  %v6895_v59 = vsel %vm6627_vm0, %v6565_v16, 0.0  ;;  %v12063_v36 = vadd.f32 %v4068_v20, %v3252_v10  ;;  %v3255_v23 = vadd.f32 %v11790_v14, %v3254_v38  ;;  %v5006_v34 = vsub.f32 0.0, %v4810_v50  ;;  %v4413_v20 = vld [vmem:[%s12645_s3 + $0x450] sm:$0xff] }
 0x35b   :  { %v6174_v49 = vadd.f32 %v5918_v30, %v4606_v4  ;;  %v3256_v0 = vpop.f32.mrb[183].mxu1  ;;  %v4073_v55 = vpop.f32.mrb[35].mxu0  ;;  %v6896_v2 = vadd.f32 %v6895_v59, %v6894_v52  ;;  %v5590_v41 = vadd.f32 1.0, %v9040_v27  ;;  %9051 = vpow2.f32 %v5343_v63  ;;  %v12088_v59 = vld [vmem:[#allocation2] ss:$0 sm:$0xff] }
 0x35c   :  { %v9042_v19 = vpop.eup %9041  ;;  %v4811_v25 = vand.u32 2147483647, %v12063_v36  ;;  %v5345_v12 = vmul.f32 1.442695, %v5006_v34  ;;  %v12073_v18 = vadd.f32 %v4071_v47, %v3255_v23  ;;  %v6372_v4 = vmul.f32 %v4412_v3, %v11984_v33  ;;  %v4414_v23 = vld [vmem:[%s12645_s3 + $0x458] sm:$0xff] }
 0x35d   :  { %v9044_v15 = vpop.eup %9043  ;;  %v6566_v35 = vsub.f32 %v6174_v49, %v6370_v43  ;;  %v5920_v61 = vmul.f32 0.6931472, %v9042_v19  ;;  %9053 = vlog2.f32 %v5590_v41  ;;  %v4609_v33 = vmax.f32 %v11992_v62, 0.0 }
 0x35e   :  { %v5591_v21 = vadd.f32 1.0, %v9044_v15  ;;  %v5007_v1 = vsub.f32 0.0, %v4811_v25  ;;  %v4812_v37 = vand.u32 2147483647, %v12073_v18  ;;  %v6373_v47 = vmul.f32 %v4413_v20, %v11992_v62  ;;  %v4415_v62 = vld [vmem:[%s12645_s3 + $0x460] sm:$0xff] }
 0x35f   :  { %v6897_v51 = vsel %vm6627_vm0, %v6566_v35, 0.0  ;;  %v6175_v48 = vadd.f32 %v5920_v61, %v4607_v6  ;;  %v3259_v53 = vpop.f32.mrb[184].mxu1  ;;  %v9046_v40 = vpop.eup %9045  ;;  %v4610_v0 = vmax.f32 %v12015_v29, 0.0 }
 0x360   :  { %v6898_v32 = vadd.f32 %v6897_v51, %v6896_v2  ;;  %9055 = vlog2.f32 %v5591_v21  ;;  %v3260_v8 = vadd.f32 %v11790_v14, %v3259_v53  ;;  %v4076_v39 = vpop.f32.mrb[36].mxu0  ;;  %v3261_v13 = vpop.f32.mrb[185].mxu1  ;;  %v5922_v60 = vmul.f32 0.6931472, %v9046_v40 }
 0x361   :  { %v6567_v54 = vsub.f32 %v6175_v48, %v6371_v22  ;;  %9057 = vpow2.f32 %v5345_v12  ;;  %v5347_v56 = vmul.f32 1.442695, %v5007_v1  ;;  %v4078_v28 = vpop.f32.mrb[37].mxu0  ;;  %v3262_v9 = vpop.f32.mrb[186].mxu1  ;;  %v5008_v58 = vsub.f32 0.0, %v4812_v37 }
 0x362   :  { %v9048_v42 = vpop.eup %9047  ;;  %v12079_v46 = vadd.f32 %v4076_v39, %v3260_v8  ;;  %v4079_v17 = vpop.f32.mrb[38].mxu0  ;;  %v6176_v10 = vadd.f32 %v5922_v60, %v4608_v24  ;;  %v3263_v49 = vadd.f32 %v12088_v59, %v3262_v9  ;;  %v6374_v1 = vmul.f32 %v4414_v23, %v12015_v29 }
 0x363   :  { %v3264_v31 = vpop.f32.mrb[187].mxu1  ;;  %v9050_v26 = vpop.eup %9049  ;;  %v6899_v14 = vsel %vm6627_vm0, %v6567_v54, 0.0  ;;  %v5592_v5 = vadd.f32 1.0, %v9048_v42  ;;  %9059 = vpow2.f32 %v5347_v56  ;;  %v5349_v27 = vmul.f32 1.442695, %v5008_v58 }
 0x364   :  { %v4081_v52 = vpop.f32.mrb[39].mxu0  ;;  %v6900_v16 = vadd.f32 %v6899_v14, %v6898_v32  ;;  %v5924_v30 = vmul.f32 0.6931472, %v9050_v26  ;;  %v6568_v38 = vsub.f32 %v6176_v10, %v6372_v4  ;;  %v4813_v43 = vand.u32 2147483647, %v12079_v46 }
 0x365   :  { %9061 = vlog2.f32 %v5592_v5  ;;  %v9052_v63 = vpop.eup %9051  ;;  %v12099_v35 = vadd.f32 %v4079_v17, %v3263_v49  ;;  %v4611_v53 = vmax.f32 %v12018_v45, 0.0  ;;  %v6375_v17 = vmul.f32 %v4415_v62, %v12018_v45  ;;  %v4416_v5 = vld [vmem:[%s12645_s3 + $0x468] sm:$0xff] }
 0x366   :  { %v6177_v50 = vadd.f32 %v5924_v30, %v4609_v33  ;;  %v6901_v44 = vsel %vm6627_vm0, %v6568_v38, 0.0  ;;  %v5593_v55 = vadd.f32 1.0, %v9052_v63  ;;  %v5009_v19 = vsub.f32 0.0, %v4813_v43 }
 0x367   :  { %v3267_v2 = vpop.f32.mrb[188].mxu1  ;;  %v9054_v41 = vpop.eup %9053  ;;  %v6902_v34 = vadd.f32 %v6901_v44, %v6900_v16  ;;  %9063 = vpow2.f32 %v5349_v27  ;;  %v4814_v40 = vand.u32 2147483647, %v12099_v35  ;;  %v4612_v52 = vmax.f32 %v12034_v57, 0.0 }
 0x368   :  { %v6569_v15 = vsub.f32 %v6177_v50, %v6373_v47  ;;  %v4084_v6 = vpop.f32.mrb[40].mxu0  ;;  %v3269_v61 = vpop.f32.mrb[189].mxu1  ;;  %v5926_v25 = vmul.f32 0.6931472, %v9054_v41  ;;  %9065 = vlog2.f32 %v5593_v55  ;;  %v5351_v22 = vmul.f32 1.442695, %v5009_v19 }
 0x369   :  { %v3268_v21 = vadd.f32 %v12088_v59, %v3267_v2  ;;  %v4086_v12 = vpop.f32.mrb[41].mxu0  ;;  %v3270_v51 = vpop.f32.mrb[190].mxu1  ;;  %v5010_v28 = vsub.f32 0.0, %v4814_v40  ;;  %v6376_v55 = vmul.f32 %v4416_v5, %v12034_v57  ;;  %v4417_v19 = vld [vmem:[%s12645_s3 + $0x470] sm:$0xff]  ;;  %v4613_v62 = vmax.f32 %v12043_v7, 0.0 }
 0x36a   :  { %v9056_v48 = vpop.eup %9055  ;;  %v6903_v3 = vsel %vm6627_vm0, %v6569_v15, 0.0  ;;  %v4087_v32 = vpop.f32.mrb[42].mxu0  ;;  %v6178_v13 = vadd.f32 %v5926_v25, %v4610_v0  ;;  %9067 = vpow2.f32 %v5351_v22  ;;  %v3271_v42 = vadd.f32 %v12088_v59, %v3270_v51 }
 0x36b   :  { %v3272_v24 = vpop.f32.mrb[191].mxu1  ;;  %v9058_v8 = vpop.eup %9057  ;;  %v6904_v39 = vadd.f32 %v6903_v3, %v6902_v34  ;;  %v5928_v54 = vmul.f32 0.6931472, %v9056_v48  ;;  %v12106_v9 = vadd.f32 %v4084_v6, %v3268_v21  ;;  %v5353_v26 = vmul.f32 1.442695, %v5010_v28 }
 0x36c   :  { %v4089_v60 = vpop.f32.mrb[43].mxu0  ;;  %v5594_v56 = vadd.f32 1.0, %v9058_v8  ;;  %v6570_v29 = vsub.f32 %v6178_v13, %v6374_v1  ;;  %v12116_v45 = vadd.f32 %v4087_v32, %v3271_v42  ;;  %v6377_v3 = vmul.f32 %v4417_v19, %v12043_v7  ;;  %v4418_v32 = vld [vmem:[%s12645_s3 + $0x478] sm:$0xff]  ;;  %v4420_v19 = vld [vmem:[%s12645_s3 + $0x488] sm:$0xff] }
 0x36d   :  { %v9060_v4 = vpop.eup %9059  ;;  %v6179_v37 = vadd.f32 %v5928_v54, %v4611_v53  ;;  %v4815_v16 = vand.u32 2147483647, %v12106_v9  ;;  %v4614_v28 = vmax.f32 %v12054_v11, 0.0  ;;  %v4615_v5 = vmax.f32 %v12063_v36, 0.0 }
 0x36e   :  { %9069 = vlog2.f32 %v5594_v56  ;;  %v5595_v31 = vadd.f32 1.0, %v9060_v4  ;;  %v6905_v10 = vsel %vm6627_vm0, %v6570_v29, 0.0  ;;  %v4816_v2 = vand.u32 2147483647, %v12116_v45 }
 0x36f   :  { %v9062_v14 = vpop.eup %9061  ;;  %v6571_v20 = vsub.f32 %v6179_v37, %v6375_v17  ;;  %v3275_v33 = vpop.f32.mrb[192].mxu1  ;;  %v6906_v30 = vadd.f32 %v6905_v10, %v6904_v39  ;;  %v5011_v50 = vsub.f32 0.0, %v4815_v16  ;;  %v6378_v17 = vmul.f32 %v4418_v32, %v12054_v11 }
 0x370   :  { %v5930_v58 = vmul.f32 0.6931472, %v9062_v14  ;;  %9071 = vlog2.f32 %v5595_v31  ;;  %v4092_v38 = vpop.f32.mrb[44].mxu0  ;;  %v3277_v43 = vpop.f32.mrb[193].mxu1  ;;  %v3276_v47 = vadd.f32 %v12088_v59, %v3275_v33  ;;  %v5012_v51 = vsub.f32 0.0, %v4816_v2  ;;  %v4419_v31 = vld [vmem:[%s12645_s3 + $0x480] sm:$0xff] }
 0x371   :  { %v6907_v63 = vsel %vm6627_vm0, %v6571_v20, 0.0  ;;  %9073 = vpow2.f32 %v5353_v26  ;;  %v4094_v27 = vpop.f32.mrb[45].mxu0  ;;  %v3278_v49 = vpop.f32.mrb[194].mxu1  ;;  %v5355_v61 = vmul.f32 1.442695, %v5011_v50 }
 0x372   :  { %v9064_v44 = vpop.eup %9063  ;;  %v6908_v23 = vadd.f32 %v6907_v63, %v6906_v30  ;;  %v6180_v0 = vadd.f32 %v5930_v58, %v4612_v52  ;;  %v4095_v41 = vpop.f32.mrb[46].mxu0  ;;  %v12126_v25 = vadd.f32 %v4092_v38, %v3276_v47  ;;  %v3279_v57 = vadd.f32 %v12088_v59, %v3278_v49 }
 0x373   :  { %v3280_v34 = vpop.f32.mrb[195].mxu1  ;;  %v9066_v15 = vpop.eup %9065  ;;  %v5596_v6 = vadd.f32 1.0, %v9064_v44  ;;  %v5357_v39 = vmul.f32 1.442695, %v5012_v51 }
 0x374   :  { %v4097_v22 = vpop.f32.mrb[47].mxu0  ;;  %v6572_v21 = vsub.f32 %v6180_v0, %v6376_v55  ;;  %v5932_v12 = vmul.f32 0.6931472, %v9066_v15  ;;  %v9068_v48 = vpop.eup %9067  ;;  %v4817_v1 = vand.u32 2147483647, %v12126_v25  ;;  %v12135_v54 = vadd.f32 %v4095_v41, %v3279_v57 }
 0x375   :  { %9075 = vlog2.f32 %v5596_v6  ;;  %v5597_v24 = vadd.f32 1.0, %v9068_v48  ;;  %v6379_v0 = vmul.f32 %v4419_v31, %v12063_v36  ;;  %v4616_v6 = vmax.f32 %v12073_v18, 0.0 }
 0x376   :  { %v6909_v53 = vsel %vm6627_vm0, %v6572_v21, 0.0  ;;  %v6181_v40 = vadd.f32 %v5932_v12, %v4613_v62  ;;  %9077 = vpow2.f32 %v5355_v61  ;;  %v5013_v13 = vsub.f32 0.0, %v4817_v1 }
 0x377   :  { %v6910_v8 = vadd.f32 %v6909_v53, %v6908_v23  ;;  %v3283_v60 = vpop.f32.mrb[196].mxu1  ;;  %9079 = vlog2.f32 %v5597_v24  ;;  %v4100_v4 = vpop.f32.mrb[48].mxu0  ;;  %v4818_v52 = vand.u32 2147483647, %v12135_v54  ;;  %v6380_v1 = vmul.f32 %v4420_v19, %v12073_v18 }
 0x378   :  { %v9070_v56 = vpop.eup %9069  ;;  %v6573_v7 = vsub.f32 %v6181_v40, %v6377_v3  ;;  %v3284_v42 = vadd.f32 %v12088_v59, %v3283_v60  ;;  %v3285_v29 = vpop.f32.mrb[197].mxu1  ;;  %9081 = vpow2.f32 %v5357_v39  ;;  %v5359_v26 = vmul.f32 1.442695, %v5013_v13  ;;  %v4421_v13 = vld [vmem:[%s12645_s3 + $0x490] sm:$0xff] }
 0x379   :  { %v5934_v37 = vmul.f32 0.6931472, %v9070_v56  ;;  %v4102_v14 = vpop.f32.mrb[49].mxu0  ;;  %v3286_v33 = vpop.f32.mrb[198].mxu1  ;;  %v5014_v27 = vsub.f32 0.0, %v4818_v52  ;;  %v4617_v60 = vmax.f32 %v12079_v46, 0.0 }
 0x37a   :  { %v9072_v10 = vpop.eup %9071  ;;  %v6911_v20 = vsel %vm6627_vm0, %v6573_v7, 0.0  ;;  %v12146_v16 = vadd.f32 %v4100_v4, %v3284_v42  ;;  %v4103_v30 = vpop.f32.mrb[50].mxu0  ;;  %9083 = vpow2.f32 %v5359_v26  ;;  %v3287_v55 = vadd.f32 %v12088_v59, %v3286_v33 }
 0x37b   :  { %v9074_v58 = vpop.eup %9073  ;;  %v6912_v11 = vadd.f32 %v6911_v20, %v6910_v8  ;;  %v6182_v38 = vadd.f32 %v5934_v37, %v4614_v28  ;;  %v5936_v43 = vmul.f32 0.6931472, %v9072_v10  ;;  %v3288_v63 = vpop.f32.mrb[199].mxu1  ;;  %v5361_v2 = vmul.f32 1.442695, %v5014_v27 }
 0x37c   :  { %v4105_v50 = vpop.f32.mrb[51].mxu0  ;;  %v5598_v47 = vadd.f32 1.0, %v9074_v58  ;;  %v4819_v49 = vand.u32 2147483647, %v12146_v16  ;;  %v12156_v61 = vadd.f32 %v4103_v30, %v3287_v55  ;;  %v6381_v20 = vmul.f32 %v4421_v13, %v12079_v46 }
 0x37d   :  { %v6574_v44 = vsub.f32 %v6182_v38, %v6378_v17  ;;  %v6183_v23 = vadd.f32 %v5936_v43, %v4615_v5  ;;  %v4422_v43 = vld [vmem:[%s12645_s3 + $0x498] sm:$0xff]  ;;  %v4618_v46 = vmax.f32 %v12099_v35, 0.0 }
 0x37e   :  { %9085 = vlog2.f32 %v5598_v47  ;;  %v5015_v41 = vsub.f32 0.0, %v4819_v49  ;;  %v4820_v40 = vand.u32 2147483647, %v12156_v61 }
 0x37f   :  { %v9076_v34 = vpop.eup %9075  ;;  %v6913_v15 = vsel %vm6627_vm0, %v6574_v44, 0.0  ;;  %v6575_v62 = vsub.f32 %v6183_v23, %v6379_v0  ;;  %v3291_v22 = vpop.f32.mrb[200].mxu1  ;;  %9087 = vpow2.f32 %v5361_v2 }
 0x380   :  { %v9078_v21 = vpop.eup %9077  ;;  %v6914_v36 = vadd.f32 %v6913_v15, %v6912_v11  ;;  %v5938_v12 = vmul.f32 0.6931472, %v9076_v34  ;;  %v5363_v51 = vmul.f32 1.442695, %v5015_v41  ;;  %v4108_v57 = vpop.f32.mrb[52].mxu0  ;;  %v5016_v18 = vsub.f32 0.0, %v4820_v40 }
 0x381   :  { %v3293_v48 = vpop.f32.mrb[201].mxu1  ;;  %v6915_v3 = vsel %vm6627_vm0, %v6575_v62, 0.0  ;;  %v5599_v53 = vadd.f32 1.0, %v9078_v21  ;;  %v4110_v32 = vpop.f32.mrb[53].mxu0  ;;  %v3292_v4 = vadd.f32 %v12088_v59, %v3291_v22  ;;  %v6382_v41 = vmul.f32 %v4422_v43, %v12099_v35  ;;  %v4423_v21 = vld [vmem:[%s12645_s3 + $0x4a0] sm:$0xff] }
 0x382   :  { %v9080_v24 = vpop.eup %9079  ;;  %v6916_v8 = vadd.f32 %v6915_v3, %v6914_v36  ;;  %v6184_v39 = vadd.f32 %v5938_v12, %v4616_v6  ;;  %9089 = vpow2.f32 %v5363_v51  ;;  %v3294_v56 = vpop.f32.mrb[202].mxu1  ;;  %v5365_v5 = vmul.f32 1.442695, %v5016_v18 }
 0x383   :  { %v4111_v7 = vpop.f32.mrb[54].mxu0  ;;  %v9082_v28 = vpop.eup %9081  ;;  %v5940_v42 = vmul.f32 0.6931472, %v9080_v24  ;;  %9091 = vlog2.f32 %v5599_v53  ;;  %v3295_v26 = vadd.f32 %v12088_v59, %v3294_v56  ;;  %v12168_v52 = vadd.f32 %v4108_v57, %v3292_v4 }
 0x384   :  { %v3296_v29 = vpop.f32.mrb[203].mxu1  ;;  %v4113_v37 = vpop.f32.mrb[55].mxu0  ;;  %v6576_v17 = vsub.f32 %v6184_v39, %v6380_v1  ;;  %v5600_v31 = vadd.f32 1.0, %v9082_v28  ;;  %v4619_v1 = vmax.f32 %v12106_v9, 0.0  ;;  %v6383_v13 = vmul.f32 %v4423_v21, %v12106_v9  ;;  %v4425_v9 = vld [vmem:[%s12645_s3 + $0x4b0] sm:$0xff] }
 0x385   :  { %v9084_v14 = vpop.eup %9083  ;;  %v6185_v10 = vadd.f32 %v5940_v42, %v4617_v60  ;;  %v12171_v58 = vadd.f32 %v4111_v7, %v3295_v26  ;;  %v4821_v47 = vand.u32 2147483647, %v12168_v52  ;;  %v4424_v60 = vld [vmem:[%s12645_s3 + $0x4a8] sm:$0xff]  ;;  %v4620_v28 = vmax.f32 %v12116_v45, 0.0 }
 0x386   :  { %v6917_v33 = vsel %vm6627_vm0, %v6576_v17, 0.0  ;;  %9093 = vlog2.f32 %v5600_v31  ;;  %v5601_v30 = vadd.f32 1.0, %v9084_v14 }
 0x387   :  { %v6918_v11 = vadd.f32 %v6917_v33, %v6916_v8  ;;  %v6577_v38 = vsub.f32 %v6185_v10, %v6381_v20  ;;  %9095 = vpow2.f32 %v5365_v5  ;;  %v3299_v63 = vpop.f32.mrb[204].mxu1  ;;  %v4116_v27 = vpop.f32.mrb[56].mxu0  ;;  %v4822_v0 = vand.u32 2147483647, %v12171_v58 }
 0x388   :  { %v9086_v50 = vpop.eup %9085  ;;  %9097 = vlog2.f32 %v5601_v30  ;;  %v3301_v49 = vpop.f32.mrb[205].mxu1  ;;  %v5017_v34 = vsub.f32 0.0, %v4821_v47  ;;  %v3300_v15 = vadd.f32 %v12088_v59, %v3299_v63  ;;  %v6384_v20 = vmul.f32 %v4424_v60, %v12116_v45 }
 0x389   :  { %v6919_v44 = vsel %vm6627_vm0, %v6577_v38, 0.0  ;;  %v5942_v23 = vmul.f32 0.6931472, %v9086_v50  ;;  %v4118_v55 = vpop.f32.mrb[57].mxu0  ;;  %v9088_v19 = vpop.eup %9087  ;;  %v5018_v12 = vsub.f32 0.0, %v4822_v0  ;;  %v4621_v5 = vmax.f32 %v12126_v25, 0.0 }
 0x38a   :  { %v6920_v2 = vadd.f32 %v6919_v44, %v6918_v11  ;;  %v3302_v62 = vpop.f32.mrb[206].mxu1  ;;  %v4119_v6 = vpop.f32.mrb[58].mxu0  ;;  %v5602_v36 = vadd.f32 1.0, %v9088_v19  ;;  %v5367_v35 = vmul.f32 1.442695, %v5017_v34  ;;  %v12187_v53 = vadd.f32 %v4116_v27, %v3300_v15 }
 0x38b   :  { %v6186_v22 = vadd.f32 %v5942_v23, %v4618_v46  ;;  %v3303_v51 = vadd.f32 %v12088_v59, %v3302_v62  ;;  %v3304_v57 = vpop.f32.mrb[207].mxu1  ;;  %v4121_v48 = vpop.f32.mrb[59].mxu0  ;;  %v5369_v8 = vmul.f32 1.442695, %v5018_v12  ;;  %v6385_v19 = vmul.f32 %v4425_v9, %v12126_v25 }
 0x38c   :  { %v9090_v3 = vpop.eup %9089  ;;  %9099 = vlog2.f32 %v5602_v36  ;;  %v4823_v56 = vand.u32 2147483647, %v12187_v53  ;;  %v4623_v60 = vmax.f32 %v12146_v16, 0.0 }
 0x38d   :  { %v9092_v40 = vpop.eup %9091  ;;  %v6578_v32 = vsub.f32 %v6186_v22, %v6382_v41  ;;  %v5603_v24 = vadd.f32 1.0, %v9090_v3  ;;  %9101 = vpow2.f32 %v5367_v35  ;;  %v12196_v42 = vadd.f32 %v4119_v6, %v3303_v51 }
 0x38e   :  { %v5944_v39 = vmul.f32 0.6931472, %v9092_v40  ;;  %v5019_v17 = vsub.f32 0.0, %v4823_v56  ;;  %v4622_v6 = vmax.f32 %v12135_v54, 0.0  ;;  %v4427_v40 = vld [vmem:[%s12645_s3 + $0x4c0] sm:$0xff] }
 0x38f   :  { %v6921_v7 = vsel %vm6627_vm0, %v6578_v32, 0.0  ;;  %9103 = vlog2.f32 %v5603_v24  ;;  %v3307_v18 = vpop.f32.mrb[208].mxu1  ;;  %v4124_v31 = vpop.f32.mrb[60].mxu0  ;;  %v4824_v33 = vand.u32 2147483647, %v12196_v42 }
 0x390   :  { %v9094_v4 = vpop.eup %9093  ;;  %v6922_v29 = vadd.f32 %v6921_v7, %v6920_v2  ;;  %v6187_v37 = vadd.f32 %v5944_v39, %v4619_v1  ;;  %9105 = vpow2.f32 %v5369_v8  ;;  %v3309_v26 = vpop.f32.mrb[209].mxu1  ;;  %v5371_v63 = vmul.f32 1.442695, %v5019_v17  ;;  %v4426_v2 = vld [vmem:[%s12645_s3 + $0x4b8] sm:$0xff] }
 0x391   :  { %v9096_v14 = vpop.eup %9095  ;;  %v5946_v10 = vmul.f32 0.6931472, %v9094_v4  ;;  %v4126_v30 = vpop.f32.mrb[61].mxu0  ;;  %v3308_v50 = vadd.f32 %v12088_v59, %v3307_v18  ;;  %v5020_v44 = vsub.f32 0.0, %v4824_v33  ;;  %v6386_v51 = vmul.f32 %v4426_v2, %v12135_v54 }
 0x392   :  { %v9098_v11 = vpop.eup %9097  ;;  %v6579_v38 = vsub.f32 %v6187_v37, %v6383_v13  ;;  %v5604_v43 = vadd.f32 1.0, %v9096_v14  ;;  %v3310_v46 = vpop.f32.mrb[210].mxu1 }
 0x393   :  { %v4127_v47 = vpop.f32.mrb[62].mxu0  ;;  %v6188_v27 = vadd.f32 %v5946_v10, %v4620_v28  ;;  %v5948_v49 = vmul.f32 0.6931472, %v9098_v11  ;;  %v3311_v23 = vadd.f32 %v12088_v59, %v3310_v46  ;;  %v3312_v0 = vpop.f32.mrb[211].mxu1  ;;  %v12211_v41 = vadd.f32 %v4124_v31, %v3308_v50 }
 0x394   :  { %v4129_v45 = vpop.f32.mrb[63].mxu0  ;;  %v6923_v55 = vsel %vm6627_vm0, %v6579_v38, 0.0  ;;  %9107 = vlog2.f32 %v5604_v43  ;;  %v5373_v22 = vmul.f32 1.442695, %v5020_v44  ;;  %v6387_v31 = vmul.f32 %v4427_v40, %v12146_v16  ;;  %v4428_v16 = vld [vmem:[%s12645_s3 + $0x4c8] sm:$0xff] }
 0x395   :  { %v6924_v34 = vadd.f32 %v6923_v55, %v6922_v29  ;;  %v6580_v15 = vsub.f32 %v6188_v27, %v6384_v20  ;;  %v6189_v62 = vadd.f32 %v5948_v49, %v4621_v5  ;;  %9109 = vpow2.f32 %v5371_v63 }
 0x396   :  { %v4825_v21 = vand.u32 2147483647, %v12211_v41  ;;  %v9100_v36 = vpop.eup %9099  ;;  %v12217_v57 = vadd.f32 %v4127_v47, %v3311_v23  ;;  %9111 = vpow2.f32 %v5373_v22  ;;  %v4624_v46 = vmax.f32 %v12156_v61, 0.0 }
 0x397   :  { %v6925_v12 = vsel %vm6627_vm0, %v6580_v15, 0.0  ;;  %v6581_v25 = vsub.f32 %v6189_v62, %v6385_v19  ;;  %v3315_v48 = vpop.f32.mrb[212].mxu1  ;;  %v9102_v3 = vpop.eup %9101  ;;  %v5950_v35 = vmul.f32 0.6931472, %v9100_v36  ;;  %v6388_v62 = vmul.f32 %v4428_v16, %v12156_v61  ;;  %v4429_v61 = vld [vmem:[%s12645_s3 + $0x4d0] sm:$0xff] }
 0x398   :  { %v6926_v1 = vadd.f32 %v6925_v12, %v6924_v34  ;;  %v5021_v32 = vsub.f32 0.0, %v4825_v21  ;;  %v4132_v24 = vpop.f32.mrb[64].mxu0  ;;  %v3317_v8 = vpop.f32.mrb[213].mxu1  ;;  %v5605_v54 = vadd.f32 1.0, %v9102_v3  ;;  %v4826_v56 = vand.u32 2147483647, %v12217_v57 }
 0x399   :  { %v9104_v39 = vpop.eup %9103  ;;  %v6927_v13 = vsel %vm6627_vm0, %v6581_v25, 0.0  ;;  %v4134_v7 = vpop.f32.mrb[65].mxu0  ;;  %v6190_v4 = vadd.f32 %v5950_v35, %v4622_v6  ;;  %v3316_v30 = vadd.f32 %v12088_v59, %v3315_v48 }
 0x39a   :  { %v9106_v28 = vpop.eup %9105  ;;  %v6928_v18 = vadd.f32 %v6927_v13, %v6926_v1  ;;  %v5952_v29 = vmul.f32 0.6931472, %v9104_v39  ;;  %v5375_v37 = vmul.f32 1.442695, %v5021_v32  ;;  %v3318_v9 = vpop.f32.mrb[214].mxu1  ;;  %9113 = vlog2.f32 %v5605_v54 }
 0x39b   :  { %v4135_v17 = vpop.f32.mrb[66].mxu0  ;;  %v5606_v26 = vadd.f32 1.0, %v9106_v28  ;;  %v5022_v14 = vsub.f32 0.0, %v4826_v56  ;;  %v3320_v10 = vpop.f32.mrb[215].mxu1  ;;  %v6582_v5 = vsub.f32 %v6190_v4, %v6386_v51  ;;  %v3319_v38 = vadd.f32 %v12088_v59, %v3318_v9  ;;  %v4430_v4 = vld [vmem:[%s12645_s3 + $0x4d8] sm:$0xff] }
 0x39c   :  { %v4137_v20 = vpop.f32.mrb[67].mxu0  ;;  %v6191_v33 = vadd.f32 %v5952_v29, %v4623_v60  ;;  %9115 = vpow2.f32 %v5375_v37  ;;  %v12233_v47 = vadd.f32 %v4132_v24, %v3316_v30  ;;  %v4625_v24 = vmax.f32 %v12168_v52, 0.0 }
 0x39d   :  { %9117 = vlog2.f32 %v5606_v26  ;;  %v5377_v11 = vmul.f32 1.442695, %v5022_v14  ;;  %v6929_v63 = vsel %vm6627_vm0, %v6582_v5, 0.0  ;;  %v12235_v23 = vadd.f32 %v4135_v17, %v3319_v38 }
 0x39e   :  { %v9108_v43 = vpop.eup %9107  ;;  %v6583_v50 = vsub.f32 %v6191_v33, %v6387_v31  ;;  %v6930_v49 = vadd.f32 %v6929_v63, %v6928_v18  ;;  %v4827_v19 = vand.u32 2147483647, %v12233_v47  ;;  %v6389_v9 = vmul.f32 %v4429_v61, %v12168_v52 }
 0x39f   :  { %v9110_v27 = vpop.eup %9109  ;;  %v5954_v44 = vmul.f32 0.6931472, %v9108_v43  ;;  %9119 = vpow2.f32 %v5377_v11  ;;  %v3323_v0 = vpop.f32.mrb[216].mxu1  ;;  %v4828_v12 = vand.u32 2147483647, %v12235_v23  ;;  %v4626_v10 = vmax.f32 %v12171_v58, 0.0 }
 0x3a0   :  { %v6931_v45 = vsel %vm6627_vm0, %v6583_v50, 0.0  ;;  %v5607_v55 = vadd.f32 1.0, %v9110_v27  ;;  %v4140_v2 = vpop.f32.mrb[68].mxu0  ;;  %v3325_v6 = vpop.f32.mrb[217].mxu1  ;;  %v5023_v36 = vsub.f32 0.0, %v4827_v19  ;;  %v3324_v1 = vadd.f32 %v12088_v59, %v3323_v0  ;;  %v4431_v0 = vld [vmem:[%s12645_s3 + $0x4e0] sm:$0xff] }
 0x3a1   :  { %v6932_v34 = vadd.f32 %v6931_v45, %v6930_v49  ;;  %v6192_v15 = vadd.f32 %v5954_v44, %v4624_v46  ;;  %v4142_v22 = vpop.f32.mrb[69].mxu0  ;;  %v9112_v21 = vpop.eup %9111  ;;  %v5024_v39 = vsub.f32 0.0, %v4828_v12  ;;  %v6390_v11 = vmul.f32 %v4430_v4, %v12171_v58 }
 0x3a2   :  { %9121 = vlog2.f32 %v5607_v55  ;;  %v3326_v25 = vpop.f32.mrb[218].mxu1  ;;  %v4143_v51 = vpop.f32.mrb[70].mxu0  ;;  %v5608_v3 = vadd.f32 1.0, %v9112_v21  ;;  %v5379_v8 = vmul.f32 1.442695, %v5023_v36  ;;  %v12248_v54 = vadd.f32 %v4140_v2, %v3324_v1 }
 0x3a3   :  { %v6584_v48 = vsub.f32 %v6192_v15, %v6388_v62  ;;  %v3327_v35 = vadd.f32 %v12088_v59, %v3326_v25  ;;  %v3328_v40 = vpop.f32.mrb[219].mxu1  ;;  %v4145_v32 = vpop.f32.mrb[71].mxu0  ;;  %v5381_v29 = vmul.f32 1.442695, %v5024_v39  ;;  %v4627_v45 = vmax.f32 %v12187_v53, 0.0 }
 0x3a4   :  { %v9114_v13 = vpop.eup %9113  ;;  %9123 = vlog2.f32 %v5608_v3  ;;  %v4829_v31 = vand.u32 2147483647, %v12248_v54  ;;  %v6391_v25 = vmul.f32 %v4431_v0, %v12187_v53  ;;  %v4434_v0 = vld [vmem:[%s12645_s3 + $0x4f8] sm:$0xff] }
 0x3a5   :  { %v6933_v60 = vsel %vm6627_vm0, %v6584_v48, 0.0  ;;  %v12250_v56 = vadd.f32 %v4143_v51, %v3327_v35  ;;  %v5956_v18 = vmul.f32 0.6931472, %v9114_v13  ;;  %9125 = vpow2.f32 %v5379_v8  ;;  %v4432_v51 = vld [vmem:[%s12645_s3 + $0x4e8] sm:$0xff] }
 0x3a6   :  { %v9116_v7 = vpop.eup %9115  ;;  %v6934_v28 = vadd.f32 %v6933_v60, %v6932_v34  ;;  %9127 = vpow2.f32 %v5381_v29  ;;  %v5025_v38 = vsub.f32 0.0, %v4829_v31  ;;  %v4433_v31 = vld [vmem:[%s12645_s3 + $0x4f0] sm:$0xff] }
 0x3a7   :  { %v9118_v37 = vpop.eup %9117  ;;  %v5609_v17 = vadd.f32 1.0, %v9116_v7  ;;  %v3331_v26 = vpop.f32.mrb[220].mxu1  ;;  %v6193_v14 = vadd.f32 %v5956_v18, %v4625_v24  ;;  %v4830_v43 = vand.u32 2147483647, %v12250_v56  ;;  %v4628_v24 = vmax.f32 %v12196_v42, 0.0 }
 0x3a8   :  { %v5958_v20 = vmul.f32 0.6931472, %v9118_v37  ;;  %v4148_v5 = vpop.f32.mrb[72].mxu0  ;;  %v3333_v33 = vpop.f32.mrb[221].mxu1  ;;  %v3332_v27 = vadd.f32 %v12088_v59, %v3331_v26  ;;  %v5383_v58 = vmul.f32 1.442695, %v5025_v38 }
 0x3a9   :  { %v9120_v30 = vpop.eup %9119  ;;  %9129 = vlog2.f32 %v5609_v17  ;;  %v4150_v63 = vpop.f32.mrb[73].mxu0  ;;  %v6585_v50 = vsub.f32 %v6193_v14, %v6389_v9  ;;  %v5026_v55 = vsub.f32 0.0, %v4830_v43  ;;  %v4629_v26 = vmax.f32 %v12211_v41, 0.0 }
 0x3aa   :  { %v3334_v52 = vpop.f32.mrb[222].mxu1  ;;  %v6194_v16 = vadd.f32 %v5958_v20, %v4626_v10  ;;  %v5610_v46 = vadd.f32 1.0, %v9120_v30  ;;  %v4151_v49 = vpop.f32.mrb[74].mxu0  ;;  %v12267_v6 = vadd.f32 %v4148_v5, %v3332_v27 }
 0x3ab   :  { %v3336_v44 = vpop.f32.mrb[223].mxu1  ;;  %v3335_v19 = vadd.f32 %v12088_v59, %v3334_v52  ;;  %v4153_v2 = vpop.f32.mrb[75].mxu0  ;;  %v6935_v15 = vsel %vm6627_vm0, %v6585_v50, 0.0  ;;  %v5385_v36 = vmul.f32 1.442695, %v5026_v55  ;;  %v6393_v50 = vmul.f32 %v4433_v31, %v12211_v41 }
 0x3ac   :  { %v9122_v34 = vpop.eup %9121  ;;  %v6586_v62 = vsub.f32 %v6194_v16, %v6390_v11  ;;  %9131 = vlog2.f32 %v5610_v46  ;;  %v6936_v22 = vadd.f32 %v6935_v15, %v6934_v28  ;;  %v4831_v48 = vand.u32 2147483647, %v12267_v6 }
 0x3ad   :  { %v5960_v21 = vmul.f32 0.6931472, %v9122_v34  ;;  %9133 = vpow2.f32 %v5383_v58  ;;  %v12275_v40 = vadd.f32 %v4151_v49, %v3335_v19  ;;  %v6392_v28 = vmul.f32 %v4432_v51, %v12196_v42 }
 0x3ae   :  { %v6937_v12 = vsel %vm6627_vm0, %v6586_v62, 0.0  ;;  %v9124_v3 = vpop.eup %9123  ;;  %9135 = vpow2.f32 %v5385_v36  ;;  %v5027_v39 = vsub.f32 0.0, %v4831_v48  ;;  %v6394_v48 = vmul.f32 %v4434_v0, %v12217_v57 }
 0x3af   :  { %v6938_v1 = vadd.f32 %v6937_v12, %v6936_v22  ;;  %v6195_v35 = vadd.f32 %v5960_v21, %v4627_v45  ;;  %v3339_v32 = vpop.f32.mrb[224].mxu1  ;;  %v9126_v61 = vpop.eup %9125  ;;  %v5962_v8 = vmul.f32 0.6931472, %v9124_v3  ;;  %v4832_v4 = vand.u32 2147483647, %v12275_v40 }
 0x3b0   :  { %v3340_v53 = vadd.f32 %v12088_v59, %v3339_v32  ;;  %v4156_v13 = vpop.f32.mrb[76].mxu0  ;;  %v3341_v60 = vpop.f32.mrb[225].mxu1  ;;  %v5611_v18 = vadd.f32 1.0, %v9126_v61  ;;  %v5387_v14 = vmul.f32 1.442695, %v5027_v39  ;;  %v4630_v45 = vmax.f32 %v12217_v57, 0.0 }
 0x3b1   :  { %v6587_v7 = vsub.f32 %v6195_v35, %v6391_v25  ;;  %v4158_v29 = vpop.f32.mrb[77].mxu0  ;;  %v3342_v37 = vpop.f32.mrb[226].mxu1  ;;  %v6196_v17 = vadd.f32 %v5962_v8, %v4628_v24  ;;  %v5028_v11 = vsub.f32 0.0, %v4832_v4 }
 0x3b2   :  { %v9128_v9 = vpop.eup %9127  ;;  %v12285_v10 = vadd.f32 %v4156_v13, %v3340_v53  ;;  %v4159_v20 = vpop.f32.mrb[78].mxu0  ;;  %9137 = vlog2.f32 %v5611_v18  ;;  %v3343_v58 = vadd.f32 %v12088_v59, %v3342_v37  ;;  %v4435_v13 = vld [vmem:[%s12645_s3 + $0x500] sm:$0xff]  ;;  %v4631_v29 = vmax.f32 %v12233_v47, 0.0 }
 0x3b3   :  { %v3344_v5 = vpop.f32.mrb[227].mxu1  ;;  %v9130_v33 = vpop.eup %9129  ;;  %v6939_v42 = vsel %vm6627_vm0, %v6587_v7, 0.0  ;;  %v5612_v30 = vadd.f32 1.0, %v9128_v9  ;;  %v6588_v63 = vsub.f32 %v6196_v17, %v6392_v28  ;;  %9139 = vpow2.f32 %v5387_v14  ;;  %v4436_v14 = vld [vmem:[%s12645_s3 + $0x508] sm:$0xff] }
 0x3b4   :  { %v4161_v38 = vpop.f32.mrb[79].mxu0  ;;  %v6940_v43 = vadd.f32 %v6939_v42, %v6938_v1  ;;  %v5964_v52 = vmul.f32 0.6931472, %v9130_v33  ;;  %v5389_v16 = vmul.f32 1.442695, %v5028_v11  ;;  %v12296_v22 = vadd.f32 %v4159_v20, %v3343_v58 }
 0x3b5   :  { %9141 = vlog2.f32 %v5612_v30  ;;  %v4833_v46 = vand.u32 2147483647, %v12285_v10  ;;  %v6941_v49 = vsel %vm6627_vm0, %v6588_v63, 0.0  ;;  %v4632_v33 = vmax.f32 %v12235_v23, 0.0 }
 0x3b6   :  { %v9132_v27 = vpop.eup %9131  ;;  %v6197_v44 = vadd.f32 %v5964_v52, %v4629_v26  ;;  %v6942_v19 = vadd.f32 %v6941_v49, %v6940_v43  ;;  %9143 = vpow2.f32 %v5389_v16  ;;  %v4834_v60 = vand.u32 2147483647, %v12296_v22 }
 0x3b7   :  { %v9134_v55 = vpop.eup %9133  ;;  %v5966_v2 = vmul.f32 0.6931472, %v9132_v27  ;;  %v5029_v41 = vsub.f32 0.0, %v4833_v46  ;;  %v3347_v34 = vpop.f32.mrb[228].mxu1  ;;  %v6395_v26 = vmul.f32 %v4435_v13, %v12233_v47  ;;  %v4437_v47 = vld [vmem:[%s12645_s3 + $0x510] sm:$0xff]  ;;  %v6396_v49 = vmul.f32 %v4436_v14, %v12235_v23 }
 0x3b8   :  { %v6589_v15 = vsub.f32 %v6197_v44, %v6393_v50  ;;  %v5613_v62 = vadd.f32 1.0, %v9134_v55  ;;  %v3348_v21 = vadd.f32 %v12088_v59, %v3347_v34  ;;  %v4164_v36 = vpop.f32.mrb[80].mxu0  ;;  %v3349_v12 = vpop.f32.mrb[229].mxu1  ;;  %v5030_v37 = vsub.f32 0.0, %v4834_v60 }
 0x3b9   :  { %v9136_v25 = vpop.eup %9135  ;;  %v6198_v51 = vadd.f32 %v5966_v2, %v4630_v45  ;;  %v5391_v3 = vmul.f32 1.442695, %v5029_v41  ;;  %v4166_v1 = vpop.f32.mrb[81].mxu0  ;;  %v4633_v44 = vmax.f32 %v12248_v54, 0.0 }
 0x3ba   :  { %v3350_v35 = vpop.f32.mrb[230].mxu1  ;;  %v6943_v32 = vsel %vm6627_vm0, %v6589_v15, 0.0  ;;  %9145 = vlog2.f32 %v5613_v62  ;;  %v5614_v61 = vadd.f32 1.0, %v9136_v25  ;;  %v4167_v24 = vpop.f32.mrb[82].mxu0  ;;  %v12305_v57 = vadd.f32 %v4164_v36, %v3348_v21 }
 0x3bb   :  { %v3352_v8 = vpop.f32.mrb[231].mxu1  ;;  %v6944_v39 = vadd.f32 %v6943_v32, %v6942_v19  ;;  %v6590_v53 = vsub.f32 %v6198_v51, %v6394_v48  ;;  %9147 = vpow2.f32 %v5391_v3  ;;  %v4169_v7 = vpop.f32.mrb[83].mxu0  ;;  %v3351_v28 = vadd.f32 %v12088_v59, %v3350_v35  ;;  %v12329_v51 = vld [vmem:[#allocation2] ss:$0 sm:$0xff] }
 0x3bc   :  { %9149 = vlog2.f32 %v5614_v61  ;;  %v9138_v18 = vpop.eup %9137  ;;  %v4835_v20 = vand.u32 2147483647, %v12305_v57  ;;  %v5393_v30 = vmul.f32 1.442695, %v5030_v37  ;;  %v4634_v8 = vmax.f32 %v12250_v56, 0.0 }
 0x3bd   :  { %v6945_v4 = vsel %vm6627_vm0, %v6590_v53, 0.0  ;;  %v9140_v9 = vpop.eup %9139  ;;  %v5968_v31 = vmul.f32 0.6931472, %v9138_v18  ;;  %v12316_v11 = vadd.f32 %v4167_v24, %v3351_v28  ;;  %v4438_v24 = vld [vmem:[%s12645_s3 + $0x518] sm:$0xff] }
 0x3be   :  { %v6946_v17 = vadd.f32 %v6945_v4, %v6944_v39  ;;  %v5615_v42 = vadd.f32 1.0, %v9140_v9  ;;  %v5031_v52 = vsub.f32 0.0, %v4835_v20 }
 0x3bf   :  { %v9142_v5 = vpop.eup %9141  ;;  %v3355_v38 = vpop.f32.mrb[232].mxu1  ;;  %v6199_v43 = vadd.f32 %v5968_v31, %v4631_v29  ;;  %v4836_v0 = vand.u32 2147483647, %v12316_v11  ;;  %v6398_v31 = vmul.f32 %v4438_v24, %v12250_v56 }
 0x3c0   :  { %v5970_v63 = vmul.f32 0.6931472, %v9142_v5  ;;  %v3356_v50 = vadd.f32 %v12088_v59, %v3355_v38  ;;  %v4172_v16 = vpop.f32.mrb[84].mxu0  ;;  %v3357_v46 = vpop.f32.mrb[233].mxu1  ;;  %9151 = vlog2.f32 %v5615_v42  ;;  %v6397_v59 = vmul.f32 %v4437_v47, %v12248_v54 }
 0x3c1   :  { %v9144_v27 = vpop.eup %9143  ;;  %v4174_v45 = vpop.f32.mrb[85].mxu0  ;;  %v6591_v55 = vsub.f32 %v6199_v43, %v6395_v26  ;;  %9153 = vpow2.f32 %v5393_v30  ;;  %v5395_v15 = vmul.f32 1.442695, %v5031_v52  ;;  %v5032_v62 = vsub.f32 0.0, %v4836_v0  ;;  %v4439_v26 = vld [vmem:[%s12645_s3 + $0x520] sm:$0xff] }
 0x3c2   :  { %v3358_v58 = vpop.f32.mrb[234].mxu1  ;;  %v6200_v19 = vadd.f32 %v5970_v63, %v4632_v33  ;;  %v5616_v2 = vadd.f32 1.0, %v9144_v27  ;;  %v4175_v41 = vpop.f32.mrb[86].mxu0  ;;  %v12326_v21 = vadd.f32 %v4172_v16, %v3356_v50  ;;  %v4635_v33 = vmax.f32 %v12267_v6, 0.0 }
 0x3c3   :  { %v3360_v34 = vpop.f32.mrb[235].mxu1  ;;  %v4177_v23 = vpop.f32.mrb[87].mxu0  ;;  %v6947_v12 = vsel %vm6627_vm0, %v6591_v55, 0.0  ;;  %v3359_v48 = vadd.f32 %v12329_v51, %v3358_v58  ;;  %v5397_v32 = vmul.f32 1.442695, %v5032_v62  ;;  %v6399_v45 = vmul.f32 %v4439_v26, %v12267_v6 }
 0x3c4   :  { %v9146_v36 = vpop.eup %9145  ;;  %v6592_v25 = vsub.f32 %v6200_v19, %v6396_v49  ;;  %9155 = vlog2.f32 %v5616_v2  ;;  %v6948_v1 = vadd.f32 %v6947_v12, %v6946_v17  ;;  %v4837_v53 = vand.u32 2147483647, %v12326_v21  ;;  %v4440_v34 = vld [vmem:[%s12645_s3 + $0x528] sm:$0xff] }
 0x3c5   :  { %v9148_v3 = vpop.eup %9147  ;;  %v5972_v35 = vmul.f32 0.6931472, %v9146_v36  ;;  %9157 = vpow2.f32 %v5395_v15  ;;  %v12338_v4 = vadd.f32 %v4175_v41, %v3359_v48 }
 0x3c6   :  { %v9150_v54 = vpop.eup %9149  ;;  %v6949_v61 = vsel %vm6627_vm0, %v6592_v25, 0.0  ;;  %v5617_v39 = vadd.f32 1.0, %v9148_v3  ;;  %9159 = vpow2.f32 %v5397_v32  ;;  %v5033_v18 = vsub.f32 0.0, %v4837_v53 }
 0x3c7   :  { %v6950_v13 = vadd.f32 %v6949_v61, %v6948_v1  ;;  %v6201_v60 = vadd.f32 %v5972_v35, %v4633_v44  ;;  %v5974_v7 = vmul.f32 0.6931472, %v9150_v54  ;;  %v3363_v28 = vpop.f32.mrb[236].mxu1  ;;  %v4180_v29 = vpop.f32.mrb[88].mxu0  ;;  %v4838_v30 = vand.u32 2147483647, %v12338_v4 }
 0x3c8   :  { %9161 = vlog2.f32 %v5617_v39  ;;  %v3365_v37 = vpop.f32.mrb[237].mxu1  ;;  %v3364_v14 = vadd.f32 %v12329_v51, %v3363_v28  ;;  %v4182_v20 = vpop.f32.mrb[89].mxu0  ;;  %v5399_v42 = vmul.f32 1.442695, %v5033_v18  ;;  %v6400_v61 = vmul.f32 %v4440_v34, %v12275_v40 }
 0x3c9   :  { %v6593_v9 = vsub.f32 %v6201_v60, %v6397_v59  ;;  %v6202_v17 = vadd.f32 %v5974_v7, %v4634_v8  ;;  %v3366_v5 = vpop.f32.mrb[238].mxu1  ;;  %v4183_v38 = vpop.f32.mrb[90].mxu0  ;;  %v5034_v44 = vsub.f32 0.0, %v4838_v30  ;;  %v4636_v59 = vmax.f32 %v12275_v40, 0.0  ;;  %v4441_v60 = vld [vmem:[%s12645_s3 + $0x530] sm:$0xff] }
 0x3ca   :  { %v9152_v43 = vpop.eup %9151  ;;  %v12348_v52 = vadd.f32 %v4180_v29, %v3364_v14  ;;  %v3367_v56 = vadd.f32 %v12329_v51, %v3366_v5  ;;  %v3368_v50 = vpop.f32.mrb[239].mxu1  ;;  %9163 = vpow2.f32 %v5399_v42  ;;  %v4637_v7 = vmax.f32 %v12285_v10, 0.0 }
 0x3cb   :  { %v6951_v63 = vsel %vm6627_vm0, %v6593_v9, 0.0  ;;  %v6594_v47 = vsub.f32 %v6202_v17, %v6398_v31  ;;  %v4185_v16 = vpop.f32.mrb[91].mxu0  ;;  %v9154_v46 = vpop.eup %9153  ;;  %v5976_v49 = vmul.f32 0.6931472, %v9152_v43  ;;  %v5401_v15 = vmul.f32 1.442695, %v5034_v44 }
 0x3cc   :  { %v6952_v27 = vadd.f32 %v6951_v63, %v6950_v13  ;;  %v5618_v58 = vadd.f32 1.0, %v9154_v46  ;;  %v4839_v55 = vand.u32 2147483647, %v12348_v52  ;;  %v12358_v12 = vadd.f32 %v4183_v38, %v3367_v56  ;;  %v4442_v56 = vld [vmem:[%s12645_s3 + $0x538] sm:$0xff] }
 0x3cd   :  { %v6953_v0 = vsel %vm6627_vm0, %v6594_v47, 0.0  ;;  %v6203_v41 = vadd.f32 %v5976_v49, %v4635_v33  ;;  %v6401_v42 = vmul.f32 %v4441_v60, %v12285_v10 }
 0x3ce   :  { %v9156_v19 = vpop.eup %9155  ;;  %v6954_v2 = vadd.f32 %v6953_v0, %v6952_v27  ;;  %9165 = vlog2.f32 %v5618_v58  ;;  %v5035_v36 = vsub.f32 0.0, %v4839_v55  ;;  %v4840_v8 = vand.u32 2147483647, %v12358_v12  ;;  %v4443_v27 = vld [vmem:[%s12645_s3 + $0x540] sm:$0xff] }
 0x3cf   :  { %v9158_v62 = vpop.eup %9157  ;;  %v5978_v23 = vmul.f32 0.6931472, %v9156_v19  ;;  %v3371_v6 = vpop.f32.mrb[240].mxu1  ;;  %v6595_v25 = vsub.f32 %v6203_v41, %v6399_v45  ;;  %9167 = vpow2.f32 %v5401_v15  ;;  %v4638_v55 = vmax.f32 %v12296_v22, 0.0 }
 0x3d0   :  { %v5619_v48 = vadd.f32 1.0, %v9158_v62  ;;  %v3372_v3 = vadd.f32 %v12329_v51, %v3371_v6  ;;  %v4188_v1 = vpop.f32.mrb[92].mxu0  ;;  %v3373_v35 = vpop.f32.mrb[241].mxu1  ;;  %v5403_v24 = vmul.f32 1.442695, %v5035_v36  ;;  %v5036_v26 = vsub.f32 0.0, %v4840_v8 }
 0x3d1   :  { %v9160_v32 = vpop.eup %9159  ;;  %v6204_v54 = vadd.f32 %v5978_v23, %v4636_v59  ;;  %v4190_v39 = vpop.f32.mrb[93].mxu0  ;;  %v6955_v13 = vsel %vm6627_vm0, %v6595_v25, 0.0  ;;  %v6402_v62 = vmul.f32 %v4442_v56, %v12296_v22  ;;  %v4444_v25 = vld [vmem:[%s12645_s3 + $0x548] sm:$0xff]  ;;  %v6403_v22 = vmul.f32 %v4443_v27, %v12305_v57 }
 0x3d2   :  { %v9162_v53 = vpop.eup %9161  ;;  %9169 = vlog2.f32 %v5619_v48  ;;  %v5620_v28 = vadd.f32 1.0, %v9160_v32  ;;  %v3374_v18 = vpop.f32.mrb[242].mxu1  ;;  %v6956_v37 = vadd.f32 %v6955_v13, %v6954_v2  ;;  %v12368_v14 = vadd.f32 %v4188_v1, %v3372_v3 }
 0x3d3   :  { %v4191_v29 = vpop.f32.mrb[94].mxu0  ;;  %v6596_v9 = vsub.f32 %v6204_v54, %v6400_v61  ;;  %v5980_v40 = vmul.f32 0.6931472, %v9162_v53  ;;  %9171 = vpow2.f32 %v5403_v24  ;;  %v3376_v17 = vpop.f32.mrb[243].mxu1  ;;  %v3375_v20 = vadd.f32 %v12329_v51, %v3374_v18 }
 0x3d4   :  { %v4193_v31 = vpop.f32.mrb[95].mxu0  ;;  %9173 = vlog2.f32 %v5620_v28  ;;  %v9164_v30 = vpop.eup %9163  ;;  %v5405_v43 = vmul.f32 1.442695, %v5036_v26  ;;  %v4841_v63 = vand.u32 2147483647, %v12368_v14  ;;  %v4639_v24 = vmax.f32 %v12305_v57, 0.0 }
 0x3d5   :  { %v6957_v5 = vsel %vm6627_vm0, %v6596_v9, 0.0  ;;  %v6205_v33 = vadd.f32 %v5980_v40, %v4637_v7  ;;  %v5621_v50 = vadd.f32 1.0, %v9164_v30  ;;  %v12377_v16 = vadd.f32 %v4191_v29, %v3375_v20 }
 0x3d6   :  { %v6958_v38 = vadd.f32 %v6957_v5, %v6956_v37  ;;  %9175 = vpow2.f32 %v5405_v43  ;;  %v5037_v10 = vsub.f32 0.0, %v4841_v63  ;;  %v4640_v53 = vmax.f32 %v12316_v11, 0.0 }
 0x3d7   :  { %v6597_v47 = vsub.f32 %v6205_v33, %v6401_v42  ;;  %v3379_v46 = vpop.f32.mrb[244].mxu1  ;;  %v4196_v44 = vpop.f32.mrb[96].mxu0  ;;  %9177 = vlog2.f32 %v5621_v50  ;;  %v4842_v19 = vand.u32 2147483647, %v12377_v16  ;;  %v6404_v28 = vmul.f32 %v4444_v25, %v12316_v11 }
 0x3d8   :  { %v3380_v49 = vadd.f32 %v12329_v51, %v3379_v46  ;;  %v3381_v0 = vpop.f32.mrb[245].mxu1  ;;  %v9166_v45 = vpop.eup %9165  ;;  %v5407_v23 = vmul.f32 1.442695, %v5037_v10  ;;  %v4641_v30 = vmax.f32 %v12326_v21, 0.0 }
 0x3d9   :  { %v6959_v58 = vsel %vm6627_vm0, %v6597_v47, 0.0  ;;  %v4198_v2 = vpop.f32.mrb[97].mxu0  ;;  %v3382_v41 = vpop.f32.mrb[246].mxu1  ;;  %v5982_v15 = vmul.f32 0.6931472, %v9166_v45  ;;  %v5038_v3 = vsub.f32 0.0, %v4842_v19 }
 0x3da   :  { %v9168_v34 = vpop.eup %9167  ;;  %v6960_v59 = vadd.f32 %v6959_v58, %v6958_v38  ;;  %v4199_v36 = vpop.f32.mrb[98].mxu0  ;;  %v12390_v1 = vadd.f32 %v4196_v44, %v3380_v49  ;;  %v3383_v35 = vadd.f32 %v12329_v51, %v3382_v41  ;;  %9179 = vpow2.f32 %v5407_v23  ;;  %v4445_v0 = vld [vmem:[%s12645_s3 + $0x550] sm:$0xff] }
 0x3db   :  { %v3384_v6 = vpop.f32.mrb[247].mxu1  ;;  %v5622_v48 = vadd.f32 1.0, %v9168_v34  ;;  %v4201_v32 = vpop.f32.mrb[99].mxu0  ;;  %v6206_v61 = vadd.f32 %v5982_v15, %v4638_v55  ;;  %v5409_v13 = vmul.f32 1.442695, %v5038_v3  ;;  %v4642_v3 = vmax.f32 %v12338_v4, 0.0 }
 0x3dc   :  { %v9170_v54 = vpop.eup %9169  ;;  %v4843_v29 = vand.u32 2147483647, %v12390_v1  ;;  %v12398_v40 = vadd.f32 %v4199_v36, %v3383_v35  ;;  %v6405_v36 = vmul.f32 %v4445_v0, %v12326_v21  ;;  %v4446_v6 = vld [vmem:[%s12645_s3 + $0x558] sm:$0xff] }
 0x3dd   :  { %v9172_v8 = vpop.eup %9171  ;;  %v5984_v39 = vmul.f32 0.6931472, %v9170_v54  ;;  %9181 = vlog2.f32 %v5622_v48  ;;  %v6598_v7 = vsub.f32 %v6206_v61, %v6402_v62 }
 0x3de   :  { %v9174_v60 = vpop.eup %9173  ;;  %v5623_v18 = vadd.f32 1.0, %v9172_v8  ;;  %9183 = vpow2.f32 %v5409_v13  ;;  %v5039_v31 = vsub.f32 0.0, %v4843_v29  ;;  %v4844_v56 = vand.u32 2147483647, %v12398_v40 }
 0x3df   :  { %v6207_v37 = vadd.f32 %v5984_v39, %v4639_v24  ;;  %v5986_v9 = vmul.f32 0.6931472, %v9174_v60  ;;  %v3387_v57 = vpop.f32.mrb[248].mxu1  ;;  %v6961_v17 = vsel %vm6627_vm0, %v6598_v7, 0.0  ;;  %v4204_v20 = vpop.f32.mrb[100].mxu0  ;;  %v6406_v13 = vmul.f32 %v4446_v6, %v12338_v4 }
 0x3e0   :  { %9185 = vlog2.f32 %v5623_v18  ;;  %v3388_v26 = vadd.f32 %v12329_v51, %v3387_v57  ;;  %v3389_v5 = vpop.f32.mrb[249].mxu1  ;;  %v6962_v33 = vadd.f32 %v6961_v17, %v6960_v59  ;;  %v4206_v38 = vpop.f32.mrb[101].mxu0  ;;  %v5411_v47 = vmul.f32 1.442695, %v5039_v31 }
 0x3e1   :  { %v6599_v42 = vsub.f32 %v6207_v37, %v6403_v22  ;;  %v6208_v11 = vadd.f32 %v5986_v9, %v4640_v53  ;;  %v3390_v43 = vpop.f32.mrb[250].mxu1  ;;  %v9176_v63 = vpop.eup %9175  ;;  %v5040_v41 = vsub.f32 0.0, %v4844_v56  ;;  %v4447_v9 = vld [vmem:[%s12645_s3 + $0x560] sm:$0xff]  ;;  %v4643_v57 = vmax.f32 %v12348_v52, 0.0 }
 0x3e2   :  { %v12404_v50 = vadd.f32 %v4204_v20, %v3388_v26  ;;  %v4207_v46 = vpop.f32.mrb[102].mxu0  ;;  %v3392_v27 = vpop.f32.mrb[251].mxu1  ;;  %v5624_v45 = vadd.f32 1.0, %v9176_v63  ;;  %v3391_v58 = vadd.f32 %v12329_v51, %v3390_v43  ;;  %9187 = vpow2.f32 %v5411_v47 }
 0x3e3   :  { %v9178_v10 = vpop.eup %9177  ;;  %v6963_v49 = vsel %vm6627_vm0, %v6599_v42, 0.0  ;;  %v6600_v44 = vsub.f32 %v6208_v11, %v6404_v28  ;;  %v4209_v55 = vpop.f32.mrb[103].mxu0  ;;  %v5413_v25 = vmul.f32 1.442695, %v5040_v41  ;;  %v6407_v63 = vmul.f32 %v4447_v9, %v12348_v52 }
 0x3e4   :  { %v6964_v19 = vadd.f32 %v6963_v49, %v6962_v33  ;;  %v5988_v2 = vmul.f32 0.6931472, %v9178_v10  ;;  %9189 = vlog2.f32 %v5624_v45  ;;  %v4845_v59 = vand.u32 2147483647, %v12404_v50  ;;  %v9180_v15 = vpop.eup %9179  ;;  %v4448_v45 = vld [vmem:[%s12645_s3 + $0x568] sm:$0xff] }
 0x3e5   :  { %v6965_v34 = vsel %vm6627_vm0, %v6600_v44, 0.0  ;;  %v5625_v35 = vadd.f32 1.0, %v9180_v15  ;;  %v12418_v54 = vadd.f32 %v4207_v46, %v3391_v58  ;;  %9191 = vpow2.f32 %v5413_v25 }
 0x3e6   :  { %v6966_v62 = vadd.f32 %v6965_v34, %v6964_v19  ;;  %v6209_v23 = vadd.f32 %v5988_v2, %v4641_v30  ;;  %v5041_v32 = vsub.f32 0.0, %v4845_v59  ;;  %v4644_v27 = vmax.f32 %v12358_v12, 0.0 }
 0x3e7   :  { %v9182_v48 = vpop.eup %9181  ;;  %v3395_v61 = vpop.f32.mrb[252].mxu1  ;;  %9193 = vlog2.f32 %v5625_v35  ;;  %v4846_v7 = vand.u32 2147483647, %v12418_v54 }
 0x3e8   :  { %v6601_v24 = vsub.f32 %v6209_v23, %v6405_v36  ;;  %v5990_v22 = vmul.f32 0.6931472, %v9182_v48  ;;  %v3396_v8 = vadd.f32 %v12329_v51, %v3395_v61  ;;  %v4212_v39 = vpop.f32.mrb[104].mxu0  ;;  %v3397_v21 = vpop.f32.mrb[253].mxu1  ;;  %v5415_v60 = vmul.f32 1.442695, %v5041_v32 }
 0x3e9   :  { %v9184_v53 = vpop.eup %9183  ;;  %v4214_v28 = vpop.f32.mrb[105].mxu0  ;;  %v5042_v5 = vsub.f32 0.0, %v4846_v7  ;;  %v6408_v48 = vmul.f32 %v4448_v45, %v12358_v12 }
 0x3ea   :  { %v9186_v18 = vpop.eup %9185  ;;  %v6967_v29 = vsel %vm6627_vm0, %v6601_v24, 0.0  ;;  %v6210_v37 = vadd.f32 %v5990_v22, %v4642_v3  ;;  %v5626_v17 = vadd.f32 1.0, %v9184_v53  ;;  %v3398_v31 = vpop.f32.mrb[254].mxu1  ;;  %9195 = vpow2.f32 %v5415_v60  ;;  %v4449_v3 = vld [vmem:[%s12645_s3 + $0x570] sm:$0xff] }
 0x3eb   :  { %v4215_v26 = vpop.f32.mrb[106].mxu0  ;;  %v6968_v20 = vadd.f32 %v6967_v29, %v6966_v62  ;;  %v5992_v4 = vmul.f32 0.6931472, %v9186_v18  ;;  %v3400_v33 = vpop.f32.mrb[255].mxu1  ;;  %v12428_v30 = vadd.f32 %v4212_v39, %v3396_v8  ;;  %v3399_v38 = vadd.f32 %v12329_v51, %v3398_v31 }
 0x3ec   :  { %v4217_v42 = vpop.f32.mrb[107].mxu0  ;;  %v6602_v11 = vsub.f32 %v6210_v37, %v6406_v13  ;;  %9197 = vlog2.f32 %v5626_v17  ;;  %v5417_v47 = vmul.f32 1.442695, %v5042_v5  ;;  %v9188_v56 = vpop.eup %9187  ;;  %v4645_v22 = vmax.f32 %v12368_v14, 0.0  ;;  %v4450_v17 = vld [vmem:[%s12645_s3 + $0x578] sm:$0xff] }
 0x3ed   :  { %v6211_v43 = vadd.f32 %v5992_v4, %v4643_v57  ;;  %v4847_v10 = vand.u32 2147483647, %v12428_v30  ;;  %v5627_v58 = vadd.f32 1.0, %v9188_v56  ;;  %v12438_v2 = vadd.f32 %v4215_v26, %v3399_v38 }
 0x3ee   :  { %v6969_v46 = vsel %vm6627_vm0, %v6602_v11, 0.0  ;;  %v9190_v49 = vpop.eup %9189  ;;  %9199 = vpow2.f32 %v5417_v47  ;;  %v6409_v28 = vmul.f32 %v4449_v3, %v12368_v14  ;;  %v4646_v31 = vmax.f32 %v12377_v16, 0.0 }
 0x3ef   :  { %v6970_v44 = vadd.f32 %v6969_v46, %v6968_v20  ;;  %v6603_v0 = vsub.f32 %v6211_v43, %v6407_v63  ;;  %v3403_v55 = vpop.f32.mrb[148].mxu1  ;;  %v5994_v19 = vmul.f32 0.6931472, %v9190_v49  ;;  %v5043_v52 = vsub.f32 0.0, %v4847_v10  ;;  %v4220_v34 = vpop.f32.mrb[108].mxu0 }
 0x3f0   :  { %v3404_v41 = vadd.f32 %v12329_v51, %v3403_v55  ;;  %v3405_v59 = vpop.f32.mrb[149].mxu1  ;;  %9201 = vlog2.f32 %v5627_v58  ;;  %v4222_v62 = vpop.f32.mrb[109].mxu0  ;;  %v4848_v39 = vand.u32 2147483647, %v12438_v2  ;;  %v6410_v46 = vmul.f32 %v4450_v17, %v12377_v16 }
 0x3f1   :  { %v6971_v15 = vsel %vm6627_vm0, %v6603_v0, 0.0  ;;  %v3406_v23 = vpop.f32.mrb[150].mxu1  ;;  %v9192_v36 = vpop.eup %9191  ;;  %v6212_v25 = vadd.f32 %v5994_v19, %v4644_v27  ;;  %v5419_v35 = vmul.f32 1.442695, %v5043_v52 }
 0x3f2   :  { %v6972_v6 = vadd.f32 %v6971_v15, %v6970_v44  ;;  %v4223_v32 = vpop.f32.mrb[110].mxu0  ;;  %v3408_v61 = vpop.f32.mrb[151].mxu1  ;;  %v5628_v8 = vadd.f32 1.0, %v9192_v36  ;;  %v12448_v21 = vadd.f32 %v4220_v34, %v3404_v41  ;;  %v3407_v12 = vadd.f32 %v12329_v51, %v3406_v23  ;;  %v4451_v41 = vld [vmem:[%s12645_s3 + $0x580] sm:$0xff] }
 0x3f3   :  { %v9194_v24 = vpop.eup %9193  ;;  %v4225_v53 = vpop.f32.mrb[111].mxu0  ;;  %v6604_v13 = vsub.f32 %v6212_v25, %v6408_v48  ;;  %9203 = vpow2.f32 %v5419_v35  ;;  %v5044_v18 = vsub.f32 0.0, %v4848_v39  ;;  %v4647_v34 = vmax.f32 %v12390_v1, 0.0 }
 0x3f4   :  { %v5996_v60 = vmul.f32 0.6931472, %v9194_v24  ;;  %v9196_v7 = vpop.eup %9195  ;;  %9205 = vlog2.f32 %v5628_v8  ;;  %v4849_v29 = vand.u32 2147483647, %v12448_v21  ;;  %v12458_v11 = vadd.f32 %v4223_v32, %v3407_v12  ;;  %v4452_v32 = vld [vmem:[%s12645_s3 + $0x588] sm:$0xff] }
 0x3f5   :  { %v6973_v9 = vsel %vm6627_vm0, %v6604_v13, 0.0  ;;  %v5629_v26 = vadd.f32 1.0, %v9196_v7  ;;  %v5421_v5 = vmul.f32 1.442695, %v5044_v18  ;;  %v6411_v35 = vmul.f32 %v4451_v41, %v12390_v1 }
 0x3f6   :  { %v9198_v37 = vpop.eup %9197  ;;  %v6213_v57 = vadd.f32 %v5996_v60, %v4645_v22  ;;  %v6974_v20 = vadd.f32 %v6973_v9, %v6972_v6  ;;  %v5045_v33 = vsub.f32 0.0, %v4849_v29  ;;  %v4850_v45 = vand.u32 2147483647, %v12458_v11  ;;  %v4453_v29 = vld [vmem:[%s12645_s3 + $0x590] sm:$0xff] }
 0x3f7   :  { %v5998_v4 = vmul.f32 0.6931472, %v9198_v37  ;;  %v3411_v14 = vpop.f32.mrb[152].mxu1  ;;  %9207 = vlog2.f32 %v5629_v26  ;;  %v4228_v43 = vpop.f32.mrb[112].mxu0  ;;  %v4648_v22 = vmax.f32 %v12398_v40, 0.0  ;;  %v6412_v18 = vmul.f32 %v4452_v32, %v12398_v40 }
 0x3f8   :  { %v6605_v42 = vsub.f32 %v6213_v57, %v6409_v28  ;;  %v3412_v38 = vadd.f32 %v12329_v51, %v3411_v14  ;;  %v3413_v63 = vpop.f32.mrb[153].mxu1  ;;  %v9200_v47 = vpop.eup %9199  ;;  %9209 = vpow2.f32 %v5421_v5  ;;  %v5423_v27 = vmul.f32 1.442695, %v5045_v33 }
 0x3f9   :  { %v6214_v56 = vadd.f32 %v5998_v4, %v4646_v31  ;;  %v4230_v10 = vpop.f32.mrb[113].mxu0  ;;  %v3414_v49 = vpop.f32.mrb[154].mxu1  ;;  %v5630_v0 = vadd.f32 1.0, %v9200_v47  ;;  %v5046_v62 = vsub.f32 0.0, %v4850_v45  ;;  %v4649_v4 = vmax.f32 %v12404_v50, 0.0 }
 0x3fa   :  { %v6975_v44 = vsel %vm6627_vm0, %v6605_v42, 0.0  ;;  %v4231_v58 = vpop.f32.mrb[114].mxu0  ;;  %v9202_v55 = vpop.eup %9201  ;;  %9211 = vpow2.f32 %v5423_v27  ;;  %v12468_v23 = vadd.f32 %v4228_v43, %v3412_v38  ;;  %v3415_v6 = vadd.f32 %v12329_v51, %v3414_v49 }
 0x3fb   :  { %v6976_v19 = vadd.f32 %v6975_v44, %v6974_v20  ;;  %v6606_v52 = vsub.f32 %v6214_v56, %v6410_v46  ;;  %v3416_v16 = vpop.f32.mrb[155].mxu1  ;;  %v4233_v59 = vpop.f32.mrb[115].mxu0  ;;  %v6000_v15 = vmul.f32 0.6931472, %v9202_v55  ;;  %9213 = vlog2.f32 %v5630_v0 }
 0x3fc   :  { %v5425_v61 = vmul.f32 1.442695, %v5046_v62  ;;  %v4851_v39 = vand.u32 2147483647, %v12468_v23  ;;  %v12478_v53 = vadd.f32 %v4231_v58, %v3415_v6  ;;  %v6413_v46 = vmul.f32 %v4453_v29, %v12404_v50 }
 0x3fd   :  { %v6977_v36 = vsel %vm6627_vm0, %v6606_v52, 0.0  ;;  %v9204_v25 = vpop.eup %9203  ;;  %v6215_v3 = vadd.f32 %v6000_v15, %v4647_v34  ;;  %v4650_v0 = vmax.f32 %v12418_v54, 0.0  ;;  %v4651_v29 = vmax.f32 %v12428_v30, 0.0 }
 0x3fe   :  { %v6978_v48 = vadd.f32 %v6977_v36, %v6976_v19  ;;  %v9206_v24 = vpop.eup %9205  ;;  %v5631_v8 = vadd.f32 1.0, %v9204_v25  ;;  %9215 = vpow2.f32 %v5425_v61  ;;  %v5047_v37 = vsub.f32 0.0, %v4851_v39  ;;  %v4454_v19 = vld [vmem:[%s12645_s3 + $0x598] sm:$0xff] }
 0x3ff   :  { %v3419_v13 = vpop.f32.mrb[156].mxu1  ;;  %v6607_v60 = vsub.f32 %v6215_v3, %v6411_v35  ;;  %v6002_v12 = vmul.f32 0.6931472, %v9206_v24  ;;  %v4236_v1 = vpop.f32.mrb[116].mxu0  ;;  %v4852_v9 = vand.u32 2147483647, %v12478_v53  ;;  %v6414_v35 = vmul.f32 %v4454_v19, %v12418_v54 }
 0x400   :  { %v3420_v7 = vadd.f32 %v12329_v51, %v3419_v13  ;;  %v3421_v28 = vpop.f32.mrb[157].mxu1  ;;  %9217 = vlog2.f32 %v5631_v8  ;;  %v4238_v57 = vpop.f32.mrb[117].mxu0  ;;  %v5427_v43 = vmul.f32 1.442695, %v5047_v37 }
 0x401   :  { %v3422_v17 = vpop.f32.mrb[158].mxu1  ;;  %v9208_v31 = vpop.eup %9207  ;;  %v6979_v26 = vsel %vm6627_vm0, %v6607_v60, 0.0  ;;  %v6216_v20 = vadd.f32 %v6002_v12, %v4648_v22  ;;  %v5048_v63 = vsub.f32 0.0, %v4852_v9  ;;  %v4456_v9 = vld [vmem:[%s12645_s3 + $0x5a8] sm:$0xff] }
 0x402   :  { %v12488_v5 = vadd.f32 %v4236_v1, %v3420_v7  ;;  %v4239_v33 = vpop.f32.mrb[118].mxu0  ;;  %v3424_v40 = vpop.f32.mrb[159].mxu1  ;;  %v6980_v42 = vadd.f32 %v6979_v26, %v6978_v48  ;;  %v6004_v38 = vmul.f32 0.6931472, %v9208_v31  ;;  %9219 = vpow2.f32 %v5427_v43  ;;  %v4455_v1 = vld [vmem:[%s12645_s3 + $0x5a0] sm:$0xff] }
 0x403   :  { %v9210_v14 = vpop.eup %9209  ;;  %v4241_v47 = vpop.f32.mrb[119].mxu0  ;;  %v6608_v56 = vsub.f32 %v6216_v20, %v6412_v18  ;;  %v5429_v45 = vmul.f32 1.442695, %v5048_v63  ;;  %v3423_v62 = vadd.f32 %v12329_v51, %v3422_v17 }
 0x404   :  { %v5632_v27 = vadd.f32 1.0, %v9210_v14  ;;  %v4853_v10 = vand.u32 2147483647, %v12488_v5  ;;  %v9212_v49 = vpop.eup %9211  ;;  %v6217_v44 = vadd.f32 %v6004_v38, %v4649_v4  ;;  %v6415_v4 = vmul.f32 %v4455_v1, %v12428_v30 }
 0x405   :  { %v9214_v58 = vpop.eup %9213  ;;  %v6981_v55 = vsel %vm6627_vm0, %v6608_v56, 0.0  ;;  %v5633_v52 = vadd.f32 1.0, %v9212_v49  ;;  %v12501_v8 = vadd.f32 %v4239_v33, %v3423_v62  ;;  %v4457_v33 = vld [vmem:[%s12645_s3 + $0x5b0] sm:$0xff]  ;;  %v6416_v38 = vmul.f32 %v4456_v9, %v12438_v2 }
 0x406   :  { %9221 = vlog2.f32 %v5632_v27  ;;  %v5049_v41 = vsub.f32 0.0, %v4853_v10  ;;  %v6982_v50 = vadd.f32 %v6981_v55, %v6980_v42  ;;  %v6609_v34 = vsub.f32 %v6217_v44, %v6413_v46 }
 0x407   :  { %v6006_v16 = vmul.f32 0.6931472, %v9214_v58  ;;  %9223 = vpow2.f32 %v5429_v45  ;;  %v3427_v59 = vpop.f32.mrb[160].mxu1  ;;  %v4244_v6 = vpop.f32.mrb[120].mxu0  ;;  %v4854_v57 = vand.u32 2147483647, %v12501_v8  ;;  %v6417_v55 = vmul.f32 %v4457_v33, %v12448_v21 }
 0x408   :  { %9225 = vlog2.f32 %v5633_v52  ;;  %v5431_v15 = vmul.f32 1.442695, %v5049_v41  ;;  %v3428_v36 = vadd.f32 %v12329_v51, %v3427_v59  ;;  %v3429_v25 = vpop.f32.mrb[161].mxu1  ;;  %v6983_v48 = vsel %vm6627_vm0, %v6609_v34, 0.0  ;;  %v4246_v32 = vpop.f32.mrb[121].mxu0 }
 0x409   :  { %v6218_v3 = vadd.f32 %v6006_v16, %v4650_v0  ;;  %v3430_v61 = vpop.f32.mrb[162].mxu1  ;;  %v9216_v24 = vpop.eup %9215  ;;  %v6984_v22 = vadd.f32 %v6983_v48, %v6982_v50  ;;  %v5050_v40 = vsub.f32 0.0, %v4854_v57  ;;  %v4652_v42 = vmax.f32 %v12438_v2, 0.0 }
 0x40a   :  { %9227 = vpow2.f32 %v5431_v15  ;;  %v12503_v39 = vadd.f32 %v4244_v6, %v3428_v36  ;;  %v4247_v13 = vpop.f32.mrb[122].mxu0  ;;  %v3432_v60 = vpop.f32.mrb[163].mxu1  ;;  %v5634_v28 = vadd.f32 1.0, %v9216_v24  ;;  %v3431_v54 = vadd.f32 %v12329_v51, %v3430_v61 }
 0x40b   :  { %v9218_v12 = vpop.eup %9217  ;;  %v6610_v7 = vsub.f32 %v6218_v3, %v6414_v35  ;;  %v4249_v18 = vpop.f32.mrb[123].mxu0  ;;  %v5433_v10 = vmul.f32 1.442695, %v5050_v40  ;;  %v4653_v58 = vmax.f32 %v12448_v21, 0.0 }
 0x40c   :  { %v6008_v37 = vmul.f32 0.6931472, %v9218_v12  ;;  %9229 = vlog2.f32 %v5634_v28  ;;  %v4855_v31 = vand.u32 2147483647, %v12503_v39  ;;  %v9220_v14 = vpop.eup %9219  ;;  %v12522_v63 = vadd.f32 %v4247_v13, %v3431_v54 }
 0x40d   :  { %v6985_v17 = vsel %vm6627_vm0, %v6610_v7, 0.0  ;;  %v5635_v27 = vadd.f32 1.0, %v9220_v14  ;;  %v4654_v13 = vmax.f32 %v12458_v11, 0.0 }
 0x40e   :  { %v6986_v26 = vadd.f32 %v6985_v17, %v6984_v22  ;;  %v6219_v20 = vadd.f32 %v6008_v37, %v4651_v29  ;;  %v5051_v43 = vsub.f32 0.0, %v4855_v31  ;;  %v4856_v34 = vand.u32 2147483647, %v12522_v63  ;;  %v4458_v22 = vld [vmem:[%s12645_s3 + $0x5b8] sm:$0xff] }
 0x40f   :  { %v3435_v47 = vpop.f32.mrb[164].mxu1  ;;  %v4252_v49 = vpop.f32.mrb[124].mxu0  ;;  %9231 = vlog2.f32 %v5635_v27 }
 0x410   :  { %v9222_v56 = vpop.eup %9221  ;;  %v6611_v46 = vsub.f32 %v6219_v20, %v6415_v4  ;;  %v3436_v30 = vadd.f32 %v12329_v51, %v3435_v47  ;;  %v3437_v44 = vpop.f32.mrb[165].mxu1  ;;  %v5435_v19 = vmul.f32 1.442695, %v5051_v43  ;;  %9233 = vpow2.f32 %v5433_v10 }
 0x411   :  { %v9224_v0 = vpop.eup %9223  ;;  %v6010_v45 = vmul.f32 0.6931472, %v9222_v56  ;;  %v4254_v2 = vpop.f32.mrb[125].mxu0  ;;  %v5052_v21 = vsub.f32 0.0, %v4856_v34 }
 0x412   :  { %v9226_v52 = vpop.eup %9225  ;;  %v6987_v41 = vsel %vm6627_vm0, %v6611_v46, 0.0  ;;  %v5636_v50 = vadd.f32 1.0, %v9224_v0  ;;  %v3438_v16 = vpop.f32.mrb[166].mxu1  ;;  %v12529_v3 = vadd.f32 %v4252_v49, %v3436_v30  ;;  %v4655_v49 = vmax.f32 %v12468_v23, 0.0 }
 0x413   :  { %v4255_v59 = vpop.f32.mrb[126].mxu0  ;;  %v6988_v15 = vadd.f32 %v6987_v41, %v6986_v26  ;;  %v6220_v62 = vadd.f32 %v6010_v45, %v4652_v42  ;;  %v6012_v36 = vmul.f32 0.6931472, %v9226_v52  ;;  %v3440_v6 = vpop.f32.mrb[167].mxu1  ;;  %v3439_v35 = vadd.f32 %v12329_v51, %v3438_v16  ;;  %v4459_v42 = vld [vmem:[%s12645_s3 + $0x5c0] sm:$0xff] }
 0x414   :  { %v4257_v25 = vpop.f32.mrb[127].mxu0  ;;  %v9228_v48 = vpop.eup %9227  ;;  %9235 = vlog2.f32 %v5636_v50  ;;  %v5437_v60 = vmul.f32 1.442695, %v5052_v21  ;;  %v4857_v12 = vand.u32 2147483647, %v12529_v3  ;;  %v6418_v26 = vmul.f32 %v4458_v22, %v12458_v11 }
 0x415   :  { %v6612_v32 = vsub.f32 %v6220_v62, %v6416_v38  ;;  %v6221_v61 = vadd.f32 %v6012_v36, %v4653_v58  ;;  %v5637_v24 = vadd.f32 1.0, %v9228_v48  ;;  %9237 = vpow2.f32 %v5435_v19 }
 0x416   :  { %v9230_v7 = vpop.eup %9229  ;;  %v12538_v54 = vadd.f32 %v4255_v59, %v3439_v35  ;;  %v5053_v9 = vsub.f32 0.0, %v4857_v12  ;;  %v6419_v58 = vmul.f32 %v4459_v42, %v12468_v23  ;;  %v4656_v41 = vmax.f32 %v12478_v53, 0.0  ;;  %v4461_v23 = vld [vmem:[%s12645_s3 + $0x5d0] sm:$0xff] }
 0x417   :  { %v6989_v1 = vsel %vm6627_vm0, %v6612_v32, 0.0  ;;  %v6613_v28 = vsub.f32 %v6221_v61, %v6417_v55  ;;  %9239 = vlog2.f32 %v5637_v24  ;;  %v3443_v18 = vpop.f32.mrb[168].mxu1  ;;  %v6014_v37 = vmul.f32 0.6931472, %v9230_v7  ;;  %v4260_v57 = vpop.f32.mrb[128].mxu0  ;;  %v4460_v55 = vld [vmem:[%s12645_s3 + $0x5c8] sm:$0xff] }
 0x418   :  { %v6990_v29 = vadd.f32 %v6989_v1, %v6988_v15  ;;  %9241 = vpow2.f32 %v5437_v60  ;;  %v3445_v17 = vpop.f32.mrb[169].mxu1  ;;  %v4858_v20 = vand.u32 2147483647, %v12538_v54  ;;  %v4262_v4 = vpop.f32.mrb[129].mxu0  ;;  %v5439_v38 = vmul.f32 1.442695, %v5053_v9 }
 0x419   :  { %v6991_v31 = vsel %vm6627_vm0, %v6613_v28, 0.0  ;;  %v3446_v33 = vpop.f32.mrb[170].mxu1  ;;  %v6222_v14 = vadd.f32 %v6014_v37, %v4654_v13  ;;  %v3444_v43 = vadd.f32 %v12329_v51, %v3443_v18  ;;  %v4263_v47 = vpop.f32.mrb[130].mxu0  ;;  %v6420_v6 = vmul.f32 %v4460_v55, %v12478_v53  ;;  %v9281_v4 = vld [vmem:[#allocation2] ss:$0 sm:$0xff] }
 0x41a   :  { %v6992_v40 = vadd.f32 %v6991_v31, %v6990_v29  ;;  %v3448_v56 = vpop.f32.mrb[171].mxu1  ;;  %v5054_v46 = vsub.f32 0.0, %v4858_v20  ;;  %v3447_v27 = vadd.f32 %v12329_v51, %v3446_v33  ;;  %v4265_v10 = vpop.f32.mrb[131].mxu0  ;;  %9243 = vpow2.f32 %v5439_v38 }
 0x41b   :  { %v9232_v11 = vpop.eup %9231  ;;  %v6614_v30 = vsub.f32 %v6222_v14, %v6418_v26  ;;  %v12549_v44 = vadd.f32 %v4260_v57, %v3444_v43  ;;  %v4657_v22 = vmax.f32 %v12488_v5, 0.0  ;;  %v6421_v28 = vmul.f32 %v4461_v23, %v12488_v5 }
 0x41c   :  { %v9234_v0 = vpop.eup %9233  ;;  %v6016_v45 = vmul.f32 0.6931472, %v9232_v11  ;;  %v5441_v19 = vmul.f32 1.442695, %v5054_v46  ;;  %v12555_v2 = vadd.f32 %v4263_v47, %v3447_v27 }
 0x41d   :  { %v6993_v52 = vsel %vm6627_vm0, %v6614_v30, 0.0  ;;  %v5638_v50 = vadd.f32 1.0, %v9234_v0  ;;  %v4859_v34 = vand.u32 2147483647, %v12549_v44 }
 0x41e   :  { %v9236_v51 = vpop.eup %9235  ;;  %v6994_v59 = vadd.f32 %v6993_v52, %v6992_v40  ;;  %v6223_v15 = vadd.f32 %v6016_v45, %v4655_v49  ;;  %9245 = vpow2.f32 %v5441_v19  ;;  %v4860_v13 = vand.u32 2147483647, %v12555_v2  ;;  %v4462_v49 = vld [vmem:[%s12645_s3 + $0x5d8] sm:$0xff]  ;;  %v4463_v52 = vld [vmem:[%s12645_s3 + $0x5e0] sm:$0xff] }
 0x41f   :  { %v9238_v16 = vpop.eup %9237  ;;  %v6018_v62 = vmul.f32 0.6931472, %v9236_v51  ;;  %v3451_v36 = vpop.f32.mrb[172].mxu1  ;;  %9247 = vlog2.f32 %v5638_v50  ;;  %v5055_v48 = vsub.f32 0.0, %v4859_v34  ;;  %v4658_v19 = vmax.f32 %v12501_v8, 0.0 }
 0x420   :  { %v5639_v25 = vadd.f32 1.0, %v9238_v16  ;;  %v4268_v21 = vpop.f32.mrb[132].mxu0  ;;  %v3453_v35 = vpop.f32.mrb[173].mxu1  ;;  %v6615_v61 = vsub.f32 %v6223_v15, %v6419_v58  ;;  %v5056_v17 = vsub.f32 0.0, %v4860_v13  ;;  %v3452_v33 = vadd.f32 %v9281_v4, %v3451_v36 }
 0x421   :  { %v9240_v32 = vpop.eup %9239  ;;  %v6224_v24 = vadd.f32 %v6018_v62, %v4656_v41  ;;  %v4270_v60 = vpop.f32.mrb[133].mxu0  ;;  %v5443_v53 = vmul.f32 1.442695, %v5055_v48  ;;  %v6422_v34 = vmul.f32 %v4462_v49, %v12501_v8  ;;  %v4659_v15 = vmax.f32 %v12503_v39, 0.0  ;;  %v4464_v35 = vld [vmem:[%s12645_s3 + $0x5e8] sm:$0xff] }
 0x422   :  { %v3454_v12 = vpop.f32.mrb[174].mxu1  ;;  %v9242_v7 = vpop.eup %9241  ;;  %v6020_v1 = vmul.f32 0.6931472, %v9240_v32  ;;  %9249 = vlog2.f32 %v5639_v25  ;;  %v6995_v37 = vsel %vm6627_vm0, %v6615_v61, 0.0  ;;  %v5445_v14 = vmul.f32 1.442695, %v5056_v17 }
 0x423   :  { %v4271_v18 = vpop.f32.mrb[134].mxu0  ;;  %v3456_v29 = vpop.f32.mrb[175].mxu1  ;;  %v6616_v9 = vsub.f32 %v6224_v24, %v6420_v6  ;;  %v5640_v57 = vadd.f32 1.0, %v9242_v7  ;;  %v6996_v26 = vadd.f32 %v6995_v37, %v6994_v59  ;;  %9251 = vpow2.f32 %v5443_v53  ;;  %v4465_v53 = vld [vmem:[%s12645_s3 + $0x5f0] sm:$0xff] }
 0x424   :  { %v4273_v31 = vpop.f32.mrb[135].mxu0  ;;  %v6225_v20 = vadd.f32 %v6020_v1, %v4657_v22  ;;  %v3455_v5 = vadd.f32 %v9281_v4, %v3454_v12  ;;  %v9244_v42 = vpop.eup %9243  ;;  %v12569_v47 = vadd.f32 %v4268_v21, %v3452_v33  ;;  %v6423_v6 = vmul.f32 %v4463_v52, %v12503_v39 }
 0x425   :  { %v6997_v40 = vsel %vm6627_vm0, %v6616_v9, 0.0  ;;  %9253 = vlog2.f32 %v5640_v57  ;;  %v5641_v56 = vadd.f32 1.0, %v9244_v42  ;;  %v4660_v8 = vmax.f32 %v12522_v63, 0.0 }
 0x426   :  { %v6998_v38 = vadd.f32 %v6997_v40, %v6996_v26  ;;  %v6617_v43 = vsub.f32 %v6225_v20, %v6421_v28  ;;  %9255 = vpow2.f32 %v5445_v14  ;;  %v12571_v46 = vadd.f32 %v4271_v18, %v3455_v5  ;;  %v4466_v26 = vld [vmem:[%s12645_s3 + $0x5f8] sm:$0xff] }
 0x427   :  { %v4861_v10 = vand.u32 2147483647, %v12569_v47  ;;  %9257 = vlog2.f32 %v5641_v56  ;;  %v6424_v12 = vmul.f32 %v4464_v35, %v12522_v63  ;;  %v4661_v18 = vmax.f32 %v12529_v3, 0.0 }
 0x428   :  { %v6999_v27 = vsel %vm6627_vm0, %v6617_v43, 0.0  ;;  %v9246_v11 = vpop.eup %9245  ;;  %v4862_v0 = vand.u32 2147483647, %v12571_v46  ;;  %v6425_v63 = vmul.f32 %v4465_v53, %v12529_v3  ;;  %v4662_v4 = vmax.f32 %v12538_v54, 0.0 }
 0x429   :  { %v7000_v30 = vadd.f32 %v6999_v27, %v6998_v38  ;;  %v9248_v45 = vpop.eup %9247  ;;  %v5642_v58 = vadd.f32 1.0, %v9246_v11  ;;  %v5057_v55 = vsub.f32 0.0, %v4861_v10  ;;  %v6426_v38 = vmul.f32 %v4466_v26, %v12538_v54  ;;  %v4467_v11 = vld [vmem:[%s12645_s3 + $0x600] sm:$0xff] }
 0x42a   :  { %v6022_v51 = vmul.f32 0.6931472, %v9248_v45  ;;  %v5058_v41 = vsub.f32 0.0, %v4862_v0  ;;  %v4663_v49 = vmax.f32 %v12549_v44, 0.0  ;;  %v4664_v52 = vmax.f32 %v12555_v2, 0.0 }
 0x42b   :  { %9259 = vlog2.f32 %v5642_v58  ;;  %v5447_v16 = vmul.f32 1.442695, %v5057_v55  ;;  %v6427_v55 = vmul.f32 %v4467_v11, %v12549_v44  ;;  %v4469_v44 = vld [vmem:[%s12645_s3 + $0x610] sm:$0xff]  ;;  %v4666_v35 = vmax.f32 %v12571_v46, 0.0 }
 0x42c   :  { %v9250_v50 = vpop.eup %9249  ;;  %v6226_v59 = vadd.f32 %v6022_v51, %v4658_v19  ;;  %v5449_v23 = vmul.f32 1.442695, %v5058_v41  ;;  %v4468_v19 = vld [vmem:[%s12645_s3 + $0x608] sm:$0xff] }
 0x42d   :  { %v6024_v62 = vmul.f32 0.6931472, %v9250_v50  ;;  %v9252_v36 = vpop.eup %9251  ;;  %9261 = vpow2.f32 %v5447_v16  ;;  %v6428_v16 = vmul.f32 %v4468_v19, %v12555_v2 }
 0x42e   :  { %v6618_v48 = vsub.f32 %v6226_v59, %v6422_v34  ;;  %v5643_v32 = vadd.f32 1.0, %v9252_v36  ;;  %9263 = vpow2.f32 %v5449_v23 }
 0x42f   :  { %v9254_v25 = vpop.eup %9253  ;;  %v6227_v21 = vadd.f32 %v6024_v62, %v4659_v15 }
 0x430   :  { %v6026_v61 = vmul.f32 0.6931472, %v9254_v25  ;;  %v9256_v24 = vpop.eup %9255  ;;  %v7001_v22 = vsel %vm6627_vm0, %v6618_v48, 0.0  ;;  %9265 = vlog2.f32 %v5643_v32  ;;  %v4665_v25 = vmax.f32 %v12569_v47, 0.0  ;;  %v4470_v48 = vld [vmem:[%s12645_s3 + $0x618] sm:$0xff] }
 0x431   :  { %v6619_v13 = vsub.f32 %v6227_v21, %v6423_v6  ;;  %v7002_v60 = vadd.f32 %v7001_v22, %v7000_v30  ;;  %v5644_v7 = vadd.f32 1.0, %v9256_v24  ;;  %v9258_v1 = vpop.eup %9257  ;;  %v6430_v22 = vmul.f32 %v4470_v48, %v12571_v46 }
 0x432   :  { %v6228_v39 = vadd.f32 %v6026_v61, %v4660_v8  ;;  %v6028_v9 = vmul.f32 0.6931472, %v9258_v1  ;;  %v6429_v8 = vmul.f32 %v4469_v44, %v12569_v47 }
 0x433   :  { %v7003_v28 = vsel %vm6627_vm0, %v6619_v13, 0.0  ;;  %9267 = vlog2.f32 %v5644_v7 }
 0x434   :  { %v7004_v29 = vadd.f32 %v7003_v28, %v7002_v60  ;;  %v6620_v37 = vsub.f32 %v6228_v39, %v6424_v12  ;;  %v6229_v31 = vadd.f32 %v6028_v9, %v4661_v18 }
 0x435   :  { %v9260_v57 = vpop.eup %9259 }
 0x436   :  { %v7005_v17 = vsel %vm6627_vm0, %v6620_v37, 0.0  ;;  %v6030_v33 = vmul.f32 0.6931472, %v9260_v57  ;;  %v6621_v14 = vsub.f32 %v6229_v31, %v6425_v63  ;;  %v7028_v57 = vld [vmem:[#allocation3] sm:$0x1] }
 0x437   :  { %v7006_v20 = vadd.f32 %v7005_v17, %v7004_v29  ;;  %v9262_v40 = vpop.eup %9261 }
 0x438   :  { %v9264_v5 = vpop.eup %9263  ;;  %v6230_v42 = vadd.f32 %v6030_v33, %v4662_v4  ;;  %v5645_v43 = vadd.f32 1.0, %v9262_v40  ;;  %v7007_v56 = vsel %vm6627_vm0, %v6621_v14, 0.0 }
 0x439   :  { %v5646_v27 = vadd.f32 1.0, %v9264_v5  ;;  %v7008_v30 = vadd.f32 %v7007_v56, %v7006_v20 }
 0x43a   :  { %v9266_v10 = vpop.eup %9265  ;;  %v6622_v3 = vsub.f32 %v6230_v42, %v6426_v38  ;;  %9269 = vlog2.f32 %v5645_v43 }
 0x43b   :  { %v6032_v0 = vmul.f32 0.6931472, %v9266_v10  ;;  %9271 = vlog2.f32 %v5646_v27 }
 0x43c   :  { %v7009_v45 = vsel %vm6627_vm0, %v6622_v3, 0.0 }
 0x43d   :  { %v9268_v58 = vpop.eup %9267  ;;  %v6231_v54 = vadd.f32 %v6032_v0, %v4663_v49  ;;  %v7010_v51 = vadd.f32 %v7009_v45, %v7008_v30 }
 0x43e   :  { %v6034_v41 = vmul.f32 0.6931472, %v9268_v58 }
 0x43f   :  { %v6623_v50 = vsub.f32 %v6231_v54, %v6427_v55 }
 0x440   :  { %v6232_v34 = vadd.f32 %v6034_v41, %v4664_v52 }
 0x441   :  { %v7011_v59 = vsel %vm6627_vm0, %v6623_v50, 0.0 }
 0x442   :  { %v6624_v15 = vsub.f32 %v6232_v34, %v6428_v16  ;;  %v7012_v62 = vadd.f32 %v7011_v59, %v7010_v51 }
 0x444   :  { %v9270_v23 = vpop.eup %9269  ;;  %v7013_v36 = vsel %vm6627_vm0, %v6624_v15, 0.0 }
 0x445   :  { %v9272_v6 = vpop.eup %9271  ;;  %v6036_v21 = vmul.f32 0.6931472, %v9270_v23  ;;  %v7014_v2 = vadd.f32 %v7013_v36, %v7012_v62 }
 0x446   :  { %v6038_v32 = vmul.f32 0.6931472, %v9272_v6 }
 0x447   :  { %v6233_v61 = vadd.f32 %v6036_v21, %v4665_v25 }
 0x448   :  { %v6234_v24 = vadd.f32 %v6038_v32, %v4666_v35 }
 0x449   :  { %v6625_v13 = vsub.f32 %v6233_v61, %v6429_v8 }
 0x44a   :  { %v6626_v60 = vsub.f32 %v6234_v24, %v6430_v22 }
 0x44b   :  { %v7015_v39 = vsel %vm6627_vm0, %v6625_v13, 0.0 }
 0x44c   :  { %v7016_v12 = vadd.f32 %v7015_v39, %v7014_v2  ;;  %v7017_v7 = vsel %vm6627_vm0, %v6626_v60, 0.0 }
 0x44e   :  { %v7018_v1 = vadd.f32 %v7017_v7, %v7016_v12 }
 0x450   :  { %7019 = vadd.xlane.f32.xlu0 %v7018_v1 }
 0x4dd   :  { %v7020_v28 = vpop.xlane.xlu0 %7019 }
 0x4de   :  { %v7021_v53 = vrot.slane %v7020_v28, 4 }
 0x4e0   :  { %v7022_v18 = vadd.f32 %v7021_v53, %v7020_v28 }
 0x4e2   :  { %v7023_v29 = vrot.slane %v7022_v18, 2 }
 0x4e4   :  { %v7024_v37 = vadd.f32 %v7023_v29, %v7022_v18 }
 0x4e6   :  { %v7025_v9 = vrot.slane %v7024_v37, 1 }
 0x4e8   :  { %v7026_v47 = vadd.f32 %v7025_v9, %v7024_v37 }
 0x4ea   :  { %7865 = vpush %v7026_v47 }
 0x51b   :  { %s7866_s3 = spop %7865 }
 0x51c   :  { %v7029_v46 = vstv %s7866_s3 }
 0x51d   :  { %v7030_v17 = vadd.f32 %v7029_v46, %v7028_v57 }
 0x51f   :  { %v7031_v31 = vmul.f32 0.5, %v7030_v17 }
 0x521   :  { %7033 = vst.msk [vmem:[#allocation4] sm:$0x1] %vm7032_vm1, %v7031_v31 }
 0x522   :  { %9293 = shalt.err (!%p9290_p4)
}
 0x523   :  { %s9294_s6 = scalar_lea.hbm %s12646_s5, 16 }
 0x524   :  { %p9295_p5 = scmp.ne.s32.totalorder %s12646_s5, %s9294_s6  ;;  %p9298_p6 = scmp.lt.u32.totalorder %s9294_s6, %s12646_s5 }
 0x526   :  { %p9300_p7 = pnand %p9298_p6, %p9295_p5 }
 0x528   :  { %9303 = shalt.err (!%p9300_p7)
}
 0x529   :  { %7043 = dma.vmem_to_hbm [thread:$0]  %s7041_s4, 16, %s12646_s5, [#allocation5]  }
 0x52a   :  { %9304 = dma.done.wait [#allocation5], 16  }
 0x52b   :  { %9305 = vsyncadd [#allocation5], 4294967280 }
 0x52c   :  { %7047 = vsyncpa [#allocation5], 1 }

</bundles_post_ra>
